<compile_context>
chip_gen: v7x
topology: tpu7x:2x2x1
jax: 0.10.0
libtpu: 0.0.40
codegen_flags: <defaults>
</compile_context>

<pallas_src>
import functools

import jax
import jax.numpy as jnp
import numpy as np
from jax import lax
from jax.experimental import pallas as pl
from jax.experimental.pallas import tpu as pltpu

EPS = 1e-5
LANE = 128
MATMUL_DTYPE = jnp.bfloat16          # MXU operand dtype (accumulation stays f32)
VMEM_LIMIT = 64 * 1024 * 1024        # explicit scoped-VMEM cap (size prod tiles to this)


def _ceil_to(n, m):
    return ((n + m - 1) // m) * m


# ----------------------------------------------------------------------------
# Kernel 1: ConvTranspose1d(E->H, k=15, stride=5, pad=5) as a polyphase matmul.
#   out[5q + r] = emb[q-1] @ W[:,:,10+r] + emb[q] @ W[:,:,5+r] + emb[q+1] @ W[:,:,r] + b
# One dot: xcat = [emb[q-1] | emb[q] | emb[q+1]]  (T, 3E)  against (3E, 5*Hp).
# ----------------------------------------------------------------------------
def _ct_polyphase_kernel(emb_ref, w_ref, b_ref, o_ref):
    x = emb_ref[0]                                           # (T, E) f32
    zrow = jnp.zeros((1, x.shape[1]), x.dtype)
    xm1 = jnp.concatenate([zrow, x[:-1, :]], axis=0)         # emb[q-1], halo row 0 = 0
    xp1 = jnp.concatenate([x[1:, :], zrow], axis=0)          # emb[q+1], halo row T-1 = 0
    xcat = jnp.concatenate([xm1, x, xp1], axis=-1).astype(MATMUL_DTYPE)   # (T, 3E)
    y = jnp.dot(xcat, w_ref[...].astype(MATMUL_DTYPE),
                preferred_element_type=jnp.float32)
    o_ref[0] = y + b_ref[...]


def pallas_ct_polyphase(emb, w_stk, b_poly):
    B, T, E = emb.shape
    H5 = w_stk.shape[1]
    return pl.pallas_call(
        _ct_polyphase_kernel,
        out_shape=jax.ShapeDtypeStruct((B, T, H5), jnp.float32),
        grid=(B,),
        in_specs=[
            pl.BlockSpec((1, T, E), lambda i: (i, 0, 0)),
            pl.BlockSpec((3 * E, H5), lambda i: (0, 0)),
            pl.BlockSpec((1, H5), lambda i: (0, 0)),
        ],
        out_specs=pl.BlockSpec((1, T, H5), lambda i: (i, 0, 0)),
        compiler_params=pltpu.CompilerParams(
            dimension_semantics=("parallel",),
            vmem_limit_bytes=VMEM_LIMIT),
    )(emb, w_stk, b_poly)


# ----------------------------------------------------------------------------
# Kernel 2: fused  In1 -> 4 residual Snake-Conv blocks -> In2 -> 1x1 conv -> LayerNorm.
# All activations and the residual stay VMEM-resident; each Snake+Conv1d is one im2col
# matmul; padded channel lanes stay exactly 0 (padded weights/affines = 0, alpha = 1).
# ----------------------------------------------------------------------------
def make_fused_backbone_kernel(L, Hp, K, D, o_real, n_blocks):
    p1 = D * (K - 1) // 2
    p2 = K // 2
    inv_l = 1.0 / float(L)
    inv_o = 1.0 / float(o_real)

    def inorm(x, g, b):
        # InstanceNorm1d: per-channel over time, biased variance, eps=1e-5 — single pass.
        s = jnp.sum(x, axis=0, keepdims=True)
        ss = jnp.sum(x * x, axis=0, keepdims=True)
        mean = s * inv_l
        var = jnp.maximum(ss * inv_l - mean * mean, 0.0)
        scale = lax.rsqrt(var + EPS) * g
        return x * scale + (b - mean * scale)

    def snake(x, alpha):
        inv_a = 1.0 / (alpha + 1e-9)                 # exact reciprocal (PyTorch parity)
        s = jnp.sin(alpha * x)
        return x + s * s * inv_a

    def shifted(xs, off):
        # xs shifted by `off` time rows with zero fill (the conv halo); Snake(0)=0 so the
        # zero halo is exactly what PyTorch's zero padding produces.
        if off < 0:
            pad = jnp.zeros((-off, xs.shape[1]), xs.dtype)
            return jnp.concatenate([pad, xs[:off, :]], axis=0)
        if off > 0:
            pad = jnp.zeros((off, xs.shape[1]), xs.dtype)
            return jnp.concatenate([xs[off:, :], pad], axis=0)
        return xs

    def snake_conv(x, alpha, w_kHp_Hp, bias, dil, pad):
        # Snake once (f32, one EUP pass), then ONE deep matmul: [L, K*Hp] @ [K*Hp, Hp].
        xs = snake(x, alpha)
        cols = [shifted(xs, k * dil - pad).astype(MATMUL_DTYPE) for k in range(K)]
        xcat = jnp.concatenate(cols, axis=-1)                       # (L, K*Hp) bf16
        return jnp.dot(xcat, w_kHp_Hp, preferred_element_type=jnp.float32) + bias

    def kernel(h0_ref, in_vec_ref, blk_vec_ref, blk_w1_ref, blk_w2_ref,
               w_head_ref, head_vec_ref, o_ref):
        # ---- WhisperCNN.In1 ----
        h = inorm(h0_ref[0], in_vec_ref[0:1, :], in_vec_ref[1:2, :])

        # ---- 4 residual Snake-Conv blocks (residual stays in VMEM) ----
        for bi in range(n_blocks):
            vec = blk_vec_ref[bi]                          # (8, Hp)
            w1 = blk_w1_ref[bi].astype(MATMUL_DTYPE)       # (K*Hp, Hp) bf16
            w2 = blk_w2_ref[bi].astype(MATMUL_DTYPE)
            y = snake_conv(h, vec[0:1, :], w1, vec[1:2, :], D, p1)   # Snake + conv1
            y = inorm(y, vec[2:3, :], vec[3:4, :])                   # In2
            y = snake_conv(y, vec[4:5, :], w2, vec[5:6, :], 1, p2)   # Snake + conv2
            h = h + inorm(y, vec[6:7, :], vec[7:8, :])               # ln3 (InstanceNorm) + skip

        # ---- WhisperCNN.In2 ----
        h = inorm(h, in_vec_ref[2:3, :], in_vec_ref[3:4, :])

        # ---- Head: 1x1 conv (matmul) + LayerNorm over the real O channels ----
        y = jnp.dot(h.astype(MATMUL_DTYPE), w_head_ref[...].astype(MATMUL_DTYPE),
                    preferred_element_type=jnp.float32) + head_vec_ref[0:1, :]
        lane = lax.broadcasted_iota(jnp.int32, y.shape, 1)
        y = jnp.where(lane < o_real, y, 0.0)       # defensive: padded lanes exactly zero
        mean = jnp.sum(y, axis=-1, keepdims=True) * inv_o
        cen = jnp.where(lane < o_real, y - mean, 0.0)
        var = jnp.sum(cen * cen, axis=-1, keepdims=True) * inv_o
        yn = cen * lax.rsqrt(var + EPS)
        o_ref[0] = yn * head_vec_ref[1:2, :] + head_vec_ref[2:3, :]

    return kernel


def pallas_fused_backbone(h0, in_vec, blk_vec, blk_w1, blk_w2, w_head, head_vec,
                          *, K, D, o_real):
    B, L, Hp = h0.shape
    n_blocks, KHp, _ = blk_w1.shape
    Op = w_head.shape[1]
    kernel = make_fused_backbone_kernel(L, Hp, K, D, o_real, n_blocks)
    return pl.pallas_call(
        kernel,
        out_shape=jax.ShapeDtypeStruct((B, L, Op), jnp.float32),
        grid=(B,),
        in_specs=[
            pl.BlockSpec((1, L, Hp), lambda i: (i, 0, 0)),
            pl.BlockSpec((4, Hp), lambda i: (0, 0)),
            pl.BlockSpec((n_blocks, 8, Hp), lambda i: (0, 0, 0)),
            # Grid-invariant weights: constant block index -> fetched once (bf16-stored).
            pl.BlockSpec((n_blocks, KHp, Hp), lambda i: (0, 0, 0)),
            pl.BlockSpec((n_blocks, KHp, Hp), lambda i: (0, 0, 0)),
            pl.BlockSpec((Hp, Op), lambda i: (0, 0)),
            pl.BlockSpec((3, Op), lambda i: (0, 0)),
        ],
        out_specs=pl.BlockSpec((1, L, Op), lambda i: (i, 0, 0)),
        compiler_params=pltpu.CompilerParams(
            dimension_semantics=("parallel",),
            vmem_limit_bytes=VMEM_LIMIT),
    )(h0, in_vec, blk_vec, blk_w1, blk_w2, w_head, head_vec)


# ----------------------------------------------------------------------------
# Parameters: torch-layout (for the pure-JAX reference) + packed/padded/bf16 (for Pallas).
# NOTE: the PyTorch module zero-inits biases / orthogonal-inits convs / sets ln3.weight
# to 0.2; here parameter VALUES are mildly randomized (semantics unchanged) so the
# numerical check below actually exercises every affine/bias path.
# ----------------------------------------------------------------------------
def init_torch_params(key, num_tokens, E, H, O, K, n_blocks=4):
    ks = iter(jax.random.split(key, 64))

    def nrm(shape, scale):
        return scale * jax.random.normal(next(ks), shape, jnp.float32)

    p = {
        "embedding": nrm((num_tokens, E), 1.0),
        "ct_w": nrm((E, H, 15), 0.3),            # ConvTranspose1d weight (torch [in, out, k])
        "ct_b": nrm((H,), 0.1),
        "In1_g": 1.0 + nrm((H,), 0.1), "In1_b": nrm((H,), 0.1),
        "In2_g": 1.0 + nrm((H,), 0.1), "In2_b": nrm((H,), 0.1),
        "head_w": nrm((O, H, 1), 0.3),           # 1x1 Conv1d weight (torch [out, in, 1])
        "head_b": nrm((O,), 0.1),
        "ln_g": 1.0 + nrm((O,), 0.1), "ln_b": nrm((O,), 0.1),
        "blocks": [],
    }
    for _ in range(n_blocks):
        p["blocks"].append({
            "alpha1": jnp.exp(nrm((H,), 0.2)),
            "w1": nrm((H, H, K), 0.2), "b1": nrm((H,), 0.1),
            "In2_g": 1.0 + nrm((H,), 0.1), "In2_b": nrm((H,), 0.1),
            "alpha2": jnp.exp(nrm((H,), 0.2)),
            "w2": nrm((H, H, K), 0.2), "b2": nrm((H,), 0.1),
            "ln3_g": 0.2 + nrm((H,), 0.05), "ln3_b": nrm((H,), 0.1),
        })
    return p


def pack_params(tp, K):
    E = tp["embedding"].shape[1]
    H = tp["In1_g"].shape[0]
    O = tp["ln_g"].shape[0]
    Hp = _ceil_to(H, LANE)
    Op = _ceil_to(O, LANE)

    def pad_last(x, to):
        return jnp.pad(x, [(0, 0)] * (x.ndim - 1) + [(0, to - x.shape[-1])])

    # --- ConvTranspose: phase-major, 3-tap-stacked weight (3E, 5*Hp), stored bf16 ---
    def phase_pack(w_slice):                      # [E, H, 5] (slice index == phase r)
        w = jnp.transpose(w_slice, (0, 2, 1))     # [E, 5, H]
        w = jnp.pad(w, ((0, 0), (0, 0), (0, Hp - H)))
        return w.reshape(E, 5 * Hp)

    w_ct = tp["ct_w"]
    ct_w = jnp.concatenate([phase_pack(w_ct[:, :, 10:15]),   # multiplies emb[q-1]
                            phase_pack(w_ct[:, :, 5:10]),    # multiplies emb[q]
                            phase_pack(w_ct[:, :, 0:5])],    # multiplies emb[q+1]
                           axis=0).astype(jnp.bfloat16)      # (3E, 5*Hp)
    ct_b = jnp.tile(pad_last(tp["ct_b"], Hp), (5,)).reshape(1, 5 * Hp)

    # --- Top-level InstanceNorm affines [In1_g, In1_b, In2_g, In2_b] (padded lanes 0) ---
    in_vec = jnp.stack([pad_last(tp["In1_g"], Hp), pad_last(tp["In1_b"], Hp),
                        pad_last(tp["In2_g"], Hp), pad_last(tp["In2_b"], Hp)])

    # --- Blocks: im2col-packed conv weights (K*Hp, Hp) bf16 + per-channel vectors ---
    def pack_conv_w(w):                           # torch [out, in, K] -> (K*Hp, Hp)
        w = jnp.transpose(w, (2, 1, 0))           # [K, in, out]
        w = jnp.pad(w, ((0, 0), (0, Hp - H), (0, Hp - H)))
        return w.reshape(K * Hp, Hp)

    pad1 = jnp.ones((Hp - H,), jnp.float32)       # padded alpha lanes -> 1 (Snake(0)=0)
    blk_vec, blk_w1, blk_w2 = [], [], []
    for blk in tp["blocks"]:
        blk_vec.append(jnp.stack([
            jnp.concatenate([blk["alpha1"], pad1]), pad_last(blk["b1"], Hp),
            pad_last(blk["In2_g"], Hp), pad_last(blk["In2_b"], Hp),
            jnp.concatenate([blk["alpha2"], pad1]), pad_last(blk["b2"], Hp),
            pad_last(blk["ln3_g"], Hp), pad_last(blk["ln3_b"], Hp),
        ]))
        blk_w1.append(pack_conv_w(blk["w1"]))
        blk_w2.append(pack_conv_w(blk["w2"]))

    # --- Head: 1x1 conv + LayerNorm ---
    w_head = jnp.pad(tp["head_w"][:, :, 0].T,
                     ((0, Hp - H), (0, Op - O))).astype(jnp.bfloat16)        # (Hp, Op)
    head_vec = jnp.stack([pad_last(tp["head_b"], Op),
                          pad_last(tp["ln_g"], Op), pad_last(tp["ln_b"], Op)])

    return {
        "embedding": tp["embedding"],
        "ct_w": ct_w, "ct_b": ct_b,
        "in_vec": in_vec,
        "blk_vec": jnp.stack(blk_vec),                          # (n_blocks, 8, Hp) f32
        "blk_w1": jnp.stack(blk_w1).astype(jnp.bfloat16),       # (n_blocks, K*Hp, Hp)
        "blk_w2": jnp.stack(blk_w2).astype(jnp.bfloat16),
        "w_head": w_head, "head_vec": head_vec,
    }


# ----------------------------------------------------------------------------
# Forward pass: embedding gather (XLA glue) -> kernel 1 -> free reshape -> kernel 2.
# ----------------------------------------------------------------------------
def whisper_cnn_forward(params, tokens, *, K, D, O):
    B, T = tokens.shape
    Hp = params["blk_w1"].shape[-1]
    emb = params["embedding"][tokens]                                   # (B, T, E)
    y_phase = pallas_ct_polyphase(emb, params["ct_w"], params["ct_b"])  # (B, T, 5*Hp)
    h0 = y_phase.reshape(B, 5 * T, Hp)       # free row-major reshape: interleaves phases
    out = pallas_fused_backbone(h0, params["in_vec"], params["blk_vec"],
                                params["blk_w1"], params["blk_w2"],
                                params["w_head"], params["head_vec"],
                                K=K, D=D, o_real=O)                     # (B, 5T, Op)
    return out[:, :, :O]


# ----------------------------------------------------------------------------
# Pure-JAX reference (torch-layout weights, lax convolutions) for correctness.
# Matmul operands are cast to bf16 at the same points as the kernels.
# ----------------------------------------------------------------------------
def reference_forward(tp, tokens, *, K, D):
    emb = tp["embedding"][tokens]                    # (B, T, E)
    x = jnp.transpose(emb, (0, 2, 1))                # (B, E, T)

    def conv(x, w, b, dil, pad, lhs_dil=1):
        y = lax.conv_general_dilated(
            x.astype(MATMUL_DTYPE), w.astype(MATMUL_DTYPE),
            window_strides=(1,), padding=[(pad, pad)],
            lhs_dilation=(lhs_dil,), rhs_dilation=(dil,),
            dimension_numbers=("NCH", "OIH", "NCH"),
            preferred_element_type=jnp.float32)
        return y + b[None, :, None]

    # ConvTranspose1d(E->H, 15, stride=5, padding=5) == zero-stuff by 5, pad 15-1-5=9,
    # cross-correlate with the flipped, [out,in,K]-transposed kernel.
    wf = jnp.transpose(tp["ct_w"][:, :, ::-1], (1, 0, 2))
    h = conv(x, wf, tp["ct_b"], dil=1, pad=9, lhs_dil=5)     # (B, H, 5T)

    def inorm(x, g, b):
        m = jnp.mean(x, axis=-1, keepdims=True)
        v = jnp.mean((x - m) ** 2, axis=-1, keepdims=True)
        return (x - m) * lax.rsqrt(v + EPS) * g[None, :, None] + b[None, :, None]

    def snake(x, a):
        a = a[None, :, None]
        return x + jnp.sin(a * x) ** 2 / (a + 1e-9)

    h = inorm(h, tp["In1_g"], tp["In1_b"])
    for blk in tp["blocks"]:
        y = conv(snake(h, blk["alpha1"]), blk["w1"], blk["b1"], D, D * (K - 1) // 2)
        y = inorm(y, blk["In2_g"], blk["In2_b"])
        y = conv(snake(y, blk["alpha2"]), blk["w2"], blk["b2"], 1, K // 2)
        h = h + inorm(y, blk["ln3_g"], blk["ln3_b"])
    h = inorm(h, tp["In2_g"], tp["In2_b"])
    y = conv(h, tp["head_w"], tp["head_b"], 1, 0)            # (B, O, 5T)
    y = jnp.transpose(y, (0, 2, 1))                          # (B, 5T, O)
    m = jnp.mean(y, axis=-1, keepdims=True)
    v = jnp.mean((y - m) ** 2, axis=-1, keepdims=True)
    return (y - m) * lax.rsqrt(v + EPS) * tp["ln_g"] + tp["ln_b"]


if __name__ == "__main__":
    num_tokens, E, H, O = 16, 8, 16, 8
    K, D = 3, 2              # kernel_sizes, dilations
    B, T = 2, 8

    key = jax.random.PRNGKey(0)
    pkey, tkey = jax.random.split(key)
    torch_params = init_torch_params(pkey, num_tokens, E, H, O, K)
    params = pack_params(torch_params, K)
    tokens = jax.random.randint(tkey, (B, T), 0, num_tokens, dtype=jnp.int32)

    fwd = jax.jit(functools.partial(whisper_cnn_forward, K=K, D=D, O=O))
    out = jax.block_until_ready(fwd(params, tokens))
    assert out.shape == (B, 5 * T, O), out.shape
    assert bool(jnp.all(jnp.isfinite(out)))

    ref = jax.block_until_ready(
        jax.jit(functools.partial(reference_forward, K=K, D=D))(torch_params, tokens))
    np.testing.assert_allclose(np.asarray(out), np.asarray(ref), atol=5e-3, rtol=5e-3)
    print("KERNEL_OK")
</pallas_src>

<mosaic_0001>
module attributes {stable_mosaic.version = 11 : i64} {
  func.func @_ct_polyphase_kernel(%arg0: i32, %arg1: memref<1x8x8xf32, #tpu.memory_space<vmem>>, %arg2: memref<24x640xbf16, #tpu.memory_space<vmem>>, %arg3: memref<1x640xf32, #tpu.memory_space<vmem>>, %arg4: memref<1x8x640xf32, #tpu.memory_space<vmem>>) attributes {dimension_semantics = [#tpu.dimension_semantics<parallel>], iteration_bounds = array<i64: 2>, scalar_prefetch = 0 : i64, scratch_operands = 0 : i64, tpu.core_type = #tpu.core_type<tc>, window_params = [{transform_indices = @transform_0, window_bounds = array<i64: 1, 8, 8>}, {pipeline_mode = #tpu.pipeline_mode<synchronous>, transform_indices = @transform_1, window_bounds = array<i64: 24, 640>}, {pipeline_mode = #tpu.pipeline_mode<synchronous>, transform_indices = @transform_2, window_bounds = array<i64: 1, 640>}, {transform_indices = @transform_3, window_bounds = array<i64: 1, 8, 640>}]} {
    %c0 = arith.constant 0 : index
    %c0_0 = arith.constant 0 : index
    %c0_1 = arith.constant 0 : index
    %0 = vector.load %arg1[%c0, %c0_0, %c0_1] : memref<1x8x8xf32, #tpu.memory_space<vmem>>, vector<1x8x8xf32>
    %1 = vector.shape_cast %0 : vector<1x8x8xf32> to vector<8x8xf32>
    %cst = arith.constant 0.000000e+00 : f32
    %2 = vector.broadcast %cst : f32 to vector<1x8xf32>
    %3 = vector.extract_strided_slice %1 {offsets = [0, 0], sizes = [7, 8], strides = [1, 1]} : vector<8x8xf32> to vector<7x8xf32>
    %4 = tpu.concatenate %2, %3 in 0 : vector<1x8xf32>, vector<7x8xf32> -> vector<8x8xf32>
    %5 = vector.extract_strided_slice %1 {offsets = [1, 0], sizes = [7, 8], strides = [1, 1]} : vector<8x8xf32> to vector<7x8xf32>
    %6 = tpu.concatenate %5, %2 in 0 : vector<7x8xf32>, vector<1x8xf32> -> vector<8x8xf32>
    %7 = tpu.concatenate %4, %1, %6 in 1 : vector<8x8xf32>, vector<8x8xf32>, vector<8x8xf32> -> vector<8x24xf32>
    %8 = arith.truncf %7 : vector<8x24xf32> to vector<8x24xbf16>
    %c0_2 = arith.constant 0 : index
    %c0_3 = arith.constant 0 : index
    %9 = vector.load %arg2[%c0_2, %c0_3] : memref<24x640xbf16, #tpu.memory_space<vmem>>, vector<24x640xbf16>
    %cst_4 = arith.constant dense<0.000000e+00> : vector<8x640xf32>
    %10 = tpu.matmul %8, %9, %cst_4 {dimension_numbers = #tpu.dot_dimension_numbers<[1], [0], [0], [1], [0, 0, 1, 1], [], []>} : vector<8x24xbf16>, vector<24x640xbf16>, vector<8x640xf32> -> vector<8x640xf32>
    %c0_5 = arith.constant 0 : index
    %c0_6 = arith.constant 0 : index
    %11 = vector.load %arg3[%c0_5, %c0_6] : memref<1x640xf32, #tpu.memory_space<vmem>>, vector<1x640xf32>
    %12 = vector.broadcast %11 : vector<1x640xf32> to vector<8x640xf32>
    %13 = arith.addf %10, %12 : vector<8x640xf32>
    %c0_7 = arith.constant 0 : index
    %c0_8 = arith.constant 0 : index
    %c0_9 = arith.constant 0 : index
    %14 = vector.load %arg4[%c0_7, %c0_8, %c0_9] : memref<1x8x640xf32, #tpu.memory_space<vmem>>, vector<1x8x640xf32>
    %15 = vector.shape_cast %14 : vector<1x8x640xf32> to vector<8x640xf32>
    %16 = vector.shape_cast %13 : vector<8x640xf32> to vector<1x8x640xf32>
    tpu.vector_store %arg4[%c0_7, %c0_8, %c0_9], %16 {strides = array<i32>} : memref<1x8x640xf32, #tpu.memory_space<vmem>>, vector<1x8x640xf32>,
    return
  }
  func.func @transform_0(%arg0: i32) -> (i32, i32, i32) {
    %c0_i32 = arith.constant 0 : i32
    %c0_i32_0 = arith.constant 0 : i32
    %c0_i32_1 = arith.constant 0 : i32
    return %arg0, %c0_i32, %c0_i32_0 : i32, i32, i32
  }
  func.func @transform_1(%arg0: i32) -> (i32, i32) {
    %c0_i32 = arith.constant 0 : i32
    %c0_i32_0 = arith.constant 0 : i32
    %c0_i32_1 = arith.constant 0 : i32
    return %c0_i32, %c0_i32_0 : i32, i32
  }
  func.func @transform_2(%arg0: i32) -> (i32, i32) {
    %c0_i32 = arith.constant 0 : i32
    %c0_i32_0 = arith.constant 0 : i32
    %c0_i32_1 = arith.constant 0 : i32
    return %c0_i32, %c0_i32_0 : i32, i32
  }
  func.func @transform_3(%arg0: i32) -> (i32, i32, i32) {
    %c0_i32 = arith.constant 0 : i32
    %c0_i32_0 = arith.constant 0 : i32
    %c0_i32_1 = arith.constant 0 : i32
    return %arg0, %c0_i32, %c0_i32_0 : i32, i32, i32
  }
}

module attributes {stable_mosaic.version = 11 : i64} {
  func.func @kernel(%arg0: i32, %arg1: memref<1x40x128xf32, #tpu.memory_space<vmem>>, %arg2: memref<4x128xf32, #tpu.memory_space<vmem>>, %arg3: memref<4x8x128xf32, #tpu.memory_space<vmem>>, %arg4: memref<4x384x128xbf16, #tpu.memory_space<vmem>>, %arg5: memref<4x384x128xbf16, #tpu.memory_space<vmem>>, %arg6: memref<128x128xbf16, #tpu.memory_space<vmem>>, %arg7: memref<3x128xf32, #tpu.memory_space<vmem>>, %arg8: memref<1x40x128xf32, #tpu.memory_space<vmem>>) attributes {dimension_semantics = [#tpu.dimension_semantics<parallel>], iteration_bounds = array<i64: 2>, scalar_prefetch = 0 : i64, scratch_operands = 0 : i64, tpu.core_type = #tpu.core_type<tc>, window_params = [{transform_indices = @transform_0, window_bounds = array<i64: 1, 40, 128>}, {pipeline_mode = #tpu.pipeline_mode<synchronous>, transform_indices = @transform_1, window_bounds = array<i64: 4, 128>}, {pipeline_mode = #tpu.pipeline_mode<synchronous>, transform_indices = @transform_2, window_bounds = array<i64: 4, 8, 128>}, {pipeline_mode = #tpu.pipeline_mode<synchronous>, transform_indices = @transform_3, window_bounds = array<i64: 4, 384, 128>}, {pipeline_mode = #tpu.pipeline_mode<synchronous>, transform_indices = @transform_4, window_bounds = array<i64: 4, 384, 128>}, {pipeline_mode = #tpu.pipeline_mode<synchronous>, transform_indices = @transform_5, window_bounds = array<i64: 128, 128>}, {pipeline_mode = #tpu.pipeline_mode<synchronous>, transform_indices = @transform_6, window_bounds = array<i64: 3, 128>}, {transform_indices = @transform_7, window_bounds = array<i64: 1, 40, 128>}]} {
    %c0 = arith.constant 0 : index
    %c0_0 = arith.constant 0 : index
    %c0_1 = arith.constant 0 : index
    %0 = vector.load %arg1[%c0, %c0_0, %c0_1] : memref<1x40x128xf32, #tpu.memory_space<vmem>>, vector<1x40x128xf32>
    %1 = vector.shape_cast %0 : vector<1x40x128xf32> to vector<40x128xf32>
    %c0_2 = arith.constant 0 : index
    %c0_3 = arith.constant 0 : index
    %2 = vector.load %arg2[%c0_2, %c0_3] : memref<4x128xf32, #tpu.memory_space<vmem>>, vector<1x128xf32>
    %c1 = arith.constant 1 : index
    %c0_4 = arith.constant 0 : index
    %3 = vector.load %arg2[%c1, %c0_4] : memref<4x128xf32, #tpu.memory_space<vmem>>, vector<1x128xf32>
    %cst = arith.constant dense<0.000000e+00> : vector<128xf32>
    %4 = vector.multi_reduction <add>, %1, %cst [0] : vector<40x128xf32> to vector<128xf32>
    %5 = vector.shape_cast %4 : vector<128xf32> to vector<1x128xf32>
    %6 = arith.mulf %1, %1 : vector<40x128xf32>
    %cst_5 = arith.constant dense<0.000000e+00> : vector<128xf32>
    %7 = vector.multi_reduction <add>, %6, %cst_5 [0] : vector<40x128xf32> to vector<128xf32>
    %8 = vector.shape_cast %7 : vector<128xf32> to vector<1x128xf32>
    %cst_6 = arith.constant 2.500000e-02 : f32
    %9 = vector.broadcast %cst_6 : f32 to vector<1x128xf32>
    %10 = arith.mulf %5, %9 : vector<1x128xf32>
    %cst_7 = arith.constant 2.500000e-02 : f32
    %11 = vector.broadcast %cst_7 : f32 to vector<1x128xf32>
    %12 = arith.mulf %8, %11 : vector<1x128xf32>
    %13 = arith.mulf %10, %10 : vector<1x128xf32>
    %14 = arith.subf %12, %13 : vector<1x128xf32>
    %cst_8 = arith.constant 0.000000e+00 : f32
    %15 = vector.broadcast %cst_8 : f32 to vector<1x128xf32>
    %16 = arith.maximumf %14, %15 : vector<1x128xf32>
    %cst_9 = arith.constant 9.99999974E-6 : f32
    %17 = vector.broadcast %cst_9 : f32 to vector<1x128xf32>
    %18 = arith.addf %16, %17 : vector<1x128xf32>
    %19 = math.rsqrt %18 : vector<1x128xf32>
    %20 = arith.mulf %19, %2 : vector<1x128xf32>
    %21 = vector.broadcast %20 : vector<1x128xf32> to vector<40x128xf32>
    %22 = arith.mulf %1, %21 : vector<40x128xf32>
    %23 = arith.mulf %10, %20 : vector<1x128xf32>
    %24 = arith.subf %3, %23 : vector<1x128xf32>
    %25 = vector.broadcast %24 : vector<1x128xf32> to vector<40x128xf32>
    %26 = arith.addf %22, %25 : vector<40x128xf32>
    %c0_10 = arith.constant 0 : index
    %c0_11 = arith.constant 0 : index
    %c0_12 = arith.constant 0 : index
    %27 = vector.load %arg3[%c0_10, %c0_11, %c0_12] : memref<4x8x128xf32, #tpu.memory_space<vmem>>, vector<1x8x128xf32>
    %28 = vector.shape_cast %27 : vector<1x8x128xf32> to vector<8x128xf32>
    %c0_13 = arith.constant 0 : index
    %c0_14 = arith.constant 0 : index
    %c0_15 = arith.constant 0 : index
    %29 = vector.load %arg4[%c0_13, %c0_14, %c0_15] : memref<4x384x128xbf16, #tpu.memory_space<vmem>>, vector<1x384x128xbf16>
    %30 = vector.shape_cast %29 : vector<1x384x128xbf16> to vector<384x128xbf16>
    %c0_16 = arith.constant 0 : index
    %c0_17 = arith.constant 0 : index
    %c0_18 = arith.constant 0 : index
    %31 = vector.load %arg5[%c0_16, %c0_17, %c0_18] : memref<4x384x128xbf16, #tpu.memory_space<vmem>>, vector<1x384x128xbf16>
    %32 = vector.shape_cast %31 : vector<1x384x128xbf16> to vector<384x128xbf16>
    %33 = vector.extract_strided_slice %28 {offsets = [0, 0], sizes = [1, 128], strides = [1, 1]} : vector<8x128xf32> to vector<1x128xf32>
    %34 = vector.extract_strided_slice %28 {offsets = [1, 0], sizes = [1, 128], strides = [1, 1]} : vector<8x128xf32> to vector<1x128xf32>
    %cst_19 = arith.constant 9.99999971E-10 : f32
    %35 = vector.broadcast %cst_19 : f32 to vector<1x128xf32>
    %36 = arith.addf %33, %35 : vector<1x128xf32>
    %cst_20 = arith.constant 1.000000e+00 : f32
    %37 = vector.broadcast %cst_20 : f32 to vector<1x128xf32>
    %38 = arith.divf %37, %36 : vector<1x128xf32>
    %39 = vector.broadcast %33 : vector<1x128xf32> to vector<40x128xf32>
    %40 = arith.mulf %39, %26 : vector<40x128xf32>
    %41 = math.sin %40 : vector<40x128xf32>
    %42 = arith.mulf %41, %41 : vector<40x128xf32>
    %43 = vector.broadcast %38 : vector<1x128xf32> to vector<40x128xf32>
    %44 = arith.mulf %42, %43 : vector<40x128xf32>
    %45 = arith.addf %26, %44 : vector<40x128xf32>
    %cst_21 = arith.constant 0.000000e+00 : f32
    %46 = vector.broadcast %cst_21 : f32 to vector<2x128xf32>
    %47 = vector.extract_strided_slice %45 {offsets = [0, 0], sizes = [38, 128], strides = [1, 1]} : vector<40x128xf32> to vector<38x128xf32>
    %48 = tpu.concatenate %46, %47 in 0 : vector<2x128xf32>, vector<38x128xf32> -> vector<40x128xf32>
    %49 = arith.truncf %48 : vector<40x128xf32> to vector<40x128xbf16>
    %50 = arith.truncf %45 : vector<40x128xf32> to vector<40x128xbf16>
    %cst_22 = arith.constant 0.000000e+00 : f32
    %51 = vector.broadcast %cst_22 : f32 to vector<2x128xf32>
    %52 = vector.extract_strided_slice %45 {offsets = [2, 0], sizes = [38, 128], strides = [1, 1]} : vector<40x128xf32> to vector<38x128xf32>
    %53 = tpu.concatenate %52, %51 in 0 : vector<38x128xf32>, vector<2x128xf32> -> vector<40x128xf32>
    %54 = arith.truncf %53 : vector<40x128xf32> to vector<40x128xbf16>
    %55 = tpu.concatenate %49, %50, %54 in 1 : vector<40x128xbf16>, vector<40x128xbf16>, vector<40x128xbf16> -> vector<40x384xbf16>
    %cst_23 = arith.constant dense<0.000000e+00> : vector<40x128xf32>
    %56 = tpu.matmul %55, %30, %cst_23 {dimension_numbers = #tpu.dot_dimension_numbers<[1], [0], [0], [1], [0, 0, 1, 1], [], []>} : vector<40x384xbf16>, vector<384x128xbf16>, vector<40x128xf32> -> vector<40x128xf32>
    %57 = vector.broadcast %34 : vector<1x128xf32> to vector<40x128xf32>
    %58 = arith.addf %56, %57 : vector<40x128xf32>
    %59 = vector.extract_strided_slice %28 {offsets = [2, 0], sizes = [1, 128], strides = [1, 1]} : vector<8x128xf32> to vector<1x128xf32>
    %60 = vector.extract_strided_slice %28 {offsets = [3, 0], sizes = [1, 128], strides = [1, 1]} : vector<8x128xf32> to vector<1x128xf32>
    %cst_24 = arith.constant dense<0.000000e+00> : vector<128xf32>
    %61 = vector.multi_reduction <add>, %58, %cst_24 [0] : vector<40x128xf32> to vector<128xf32>
    %62 = vector.shape_cast %61 : vector<128xf32> to vector<1x128xf32>
    %63 = arith.mulf %58, %58 : vector<40x128xf32>
    %cst_25 = arith.constant dense<0.000000e+00> : vector<128xf32>
    %64 = vector.multi_reduction <add>, %63, %cst_25 [0] : vector<40x128xf32> to vector<128xf32>
    %65 = vector.shape_cast %64 : vector<128xf32> to vector<1x128xf32>
    %cst_26 = arith.constant 2.500000e-02 : f32
    %66 = vector.broadcast %cst_26 : f32 to vector<1x128xf32>
    %67 = arith.mulf %62, %66 : vector<1x128xf32>
    %cst_27 = arith.constant 2.500000e-02 : f32
    %68 = vector.broadcast %cst_27 : f32 to vector<1x128xf32>
    %69 = arith.mulf %65, %68 : vector<1x128xf32>
    %70 = arith.mulf %67, %67 : vector<1x128xf32>
    %71 = arith.subf %69, %70 : vector<1x128xf32>
    %cst_28 = arith.constant 0.000000e+00 : f32
    %72 = vector.broadcast %cst_28 : f32 to vector<1x128xf32>
    %73 = arith.maximumf %71, %72 : vector<1x128xf32>
    %cst_29 = arith.constant 9.99999974E-6 : f32
    %74 = vector.broadcast %cst_29 : f32 to vector<1x128xf32>
    %75 = arith.addf %73, %74 : vector<1x128xf32>
    %76 = math.rsqrt %75 : vector<1x128xf32>
    %77 = arith.mulf %76, %59 : vector<1x128xf32>
    %78 = vector.broadcast %77 : vector<1x128xf32> to vector<40x128xf32>
    %79 = arith.mulf %58, %78 : vector<40x128xf32>
    %80 = arith.mulf %67, %77 : vector<1x128xf32>
    %81 = arith.subf %60, %80 : vector<1x128xf32>
    %82 = vector.broadcast %81 : vector<1x128xf32> to vector<40x128xf32>
    %83 = arith.addf %79, %82 : vector<40x128xf32>
    %84 = vector.extract_strided_slice %28 {offsets = [4, 0], sizes = [1, 128], strides = [1, 1]} : vector<8x128xf32> to vector<1x128xf32>
    %85 = vector.extract_strided_slice %28 {offsets = [5, 0], sizes = [1, 128], strides = [1, 1]} : vector<8x128xf32> to vector<1x128xf32>
    %cst_30 = arith.constant 9.99999971E-10 : f32
    %86 = vector.broadcast %cst_30 : f32 to vector<1x128xf32>
    %87 = arith.addf %84, %86 : vector<1x128xf32>
    %cst_31 = arith.constant 1.000000e+00 : f32
    %88 = vector.broadcast %cst_31 : f32 to vector<1x128xf32>
    %89 = arith.divf %88, %87 : vector<1x128xf32>
    %90 = vector.broadcast %84 : vector<1x128xf32> to vector<40x128xf32>
    %91 = arith.mulf %90, %83 : vector<40x128xf32>
    %92 = math.sin %91 : vector<40x128xf32>
    %93 = arith.mulf %92, %92 : vector<40x128xf32>
    %94 = vector.broadcast %89 : vector<1x128xf32> to vector<40x128xf32>
    %95 = arith.mulf %93, %94 : vector<40x128xf32>
    %96 = arith.addf %83, %95 : vector<40x128xf32>
    %cst_32 = arith.constant 0.000000e+00 : f32
    %97 = vector.broadcast %cst_32 : f32 to vector<1x128xf32>
    %98 = vector.extract_strided_slice %96 {offsets = [0, 0], sizes = [39, 128], strides = [1, 1]} : vector<40x128xf32> to vector<39x128xf32>
    %99 = tpu.concatenate %97, %98 in 0 : vector<1x128xf32>, vector<39x128xf32> -> vector<40x128xf32>
    %100 = arith.truncf %99 : vector<40x128xf32> to vector<40x128xbf16>
    %101 = arith.truncf %96 : vector<40x128xf32> to vector<40x128xbf16>
    %cst_33 = arith.constant 0.000000e+00 : f32
    %102 = vector.broadcast %cst_33 : f32 to vector<1x128xf32>
    %103 = vector.extract_strided_slice %96 {offsets = [1, 0], sizes = [39, 128], strides = [1, 1]} : vector<40x128xf32> to vector<39x128xf32>
    %104 = tpu.concatenate %103, %102 in 0 : vector<39x128xf32>, vector<1x128xf32> -> vector<40x128xf32>
    %105 = arith.truncf %104 : vector<40x128xf32> to vector<40x128xbf16>
    %106 = tpu.concatenate %100, %101, %105 in 1 : vector<40x128xbf16>, vector<40x128xbf16>, vector<40x128xbf16> -> vector<40x384xbf16>
    %cst_34 = arith.constant dense<0.000000e+00> : vector<40x128xf32>
    %107 = tpu.matmul %106, %32, %cst_34 {dimension_numbers = #tpu.dot_dimension_numbers<[1], [0], [0], [1], [0, 0, 1, 1], [], []>} : vector<40x384xbf16>, vector<384x128xbf16>, vector<40x128xf32> -> vector<40x128xf32>
    %108 = vector.broadcast %85 : vector<1x128xf32> to vector<40x128xf32>
    %109 = arith.addf %107, %108 : vector<40x128xf32>
    %110 = vector.extract_strided_slice %28 {offsets = [6, 0], sizes = [1, 128], strides = [1, 1]} : vector<8x128xf32> to vector<1x128xf32>
    %111 = vector.extract_strided_slice %28 {offsets = [7, 0], sizes = [1, 128], strides = [1, 1]} : vector<8x128xf32> to vector<1x128xf32>
    %cst_35 = arith.constant dense<0.000000e+00> : vector<128xf32>
    %112 = vector.multi_reduction <add>, %109, %cst_35 [0] : vector<40x128xf32> to vector<128xf32>
    %113 = vector.shape_cast %112 : vector<128xf32> to vector<1x128xf32>
    %114 = arith.mulf %109, %109 : vector<40x128xf32>
    %cst_36 = arith.constant dense<0.000000e+00> : vector<128xf32>
    %115 = vector.multi_reduction <add>, %114, %cst_36 [0] : vector<40x128xf32> to vector<128xf32>
    %116 = vector.shape_cast %115 : vector<128xf32> to vector<1x128xf32>
    %cst_37 = arith.constant 2.500000e-02 : f32
    %117 = vector.broadcast %cst_37 : f32 to vector<1x128xf32>
    %118 = arith.mulf %113, %117 : vector<1x128xf32>
    %cst_38 = arith.constant 2.500000e-02 : f32
    %119 = vector.broadcast %cst_38 : f32 to vector<1x128xf32>
    %120 = arith.mulf %116, %119 : vector<1x128xf32>
    %121 = arith.mulf %118, %118 : vector<1x128xf32>
    %122 = arith.subf %120, %121 : vector<1x128xf32>
    %cst_39 = arith.constant 0.000000e+00 : f32
    %123 = vector.broadcast %cst_39 : f32 to vector<1x128xf32>
    %124 = arith.maximumf %122, %123 : vector<1x128xf32>
    %cst_40 = arith.constant 9.99999974E-6 : f32
    %125 = vector.broadcast %cst_40 : f32 to vector<1x128xf32>
    %126 = arith.addf %124, %125 : vector<1x128xf32>
    %127 = math.rsqrt %126 : vector<1x128xf32>
    %128 = arith.mulf %127, %110 : vector<1x128xf32>
    %129 = vector.broadcast %128 : vector<1x128xf32> to vector<40x128xf32>
    %130 = arith.mulf %109, %129 : vector<40x128xf32>
    %131 = arith.mulf %118, %128 : vector<1x128xf32>
    %132 = arith.subf %111, %131 : vector<1x128xf32>
    %133 = vector.broadcast %132 : vector<1x128xf32> to vector<40x128xf32>
    %134 = arith.addf %130, %133 : vector<40x128xf32>
    %135 = arith.addf %26, %134 : vector<40x128xf32>
    %c1_41 = arith.constant 1 : index
    %c0_42 = arith.constant 0 : index
    %c0_43 = arith.constant 0 : index
    %136 = vector.load %arg3[%c1_41, %c0_42, %c0_43] : memref<4x8x128xf32, #tpu.memory_space<vmem>>, vector<1x8x128xf32>
    %137 = vector.shape_cast %136 : vector<1x8x128xf32> to vector<8x128xf32>
    %c1_44 = arith.constant 1 : index
    %c0_45 = arith.constant 0 : index
    %c0_46 = arith.constant 0 : index
    %138 = vector.load %arg4[%c1_44, %c0_45, %c0_46] : memref<4x384x128xbf16, #tpu.memory_space<vmem>>, vector<1x384x128xbf16>
    %139 = vector.shape_cast %138 : vector<1x384x128xbf16> to vector<384x128xbf16>
    %c1_47 = arith.constant 1 : index
    %c0_48 = arith.constant 0 : index
    %c0_49 = arith.constant 0 : index
    %140 = vector.load %arg5[%c1_47, %c0_48, %c0_49] : memref<4x384x128xbf16, #tpu.memory_space<vmem>>, vector<1x384x128xbf16>
    %141 = vector.shape_cast %140 : vector<1x384x128xbf16> to vector<384x128xbf16>
    %142 = vector.extract_strided_slice %137 {offsets = [0, 0], sizes = [1, 128], strides = [1, 1]} : vector<8x128xf32> to vector<1x128xf32>
    %143 = vector.extract_strided_slice %137 {offsets = [1, 0], sizes = [1, 128], strides = [1, 1]} : vector<8x128xf32> to vector<1x128xf32>
    %cst_50 = arith.constant 9.99999971E-10 : f32
    %144 = vector.broadcast %cst_50 : f32 to vector<1x128xf32>
    %145 = arith.addf %142, %144 : vector<1x128xf32>
    %cst_51 = arith.constant 1.000000e+00 : f32
    %146 = vector.broadcast %cst_51 : f32 to vector<1x128xf32>
    %147 = arith.divf %146, %145 : vector<1x128xf32>
    %148 = vector.broadcast %142 : vector<1x128xf32> to vector<40x128xf32>
    %149 = arith.mulf %148, %135 : vector<40x128xf32>
    %150 = math.sin %149 : vector<40x128xf32>
    %151 = arith.mulf %150, %150 : vector<40x128xf32>
    %152 = vector.broadcast %147 : vector<1x128xf32> to vector<40x128xf32>
    %153 = arith.mulf %151, %152 : vector<40x128xf32>
    %154 = arith.addf %135, %153 : vector<40x128xf32>
    %cst_52 = arith.constant 0.000000e+00 : f32
    %155 = vector.broadcast %cst_52 : f32 to vector<2x128xf32>
    %156 = vector.extract_strided_slice %154 {offsets = [0, 0], sizes = [38, 128], strides = [1, 1]} : vector<40x128xf32> to vector<38x128xf32>
    %157 = tpu.concatenate %155, %156 in 0 : vector<2x128xf32>, vector<38x128xf32> -> vector<40x128xf32>
    %158 = arith.truncf %157 : vector<40x128xf32> to vector<40x128xbf16>
    %159 = arith.truncf %154 : vector<40x128xf32> to vector<40x128xbf16>
    %cst_53 = arith.constant 0.000000e+00 : f32
    %160 = vector.broadcast %cst_53 : f32 to vector<2x128xf32>
    %161 = vector.extract_strided_slice %154 {offsets = [2, 0], sizes = [38, 128], strides = [1, 1]} : vector<40x128xf32> to vector<38x128xf32>
    %162 = tpu.concatenate %161, %160 in 0 : vector<38x128xf32>, vector<2x128xf32> -> vector<40x128xf32>
    %163 = arith.truncf %162 : vector<40x128xf32> to vector<40x128xbf16>
    %164 = tpu.concatenate %158, %159, %163 in 1 : vector<40x128xbf16>, vector<40x128xbf16>, vector<40x128xbf16> -> vector<40x384xbf16>
    %cst_54 = arith.constant dense<0.000000e+00> : vector<40x128xf32>
    %165 = tpu.matmul %164, %139, %cst_54 {dimension_numbers = #tpu.dot_dimension_numbers<[1], [0], [0], [1], [0, 0, 1, 1], [], []>} : vector<40x384xbf16>, vector<384x128xbf16>, vector<40x128xf32> -> vector<40x128xf32>
    %166 = vector.broadcast %143 : vector<1x128xf32> to vector<40x128xf32>
    %167 = arith.addf %165, %166 : vector<40x128xf32>
    %168 = vector.extract_strided_slice %137 {offsets = [2, 0], sizes = [1, 128], strides = [1, 1]} : vector<8x128xf32> to vector<1x128xf32>
    %169 = vector.extract_strided_slice %137 {offsets = [3, 0], sizes = [1, 128], strides = [1, 1]} : vector<8x128xf32> to vector<1x128xf32>
    %cst_55 = arith.constant dense<0.000000e+00> : vector<128xf32>
    %170 = vector.multi_reduction <add>, %167, %cst_55 [0] : vector<40x128xf32> to vector<128xf32>
    %171 = vector.shape_cast %170 : vector<128xf32> to vector<1x128xf32>
    %172 = arith.mulf %167, %167 : vector<40x128xf32>
    %cst_56 = arith.constant dense<0.000000e+00> : vector<128xf32>
    %173 = vector.multi_reduction <add>, %172, %cst_56 [0] : vector<40x128xf32> to vector<128xf32>
    %174 = vector.shape_cast %173 : vector<128xf32> to vector<1x128xf32>
    %cst_57 = arith.constant 2.500000e-02 : f32
    %175 = vector.broadcast %cst_57 : f32 to vector<1x128xf32>
    %176 = arith.mulf %171, %175 : vector<1x128xf32>
    %cst_58 = arith.constant 2.500000e-02 : f32
    %177 = vector.broadcast %cst_58 : f32 to vector<1x128xf32>
    %178 = arith.mulf %174, %177 : vector<1x128xf32>
    %179 = arith.mulf %176, %176 : vector<1x128xf32>
    %180 = arith.subf %178, %179 : vector<1x128xf32>
    %cst_59 = arith.constant 0.000000e+00 : f32
    %181 = vector.broadcast %cst_59 : f32 to vector<1x128xf32>
    %182 = arith.maximumf %180, %181 : vector<1x128xf32>
    %cst_60 = arith.constant 9.99999974E-6 : f32
    %183 = vector.broadcast %cst_60 : f32 to vector<1x128xf32>
    %184 = arith.addf %182, %183 : vector<1x128xf32>
    %185 = math.rsqrt %184 : vector<1x128xf32>
    %186 = arith.mulf %185, %168 : vector<1x128xf32>
    %187 = vector.broadcast %186 : vector<1x128xf32> to vector<40x128xf32>
    %188 = arith.mulf %167, %187 : vector<40x128xf32>
    %189 = arith.mulf %176, %186 : vector<1x128xf32>
    %190 = arith.subf %169, %189 : vector<1x128xf32>
    %191 = vector.broadcast %190 : vector<1x128xf32> to vector<40x128xf32>
    %192 = arith.addf %188, %191 : vector<40x128xf32>
    %193 = vector.extract_strided_slice %137 {offsets = [4, 0], sizes = [1, 128], strides = [1, 1]} : vector<8x128xf32> to vector<1x128xf32>
    %194 = vector.extract_strided_slice %137 {offsets = [5, 0], sizes = [1, 128], strides = [1, 1]} : vector<8x128xf32> to vector<1x128xf32>
    %cst_61 = arith.constant 9.99999971E-10 : f32
    %195 = vector.broadcast %cst_61 : f32 to vector<1x128xf32>
    %196 = arith.addf %193, %195 : vector<1x128xf32>
    %cst_62 = arith.constant 1.000000e+00 : f32
    %197 = vector.broadcast %cst_62 : f32 to vector<1x128xf32>
    %198 = arith.divf %197, %196 : vector<1x128xf32>
    %199 = vector.broadcast %193 : vector<1x128xf32> to vector<40x128xf32>
    %200 = arith.mulf %199, %192 : vector<40x128xf32>
    %201 = math.sin %200 : vector<40x128xf32>
    %202 = arith.mulf %201, %201 : vector<40x128xf32>
    %203 = vector.broadcast %198 : vector<1x128xf32> to vector<40x128xf32>
    %204 = arith.mulf %202, %203 : vector<40x128xf32>
    %205 = arith.addf %192, %204 : vector<40x128xf32>
    %cst_63 = arith.constant 0.000000e+00 : f32
    %206 = vector.broadcast %cst_63 : f32 to vector<1x128xf32>
    %207 = vector.extract_strided_slice %205 {offsets = [0, 0], sizes = [39, 128], strides = [1, 1]} : vector<40x128xf32> to vector<39x128xf32>
    %208 = tpu.concatenate %206, %207 in 0 : vector<1x128xf32>, vector<39x128xf32> -> vector<40x128xf32>
    %209 = arith.truncf %208 : vector<40x128xf32> to vector<40x128xbf16>
    %210 = arith.truncf %205 : vector<40x128xf32> to vector<40x128xbf16>
    %cst_64 = arith.constant 0.000000e+00 : f32
    %211 = vector.broadcast %cst_64 : f32 to vector<1x128xf32>
    %212 = vector.extract_strided_slice %205 {offsets = [1, 0], sizes = [39, 128], strides = [1, 1]} : vector<40x128xf32> to vector<39x128xf32>
    %213 = tpu.concatenate %212, %211 in 0 : vector<39x128xf32>, vector<1x128xf32> -> vector<40x128xf32>
    %214 = arith.truncf %213 : vector<40x128xf32> to vector<40x128xbf16>
    %215 = tpu.concatenate %209, %210, %214 in 1 : vector<40x128xbf16>, vector<40x128xbf16>, vector<40x128xbf16> -> vector<40x384xbf16>
    %cst_65 = arith.constant dense<0.000000e+00> : vector<40x128xf32>
    %216 = tpu.matmul %215, %141, %cst_65 {dimension_numbers = #tpu.dot_dimension_numbers<[1], [0], [0], [1], [0, 0, 1, 1], [], []>} : vector<40x384xbf16>, vector<384x128xbf16>, vector<40x128xf32> -> vector<40x128xf32>
    %217 = vector.broadcast %194 : vector<1x128xf32> to vector<40x128xf32>
    %218 = arith.addf %216, %217 : vector<40x128xf32>
    %219 = vector.extract_strided_slice %137 {offsets = [6, 0], sizes = [1, 128], strides = [1, 1]} : vector<8x128xf32> to vector<1x128xf32>
    %220 = vector.extract_strided_slice %137 {offsets = [7, 0], sizes = [1, 128], strides = [1, 1]} : vector<8x128xf32> to vector<1x128xf32>
    %cst_66 = arith.constant dense<0.000000e+00> : vector<128xf32>
    %221 = vector.multi_reduction <add>, %218, %cst_66 [0] : vector<40x128xf32> to vector<128xf32>
    %222 = vector.shape_cast %221 : vector<128xf32> to vector<1x128xf32>
    %223 = arith.mulf %218, %218 : vector<40x128xf32>
    %cst_67 = arith.constant dense<0.000000e+00> : vector<128xf32>
    %224 = vector.multi_reduction <add>, %223, %cst_67 [0] : vector<40x128xf32> to vector<128xf32>
    %225 = vector.shape_cast %224 : vector<128xf32> to vector<1x128xf32>
    %cst_68 = arith.constant 2.500000e-02 : f32
    %226 = vector.broadcast %cst_68 : f32 to vector<1x128xf32>
    %227 = arith.mulf %222, %226 : vector<1x128xf32>
    %cst_69 = arith.constant 2.500000e-02 : f32
    %228 = vector.broadcast %cst_69 : f32 to vector<1x128xf32>
    %229 = arith.mulf %225, %228 : vector<1x128xf32>
    %230 = arith.mulf %227, %227 : vector<1x128xf32>
    %231 = arith.subf %229, %230 : vector<1x128xf32>
    %cst_70 = arith.constant 0.000000e+00 : f32
    %232 = vector.broadcast %cst_70 : f32 to vector<1x128xf32>
    %233 = arith.maximumf %231, %232 : vector<1x128xf32>
    %cst_71 = arith.constant 9.99999974E-6 : f32
    %234 = vector.broadcast %cst_71 : f32 to vector<1x128xf32>
    %235 = arith.addf %233, %234 : vector<1x128xf32>
    %236 = math.rsqrt %235 : vector<1x128xf32>
    %237 = arith.mulf %236, %219 : vector<1x128xf32>
    %238 = vector.broadcast %237 : vector<1x128xf32> to vector<40x128xf32>
    %239 = arith.mulf %218, %238 : vector<40x128xf32>
    %240 = arith.mulf %227, %237 : vector<1x128xf32>
    %241 = arith.subf %220, %240 : vector<1x128xf32>
    %242 = vector.broadcast %241 : vector<1x128xf32> to vector<40x128xf32>
    %243 = arith.addf %239, %242 : vector<40x128xf32>
    %244 = arith.addf %135, %243 : vector<40x128xf32>
    %c2 = arith.constant 2 : index
    %c0_72 = arith.constant 0 : index
    %c0_73 = arith.constant 0 : index
    %245 = vector.load %arg3[%c2, %c0_72, %c0_73] : memref<4x8x128xf32, #tpu.memory_space<vmem>>, vector<1x8x128xf32>
    %246 = vector.shape_cast %245 : vector<1x8x128xf32> to vector<8x128xf32>
    %c2_74 = arith.constant 2 : index
    %c0_75 = arith.constant 0 : index
    %c0_76 = arith.constant 0 : index
    %247 = vector.load %arg4[%c2_74, %c0_75, %c0_76] : memref<4x384x128xbf16, #tpu.memory_space<vmem>>, vector<1x384x128xbf16>
    %248 = vector.shape_cast %247 : vector<1x384x128xbf16> to vector<384x128xbf16>
    %c2_77 = arith.constant 2 : index
    %c0_78 = arith.constant 0 : index
    %c0_79 = arith.constant 0 : index
    %249 = vector.load %arg5[%c2_77, %c0_78, %c0_79] : memref<4x384x128xbf16, #tpu.memory_space<vmem>>, vector<1x384x128xbf16>
    %250 = vector.shape_cast %249 : vector<1x384x128xbf16> to vector<384x128xbf16>
    %251 = vector.extract_strided_slice %246 {offsets = [0, 0], sizes = [1, 128], strides = [1, 1]} : vector<8x128xf32> to vector<1x128xf32>
    %252 = vector.extract_strided_slice %246 {offsets = [1, 0], sizes = [1, 128], strides = [1, 1]} : vector<8x128xf32> to vector<1x128xf32>
    %cst_80 = arith.constant 9.99999971E-10 : f32
    %253 = vector.broadcast %cst_80 : f32 to vector<1x128xf32>
    %254 = arith.addf %251, %253 : vector<1x128xf32>
    %cst_81 = arith.constant 1.000000e+00 : f32
    %255 = vector.broadcast %cst_81 : f32 to vector<1x128xf32>
    %256 = arith.divf %255, %254 : vector<1x128xf32>
    %257 = vector.broadcast %251 : vector<1x128xf32> to vector<40x128xf32>
    %258 = arith.mulf %257, %244 : vector<40x128xf32>
    %259 = math.sin %258 : vector<40x128xf32>
    %260 = arith.mulf %259, %259 : vector<40x128xf32>
    %261 = vector.broadcast %256 : vector<1x128xf32> to vector<40x128xf32>
    %262 = arith.mulf %260, %261 : vector<40x128xf32>
    %263 = arith.addf %244, %262 : vector<40x128xf32>
    %cst_82 = arith.constant 0.000000e+00 : f32
    %264 = vector.broadcast %cst_82 : f32 to vector<2x128xf32>
    %265 = vector.extract_strided_slice %263 {offsets = [0, 0], sizes = [38, 128], strides = [1, 1]} : vector<40x128xf32> to vector<38x128xf32>
    %266 = tpu.concatenate %264, %265 in 0 : vector<2x128xf32>, vector<38x128xf32> -> vector<40x128xf32>
    %267 = arith.truncf %266 : vector<40x128xf32> to vector<40x128xbf16>
    %268 = arith.truncf %263 : vector<40x128xf32> to vector<40x128xbf16>
    %cst_83 = arith.constant 0.000000e+00 : f32
    %269 = vector.broadcast %cst_83 : f32 to vector<2x128xf32>
    %270 = vector.extract_strided_slice %263 {offsets = [2, 0], sizes = [38, 128], strides = [1, 1]} : vector<40x128xf32> to vector<38x128xf32>
    %271 = tpu.concatenate %270, %269 in 0 : vector<38x128xf32>, vector<2x128xf32> -> vector<40x128xf32>
    %272 = arith.truncf %271 : vector<40x128xf32> to vector<40x128xbf16>
    %273 = tpu.concatenate %267, %268, %272 in 1 : vector<40x128xbf16>, vector<40x128xbf16>, vector<40x128xbf16> -> vector<40x384xbf16>
    %cst_84 = arith.constant dense<0.000000e+00> : vector<40x128xf32>
    %274 = tpu.matmul %273, %248, %cst_84 {dimension_numbers = #tpu.dot_dimension_numbers<[1], [0], [0], [1], [0, 0, 1, 1], [], []>} : vector<40x384xbf16>, vector<384x128xbf16>, vector<40x128xf32> -> vector<40x128xf32>
    %275 = vector.broadcast %252 : vector<1x128xf32> to vector<40x128xf32>
    %276 = arith.addf %274, %275 : vector<40x128xf32>
    %277 = vector.extract_strided_slice %246 {offsets = [2, 0], sizes = [1, 128], strides = [1, 1]} : vector<8x128xf32> to vector<1x128xf32>
    %278 = vector.extract_strided_slice %246 {offsets = [3, 0], sizes = [1, 128], strides = [1, 1]} : vector<8x128xf32> to vector<1x128xf32>
    %cst_85 = arith.constant dense<0.000000e+00> : vector<128xf32>
    %279 = vector.multi_reduction <add>, %276, %cst_85 [0] : vector<40x128xf32> to vector<128xf32>
    %280 = vector.shape_cast %279 : vector<128xf32> to vector<1x128xf32>
    %281 = arith.mulf %276, %276 : vector<40x128xf32>
    %cst_86 = arith.constant dense<0.000000e+00> : vector<128xf32>
    %282 = vector.multi_reduction <add>, %281, %cst_86 [0] : vector<40x128xf32> to vector<128xf32>
    %283 = vector.shape_cast %282 : vector<128xf32> to vector<1x128xf32>
    %cst_87 = arith.constant 2.500000e-02 : f32
    %284 = vector.broadcast %cst_87 : f32 to vector<1x128xf32>
    %285 = arith.mulf %280, %284 : vector<1x128xf32>
    %cst_88 = arith.constant 2.500000e-02 : f32
    %286 = vector.broadcast %cst_88 : f32 to vector<1x128xf32>
    %287 = arith.mulf %283, %286 : vector<1x128xf32>
    %288 = arith.mulf %285, %285 : vector<1x128xf32>
    %289 = arith.subf %287, %288 : vector<1x128xf32>
    %cst_89 = arith.constant 0.000000e+00 : f32
    %290 = vector.broadcast %cst_89 : f32 to vector<1x128xf32>
    %291 = arith.maximumf %289, %290 : vector<1x128xf32>
    %cst_90 = arith.constant 9.99999974E-6 : f32
    %292 = vector.broadcast %cst_90 : f32 to vector<1x128xf32>
    %293 = arith.addf %291, %292 : vector<1x128xf32>
    %294 = math.rsqrt %293 : vector<1x128xf32>
    %295 = arith.mulf %294, %277 : vector<1x128xf32>
    %296 = vector.broadcast %295 : vector<1x128xf32> to vector<40x128xf32>
    %297 = arith.mulf %276, %296 : vector<40x128xf32>
    %298 = arith.mulf %285, %295 : vector<1x128xf32>
    %299 = arith.subf %278, %298 : vector<1x128xf32>
    %300 = vector.broadcast %299 : vector<1x128xf32> to vector<40x128xf32>
    %301 = arith.addf %297, %300 : vector<40x128xf32>
    %302 = vector.extract_strided_slice %246 {offsets = [4, 0], sizes = [1, 128], strides = [1, 1]} : vector<8x128xf32> to vector<1x128xf32>
    %303 = vector.extract_strided_slice %246 {offsets = [5, 0], sizes = [1, 128], strides = [1, 1]} : vector<8x128xf32> to vector<1x128xf32>
    %cst_91 = arith.constant 9.99999971E-10 : f32
    %304 = vector.broadcast %cst_91 : f32 to vector<1x128xf32>
    %305 = arith.addf %302, %304 : vector<1x128xf32>
    %cst_92 = arith.constant 1.000000e+00 : f32
    %306 = vector.broadcast %cst_92 : f32 to vector<1x128xf32>
    %307 = arith.divf %306, %305 : vector<1x128xf32>
    %308 = vector.broadcast %302 : vector<1x128xf32> to vector<40x128xf32>
    %309 = arith.mulf %308, %301 : vector<40x128xf32>
    %310 = math.sin %309 : vector<40x128xf32>
    %311 = arith.mulf %310, %310 : vector<40x128xf32>
    %312 = vector.broadcast %307 : vector<1x128xf32> to vector<40x128xf32>
    %313 = arith.mulf %311, %312 : vector<40x128xf32>
    %314 = arith.addf %301, %313 : vector<40x128xf32>
    %cst_93 = arith.constant 0.000000e+00 : f32
    %315 = vector.broadcast %cst_93 : f32 to vector<1x128xf32>
    %316 = vector.extract_strided_slice %314 {offsets = [0, 0], sizes = [39, 128], strides = [1, 1]} : vector<40x128xf32> to vector<39x128xf32>
    %317 = tpu.concatenate %315, %316 in 0 : vector<1x128xf32>, vector<39x128xf32> -> vector<40x128xf32>
    %318 = arith.truncf %317 : vector<40x128xf32> to vector<40x128xbf16>
    %319 = arith.truncf %314 : vector<40x128xf32> to vector<40x128xbf16>
    %cst_94 = arith.constant 0.000000e+00 : f32
    %320 = vector.broadcast %cst_94 : f32 to vector<1x128xf32>
    %321 = vector.extract_strided_slice %314 {offsets = [1, 0], sizes = [39, 128], strides = [1, 1]} : vector<40x128xf32> to vector<39x128xf32>
    %322 = tpu.concatenate %321, %320 in 0 : vector<39x128xf32>, vector<1x128xf32> -> vector<40x128xf32>
    %323 = arith.truncf %322 : vector<40x128xf32> to vector<40x128xbf16>
    %324 = tpu.concatenate %318, %319, %323 in 1 : vector<40x128xbf16>, vector<40x128xbf16>, vector<40x128xbf16> -> vector<40x384xbf16>
    %cst_95 = arith.constant dense<0.000000e+00> : vector<40x128xf32>
    %325 = tpu.matmul %324, %250, %cst_95 {dimension_numbers = #tpu.dot_dimension_numbers<[1], [0], [0], [1], [0, 0, 1, 1], [], []>} : vector<40x384xbf16>, vector<384x128xbf16>, vector<40x128xf32> -> vector<40x128xf32>
    %326 = vector.broadcast %303 : vector<1x128xf32> to vector<40x128xf32>
    %327 = arith.addf %325, %326 : vector<40x128xf32>
    %328 = vector.extract_strided_slice %246 {offsets = [6, 0], sizes = [1, 128], strides = [1, 1]} : vector<8x128xf32> to vector<1x128xf32>
    %329 = vector.extract_strided_slice %246 {offsets = [7, 0], sizes = [1, 128], strides = [1, 1]} : vector<8x128xf32> to vector<1x128xf32>
    %cst_96 = arith.constant dense<0.000000e+00> : vector<128xf32>
    %330 = vector.multi_reduction <add>, %327, %cst_96 [0] : vector<40x128xf32> to vector<128xf32>
    %331 = vector.shape_cast %330 : vector<128xf32> to vector<1x128xf32>
    %332 = arith.mulf %327, %327 : vector<40x128xf32>
    %cst_97 = arith.constant dense<0.000000e+00> : vector<128xf32>
    %333 = vector.multi_reduction <add>, %332, %cst_97 [0] : vector<40x128xf32> to vector<128xf32>
    %334 = vector.shape_cast %333 : vector<128xf32> to vector<1x128xf32>
    %cst_98 = arith.constant 2.500000e-02 : f32
    %335 = vector.broadcast %cst_98 : f32 to vector<1x128xf32>
    %336 = arith.mulf %331, %335 : vector<1x128xf32>
    %cst_99 = arith.constant 2.500000e-02 : f32
    %337 = vector.broadcast %cst_99 : f32 to vector<1x128xf32>
    %338 = arith.mulf %334, %337 : vector<1x128xf32>
    %339 = arith.mulf %336, %336 : vector<1x128xf32>
    %340 = arith.subf %338, %339 : vector<1x128xf32>
    %cst_100 = arith.constant 0.000000e+00 : f32
    %341 = vector.broadcast %cst_100 : f32 to vector<1x128xf32>
    %342 = arith.maximumf %340, %341 : vector<1x128xf32>
    %cst_101 = arith.constant 9.99999974E-6 : f32
    %343 = vector.broadcast %cst_101 : f32 to vector<1x128xf32>
    %344 = arith.addf %342, %343 : vector<1x128xf32>
    %345 = math.rsqrt %344 : vector<1x128xf32>
    %346 = arith.mulf %345, %328 : vector<1x128xf32>
    %347 = vector.broadcast %346 : vector<1x128xf32> to vector<40x128xf32>
    %348 = arith.mulf %327, %347 : vector<40x128xf32>
    %349 = arith.mulf %336, %346 : vector<1x128xf32>
    %350 = arith.subf %329, %349 : vector<1x128xf32>
    %351 = vector.broadcast %350 : vector<1x128xf32> to vector<40x128xf32>
    %352 = arith.addf %348, %351 : vector<40x128xf32>
    %353 = arith.addf %244, %352 : vector<40x128xf32>
    %c3 = arith.constant 3 : index
    %c0_102 = arith.constant 0 : index
    %c0_103 = arith.constant 0 : index
    %354 = vector.load %arg3[%c3, %c0_102, %c0_103] : memref<4x8x128xf32, #tpu.memory_space<vmem>>, vector<1x8x128xf32>
    %355 = vector.shape_cast %354 : vector<1x8x128xf32> to vector<8x128xf32>
    %c3_104 = arith.constant 3 : index
    %c0_105 = arith.constant 0 : index
    %c0_106 = arith.constant 0 : index
    %356 = vector.load %arg4[%c3_104, %c0_105, %c0_106] : memref<4x384x128xbf16, #tpu.memory_space<vmem>>, vector<1x384x128xbf16>
    %357 = vector.shape_cast %356 : vector<1x384x128xbf16> to vector<384x128xbf16>
    %c3_107 = arith.constant 3 : index
    %c0_108 = arith.constant 0 : index
    %c0_109 = arith.constant 0 : index
    %358 = vector.load %arg5[%c3_107, %c0_108, %c0_109] : memref<4x384x128xbf16, #tpu.memory_space<vmem>>, vector<1x384x128xbf16>
    %359 = vector.shape_cast %358 : vector<1x384x128xbf16> to vector<384x128xbf16>
    %360 = vector.extract_strided_slice %355 {offsets = [0, 0], sizes = [1, 128], strides = [1, 1]} : vector<8x128xf32> to vector<1x128xf32>
    %361 = vector.extract_strided_slice %355 {offsets = [1, 0], sizes = [1, 128], strides = [1, 1]} : vector<8x128xf32> to vector<1x128xf32>
    %cst_110 = arith.constant 9.99999971E-10 : f32
    %362 = vector.broadcast %cst_110 : f32 to vector<1x128xf32>
    %363 = arith.addf %360, %362 : vector<1x128xf32>
    %cst_111 = arith.constant 1.000000e+00 : f32
    %364 = vector.broadcast %cst_111 : f32 to vector<1x128xf32>
    %365 = arith.divf %364, %363 : vector<1x128xf32>
    %366 = vector.broadcast %360 : vector<1x128xf32> to vector<40x128xf32>
    %367 = arith.mulf %366, %353 : vector<40x128xf32>
    %368 = math.sin %367 : vector<40x128xf32>
    %369 = arith.mulf %368, %368 : vector<40x128xf32>
    %370 = vector.broadcast %365 : vector<1x128xf32> to vector<40x128xf32>
    %371 = arith.mulf %369, %370 : vector<40x128xf32>
    %372 = arith.addf %353, %371 : vector<40x128xf32>
    %cst_112 = arith.constant 0.000000e+00 : f32
    %373 = vector.broadcast %cst_112 : f32 to vector<2x128xf32>
    %374 = vector.extract_strided_slice %372 {offsets = [0, 0], sizes = [38, 128], strides = [1, 1]} : vector<40x128xf32> to vector<38x128xf32>
    %375 = tpu.concatenate %373, %374 in 0 : vector<2x128xf32>, vector<38x128xf32> -> vector<40x128xf32>
    %376 = arith.truncf %375 : vector<40x128xf32> to vector<40x128xbf16>
    %377 = arith.truncf %372 : vector<40x128xf32> to vector<40x128xbf16>
    %cst_113 = arith.constant 0.000000e+00 : f32
    %378 = vector.broadcast %cst_113 : f32 to vector<2x128xf32>
    %379 = vector.extract_strided_slice %372 {offsets = [2, 0], sizes = [38, 128], strides = [1, 1]} : vector<40x128xf32> to vector<38x128xf32>
    %380 = tpu.concatenate %379, %378 in 0 : vector<38x128xf32>, vector<2x128xf32> -> vector<40x128xf32>
    %381 = arith.truncf %380 : vector<40x128xf32> to vector<40x128xbf16>
    %382 = tpu.concatenate %376, %377, %381 in 1 : vector<40x128xbf16>, vector<40x128xbf16>, vector<40x128xbf16> -> vector<40x384xbf16>
    %cst_114 = arith.constant dense<0.000000e+00> : vector<40x128xf32>
    %383 = tpu.matmul %382, %357, %cst_114 {dimension_numbers = #tpu.dot_dimension_numbers<[1], [0], [0], [1], [0, 0, 1, 1], [], []>} : vector<40x384xbf16>, vector<384x128xbf16>, vector<40x128xf32> -> vector<40x128xf32>
    %384 = vector.broadcast %361 : vector<1x128xf32> to vector<40x128xf32>
    %385 = arith.addf %383, %384 : vector<40x128xf32>
    %386 = vector.extract_strided_slice %355 {offsets = [2, 0], sizes = [1, 128], strides = [1, 1]} : vector<8x128xf32> to vector<1x128xf32>
    %387 = vector.extract_strided_slice %355 {offsets = [3, 0], sizes = [1, 128], strides = [1, 1]} : vector<8x128xf32> to vector<1x128xf32>
    %cst_115 = arith.constant dense<0.000000e+00> : vector<128xf32>
    %388 = vector.multi_reduction <add>, %385, %cst_115 [0] : vector<40x128xf32> to vector<128xf32>
    %389 = vector.shape_cast %388 : vector<128xf32> to vector<1x128xf32>
    %390 = arith.mulf %385, %385 : vector<40x128xf32>
    %cst_116 = arith.constant dense<0.000000e+00> : vector<128xf32>
    %391 = vector.multi_reduction <add>, %390, %cst_116 [0] : vector<40x128xf32> to vector<128xf32>
    %392 = vector.shape_cast %391 : vector<128xf32> to vector<1x128xf32>
    %cst_117 = arith.constant 2.500000e-02 : f32
    %393 = vector.broadcast %cst_117 : f32 to vector<1x128xf32>
    %394 = arith.mulf %389, %393 : vector<1x128xf32>
    %cst_118 = arith.constant 2.500000e-02 : f32
    %395 = vector.broadcast %cst_118 : f32 to vector<1x128xf32>
    %396 = arith.mulf %392, %395 : vector<1x128xf32>
    %397 = arith.mulf %394, %394 : vector<1x128xf32>
    %398 = arith.subf %396, %397 : vector<1x128xf32>
    %cst_119 = arith.constant 0.000000e+00 : f32
    %399 = vector.broadcast %cst_119 : f32 to vector<1x128xf32>
    %400 = arith.maximumf %398, %399 : vector<1x128xf32>
    %cst_120 = arith.constant 9.99999974E-6 : f32
    %401 = vector.broadcast %cst_120 : f32 to vector<1x128xf32>
    %402 = arith.addf %400, %401 : vector<1x128xf32>
    %403 = math.rsqrt %402 : vector<1x128xf32>
    %404 = arith.mulf %403, %386 : vector<1x128xf32>
    %405 = vector.broadcast %404 : vector<1x128xf32> to vector<40x128xf32>
    %406 = arith.mulf %385, %405 : vector<40x128xf32>
    %407 = arith.mulf %394, %404 : vector<1x128xf32>
    %408 = arith.subf %387, %407 : vector<1x128xf32>
    %409 = vector.broadcast %408 : vector<1x128xf32> to vector<40x128xf32>
    %410 = arith.addf %406, %409 : vector<40x128xf32>
    %411 = vector.extract_strided_slice %355 {offsets = [4, 0], sizes = [1, 128], strides = [1, 1]} : vector<8x128xf32> to vector<1x128xf32>
    %412 = vector.extract_strided_slice %355 {offsets = [5, 0], sizes = [1, 128], strides = [1, 1]} : vector<8x128xf32> to vector<1x128xf32>
    %cst_121 = arith.constant 9.99999971E-10 : f32
    %413 = vector.broadcast %cst_121 : f32 to vector<1x128xf32>
    %414 = arith.addf %411, %413 : vector<1x128xf32>
    %cst_122 = arith.constant 1.000000e+00 : f32
    %415 = vector.broadcast %cst_122 : f32 to vector<1x128xf32>
    %416 = arith.divf %415, %414 : vector<1x128xf32>
    %417 = vector.broadcast %411 : vector<1x128xf32> to vector<40x128xf32>
    %418 = arith.mulf %417, %410 : vector<40x128xf32>
    %419 = math.sin %418 : vector<40x128xf32>
    %420 = arith.mulf %419, %419 : vector<40x128xf32>
    %421 = vector.broadcast %416 : vector<1x128xf32> to vector<40x128xf32>
    %422 = arith.mulf %420, %421 : vector<40x128xf32>
    %423 = arith.addf %410, %422 : vector<40x128xf32>
    %cst_123 = arith.constant 0.000000e+00 : f32
    %424 = vector.broadcast %cst_123 : f32 to vector<1x128xf32>
    %425 = vector.extract_strided_slice %423 {offsets = [0, 0], sizes = [39, 128], strides = [1, 1]} : vector<40x128xf32> to vector<39x128xf32>
    %426 = tpu.concatenate %424, %425 in 0 : vector<1x128xf32>, vector<39x128xf32> -> vector<40x128xf32>
    %427 = arith.truncf %426 : vector<40x128xf32> to vector<40x128xbf16>
    %428 = arith.truncf %423 : vector<40x128xf32> to vector<40x128xbf16>
    %cst_124 = arith.constant 0.000000e+00 : f32
    %429 = vector.broadcast %cst_124 : f32 to vector<1x128xf32>
    %430 = vector.extract_strided_slice %423 {offsets = [1, 0], sizes = [39, 128], strides = [1, 1]} : vector<40x128xf32> to vector<39x128xf32>
    %431 = tpu.concatenate %430, %429 in 0 : vector<39x128xf32>, vector<1x128xf32> -> vector<40x128xf32>
    %432 = arith.truncf %431 : vector<40x128xf32> to vector<40x128xbf16>
    %433 = tpu.concatenate %427, %428, %432 in 1 : vector<40x128xbf16>, vector<40x128xbf16>, vector<40x128xbf16> -> vector<40x384xbf16>
    %cst_125 = arith.constant dense<0.000000e+00> : vector<40x128xf32>
    %434 = tpu.matmul %433, %359, %cst_125 {dimension_numbers = #tpu.dot_dimension_numbers<[1], [0], [0], [1], [0, 0, 1, 1], [], []>} : vector<40x384xbf16>, vector<384x128xbf16>, vector<40x128xf32> -> vector<40x128xf32>
    %435 = vector.broadcast %412 : vector<1x128xf32> to vector<40x128xf32>
    %436 = arith.addf %434, %435 : vector<40x128xf32>
    %437 = vector.extract_strided_slice %355 {offsets = [6, 0], sizes = [1, 128], strides = [1, 1]} : vector<8x128xf32> to vector<1x128xf32>
    %438 = vector.extract_strided_slice %355 {offsets = [7, 0], sizes = [1, 128], strides = [1, 1]} : vector<8x128xf32> to vector<1x128xf32>
    %cst_126 = arith.constant dense<0.000000e+00> : vector<128xf32>
    %439 = vector.multi_reduction <add>, %436, %cst_126 [0] : vector<40x128xf32> to vector<128xf32>
    %440 = vector.shape_cast %439 : vector<128xf32> to vector<1x128xf32>
    %441 = arith.mulf %436, %436 : vector<40x128xf32>
    %cst_127 = arith.constant dense<0.000000e+00> : vector<128xf32>
    %442 = vector.multi_reduction <add>, %441, %cst_127 [0] : vector<40x128xf32> to vector<128xf32>
    %443 = vector.shape_cast %442 : vector<128xf32> to vector<1x128xf32>
    %cst_128 = arith.constant 2.500000e-02 : f32
    %444 = vector.broadcast %cst_128 : f32 to vector<1x128xf32>
    %445 = arith.mulf %440, %444 : vector<1x128xf32>
    %cst_129 = arith.constant 2.500000e-02 : f32
    %446 = vector.broadcast %cst_129 : f32 to vector<1x128xf32>
    %447 = arith.mulf %443, %446 : vector<1x128xf32>
    %448 = arith.mulf %445, %445 : vector<1x128xf32>
    %449 = arith.subf %447, %448 : vector<1x128xf32>
    %cst_130 = arith.constant 0.000000e+00 : f32
    %450 = vector.broadcast %cst_130 : f32 to vector<1x128xf32>
    %451 = arith.maximumf %449, %450 : vector<1x128xf32>
    %cst_131 = arith.constant 9.99999974E-6 : f32
    %452 = vector.broadcast %cst_131 : f32 to vector<1x128xf32>
    %453 = arith.addf %451, %452 : vector<1x128xf32>
    %454 = math.rsqrt %453 : vector<1x128xf32>
    %455 = arith.mulf %454, %437 : vector<1x128xf32>
    %456 = vector.broadcast %455 : vector<1x128xf32> to vector<40x128xf32>
    %457 = arith.mulf %436, %456 : vector<40x128xf32>
    %458 = arith.mulf %445, %455 : vector<1x128xf32>
    %459 = arith.subf %438, %458 : vector<1x128xf32>
    %460 = vector.broadcast %459 : vector<1x128xf32> to vector<40x128xf32>
    %461 = arith.addf %457, %460 : vector<40x128xf32>
    %462 = arith.addf %353, %461 : vector<40x128xf32>
    %c2_132 = arith.constant 2 : index
    %c0_133 = arith.constant 0 : index
    %463 = vector.load %arg2[%c2_132, %c0_133] : memref<4x128xf32, #tpu.memory_space<vmem>>, vector<1x128xf32>
    %c3_134 = arith.constant 3 : index
    %c0_135 = arith.constant 0 : index
    %464 = vector.load %arg2[%c3_134, %c0_135] : memref<4x128xf32, #tpu.memory_space<vmem>>, vector<1x128xf32>
    %cst_136 = arith.constant dense<0.000000e+00> : vector<128xf32>
    %465 = vector.multi_reduction <add>, %462, %cst_136 [0] : vector<40x128xf32> to vector<128xf32>
    %466 = vector.shape_cast %465 : vector<128xf32> to vector<1x128xf32>
    %467 = arith.mulf %462, %462 : vector<40x128xf32>
    %cst_137 = arith.constant dense<0.000000e+00> : vector<128xf32>
    %468 = vector.multi_reduction <add>, %467, %cst_137 [0] : vector<40x128xf32> to vector<128xf32>
    %469 = vector.shape_cast %468 : vector<128xf32> to vector<1x128xf32>
    %cst_138 = arith.constant 2.500000e-02 : f32
    %470 = vector.broadcast %cst_138 : f32 to vector<1x128xf32>
    %471 = arith.mulf %466, %470 : vector<1x128xf32>
    %cst_139 = arith.constant 2.500000e-02 : f32
    %472 = vector.broadcast %cst_139 : f32 to vector<1x128xf32>
    %473 = arith.mulf %469, %472 : vector<1x128xf32>
    %474 = arith.mulf %471, %471 : vector<1x128xf32>
    %475 = arith.subf %473, %474 : vector<1x128xf32>
    %cst_140 = arith.constant 0.000000e+00 : f32
    %476 = vector.broadcast %cst_140 : f32 to vector<1x128xf32>
    %477 = arith.maximumf %475, %476 : vector<1x128xf32>
    %cst_141 = arith.constant 9.99999974E-6 : f32
    %478 = vector.broadcast %cst_141 : f32 to vector<1x128xf32>
    %479 = arith.addf %477, %478 : vector<1x128xf32>
    %480 = math.rsqrt %479 : vector<1x128xf32>
    %481 = arith.mulf %480, %463 : vector<1x128xf32>
    %482 = vector.broadcast %481 : vector<1x128xf32> to vector<40x128xf32>
    %483 = arith.mulf %462, %482 : vector<40x128xf32>
    %484 = arith.mulf %471, %481 : vector<1x128xf32>
    %485 = arith.subf %464, %484 : vector<1x128xf32>
    %486 = vector.broadcast %485 : vector<1x128xf32> to vector<40x128xf32>
    %487 = arith.addf %483, %486 : vector<40x128xf32>
    %488 = arith.truncf %487 : vector<40x128xf32> to vector<40x128xbf16>
    %c0_142 = arith.constant 0 : index
    %c0_143 = arith.constant 0 : index
    %489 = vector.load %arg6[%c0_142, %c0_143] : memref<128x128xbf16, #tpu.memory_space<vmem>>, vector<128x128xbf16>
    %cst_144 = arith.constant dense<0.000000e+00> : vector<40x128xf32>
    %490 = tpu.matmul %488, %489, %cst_144 {dimension_numbers = #tpu.dot_dimension_numbers<[1], [0], [0], [1], [0, 0, 1, 1], [], []>} : vector<40x128xbf16>, vector<128x128xbf16>, vector<40x128xf32> -> vector<40x128xf32>
    %c0_145 = arith.constant 0 : index
    %c0_146 = arith.constant 0 : index
    %491 = vector.load %arg7[%c0_145, %c0_146] : memref<3x128xf32, #tpu.memory_space<vmem>>, vector<1x128xf32>
    %492 = vector.broadcast %491 : vector<1x128xf32> to vector<40x128xf32>
    %493 = arith.addf %490, %492 : vector<40x128xf32>
    %494 = tpu.iota {dimensions = array<i32: 1>} : vector<40x128xi32>
    %c8_i32 = arith.constant 8 : i32
    %495 = vector.broadcast %c8_i32 : i32 to vector<40x128xi32>
    %496 = arith.cmpi slt, %494, %495 : vector<40x128xi32>
    %cst_147 = arith.constant 0.000000e+00 : f32
    %497 = vector.broadcast %cst_147 : f32 to vector<40x128xf32>
    %498 = arith.select %496, %493, %497 : vector<40x128xi1>, vector<40x128xf32>
    %cst_148 = arith.constant dense<0.000000e+00> : vector<40xf32>
    %499 = vector.multi_reduction <add>, %498, %cst_148 [1] : vector<40x128xf32> to vector<40xf32>
    %500 = vector.shape_cast %499 : vector<40xf32> to vector<40x1xf32>
    %cst_149 = arith.constant 1.250000e-01 : f32
    %501 = vector.broadcast %cst_149 : f32 to vector<40x1xf32>
    %502 = arith.mulf %500, %501 : vector<40x1xf32>
    %c8_i32_150 = arith.constant 8 : i32
    %503 = vector.broadcast %c8_i32_150 : i32 to vector<40x128xi32>
    %504 = arith.cmpi slt, %494, %503 : vector<40x128xi32>
    %505 = vector.broadcast %502 : vector<40x1xf32> to vector<40x128xf32>
    %506 = arith.subf %498, %505 : vector<40x128xf32>
    %cst_151 = arith.constant 0.000000e+00 : f32
    %507 = vector.broadcast %cst_151 : f32 to vector<40x128xf32>
    %508 = arith.select %504, %506, %507 : vector<40x128xi1>, vector<40x128xf32>
    %509 = arith.mulf %508, %508 : vector<40x128xf32>
    %cst_152 = arith.constant dense<0.000000e+00> : vector<40xf32>
    %510 = vector.multi_reduction <add>, %509, %cst_152 [1] : vector<40x128xf32> to vector<40xf32>
    %511 = vector.shape_cast %510 : vector<40xf32> to vector<40x1xf32>
    %cst_153 = arith.constant 1.250000e-01 : f32
    %512 = vector.broadcast %cst_153 : f32 to vector<40x1xf32>
    %513 = arith.mulf %511, %512 : vector<40x1xf32>
    %cst_154 = arith.constant 9.99999974E-6 : f32
    %514 = vector.broadcast %cst_154 : f32 to vector<40x1xf32>
    %515 = arith.addf %513, %514 : vector<40x1xf32>
    %516 = math.rsqrt %515 : vector<40x1xf32>
    %517 = vector.broadcast %516 : vector<40x1xf32> to vector<40x128xf32>
    %518 = arith.mulf %508, %517 : vector<40x128xf32>
    %c1_155 = arith.constant 1 : index
    %c0_156 = arith.constant 0 : index
    %519 = vector.load %arg7[%c1_155, %c0_156] : memref<3x128xf32, #tpu.memory_space<vmem>>, vector<1x128xf32>
    %520 = vector.broadcast %519 : vector<1x128xf32> to vector<40x128xf32>
    %521 = arith.mulf %518, %520 : vector<40x128xf32>
    %c2_157 = arith.constant 2 : index
    %c0_158 = arith.constant 0 : index
    %522 = vector.load %arg7[%c2_157, %c0_158] : memref<3x128xf32, #tpu.memory_space<vmem>>, vector<1x128xf32>
    %523 = vector.broadcast %522 : vector<1x128xf32> to vector<40x128xf32>
    %524 = arith.addf %521, %523 : vector<40x128xf32>
    %c0_159 = arith.constant 0 : index
    %c0_160 = arith.constant 0 : index
    %c0_161 = arith.constant 0 : index
    %525 = vector.load %arg8[%c0_159, %c0_160, %c0_161] : memref<1x40x128xf32, #tpu.memory_space<vmem>>, vector<1x40x128xf32>
    %526 = vector.shape_cast %525 : vector<1x40x128xf32> to vector<40x128xf32>
    %527 = vector.shape_cast %524 : vector<40x128xf32> to vector<1x40x128xf32>
    tpu.vector_store %arg8[%c0_159, %c0_160, %c0_161], %527 {strides = array<i32>} : memref<1x40x128xf32, #tpu.memory_space<vmem>>, vector<1x40x128xf32>,
    return
  }
  func.func @transform_0(%arg0: i32) -> (i32, i32, i32) {
    %c0_i32 = arith.constant 0 : i32
    %c0_i32_0 = arith.constant 0 : i32
    %c0_i32_1 = arith.constant 0 : i32
    return %arg0, %c0_i32, %c0_i32_0 : i32, i32, i32
  }
  func.func @transform_1(%arg0: i32) -> (i32, i32) {
    %c0_i32 = arith.constant 0 : i32
    %c0_i32_0 = arith.constant 0 : i32
    %c0_i32_1 = arith.constant 0 : i32
    return %c0_i32, %c0_i32_0 : i32, i32
  }
  func.func @transform_2(%arg0: i32) -> (i32, i32, i32) {
    %c0_i32 = arith.constant 0 : i32
    %c0_i32_0 = arith.constant 0 : i32
    %c0_i32_1 = arith.constant 0 : i32
    %c0_i32_2 = arith.constant 0 : i32
    return %c0_i32, %c0_i32_0, %c0_i32_1 : i32, i32, i32
  }
  func.func @transform_3(%arg0: i32) -> (i32, i32, i32) {
    %c0_i32 = arith.constant 0 : i32
    %c0_i32_0 = arith.constant 0 : i32
    %c0_i32_1 = arith.constant 0 : i32
    %c0_i32_2 = arith.constant 0 : i32
    return %c0_i32, %c0_i32_0, %c0_i32_1 : i32, i32, i32
  }
  func.func @transform_4(%arg0: i32) -> (i32, i32, i32) {
    %c0_i32 = arith.constant 0 : i32
    %c0_i32_0 = arith.constant 0 : i32
    %c0_i32_1 = arith.constant 0 : i32
    %c0_i32_2 = arith.constant 0 : i32
    return %c0_i32, %c0_i32_0, %c0_i32_1 : i32, i32, i32
  }
  func.func @transform_5(%arg0: i32) -> (i32, i32) {
    %c0_i32 = arith.constant 0 : i32
    %c0_i32_0 = arith.constant 0 : i32
    %c0_i32_1 = arith.constant 0 : i32
    return %c0_i32, %c0_i32_0 : i32, i32
  }
  func.func @transform_6(%arg0: i32) -> (i32, i32) {
    %c0_i32 = arith.constant 0 : i32
    %c0_i32_0 = arith.constant 0 : i32
    %c0_i32_1 = arith.constant 0 : i32
    return %c0_i32, %c0_i32_0 : i32, i32
  }
  func.func @transform_7(%arg0: i32) -> (i32, i32, i32) {
    %c0_i32 = arith.constant 0 : i32
    %c0_i32_0 = arith.constant 0 : i32
    %c0_i32_1 = arith.constant 0 : i32
    return %arg0, %c0_i32, %c0_i32_0 : i32, i32, i32
  }
}

</mosaic_0001>

<bundles_post_ra>
// kernel: whisper_cnn_forward.2
= control target key start
LH: loop header
LB: loop body
LE: loop exit
PB: predicated region body
PF: predicated region fallthrough
CT: control target
= control target key end

     0   :  { %8 = vsyncpa [#allocation3], 0  ;;  %s1115_s0 = inlined_call_operand.hbm [shape: f32[2,8,8], index: 0, kind: input, shape index: {}]   ;;  %s1116_s1 = inlined_call_operand.hbm [shape: bf16[24,640], index: 1, kind: input, shape index: {}]   ;;  %s1117_s2 = inlined_call_operand.hbm [shape: f32[1,640], index: 2, kind: input, shape index: {}]   ;;  %s1118_s3 = inlined_call_operand.hbm [shape: f32[2,8,640], index: 3, kind: output, shape index: {}]  }
   0x1   :  { %10 = vsyncpa [#allocation3 + $0x1], 0 }
   0x2   :  { %11 = vsyncpa [#allocation6], 0 }
   0x3   :  { %12 = vsyncpa [#allocation4], 0 }
   0x4   :  { %14 = vsyncpa [#allocation4 + $0x1], 0  ;;  %s879_s12 = smov 0   ;;  %s881_s13 = smov 0  }
   0x5   :  { %s883_s14 = smov 0   ;;  %s885_s15 = smov 0  }
   0x6 LB: > { %s900_s16 = sadd.s32 4294967295, %s846_s15   ;;  %s562_s17 = sadd.s32 4294967294, %s846_s15   ;;  %s846_s15 = sphi %s885_s15, %s1138_s15   ;;  %s842_s14 = sphi %s883_s14, %s1137_s14   ;;  %s838_s13 = sphi %s881_s13, %s1136_s13   ;;  %s834_s12 = sphi %s879_s12, %s1135_s12  }
   0x7   : > { %p40_p0 = scmp.ne.s32.totalorder %s838_s13, %s834_s12  ;;  %p1119_p1 = scmp.eq.s32.totalorder %s900_s16, 0 }
   0x8   : > { %p112_p3 = scmp.eq.s32.totalorder %s562_s17, 1  ;;  %p563_p5 = scmp.ge.s32.totalorder %s846_s15, 1 }
   0x9   : > { %p909_p4 = por %p1119_p1, %p40_p0  ;;  %p119_p7 = scmp.lt.s32.totalorder %s846_s15, 3 }
   0xa   : > { %p914_p6 = por %p112_p3, %p40_p0  ;;  %s848_s21 = smov [#allocation5]  }
   0xb   : > { %s1122_s18 = scalar_select %p909_p4, 1, 0 }
   0xc   : > { %s1123_s19 = scalar_select %p914_p6, 1, 0 }
   0xd   : > { %p919_p8 = pnand %p563_p5, %p119_p7  ;;  %s131_s22 = sshll.u32 %s848_s21, 4  ;;  %s923_s22 = int_to_ptr.vmem [resolvable:$true] %s131_s22 }
   0xe   : > { %s849_s24 = smov [#allocation7]   ;;  %s690_s28 = scalar_lea.hbm %s1116_s1, 960 }
   0xf   : > { %p616_p9 = pneg %p919_p8  ;;  %s145_s25 = sshll.u32 %s849_s24, 4  ;;  %s934_s25 = int_to_ptr.vmem [resolvable:$true] %s145_s25 }
  0x10   : > { %p691_p12 = scmp.ne.s32.totalorder %s1116_s1, %s690_s28  ;;  %p697_p5 = scmp.lt.u32.totalorder %s690_s28, %s1116_s1 }
  0x11   : > { %p930_p11 = pnand %p616_p9, %p1119_p1 }
  0x13   : > { %p692_p13 = pneg %p930_p11 }
  0x15   : > { %p693_p0 = pnand %p692_p13, %p691_p12 }
  0x17   : > { %p694_p3 = pneg %p693_p0 }
  0x19   : > { %p699_p7 = pnand %p697_p5, %p694_p3 }
  0x1b   : > { %702 = shalt.err (!%p699_p7)
}
  0x1c   : > { %s703_s6 = scalar_lea.vmem %s923_s22, 960  ;;  %p711_p2 = scmp.lt.s32.totalorder %s923_s22, %s923_s22 }
  0x1d   : > { %p704_p9 = scmp.ne.s32.totalorder %s923_s22, %s703_s6  ;;  %p712_p12 = scmp.lt.s32.totalorder %s703_s6, %s703_s6 }
  0x1f   : > { %p706_p10 = pnand %p704_p9, %p692_p13  ;;  %p713_p0 = por %p712_p12, %p711_p2 }
  0x21   : > { %p707_p1 = pneg %p706_p10 }
  0x23   : > { %p714_p6 = pnand %p713_p0, %p707_p1 }
  0x25   : > { %717 = shalt.err (!%p714_p6)
}
  0x26   : > { %s850_s7 = smov 320   ;;  %s851_s8 = smov 20  }
  0x27   : > { %619 = dma.hbm_to_vmem [thread:$0]  (!%p930_p11), %s1116_s1, 960, %s923_s22, [#allocation6], %s850_s7, %s850_s7, %s851_s8  }
  0x28   : > { %s718_s21 = scalar_lea.hbm %s1117_s2, 80 }
  0x29   : > { %p719_p2 = scmp.ne.s32.totalorder %s1117_s2, %s718_s21  ;;  %p725_p10 = scmp.lt.u32.totalorder %s718_s21, %s1117_s2 }
  0x2b   : > { %p721_p1 = pnand %p719_p2, %p692_p13 }
  0x2d   : > { %p722_p6 = pneg %p721_p1 }
  0x2f   : > { %p727_p3 = pnand %p725_p10, %p722_p6 }
  0x31   : > { %730 = shalt.err (!%p727_p3)
}
  0x32   : > { %s731_s22 = scalar_lea.vmem %s934_s25, 80  ;;  %s738_s29 = scalar_lea.vmem %s934_s25, 96 }
  0x33   : > { %p732_p5 = scmp.ne.s32.totalorder %s934_s25, %s731_s22  ;;  %p739_p12 = scmp.lt.s32.totalorder %s934_s25, %s934_s25 }
  0x34   : > { %p740_p0 = scmp.lt.s32.totalorder %s738_s29, %s731_s22 }
  0x35   : > { %p734_p7 = pnand %p732_p5, %p692_p13 }
  0x36   : > { %p741_p2 = por %p740_p0, %p739_p12 }
  0x37   : > { %p735_p9 = pneg %p734_p7 }
  0x39   : > { %p742_p1 = pnand %p741_p2, %p735_p9 }
  0x3b   : > { %745 = shalt.err (!%p742_p1)
}
  0x3c   : > { %622 = dma.hbm_to_vmem [thread:$0]  (!%p930_p11), %s1117_s2, 80, %s934_s25, [#allocation6]  }
  0x3d   : > { %s990_s5 = sadd.s32 1, %s846_s15   ;;  %s27_s23 = sadd.s32 1, %s842_s14 }
  0x3e   : > { %s24_s6 = ssub.s32 %s846_s15, %s990_s5  ;;  %p34_p13 = scmp.ne.s32.totalorder %s842_s14, %s838_s13 }
  0x3f   : > { %p25_p6 = scmp.eq.s32.totalorder %s24_s6, 0  ;;  %p35_p10 = scmp.eq.s32.totalorder %s846_s15, 0 }
  0x40   : > { %p1126_p3 = scmp.eq.s32.totalorder %s900_s16, 1  ;;  %p633_p7 = scmp.lt.s32.totalorder %s846_s15, 2 }
  0x41   : > { %s1006_s8 = scalar_select %p25_p6, %s842_s14, %s27_s23  }
  0x42   : > { %p1000_p5 = por %p1126_p3, %p34_p13  ;;  %p36_p9 = por %p35_p10, %p34_p13 }
  0x43   : > { %s156_s9 = sand.u32 1, %s842_s14   ;;  %s568_s25 = sshll.u32 %s846_s15, 7 }
  0x44   : > { %s1127_s7 = scalar_select %p1000_p5, 1, 0 }
  0x45   : > { %s567_s10 = sshll.u32 %s156_s9, 3  ;;  %s1013_s21 = scalar_lea.hbm %s1115_s0, %s568_s25 }
  0x46   : > { %s160_s24 = scalar_lea.vmem [#allocation2], %s567_s10  ;;  %p1017_p11 = pnand %p633_p7, %p36_p9 }
  0x47   : > { %s167_s26 = sshll.u32 %s160_s24, 4  ;;  %s157_s28 = scalar_lea.sflag [#allocation3], %s156_s9  ;;  %s1015_s26 = int_to_ptr.vmem [resolvable:$true] %s167_s26 }
  0x48   : > { %s746_s22 = scalar_lea.hbm %s1013_s21, 128  ;;  %p748_p0 = pneg %p1017_p11 }
  0x49   : > { %p747_p12 = scmp.ne.s32.totalorder %s1013_s21, %s746_s22  ;;  %s751_s4 = scalar_lea.hbm %s1115_s0, 256 }
  0x4a   : > { %p752_p13 = scmp.lt.u32.totalorder %s1013_s21, %s1115_s0  ;;  %p753_p6 = scmp.lt.u32.totalorder %s751_s4, %s746_s22 }
  0x4b   : > { %p749_p2 = pnand %p748_p0, %p747_p12  ;;  %p755_p3 = scmp.lt.u32.totalorder %s746_s22, %s1013_s21 }
  0x4c   : > { %p754_p10 = por %p753_p6, %p752_p13 }
  0x4d   : > { %p750_p1 = pneg %p749_p2 }
  0x4e   : > { %p756_p7 = por %p755_p3, %p754_p10 }
  0x50   : > { %p757_p9 = pnand %p756_p7, %p750_p1 }
  0x52   : > { %760 = shalt.err (!%p757_p9)
}
  0x53   : > { %s761_s9 = scalar_lea.vmem %s1015_s26, 128  ;;  %s852_s10 = smov [#allocation2]  }
  0x54   : > { %p762_p12 = scmp.ne.s32.totalorder %s1015_s26, %s761_s9  ;;  %s766_s25 = sshll.u32 %s852_s10, 4  ;;  %s767_s25 = int_to_ptr.vmem [resolvable:$false] %s766_s25 }
  0x55   : > { %s768_s11 = scalar_lea.vmem %s767_s25, 256  ;;  %p769_p4 = scmp.lt.s32.totalorder %s1015_s26, %s767_s25 }
  0x56   : > { %p764_p2 = pnand %p762_p12, %p748_p0  ;;  %p770_p13 = scmp.lt.s32.totalorder %s768_s11, %s761_s9 }
  0x58   : > { %p765_p5 = pneg %p764_p2  ;;  %p771_p6 = por %p770_p13, %p769_p4 }
  0x5a   : > { %p772_p10 = pnand %p771_p6, %p765_p5 }
  0x5c   : > { %775 = shalt.err (!%p772_p10)
}
  0x5d   : > { %626 = dma.hbm_to_vmem [thread:$0]  (!%p1017_p11), %s1013_s21, 128, %s1015_s26, %s157_s28  }
  0x5e   : > { %176 = sbr.rel (%p919_p8) target bundleno = 465 (0x1d1), region = 32  ;;  %s1049_s17 = sand.u32 (!%p919_p8), 1, %s838_s13  }
  0x5f   : > { %s570_s24 = sshll.u32 (!%p919_p8), %s1049_s17, 3  ;;  %s179_s22 = scalar_lea.sflag (!%p919_p8), [#allocation3], %s1049_s17 }
  0x60   : > { %s182_s29 = scalar_lea.vmem (!%p919_p8), [#allocation2], %s570_s24  ;;  %p1129_p4 = scmp.ne.s32.totalorder (!%p919_p8), %s1122_s18, 0 }
  0x65   : > { %821 = dma.done.wait (%p1129_p4), %s179_s22, 128  }
  0x66   : > { %823 = vsyncadd (%p1129_p4), %s179_s22, 4294967168  ;;  %p1130_p5 = scmp.eq.s32.totalorder %s900_s16, 0 }
  0x68   : > { %825 = dma.done.wait (%p1130_p5), [#allocation6], 1040   ;;  %p1131_p11 = pmov %p1130_p5 }
  0x69   : > { %v853_v0 = vmov 0   ;;  %v214_v1 = vld [vmem:[%s182_s29] sm:$0xff]  ;;  %vm222_vm0 = vcmask 1046528   ;;  %s854_s20 = smov 8   ;;  %v681_v5 = vld [vmem:[#allocation5 + $0xc] ss:$20 sps:$4 sm:$0xff]   ;;  %v247_v27 = vlaneseq }
  0x6a   : > { %827 = vsyncadd (%p1131_p11), [#allocation6], 4294966256  ;;  %363 = vmatprep.mubr.bf16.mxu0 %v853_v0  ;;  %404 = vmatprep.mubr.bf16.mxu1 %v853_v0  ;;  %v220_v2 = vrot.slane %v214_v1, 1  ;;  %v678_v3 = vld [vmem:[#allocation5 + $0x4] ss:$20 sps:$4 sm:$0xff]   ;;  %v242_v8 = vld [vmem:[#allocation5 + $0x28] sm:$0xff] }
  0x6b   : > { %224 = vrot.lane.b32.xlu0 %v214_v1, %s854_s20  ;;  %v680_v4 = vld [vmem:[#allocation5] ss:$20 sps:$4 sm:$0xff]   ;;  %331 = vmatprep.subr.bf16.mxu0 %v678_v3  ;;  %v683_v7 = vld [vmem:[#allocation5 + $0x8] ss:$20 sps:$4 sm:$0xff]   ;;  %vm315_vm1 = vcmask 1043456   ;;  %v579_v10 = vcombine.high %v242_v8, %v242_v8  ;;  %v578_v11 = vcombine.low %v242_v8, %v242_v8  ;;  %s855_s18 = smov 16  }
  0x6c   : > { %v223_v6 = vsel %vm222_vm0, %v220_v2, 0.0  ;;  %v243_v9 = vld [vmem:[#allocation5 + $0x30] sm:$0xff]  ;;  %332 = vmatpush1.bf16.msra.mxu0 %v680_v4  ;;  %372 = vmatprep.subr.bf16.mxu1 %v681_v5  ;;  %v856_v16 = vmov 0.0   ;;  %v216_v17 = vrot.slane %v214_v1, 7  ;;  %vm218_vm2 = vcmask 1040384   ;;  %s602_s21 = smul.u32 40, %s1049_s17 }
  0x6d   : > { %v581_v12 = vcombine.high %v243_v9, %v243_v9  ;;  %373 = vmatpush1.bf16.msra.mxu1 %v683_v7  ;;  %v580_v13 = vcombine.low %v243_v9, %v243_v9  ;;  %583 = vmatprep.subr.msk.bf16.mxu0 %vm315_vm1, %v579_v10  ;;  %v317_v14 = vsel %vm315_vm1, %v578_v11, 0  ;;  %vm231_vm3 = vcmask 64512   ;;  %v688_v23 = vld [vmem:[#allocation5 + $0x10] ss:$20 sps:$4 sm:$0xff]   ;;  %v689_v25 = vld [vmem:[#allocation5 + $0x38] ss:$0 sps:$4 sm:$0xff]  }
  0x6e   : > { %v219_v19 = vsel %vm218_vm2, 0.0, %v216_v17  ;;  %vm233_vm4 = vcmask 130048   ;;  %vm311_vm5 = vcmask 195584   ;;  %vm857_vm6 = vmmov 0   ;;  %v245_v31 = vld [vmem:[#allocation7] sm:$0x1f] }
  0x6f   : > { %228 = vrot.lane.b32.xlu0 %v223_v6, %s855_s18  ;;  %585 = vmatprep.subr.msk.bf16.mxu1 %vm315_vm1, %v581_v12  ;;  %v323_v15 = vsel %vm315_vm1, %v580_v13, 0  ;;  %v329_v26 = vsel %vm315_vm1, %v689_v25, 0  ;;  %v248_v28 = vshrl.u32 %v247_v27, 7  ;;  %s212_s26 = scalar_lea.vmem [#allocation8], %s602_s21  ;;  %s603_s27 = smul.u32 640, %s900_s16 }
  0x70   : > { %334 = vmatpush1.bf16.msra.mxu0 %v317_v14  ;;  %s473_s28 = sshll.u32 %s212_s26, 4  ;;  %s459_s6 = scalar_lea.sflag [#allocation4], %s1049_s17  ;;  %s1073_s28 = int_to_ptr.vmem [resolvable:$true] %s473_s28 }
  0x71   : > { %375 = vmatpush1.bf16.msra.mxu1 %v323_v15  ;;  %594 = vmatprep.subr.bf16.mxu0 %v856_v16  ;;  %v249_v29 = vsub.s32 0, %v248_v28  ;;  %v257_v30 = vsub.s32 2, %v248_v28  ;;  %v253_v32 = vsub.s32 1, %v248_v28  ;;  %v261_v33 = vsub.s32 3, %v248_v28  ;;  %s1071_s23 = scalar_lea.hbm %s1118_s3, %s603_s27  ;;  %s776_s9 = scalar_lea.vmem %s1073_s28, 640 }
  0x72   : > { %v265_v44 = vsub.s32 4, %v248_v28  ;;  %p777_p8 = scmp.ne.s32.totalorder %s1073_s28, %s776_s9  ;;  %p1132_p0 = scmp.ne.s32.totalorder %s1127_s7, 0 }
  0x73   : > { %v250_v34 = vrot.slane %v245_v31, %v249_v29  ;;  %v258_v35 = vrot.slane %v245_v31, %v257_v30  ;;  %v254_v36 = vrot.slane %v245_v31, %v253_v32  ;;  %v262_v37 = vrot.slane %v245_v31, %v261_v33  ;;  %s858_s16 = smov [#allocation8]  }
  0x74   : > { %v266_v51 = vrot.slane %v245_v31, %v265_v44  ;;  %p778_p1 = pnand %p777_p8, %p1132_p0  ;;  %s780_s10 = sshll.u32 %s858_s16, 4  ;;  %s781_s10 = int_to_ptr.vmem [resolvable:$false] %s780_s10 }
  0x75   : > { %s782_s25 = scalar_lea.vmem %s781_s10, 1280  ;;  %p783_p7 = scmp.lt.s32.totalorder %s1073_s28, %s781_s10 }
  0x76   : > { %p779_p3 = pneg %p778_p1  ;;  %p784_p9 = scmp.lt.s32.totalorder %s782_s25, %s776_s9 }
  0x78   : > { %p785_p12 = por %p784_p9, %p783_p7 }
  0x7a   : > { %p786_p2 = pnand %p785_p12, %p779_p3 }
  0xdd   : > { %v225_v18 = vpop.permute.xlu0 %224 }
  0xde   : > { %v232_v20 = vsel %vm231_vm3, %v219_v19, %v225_v18 }
  0xe1   : > { %v229_v21 = vpop.permute.xlu0 %228 }
  0xe2   : > { %v234_v22 = vsel %vm233_vm4, %v232_v20, %v229_v21 }
  0xe3   : > { %v235_v24 = vpack.c.bf16 %v234_v22, %v234_v22 }
  0xe5   : > { %584 = vmatmul.mubr.msk.bf16.vlgmr.msra.gmra.mrb[0].mxu0 %vm311_vm5, %v235_v24  ;;  %586 = vmatmul.mubr.msk.bf16.vlgmr.msra.gmra.mrb[0].mxu1 %vm311_vm5, %v235_v24 }
  0xe6   : > { %595 = vmatpush3.bf16.msra.mxu0 %v688_v23  ;;  %598 = vmatprep.mubr.msk.bf16.mxu0 %vm857_vm6, %v856_v16 }
  0xe7   : > { %596 = vmatprep.subr.bf16.mxu0 %v856_v16 }
  0xea   : > { %597 = vmatpush3.bf16.msra.mxu0 %v329_v26 }
  0xed   : > { %599 = vmatmul.mubr.msk.bf16.vlgmr.msra.gmra.mrb[4].mxu0 %vm311_vm5, %v235_v24 }
 0x1b8   : > { %v365_v38 = vpop.f32.mrb[0].mxu0  ;;  %v406_v39 = vpop.f32.mrb[0].mxu1 }
 0x1b9   : > { %v366_v40 = vadd.f32 %v365_v38, %v250_v34  ;;  %v407_v41 = vadd.f32 %v406_v39, %v258_v35  ;;  %v367_v42 = vpop.f32.mrb[1].mxu0  ;;  %v408_v43 = vpop.f32.mrb[1].mxu1 }
 0x1ba   : > { %v368_v45 = vadd.f32 %v367_v42, %v254_v36  ;;  %v409_v46 = vadd.f32 %v408_v43, %v262_v37  ;;  %v369_v47 = vpop.f32.mrb[2].mxu0  ;;  %v410_v48 = vpop.f32.mrb[2].mxu1 }
 0x1bb   : > { %453 = vst [vmem:[%s212_s26] sm:$0xff] %v366_v40  ;;  %455 = vst [vmem:[%s212_s26 + $0x10] sm:$0xff] %v407_v41  ;;  %v370_v49 = vpop.f32.mrb[3].mxu0  ;;  %v411_v50 = vpop.f32.mrb[3].mxu1 }
 0x1bc   : > { %454 = vst [vmem:[%s212_s26 + $0x8] sm:$0xff] %v368_v45  ;;  %456 = vst [vmem:[%s212_s26 + $0x18] sm:$0xff] %v409_v46 }
 0x1c0   : > { %v447_v52 = vpop.f32.mrb[4].mxu0 }
 0x1c1   : > { %v448_v53 = vadd.f32 %v447_v52, %v266_v51  ;;  %v600_v54 = vpop.f32.mrb[5].mxu0 }
 0x1c2   : > { %v450_v55 = vpop.f32.mrb[6].mxu0 }
 0x1c3   : > { %457 = vst [vmem:[%s212_s26 + $0x20] sm:$0xff] %v448_v53  ;;  %v601_v56 = vpop.f32.mrb[7].mxu0 }
 0x1c4   : > { %789 = shalt.err (!%p786_p2)
}
 0x1c5   : > { %s790_s11 = scalar_lea.hbm %s1071_s23, 640  ;;  %s794_s22 = scalar_lea.hbm %s1118_s3, 1280 }
 0x1c6   : > { %p791_p13 = scmp.ne.s32.totalorder %s1071_s23, %s790_s11  ;;  %p795_p4 = scmp.lt.u32.totalorder %s1071_s23, %s1118_s3 }
 0x1c7   : > { %p796_p5 = scmp.lt.u32.totalorder %s794_s22, %s790_s11  ;;  %p798_p8 = scmp.lt.u32.totalorder %s790_s11, %s1071_s23 }
 0x1c8   : > { %p792_p6 = pnand %p791_p13, %p1132_p0 }
 0x1c9   : > { %p797_p11 = por %p796_p5, %p795_p4 }
 0x1ca   : > { %p793_p10 = pneg %p792_p6 }
 0x1cb   : > { %p799_p1 = por %p798_p8, %p797_p11 }
 0x1cd   : > { %p800_p3 = pnand %p799_p1, %p793_p10 }
 0x1cf   : > { %803 = shalt.err (!%p800_p3)
}
 0x1d0   : > { %614 = dma.vmem_to_hbm [thread:$0]  (%p1132_p0), %s1073_s28, 640, %s1071_s23, %s459_s6  }
 0x1d1 PF: > { %s485_s18 = sand.u32 1, %s834_s12   ;;  %p1133_p7 = scmp.ne.s32.totalorder %s1123_s19, 0 }
 0x1d2   : > { %p1134_p9 = scmp.ge.s32.totalorder %s846_s15, 2  ;;  %s486_s21 = scalar_lea.sflag [#allocation4], %s485_s18 }
 0x1d4   : > { %p628_p12 = pnand %p1134_p9, %p1133_p7 }
 0x1d6   : > { %829 = dma.done.wait (!%p628_p12), %s486_s21, 640  }
 0x1d7   : > { %831 = vsyncadd (!%p628_p12), %s486_s21, 4294966656  ;;  %p17_p2 = scmp.ge.s32.totalorder %s990_s5, 4   ;;  %s1135_s12 = smov %s838_s13 }
 0x1d8   : > { %s1136_s13 = smov %s842_s14  ;;  %s1137_s14 = smov %s1006_s8 }
 0x1d9   : > { %s1138_s15 = smov %s990_s5  ;;  %19 = sbr.rel (!%p17_p2) target bundleno = 6 (0x6), region = 85 }
 0x1e0   :  { %491 = vsyncpa [#allocation3], 1 }
 0x1e1   :  { %493 = vsyncpa [#allocation3 + $0x1], 1 }
 0x1e2   :  { %494 = vsyncpa [#allocation6], 1 }
 0x1e3   :  { %495 = vsyncpa [#allocation4], 1 }
 0x1e4   :  { %497 = vsyncpa [#allocation4 + $0x1], 1 }

// kernel: whisper_cnn_forward.3
= control target key start
LH: loop header
LB: loop body
LE: loop exit
PB: predicated region body
PF: predicated region fallthrough
CT: control target
= control target key end

     0   :  { %s15340_s0 = inlined_call_operand.hbm [shape: f32[2,40,128], index: 0, kind: input, shape index: {}]   ;;  %s15341_s1 = inlined_call_operand.hbm [shape: f32[4,128], index: 1, kind: input, shape index: {}]   ;;  %s15342_s2 = inlined_call_operand.hbm [shape: f32[4,8,128], index: 2, kind: input, shape index: {}]   ;;  %s15343_s3 = inlined_call_operand.hbm [shape: bf16[4,384,128], index: 3, kind: input, shape index: {}]   ;;  %s15344_s4 = inlined_call_operand.hbm [shape: bf16[4,384,128], index: 4, kind: input, shape index: {}]   ;;  %s15345_s5 = inlined_call_operand.hbm [shape: bf16[128,128], index: 5, kind: input, shape index: {}]   ;;  %s15346_s6 = inlined_call_operand.hbm [shape: f32[3,128], index: 6, kind: input, shape index: {}]   ;;  %s15347_s7 = inlined_call_operand.hbm [shape: f32[2,40,128], index: 7, kind: output, shape index: {}]  }
   0x1   :  { %15424 = sst [smem:[#allocation30_spill]] %s15341_s1 }
   0x2   :  { %12 = vsyncpa [#allocation3], 0 }
   0x3   :  { %14 = vsyncpa [#allocation3 + $0x1], 0 }
   0x4   :  { %15 = vsyncpa [#allocation6], 0 }
   0x5   :  { %16 = vsyncpa [#allocation9], 0 }
   0x6   :  { %17 = vsyncpa [#allocation12], 0 }
   0x7   :  { %18 = vsyncpa [#allocation4], 0 }
   0x8   :  { %20 = vsyncpa [#allocation4 + $0x1], 0  ;;  %s10669_s24 = smov 0   ;;  %s10671_s25 = smov 0  }
   0x9   :  { %s10673_s26 = smov 0   ;;  %s10675_s27 = smov 0  }
   0xa LB: > { %s10606_s28 = smov [#allocation5]   ;;  %s10690_s30 = sadd.s32 4294967295, %s10604_s27   ;;  %s10604_s27 = sphi %s10675_s27, %s15649_s27   ;;  %s10600_s26 = sphi %s10673_s26, %s15648_s26   ;;  %s10596_s25 = sphi %s10671_s25, %s15647_s25   ;;  %s10592_s24 = sphi %s10669_s24, %s15646_s24  }
   0xb   : > { %s222_s29 = sshll.u32 %s10606_s28, 4  ;;  %p8559_p0 = scmp.ge.s32.totalorder %s10604_s27, 1  ;;  %s223_s29 = int_to_ptr.vmem [resolvable:$true] %s222_s29 }
   0xc   : > { %p15348_p1 = scmp.eq.s32.totalorder %s10690_s30, 0  ;;  %p209_p2 = scmp.lt.s32.totalorder %s10604_s27, 3 }
   0xd   : > { %s10607_s9 = smov [#allocation8]   ;;  %s10608_s12 = smov [#allocation11]  }
   0xe   : > { %p10695_p3 = pnand %p8559_p0, %p209_p2  ;;  %s245_s10 = sshll.u32 %s10607_s9, 4  ;;  %s10702_s10 = int_to_ptr.vmem [resolvable:$true] %s245_s10 }
   0xf   : > { %s271_s13 = sshll.u32 %s10608_s12, 4  ;;  %s15427_s1 = sld [smem:[#allocation30_spill]]  ;;  %s10710_s13 = int_to_ptr.vmem [resolvable:$true] %s271_s13 }
  0x10   : > { %s15425_s8 = scalar_select %p10695_p3, 1, 0 }
  0x11   : > { %p9828_p5 = pneg %p10695_p3 }
  0x13   : > { %p10706_p6 = pnand %p9828_p5, %p15348_p1 }
  0x15   : > { %s10328_s16 = scalar_lea.hbm %s15427_s1, 64  ;;  %p10720_p8 = pneg %p10706_p6 }
  0x16   : > { %p10329_p7 = scmp.ne.s32.totalorder %s15427_s1, %s10328_s16  ;;  %p10335_p11 = scmp.lt.u32.totalorder %s10328_s16, %s15427_s1 }
  0x18   : > { %p10331_p9 = pnand %p10720_p8, %p10329_p7 }
  0x1a   : > { %p10332_p10 = pneg %p10331_p9 }
  0x1c   : > { %p10337_p12 = pnand %p10335_p11, %p10332_p10 }
  0x1e   : > { %10340 = shalt.err (!%p10337_p12)
}
  0x1f   : > { %s10341_s22 = scalar_lea.vmem %s223_s29, 64  ;;  %p10349_p5 = scmp.lt.s32.totalorder %s223_s29, %s223_s29 }
  0x20   : > { %p10342_p13 = scmp.ne.s32.totalorder %s223_s29, %s10341_s22  ;;  %p10350_p4 = scmp.lt.s32.totalorder %s10341_s22, %s10341_s22 }
  0x22   : > { %p10344_p0 = pnand %p10342_p13, %p10720_p8  ;;  %p10351_p1 = por %p10350_p4, %p10349_p5 }
  0x24   : > { %p10345_p2 = pneg %p10344_p0 }
  0x26   : > { %p10352_p3 = pnand %p10351_p1, %p10345_p2 }
  0x28   : > { %10355 = shalt.err (!%p10352_p3)
}
  0x29   : > { %9831 = dma.hbm_to_vmem [thread:$0]  (!%p10706_p6), %s15427_s1, 64, %s223_s29, [#allocation6]  }
  0x2a   : > { %s10356_s14 = scalar_lea.hbm %s15343_s3, 12288 }
  0x2b   : > { %p10357_p7 = scmp.ne.s32.totalorder %s15343_s3, %s10356_s14  ;;  %p10363_p1 = scmp.lt.u32.totalorder %s10356_s14, %s15343_s3 }
  0x2d   : > { %p10359_p9 = pnand %p10357_p7, %p10720_p8 }
  0x2f   : > { %p10360_p4 = pneg %p10359_p9 }
  0x31   : > { %p10365_p3 = pnand %p10363_p1, %p10360_p4 }
  0x33   : > { %10368 = shalt.err (!%p10365_p3)
}
  0x34   : > { %s10369_s29 = scalar_lea.vmem %s10702_s10, 12288  ;;  %p10377_p13 = scmp.lt.s32.totalorder %s10702_s10, %s10702_s10 }
  0x35   : > { %p10370_p10 = scmp.ne.s32.totalorder %s10702_s10, %s10369_s29  ;;  %p10378_p0 = scmp.lt.s32.totalorder %s10369_s29, %s10369_s29 }
  0x37   : > { %p10372_p11 = pnand %p10370_p10, %p10720_p8  ;;  %p10379_p2 = por %p10378_p0, %p10377_p13 }
  0x39   : > { %p10373_p12 = pneg %p10372_p11 }
  0x3b   : > { %p10380_p5 = pnand %p10379_p2, %p10373_p12 }
  0x3d   : > { %10383 = shalt.err (!%p10380_p5)
}
  0x3e   : > { %s15350_s20 = smov 64   ;;  %s10610_s21 = smov 4  }
  0x3f   : > { %9837 = dma.hbm_to_vmem [thread:$0]  (!%p10706_p6), %s15343_s3, 12288, %s10702_s10, [#allocation9], %s15350_s20, %s15350_s20, %s10610_s21  }
  0x40   : > { %s10384_s12 = scalar_lea.hbm %s15345_s5, 1024 }
  0x41   : > { %p10385_p7 = scmp.ne.s32.totalorder %s15345_s5, %s10384_s12  ;;  %p10391_p1 = scmp.lt.u32.totalorder %s10384_s12, %s15345_s5 }
  0x43   : > { %p10387_p9 = pnand %p10385_p7, %p10720_p8 }
  0x45   : > { %p10388_p4 = pneg %p10387_p9 }
  0x47   : > { %p10393_p3 = pnand %p10391_p1, %p10388_p4 }
  0x49   : > { %10396 = shalt.err (!%p10393_p3)
}
  0x4a   : > { %s10397_s10 = scalar_lea.vmem %s10710_s13, 1024  ;;  %p10405_p13 = scmp.lt.s32.totalorder %s10710_s13, %s10710_s13 }
  0x4b   : > { %p10398_p10 = scmp.ne.s32.totalorder %s10710_s13, %s10397_s10  ;;  %p10406_p0 = scmp.lt.s32.totalorder %s10397_s10, %s10397_s10 }
  0x4d   : > { %p10400_p11 = pnand %p10398_p10, %p10720_p8  ;;  %p10407_p2 = por %p10406_p0, %p10405_p13 }
  0x4f   : > { %p10401_p12 = pneg %p10400_p11 }
  0x51   : > { %p10408_p5 = pnand %p10407_p2, %p10401_p12 }
  0x53   : > { %10411 = shalt.err (!%p10408_p5)
}
  0x54   : > { %9843 = dma.hbm_to_vmem [thread:$0]  (!%p10706_p6), %s15345_s5, 1024, %s10710_s13, [#allocation12], %s15350_s20, %s15350_s20, %s10610_s21  }
  0x55   : > { %s10611_s22 = smov [#allocation7]   ;;  %s10412_s12 = scalar_lea.hbm %s15342_s2, 512 }
  0x56   : > { %s232_s23 = sshll.u32 %s10611_s22, 4  ;;  %p10413_p7 = scmp.ne.s32.totalorder %s15342_s2, %s10412_s12  ;;  %s233_s23 = int_to_ptr.vmem [resolvable:$true] %s232_s23 }
  0x57   : > { %p10419_p1 = scmp.lt.u32.totalorder %s10412_s12, %s15342_s2 }
  0x58   : > { %p10415_p9 = pnand %p10413_p7, %p10720_p8 }
  0x5a   : > { %p10416_p4 = pneg %p10415_p9 }
  0x5c   : > { %p10421_p3 = pnand %p10419_p1, %p10416_p4 }
  0x5e   : > { %10424 = shalt.err (!%p10421_p3)
}
  0x5f   : > { %s10425_s13 = scalar_lea.vmem %s233_s23, 512  ;;  %p10433_p13 = scmp.lt.s32.totalorder %s233_s23, %s233_s23 }
  0x60   : > { %p10426_p10 = scmp.ne.s32.totalorder %s233_s23, %s10425_s13  ;;  %p10434_p0 = scmp.lt.s32.totalorder %s10425_s13, %s10425_s13 }
  0x62   : > { %p10428_p11 = pnand %p10426_p10, %p10720_p8  ;;  %p10435_p2 = por %p10434_p0, %p10433_p13 }
  0x64   : > { %p10429_p12 = pneg %p10428_p11 }
  0x66   : > { %p10436_p5 = pnand %p10435_p2, %p10429_p12 }
  0x68   : > { %10439 = shalt.err (!%p10436_p5)
}
  0x69   : > { %s15351_s10 = smov 128   ;;  %s15352_s18 = smov 8  }
  0x6a   : > { %9834 = dma.hbm_to_vmem [thread:$0]  (!%p10706_p6), %s15342_s2, 512, %s233_s23, [#allocation6], %s15351_s10, %s15351_s10, %s15352_s18  }
  0x6b   : > { %s10614_s28 = smov [#allocation10]   ;;  %s10615_s12 = smov [#allocation13]  }
  0x6c   : > { %s258_s9 = sshll.u32 %s10614_s28, 4  ;;  %s285_s14 = sshll.u32 %s10615_s12, 4  ;;  %s259_s9 = int_to_ptr.vmem [resolvable:$true] %s258_s9  ;;  %s10809_s14 = int_to_ptr.vmem [resolvable:$true] %s285_s14 }
  0x6d   : > { %s10440_s17 = scalar_lea.hbm %s15344_s4, 12288 }
  0x6e   : > { %p10441_p7 = scmp.ne.s32.totalorder %s15344_s4, %s10440_s17  ;;  %p10447_p1 = scmp.lt.u32.totalorder %s10440_s17, %s15344_s4 }
  0x70   : > { %p10443_p9 = pnand %p10441_p7, %p10720_p8 }
  0x72   : > { %p10444_p4 = pneg %p10443_p9 }
  0x74   : > { %p10449_p3 = pnand %p10447_p1, %p10444_p4 }
  0x76   : > { %10452 = shalt.err (!%p10449_p3)
}
  0x77   : > { %s10453_s22 = scalar_lea.vmem %s259_s9, 12288  ;;  %p10461_p13 = scmp.lt.s32.totalorder %s259_s9, %s259_s9 }
  0x78   : > { %p10454_p10 = scmp.ne.s32.totalorder %s259_s9, %s10453_s22  ;;  %p10462_p0 = scmp.lt.s32.totalorder %s10453_s22, %s10453_s22 }
  0x7a   : > { %p10456_p11 = pnand %p10454_p10, %p10720_p8  ;;  %p10463_p2 = por %p10462_p0, %p10461_p13 }
  0x7c   : > { %p10457_p12 = pneg %p10456_p11 }
  0x7e   : > { %p10464_p5 = pnand %p10463_p2, %p10457_p12 }
  0x80   : > { %10467 = shalt.err (!%p10464_p5)
}
  0x81   : > { %s15429_s20 = smov 64   ;;  %s10468_s17 = scalar_lea.hbm %s15346_s6, 64 }
  0x82   : > { %9840 = dma.hbm_to_vmem [thread:$0]  (!%p10706_p6), %s15344_s4, 12288, %s259_s9, [#allocation9], %s15429_s20, %s15429_s20, %s10610_s21  }
  0x83   : > { %p10469_p7 = scmp.ne.s32.totalorder %s15346_s6, %s10468_s17  ;;  %p10475_p1 = scmp.lt.u32.totalorder %s10468_s17, %s15346_s6 }
  0x85   : > { %p10471_p9 = pnand %p10469_p7, %p10720_p8 }
  0x87   : > { %p10472_p4 = pneg %p10471_p9 }
  0x89   : > { %p10477_p3 = pnand %p10475_p1, %p10472_p4 }
  0x8b   : > { %10480 = shalt.err (!%p10477_p3)
}
  0x8c   : > { %s10481_s21 = scalar_lea.vmem %s10809_s14, 64  ;;  %p10489_p13 = scmp.lt.s32.totalorder %s10809_s14, %s10809_s14 }
  0x8d   : > { %p10482_p10 = scmp.ne.s32.totalorder %s10809_s14, %s10481_s21  ;;  %p10490_p0 = scmp.lt.s32.totalorder %s10481_s21, %s10481_s21 }
  0x8f   : > { %p10484_p11 = pnand %p10482_p10, %p10720_p8  ;;  %p10491_p2 = por %p10490_p0, %p10489_p13 }
  0x91   : > { %p10485_p12 = pneg %p10484_p11 }
  0x93   : > { %p10492_p5 = pnand %p10491_p2, %p10485_p12 }
  0x95   : > { %10495 = shalt.err (!%p10492_p5)
}
  0x96   : > { %9846 = dma.hbm_to_vmem [thread:$0]  (!%p10706_p6), %s15346_s6, 64, %s10809_s14, [#allocation12]  }
  0x97   : > { %s8558_s11 = sadd.s32 4294967294, %s10604_s27   ;;  %s10857_s19 = sadd.s32 1, %s10604_s27  }
  0x98   : > { %s30_s28 = ssub.s32 %s10604_s27, %s10857_s19  ;;  %s33_s12 = sadd.s32 1, %s10600_s26 }
  0x99   : > { %p31_p8 = scmp.eq.s32.totalorder %s30_s28, 0  ;;  %p40_p7 = scmp.ne.s32.totalorder %s10600_s26, %s10596_s25 }
  0x9a   : > { %p41_p9 = scmp.eq.s32.totalorder %s10604_s27, 0  ;;  %p46_p4 = scmp.ne.s32.totalorder %s10596_s25, %s10592_s24 }
  0x9b   : > { %s10868_s15 = scalar_select %p31_p8, %s10600_s26, %s33_s12  }
  0x9c   : > { %p42_p1 = por %p41_p9, %p40_p7  ;;  %p15430_p3 = scmp.eq.s32.totalorder %s10690_s30, 0 }
  0x9d   : > { %p196_p6 = scmp.eq.s32.totalorder %s10690_s30, 1  ;;  %p202_p11 = scmp.eq.s32.totalorder %s8558_s11, 1 }
  0x9e   : > { %p10872_p10 = por %p15430_p3, %p46_p4  ;;  %p9861_p12 = scmp.lt.s32.totalorder %s10604_s27, 2 }
  0x9f   : > { %s296_s14 = sand.u32 1, %s10600_s26   ;;  %p10879_p13 = por %p196_p6, %p40_p7 }
  0xa0   : > { %p10883_p0 = por %p202_p11, %p46_p4  ;;  %s9636_s29 = smul.u32 40, %s296_s14 }
  0xa1   : > { %s15432_s17 = scalar_select %p10879_p13, 1, 0 }
  0xa2   : > { %s15433_s13 = scalar_select %p10883_p0, 1, 0 }
  0xa3   : > { %s9637_s23 = smul.u32 640, %s10604_s27  ;;  %p10888_p2 = pnand %p9861_p12, %p42_p1 }
  0xa4   : > { %s300_s11 = scalar_lea.vmem [#allocation2], %s9636_s29  ;;  %s10899_s12 = scalar_lea.sflag [#allocation3], %s296_s14 }
  0xa5   : > { %s10895_s20 = scalar_lea.hbm %s15340_s0, %s9637_s23  ;;  %s307_s28 = sshll.u32 %s300_s11, 4  ;;  %s10897_s28 = int_to_ptr.vmem [resolvable:$true] %s307_s28 }
  0xa6   : > { %s10496_s10 = scalar_lea.hbm %s10895_s20, 640  ;;  %p10498_p8 = pneg %p10888_p2 }
  0xa7   : > { %p10497_p5 = scmp.ne.s32.totalorder %s10895_s20, %s10496_s10  ;;  %s10501_s9 = scalar_lea.hbm %s15340_s0, 1280 }
  0xa8   : > { %p10502_p4 = scmp.lt.u32.totalorder %s10895_s20, %s15340_s0  ;;  %p10503_p1 = scmp.lt.u32.totalorder %s10501_s9, %s10496_s10 }
  0xa9   : > { %p10499_p7 = pnand %p10498_p8, %p10497_p5  ;;  %p10505_p6 = scmp.lt.u32.totalorder %s10496_s10, %s10895_s20 }
  0xaa   : > { %p10504_p3 = por %p10503_p1, %p10502_p4 }
  0xab   : > { %p10500_p9 = pneg %p10499_p7 }
  0xac   : > { %p10506_p11 = por %p10505_p6, %p10504_p3 }
  0xae   : > { %p10507_p12 = pnand %p10506_p11, %p10500_p9 }
  0xb0   : > { %10510 = shalt.err (!%p10507_p12)
}
  0xb1   : > { %s10511_s14 = scalar_lea.vmem %s10897_s28, 640  ;;  %s10616_s29 = smov [#allocation2]  }
  0xb2   : > { %p10512_p5 = scmp.ne.s32.totalorder %s10897_s28, %s10511_s14  ;;  %s10516_s11 = sshll.u32 %s10616_s29, 4  ;;  %s10517_s11 = int_to_ptr.vmem [resolvable:$false] %s10516_s11 }
  0xb3   : > { %s10518_s1 = scalar_lea.vmem %s10517_s11, 1280  ;;  %p10519_p13 = scmp.lt.s32.totalorder %s10897_s28, %s10517_s11 }
  0xb4   : > { %p10514_p7 = pnand %p10512_p5, %p10498_p8  ;;  %p10520_p4 = scmp.lt.s32.totalorder %s10518_s1, %s10511_s14 }
  0xb6   : > { %p10515_p0 = pneg %p10514_p7  ;;  %p10521_p1 = por %p10520_p4, %p10519_p13 }
  0xb8   : > { %p10522_p3 = pnand %p10521_p1, %p10515_p0 }
  0xba   : > { %10525 = shalt.err (!%p10522_p3)
}
  0xbb   : > { %s15435_s10 = smov 8   ;;  %s15436_s18 = smov 128  }
  0xbc   : > { %9850 = dma.hbm_to_vmem [thread:$0]  (!%p10888_p2), %s10895_s20, 640, %s10897_s28, %s10899_s12, %s15436_s18, %s15436_s18, %s15435_s10  }
  0xbd   : > { %p15437_p8 = scmp.ne.s32.totalorder %s15425_s8, 0 }
  0xbf   : > { %319 = sbr.rel (%p15437_p8) target bundleno = 4466 (0x1172), region = 48 }
  0xc6   : > { %s10933_s23 = sand.u32 1, %s10596_s25  }
  0xc7   : > { %s9638_s21 = smul.u32 40, %s10933_s23  ;;  %s322_s9 = scalar_lea.sflag [#allocation3], %s10933_s23 }
  0xc9   : > { %s10939_s22 = scalar_lea.vmem [#allocation2], %s9638_s21 }
  0xca   : > { %10571 = dma.done.wait (%p10872_p10), %s322_s9, 640  }
  0xcb   : > { %10573 = vsyncadd (%p10872_p10), %s322_s9, 4294966656  ;;  %p15438_p13 = scmp.eq.s32.totalorder %s10690_s30, 0 }
  0xcd   : > { %10575 = dma.done.wait (%p15438_p13), [#allocation6], 576   ;;  %p15439_p0 = pmov %p15438_p13 }
  0xcf   : > { %10577 = vsyncadd (%p15439_p0), [#allocation6], 4294966720  ;;  %p15440_p2 = pmov %p15439_p0 }
  0xd0   : > { %p15441_p9 = pmov %p15439_p0 }
  0xd1   : > { %10579 = dma.done.wait (%p15440_p2), [#allocation9], 24576  }
  0xd2   : > { %10581 = vsyncadd (%p15441_p9), [#allocation9], 4294942720  ;;  %p15442_p6 = pmov %p15439_p0 }
  0xd3   : > { %p15443_p11 = pmov %p15439_p0 }
  0xd4   : > { %10583 = dma.done.wait (%p15442_p6), [#allocation12], 1088  }
  0xd5   : > { %10585 = vsyncadd (%p15443_p11), [#allocation12], 4294966208  ;;  %v15355_v0 = vmov 0.0   ;;  %v9922_v1 = vld [vmem:[#allocation8 + $0x40] sm:$0xff]   ;;  %v9925_v4 = vld [vmem:[#allocation8 + $0x48] sm:$0xff]   ;;  %v15354_v55 = vlaneseq  ;;  %vm15399_vm0 = vmmov 0  }
  0xd6   : > { %9368 = vmatprep.subr.bf16.mxu1 %v15355_v0  ;;  %v9923_v2 = vld [vmem:[#allocation8] sm:$0xff]   ;;  %8997 = vmatprep.subr.bf16.mxu0 %v9922_v1  ;;  %v9926_v5 = vld [vmem:[#allocation8 + $0x8] sm:$0xff]   ;;  %v9928_v7 = vld [vmem:[#allocation8 + $0x50] sm:$0xff]   ;;  %s379_s8 = scalar_lea.vmem [#allocation14], %s9638_s21  ;;  %s9799_s16 = smul.u32 640, %s10690_s30 }
  0xd7   : > { %v9924_v3 = vld [vmem:[#allocation8 + $0x80] sm:$0xff]   ;;  %8998 = vmatpush3.bf16.msra.mxu0 %v9923_v2  ;;  %v9927_v6 = vld [vmem:[#allocation8 + $0x88] sm:$0xff]   ;;  %v9929_v8 = vld [vmem:[#allocation8 + $0x10] sm:$0xff]   ;;  %v10991_v60 = vshrl.u32 %v15354_v55, 7  ;;  %9384 = vmatprep.mubr.msk.bf16.mxu1 %vm15399_vm0, %v15355_v0  ;;  %s8428_s20 = sshll.u32 %s379_s8, 4  ;;  %s8415_s30 = scalar_lea.sflag [#allocation4], %s10933_s23  ;;  %s15296_s20 = int_to_ptr.vmem [resolvable:$true] %s8428_s20 }
  0xd8   : > { %9369 = vmatpush3.bf16.msra.mxu1 %v9924_v3  ;;  %8999 = vmatprep.subr.bf16.mxu0 %v9925_v4  ;;  %v9930_v9 = vld [vmem:[#allocation8 + $0x90] sm:$0xff]   ;;  %v9931_v10 = vld [vmem:[#allocation8 + $0x58] sm:$0xff]   ;;  %v9934_v13 = vld [vmem:[#allocation8 + $0x60] sm:$0xff]   ;;  %s15294_s14 = scalar_lea.hbm %s15347_s7, %s9799_s16  ;;  %s10526_s29 = scalar_lea.vmem %s15296_s20, 640 }
  0xd9   : > { %9370 = vmatprep.subr.bf16.mxu1 %v15355_v0  ;;  %v9932_v11 = vld [vmem:[#allocation8 + $0x18] sm:$0xff]   ;;  %v9935_v14 = vld [vmem:[#allocation8 + $0x20] sm:$0xff]   ;;  %v9937_v16 = vld [vmem:[#allocation8 + $0x68] sm:$0xff]   ;;  %v10997_v63 = vsub.s32 0, %v10991_v60  ;;  %p10527_p10 = scmp.ne.s32.totalorder %s15296_s20, %s10526_s29  ;;  %p15643_p12 = scmp.ne.s32.totalorder %s15432_s17, 0 }
  0xda   : > { %v9933_v12 = vld [vmem:[#allocation8 + $0x98] sm:$0xff]   ;;  %v9936_v15 = vld [vmem:[#allocation8 + $0xa0] sm:$0xff]   ;;  %v9938_v17 = vld [vmem:[#allocation8 + $0x28] sm:$0xff]   ;;  %s10626_s11 = smov [#allocation14]  }
  0xdb   : > { %9000 = vmatpush3.bf16.msra.mxu0 %v9926_v5  ;;  %v9939_v18 = vld [vmem:[#allocation8 + $0xa8] sm:$0xff]   ;;  %v9940_v19 = vld [vmem:[#allocation8 + $0x70] sm:$0xff]   ;;  %v9943_v25 = vld [vmem:[#allocation8 + $0x78] sm:$0xff]   ;;  %15444 = vst [vmem:[#allocation20_spill] sm:$0xff] %v10997_v63  ;;  %p10528_p5 = pnand %p10527_p10, %p15643_p12  ;;  %s10530_s1 = sshll.u32 %s10626_s11, 4  ;;  %s10531_s1 = int_to_ptr.vmem [resolvable:$false] %s10530_s1 }
  0xdc   : > { %9371 = vmatpush3.bf16.msra.mxu1 %v9927_v6  ;;  %9001 = vmatprep.subr.bf16.mxu0 %v9928_v7  ;;  %v9941_v20 = vld [vmem:[#allocation8 + $0x30] sm:$0xff]   ;;  %v10970_v23 = vld [vmem:[%s10939_s22 + $0x10] sm:$0xff]  ;;  %s10532_s10 = scalar_lea.vmem %s10531_s1, 1280  ;;  %p10533_p4 = scmp.lt.s32.totalorder %s15296_s20, %s10531_s1 }
  0xdd   : > { %9372 = vmatprep.subr.bf16.mxu1 %v15355_v0  ;;  %v10964_v21 = vld [vmem:[%s10939_s22] sm:$0xff]  ;;  %v10967_v22 = vld [vmem:[%s10939_s22 + $0x8] sm:$0xff]  ;;  %v10973_v26 = vld [vmem:[%s10939_s22 + $0x18] sm:$0xff]  ;;  %v400_v31 = vmul.f32 %v10970_v23, %v10970_v23  ;;  %p10529_p7 = pneg %p10528_p5  ;;  %p10534_p1 = scmp.lt.s32.totalorder %s10532_s10, %s10526_s29 }
  0xde   : > { %v9942_v24 = vld [vmem:[#allocation8 + $0xb0] sm:$0xff]   ;;  %v388_v27 = vadd.f32 %v10967_v22, %v10964_v21  ;;  %v398_v28 = vmul.f32 %v10964_v21, %v10964_v21  ;;  %v399_v29 = vmul.f32 %v10967_v22, %v10967_v22  ;;  %v9944_v32 = vld [vmem:[#allocation8 + $0x38] sm:$0xff]   ;;  %v401_v34 = vmul.f32 %v10973_v26, %v10973_v26  ;;  %v441_v7 = vld [vmem:[#allocation7] sm:$0xff] }
  0xdf   : > { %9002 = vmatpush3.bf16.msra.mxu0 %v9929_v8  ;;  %v385_v30 = vld [vmem:[%s10939_s22 + $0x20] sm:$0xff]  ;;  %v386_v1 = vld [vmem:[#allocation5] sm:$0x1]  ;;  %v387_v3 = vld [vmem:[#allocation5 + $0x1] sm:$0x1]  ;;  %p10535_p3 = por %p10534_p1, %p10533_p4 }
  0xe0   : > { %9373 = vmatpush3.bf16.msra.mxu1 %v9930_v9  ;;  %9003 = vmatprep.subr.bf16.mxu0 %v9931_v10  ;;  %v389_v33 = vadd.f32 %v388_v27, %v10970_v23  ;;  %v403_v35 = vadd.f32 %v399_v29, %v398_v28  ;;  %v402_v37 = vmul.f32 %v385_v30, %v385_v30  ;;  %v9945_v59 = vld [vmem:[#allocation8 + $0xb8] sm:$0xff]  }
  0xe1   : > { %9374 = vmatprep.subr.bf16.mxu1 %v15355_v0  ;;  %p10536_p8 = pnand %p10535_p3, %p10529_p7 }
  0xe2   : > { %v390_v36 = vadd.f32 %v389_v33, %v10973_v26  ;;  %v404_v38 = vadd.f32 %v403_v35, %v400_v31 }
  0xe3   : > { %9004 = vmatpush3.bf16.msra.mxu0 %v9932_v11 }
  0xe4   : > { %9375 = vmatpush3.bf16.msra.mxu1 %v9933_v12  ;;  %9005 = vmatprep.subr.bf16.mxu0 %v9934_v13  ;;  %v391_v39 = vadd.f32 %v390_v36, %v385_v30  ;;  %v405_v40 = vadd.f32 %v404_v38, %v401_v34 }
  0xe5   : > { %9376 = vmatprep.subr.bf16.mxu1 %v15355_v0 }
  0xe6   : > { %v392_v41 = vrot.slane %v391_v39, 4  ;;  %v406_v42 = vadd.f32 %v405_v40, %v402_v37 }
  0xe7   : > { %9006 = vmatpush3.bf16.msra.mxu0 %v9935_v14  ;;  %v11005_v14 = vrot.slane %v441_v7, %v10997_v63 }
  0xe8   : > { %9377 = vmatpush3.bf16.msra.mxu1 %v9936_v15  ;;  %9007 = vmatprep.subr.bf16.mxu0 %v9937_v16  ;;  %v393_v43 = vadd.f32 %v392_v41, %v391_v39  ;;  %v407_v44 = vrot.slane %v406_v42, 4 }
  0xe9   : > { %9378 = vmatprep.subr.bf16.mxu1 %v15355_v0 }
  0xea   : > { %v394_v45 = vrot.slane %v393_v43, 2  ;;  %v408_v46 = vadd.f32 %v407_v44, %v406_v42  ;;  %v538_v42 = vadd.f32 1e-09, %v441_v7  ;;  %v15363_v7 = vmov 920167782  }
  0xeb   : > { %9008 = vmatpush3.bf16.msra.mxu0 %v9938_v17 }
  0xec   : > { %9379 = vmatpush3.bf16.msra.mxu1 %v9939_v18  ;;  %9009 = vmatprep.subr.bf16.mxu0 %v9940_v19  ;;  %v395_v47 = vadd.f32 %v394_v45, %v393_v43  ;;  %v409_v48 = vrot.slane %v408_v46, 2 }
  0xed   : > { %9380 = vmatprep.subr.bf16.mxu1 %v15355_v0 }
  0xee   : > { %v396_v49 = vrot.slane %v395_v47, 1  ;;  %v410_v50 = vadd.f32 %v409_v48, %v408_v46 }
  0xef   : > { %9010 = vmatpush3.bf16.msra.mxu0 %v9941_v20 }
  0xf0   : > { %9381 = vmatpush3.bf16.msra.mxu1 %v9942_v24  ;;  %9011 = vmatprep.subr.bf16.mxu0 %v9943_v25  ;;  %v397_v51 = vadd.f32 %v396_v49, %v395_v47  ;;  %v411_v52 = vrot.slane %v410_v50, 1 }
  0xf1   : > { %9382 = vmatprep.subr.bf16.mxu1 %v15355_v0 }
  0xf2   : > { %v412_v53 = vadd.f32 %v411_v52, %v410_v50  ;;  %v413_v54 = vmul.f32 0.025, %v397_v51 }
  0xf3   : > { %9012 = vmatpush3.bf16.msra.mxu0 %v9944_v32 }
  0xf4   : > { %v414_v56 = vmul.f32 0.025, %v412_v53  ;;  %v415_v57 = vmul.f32 %v413_v54, %v413_v54  ;;  %9383 = vmatpush3.bf16.msra.mxu1 %v9945_v59 }
  0xf5   : > { %9396 = vmatprep.subr.bf16.mxu1 %v15355_v0 }
  0xf6   : > { %v416_v58 = vsub.f32 %v414_v56, %v415_v57 }
  0xf8   : > { %v417_v61 = vmax.f32 %v416_v58, 0.0 }
  0xfa   : > { %v418_v62 = vadd.f32 1e-05, %v417_v61  ;;  %v15378_v61 = vmov 683565275  }
  0xfc   : > { %10122 = vrsqrt.f32 %v418_v62 }
  0xfd   : > { %10124 = vrcp.f32 %v538_v42 }
 0x106   : > { %v10123_v2 = vpop.eup %10122 }
 0x107   : > { %v420_v4 = vmul.f32 %v10123_v2, %v386_v1  ;;  %v15369_v1 = vmov 2475754826  }
 0x109   : > { %v424_v5 = vrot.slane %v420_v4, %v10997_v63  ;;  %v430_v6 = vmul.f32 %v420_v4, %v413_v54 }
 0x10b   : > { %v425_v8 = vmul.f32 %v424_v5, %v10964_v21  ;;  %v426_v9 = vmul.f32 %v424_v5, %v10967_v22  ;;  %v431_v10 = vsub.f32 %v387_v3, %v430_v6  ;;  %v427_v11 = vmul.f32 %v424_v5, %v10970_v23 }
 0x10c   : > { %v429_v12 = vmul.f32 %v424_v5, %v385_v30  ;;  %v428_v18 = vmul.f32 %v424_v5, %v10973_v26  ;;  %v15367_v3 = vmov 2131351028   ;;  %v15365_v5 = vmov 2102212464  }
 0x10d   : > { %v435_v13 = vrot.slane %v431_v10, %v10997_v63 }
 0x10f   : > { %v11007_v15 = vadd.f32 %v435_v13, %v425_v8  ;;  %v11009_v16 = vadd.f32 %v435_v13, %v426_v9  ;;  %v11011_v17 = vadd.f32 %v435_v13, %v427_v11  ;;  %v11014_v19 = vadd.f32 %v435_v13, %v429_v12 }
 0x110   : > { %v11030_v25 = vadd.f32 %v435_v13, %v428_v18  ;;  %v15360_v18 = vmov 1326507024  }
 0x111   : > { %v11018_v20 = vmul.f32 %v11005_v14, %v11007_v15  ;;  %v11022_v21 = vmul.f32 %v11005_v14, %v11009_v16  ;;  %v11026_v22 = vmul.f32 %v11005_v14, %v11011_v17 }
 0x112   : > { %v11042_v35 = vmul.f32 %v11005_v14, %v11030_v25 }
 0x113   : > { %v550_v23 = vand.u32 2147483647, %v11018_v20  ;;  %v553_v24 = vand.u32 2139095040, %v11018_v20  ;;  %v654_v26 = vand.u32 2147483647, %v11022_v21  ;;  %v657_v27 = vand.u32 2139095040, %v11022_v21 }
 0x114   : > { %v761_v32 = vand.u32 2139095040, %v11026_v22  ;;  %v758_v34 = vand.u32 2147483647, %v11026_v22  ;;  %v862_v45 = vand.u32 2147483647, %v11042_v35  ;;  %v865_v46 = vand.u32 2139095040, %v11042_v35 }
 0x115   : > { %v554_v28 = vshrl.u32 %v553_v24, 23  ;;  %v557_v29 = vand.u32 8388607, %v550_v23  ;;  %v658_v30 = vshrl.u32 %v657_v27, 23  ;;  %v661_v31 = vand.u32 8388607, %v654_v26 }
 0x116   : > { %v762_v39 = vshrl.u32 %v761_v32, 23  ;;  %v11046_v41 = vand.u32 8388607, %v758_v34  ;;  %v11059_v58 = vshrl.u32 %v865_v46, 23  ;;  %vm552_vm13 = vcmp.lt.s32.totalorder %v11018_v20, 0 }
 0x117   : > { %v8575_v33 = vadd.s32 4294967169, %v554_v28  ;;  %v558_v36 = vor.u32 8388608, %v557_v29  ;;  %v8579_v37 = vadd.s32 4294967169, %v658_v30  ;;  %v662_v38 = vor.u32 8388608, %v661_v31 }
 0x118   : > { %v8583_v44 = vadd.s32 4294967169, %v762_v39  ;;  %v766_v53 = vor.u32 8388608, %v11046_v41  ;;  %vm11155_vm14 = vcmp.le.f32.partialorder %v550_v23, 0.7853982 }
 0x119   : > { %v560_v40 = vadd.s32 1, %v8575_v33  ;;  %v664_v43 = vadd.s32 1, %v8579_v37  ;;  %v11050_v48 = vshll.u32 %v558_v36, 8  ;;  %v11052_v49 = vshll.u32 %v662_v38, 8 }
 0x11a   : > { %v11057_v57 = vadd.s32 1, %v8583_v44 }
 0x11b   : > { %vm561_vm1 = vcmp.gt.s32.totalorder %v560_v40, 0  ;;  %vm665_vm2 = vcmp.gt.s32.totalorder %v664_v43, 0 }
 0x11c   : > { %v562_v47 = vsel %vm561_vm1, %v560_v40, 0  ;;  %v666_v52 = vsel %vm665_vm2, %v664_v43, 0  ;;  %vm769_vm7 = vcmp.gt.s32.totalorder %v11057_v57, 0  ;;  %vm656_vm2 = vcmp.lt.s32.totalorder %v11022_v21, 0 }
 0x11d   : > { %v563_v50 = vshrl.u32 %v562_v47, 5  ;;  %v564_v51 = vand.u32 31, %v562_v47  ;;  %v11055_v54 = vshrl.u32 %v666_v52, 5  ;;  %v668_v56 = vand.u32 31, %v666_v52 }
 0x11f   : > { %v565_v59 = vsub.s32 32, %v564_v51  ;;  %v567_v62 = vshll.u32 %v15378_v61, %v564_v51  ;;  %v570_v2 = vshll.u32 %v15369_v1, %v564_v51  ;;  %v573_v4 = vshll.u32 %v15367_v3, %v564_v51 }
 0x120   : > { %v576_v6 = vshll.u32 %v15365_v5, %v564_v51  ;;  %v579_v8 = vshll.u32 %v15363_v7, %v564_v51  ;;  %vm582_vm3 = vcmp.lt.s32.totalorder %v563_v50, 1  ;;  %vm583_vm4 = vcmp.lt.s32.totalorder %v563_v50, 2 }
 0x121   : > { %v566_v9 = vshrl.u32 %v15378_v61, %v565_v59  ;;  %v568_v10 = vshrl.u32 %v15369_v1, %v565_v59  ;;  %v571_v11 = vshrl.u32 %v15367_v3, %v565_v59  ;;  %v574_v12 = vshrl.u32 %v15365_v5, %v565_v59 }
 0x122   : > { %v577_v13 = vshrl.u32 %v15363_v7, %v565_v59  ;;  %v580_v24 = vshrl.u32 %v15360_v18, %v565_v59  ;;  %vm584_vm5 = vcmp.lt.s32.totalorder %v563_v50, 3  ;;  %vm585_vm6 = vcmp.lt.s32.totalorder %v563_v50, 4 }
 0x123   : > { %v569_v27 = vor.u32 %v568_v10, %v567_v62  ;;  %v572_v28 = vor.u32 %v571_v11, %v570_v2  ;;  %v575_v29 = vor.u32 %v574_v12, %v573_v4  ;;  %v669_v30 = vsub.s32 32, %v668_v56 }
 0x124   : > { %v578_v31 = vor.u32 %v577_v13, %v576_v6  ;;  %v581_v32 = vor.u32 %v580_v24, %v579_v8  ;;  %v671_v33 = vshll.u32 %v15378_v61, %v668_v56  ;;  %v674_v46 = vshll.u32 %v15369_v1, %v668_v56 }
 0x125   : > { %v586_v36 = vsel %vm582_vm3, %v566_v9, %v569_v27  ;;  %v587_v37 = vsel %vm585_vm6, %v575_v29, 2102212464  ;;  %v590_v38 = vsel %vm582_vm3, %v569_v27, %v572_v28  ;;  %v594_v39 = vsel %vm582_vm3, %v572_v28, %v575_v29 }
 0x126   : > { %v588_v40 = vsel %vm584_vm5, %v572_v28, %v587_v37  ;;  %v591_v43 = vsel %vm585_vm6, %v578_v31, 920167782  ;;  %v595_v44 = vsel %vm585_vm6, %v581_v32, 1326507024  ;;  %v670_v51 = vshrl.u32 %v15378_v61, %v669_v30  ;;  %v11109_v37 = vpop.eup %10124 }
 0x127   : > { %v592_v42 = vsel %vm584_vm5, %v575_v29, %v591_v43  ;;  %v596_v47 = vsel %vm584_vm5, %v578_v31, %v595_v44  ;;  %v672_v52 = vshrl.u32 %v15369_v1, %v669_v30  ;;  %v589_v59 = vsel %vm583_vm4, %v586_v36, %v588_v40 }
 0x128   : > { %v593_v62 = vsel %vm583_vm4, %v590_v38, %v592_v42  ;;  %v597_v2 = vsel %vm583_vm4, %v594_v39, %v596_v47  ;;  %v675_v4 = vshrl.u32 %v15367_v3, %v669_v30  ;;  %v677_v13 = vshll.u32 %v15367_v3, %v668_v56 }
 0x129   : > { %v11088_v6 = vmul.u32.u64.low %v11050_v48, %v597_v2  ;;  %v11089_v8 = vmul.u32.u64.high %v11050_v48, %v597_v2, %v11088_v6  ;;  %v11092_v9 = vmul.u32.u64.low %v11050_v48, %v593_v62  ;;  %v11093_v10 = vmul.u32.u64.high %v11050_v48, %v593_v62, %v11092_v9 }
 0x12a   : > { %v673_v11 = vor.u32 %v672_v52, %v671_v33  ;;  %v676_v12 = vor.u32 %v675_v4, %v674_v46  ;;  %v678_v24 = vshrl.u32 %v15365_v5, %v669_v30  ;;  %v680_v50 = vshll.u32 %v15365_v5, %v668_v56 }
 0x12b   : > { %v681_v27 = vshrl.u32 %v15363_v7, %v669_v30  ;;  %v683_v28 = vshll.u32 %v15363_v7, %v668_v56  ;;  %v684_v29 = vshrl.u32 %v15360_v18, %v669_v30  ;;  %v605_v31 = vmul.u32 %v11050_v48, %v589_v59 }
 0x12c   : > { %v679_v32 = vor.u32 %v678_v24, %v677_v13  ;;  %vm686_vm8 = vcmp.lt.s32.totalorder %v11055_v54, 1  ;;  %vm687_vm9 = vcmp.lt.s32.totalorder %v11055_v54, 2  ;;  %vm607_vm10 = vc.u32 %v11089_v8, %v11092_v9 }
 0x12d   : > { %v608_v33 = vadd.s32 1, %v11093_v10  ;;  %v682_v36 = vor.u32 %v681_v27, %v680_v50  ;;  %vm688_vm11 = vcmp.lt.s32.totalorder %v11055_v54, 3  ;;  %v685_v56 = vor.u32 %v684_v29, %v683_v28 }
 0x12e   : > { %vm689_vm12 = vcmp.lt.s32.totalorder %v11055_v54, 4  ;;  %v690_v30 = vsel %vm686_vm8, %v670_v51, %v673_v11  ;;  %v694_v48 = vsel %vm686_vm8, %v673_v11, %v676_v12  ;;  %v698_v43 = vsel %vm686_vm8, %v676_v12, %v679_v32 }
 0x12f   : > { %v609_v38 = vsel %vm607_vm10, %v608_v33, %v11093_v10  ;;  %v691_v39 = vsel %vm689_vm12, %v679_v32, 2102212464  ;;  %v695_v40 = vsel %vm689_vm12, %v682_v36, 920167782  ;;  %v699_v47 = vsel %vm689_vm12, %v685_v56, 1326507024 }
 0x130   : > { %v610_v44 = vadd.s32 %v609_v38, %v605_v31  ;;  %v692_v46 = vsel %vm688_vm11, %v676_v12, %v691_v39  ;;  %v696_v42 = vsel %vm688_vm11, %v679_v32, %v695_v40  ;;  %v700_v59 = vsel %vm688_vm11, %v682_v36, %v699_v47 }
 0x131   : > { %v693_v52 = vsel %vm687_vm9, %v690_v30, %v692_v46  ;;  %v697_v51 = vsel %vm687_vm9, %v694_v48, %v696_v42  ;;  %v770_v62 = vsel %vm769_vm7, %v11057_v57, 0  ;;  %v701_v4 = vsel %vm687_vm9, %v698_v43, %v700_v59 }
 0x132   : > { %v611_v2 = vadd.s32 536870912, %v610_v44  ;;  %v11129_v6 = vmul.u32.u64.low %v11052_v49, %v697_v51  ;;  %v11130_v10 = vmul.u32.u64.high %v11052_v49, %v697_v51, %v11129_v6  ;;  %v11137_v13 = vshrl.u32 %v770_v62, 5 }
 0x133   : > { %v11134_v11 = vmul.u32.u64.low %v11052_v49, %v701_v4  ;;  %v11135_v12 = vmul.u32.u64.high %v11052_v49, %v701_v4, %v11134_v11  ;;  %v772_v50 = vand.u32 31, %v770_v62  ;;  %v709_v57 = vmul.u32 %v11052_v49, %v693_v52 }
 0x134   : > { %v612_v24 = vshrl.u32 %v611_v2, 30  ;;  %v11143_v54 = vshll.u32 %v766_v53, 8  ;;  %v11146_v27 = vadd.s32 4294967169, %v11059_v58  ;;  %v11150_v28 = vand.u32 8388607, %v862_v45 }
 0x135   : > { %v712_v32 = vadd.s32 1, %v11130_v10  ;;  %v773_v33 = vsub.s32 32, %v772_v50  ;;  %vm711_vm15 = vc.u32 %v11135_v12, %v11129_v6  ;;  %vm790_vm1 = vcmp.lt.s32.totalorder %v11137_v13, 1 }
 0x136   : > { %v613_v29 = vshll.u32 %v612_v24, 30  ;;  %v636_v31 = vsub.s32 4, %v612_v24  ;;  %v775_v36 = vshll.u32 %v15378_v61, %v772_v50  ;;  %v778_v30 = vshll.u32 %v15369_v1, %v772_v50 }
 0x137   : > { %v713_v53 = vsel %vm711_vm15, %v712_v32, %v11130_v10  ;;  %v776_v56 = vshrl.u32 %v15369_v1, %v773_v33  ;;  %v779_v48 = vshrl.u32 %v15367_v3, %v773_v33  ;;  %v781_v38 = vshll.u32 %v15367_v3, %v772_v50 }
 0x138   : > { %v11162_v41 = vsub.s32 %v610_v44, %v613_v29  ;;  %v714_v58 = vadd.s32 %v713_v53, %v709_v57  ;;  %v782_v39 = vshrl.u32 %v15365_v5, %v773_v33  ;;  %vm791_vm3 = vcmp.lt.s32.totalorder %v11137_v13, 2 }
 0x139   : > { %v784_v43 = vshll.u32 %v15365_v5, %v772_v50  ;;  %vm792_vm4 = vcmp.lt.s32.totalorder %v11137_v13, 3  ;;  %v637_v46 = vsel %vm552_vm13, %v636_v31, %v612_v24  ;;  %v785_v42 = vshrl.u32 %v15363_v7, %v773_v33 }
 0x13a   : > { %v616_v23 = vsub.s32 0, %v11162_v41  ;;  %v715_v40 = vadd.s32 536870912, %v714_v58  ;;  %vm793_vm5 = vcmp.lt.s32.totalorder %v11137_v13, 4  ;;  %v774_v52 = vshrl.u32 %v15378_v61, %v773_v33 }
 0x13b   : > { %v787_v51 = vshll.u32 %v15363_v7, %v772_v50  ;;  %v788_v59 = vshrl.u32 %v15360_v18, %v773_v33  ;;  %vm11186_vm6 = vcmp.le.f32.partialorder %v654_v26, 0.7853982  ;;  %v777_v4 = vor.u32 %v776_v56, %v775_v36 }
 0x13c   : > { %v8576_v44 = vmin.u32 %v616_v23, %v11162_v41  ;;  %v716_v47 = vshrl.u32 %v715_v40, 30  ;;  %v780_v10 = vor.u32 %v779_v48, %v778_v30  ;;  %v783_v11 = vor.u32 %v782_v39, %v781_v38 }
 0x13d   : > { %v11192_v29 = vrot.slane %v11109_v37, %v10997_v63  ;;  %v786_v31 = vor.u32 %v785_v42, %v784_v43  ;;  %v639_v32 = vsel %vm11155_vm14, 0, %v637_v46  ;;  %v789_v33 = vor.u32 %v788_v59, %v787_v51 }
 0x13e   : > { %v618_v62 = vclz %v8576_v44  ;;  %v717_v24 = vshll.u32 %v716_v47, 30  ;;  %v740_v57 = vsub.s32 4, %v716_v47  ;;  %v795_v26 = vsel %vm793_vm5, %v783_v11, 2102212464 }
 0x13f   : > { %v606_v53 = vadd.s32 %v11092_v9, %v11089_v8  ;;  %v794_v56 = vsel %vm790_vm1, %v774_v52, %v777_v4  ;;  %v799_v30 = vsel %vm793_vm5, %v786_v31, 920167782  ;;  %v798_v23 = vsel %vm790_vm1, %v777_v4, %v780_v10 }
 0x140   : > { %v8577_v50 = vadd.s32 4294967294, %v618_v62  ;;  %v11200_v36 = vsub.s32 %v714_v58, %v717_v24  ;;  %v800_v48 = vsel %vm792_vm4, %v783_v11, %v799_v30  ;;  %v802_v38 = vsel %vm790_vm1, %v780_v10, %v783_v11 }
 0x141   : > { %v741_v9 = vsel %vm656_vm2, %v740_v57, %v716_v47  ;;  %v796_v58 = vsel %vm792_vm4, %v780_v10, %v795_v26  ;;  %v803_v46 = vsel %vm793_vm5, %v789_v33, 1326507024  ;;  %v801_v52 = vsel %vm791_vm3, %v798_v23, %v800_v48 }
 0x142   : > { %vm8578_vm7 = vcmp.lt.s32.totalorder %v8577_v50, 0  ;;  %v720_v8 = vsub.s32 0, %v11200_v36  ;;  %v804_v51 = vsel %vm792_vm4, %v786_v31, %v803_v46  ;;  %v870_v47 = vor.u32 8388608, %v11150_v28 }
 0x143   : > { %v621_v39 = vsel %vm8578_vm7, 0, %v8577_v50  ;;  %v805_v4 = vsel %vm791_vm3, %v802_v38, %v804_v51  ;;  %v643_v10 = vadd.s32 3, %v639_v32  ;;  %v743_v24 = vsel %vm11186_vm6, 0, %v741_v9 }
 0x144   : > { %v622_v40 = vsub.s32 32, %v621_v39  ;;  %v623_v43 = vshll.u32 %v11162_v41, %v621_v39  ;;  %v626_v44 = vsub.s32 4294967266, %v621_v39  ;;  %v8580_v42 = vmin.u32 %v720_v8, %v11200_v36 }
 0x145   : > { %v872_v41 = vadd.s32 1, %v11146_v27  ;;  %v797_v57 = vsel %vm791_vm3, %v794_v56, %v796_v58  ;;  %v11234_v31 = vmul.u32.u64.low %v11143_v54, %v805_v4  ;;  %v11235_v26 = vmul.u32.u64.high %v11143_v54, %v805_v4, %v11234_v31 }
 0x146   : > { %v624_v59 = vshrl.u32 %v606_v53, %v622_v40  ;;  %v627_v62 = vadd.s32 127, %v626_v44  ;;  %v722_v11 = vclz %v8580_v42  ;;  %v710_v48 = vadd.s32 %v11129_v6, %v11135_v12 }
 0x147   : > { %v11238_v30 = vmul.u32.u64.low %v11143_v54, %v801_v52  ;;  %v11239_v23 = vmul.u32.u64.high %v11143_v54, %v801_v52, %v11238_v30  ;;  %vm873_vm8 = vcmp.gt.s32.totalorder %v872_v41, 0  ;;  %v11244_v56 = vand.u32 3, %v643_v10 }
 0x148   : > { %v625_v50 = vor.u32 %v624_v59, %v623_v43  ;;  %v628_v33 = vshll.u32 %v627_v62, 23  ;;  %v8581_v53 = vadd.s32 4294967294, %v722_v11  ;;  %v874_v13 = vsel %vm873_vm8, %v872_v41, 0 }
 0x149   : > { %v747_v38 = vadd.s32 3, %v743_v24  ;;  %v876_v39 = vand.u32 31, %v874_v13  ;;  %v813_v58 = vmul.u32 %v11143_v54, %v797_v57  ;;  %vm815_vm10 = vc.u32 %v11235_v26, %v11238_v30 }
 0x14a   : > { %v629_v27 = vor.u32 4788187, %v628_v33  ;;  %v632_v32 = vcvt.s32.f32 %v625_v50  ;;  %vm8582_vm9 = vcmp.lt.s32.totalorder %v8581_v53, 0  ;;  %v816_v46 = vadd.s32 1, %v11239_v23 }
 0x14b   : > { %v725_v9 = vsel %vm8582_vm9, 0, %v8581_v53  ;;  %v11251_v12 = vshrl.u32 %v874_v13, 5  ;;  %v877_v42 = vsub.s32 32, %v876_v39  ;;  %v11255_v52 = vmul.f32 %v11005_v14, %v11014_v19 }
 0x14c   : > { %v630_v8 = vand.u32 2147483647, %v629_v27  ;;  %v726_v40 = vsub.s32 32, %v725_v9  ;;  %v727_v43 = vshll.u32 %v11200_v36, %v725_v9  ;;  %v730_v44 = vsub.s32 4294967266, %v725_v9 }
 0x14d   : > { %v817_v54 = vsel %vm815_vm10, %v816_v46, %v11239_v23  ;;  %v879_v62 = vshll.u32 %v15378_v61, %v876_v39  ;;  %v880_v36 = vshrl.u32 %v15369_v1, %v877_v42  ;;  %v882_v10 = vshll.u32 %v15369_v1, %v876_v39 }
 0x14e   : > { %v633_v6 = vmul.f32 %v632_v32, %v630_v8  ;;  %v728_v51 = vshrl.u32 %v710_v48, %v726_v40  ;;  %v731_v59 = vadd.s32 127, %v730_v44  ;;  %v818_v41 = vadd.s32 %v817_v54, %v813_v58 }
 0x14f   : > { %v883_v57 = vshrl.u32 %v15367_v3, %v877_v42  ;;  %v885_v50 = vshll.u32 %v15367_v3, %v876_v39  ;;  %v886_v31 = vshrl.u32 %v15365_v5, %v877_v42  ;;  %v888_v53 = vshll.u32 %v15365_v5, %v876_v39 }
 0x150   : > { %v634_v4 = vxor.u32 2147483648, %v633_v6  ;;  %v729_v11 = vor.u32 %v728_v51, %v727_v43  ;;  %v732_v24 = vshll.u32 %v731_v59, 23  ;;  %v819_v33 = vadd.s32 536870912, %v818_v41 }
 0x151   : > { %v881_v48 = vor.u32 %v880_v36, %v879_v62  ;;  %v884_v8 = vor.u32 %v883_v57, %v882_v10  ;;  %v889_v9 = vshrl.u32 %v15363_v7, %v877_v42  ;;  %v891_v40 = vshll.u32 %v15363_v7, %v876_v39 }
 0x152   : > { %v635_v14 = vsel %vm552_vm13, %v634_v4, %v633_v6  ;;  %v733_v27 = vor.u32 4788187, %v732_v24  ;;  %v736_v32 = vcvt.s32.f32 %v729_v11  ;;  %v820_v13 = vshrl.u32 %v819_v33, 30 }
 0x153   : > { %v638_v23 = vsel %vm11155_vm14, %v11018_v20, %v635_v14  ;;  %v892_v43 = vshrl.u32 %v15360_v18, %v877_v42  ;;  %v11273_v44 = vand.u32 3, %v747_v38  ;;  %v890_v6 = vor.u32 %v889_v9, %v888_v53 }
 0x154   : > { %10126 = vcosq.f32 %v638_v23  ;;  %v734_v58 = vand.u32 2147483647, %v733_v27  ;;  %v821_v46 = vshll.u32 %v820_v13, 30  ;;  %vm894_vm11 = vcmp.lt.s32.totalorder %v11251_v12, 1 }
 0x155   : > { %10128 = vsinq.f32 %v638_v23  ;;  %v878_v51 = vshrl.u32 %v15378_v61, %v877_v42  ;;  %v887_v59 = vor.u32 %v886_v31, %v885_v50  ;;  %v11279_v54 = vshll.u32 %v870_v47, 8 }
 0x156   : > { %v737_v49 = vmul.f32 %v736_v32, %v734_v58  ;;  %vm760_vm12 = vcmp.lt.s32.totalorder %v11026_v22, 0  ;;  %v11282_v62 = vsub.s32 %v818_v41, %v821_v46  ;;  %v893_v39 = vor.u32 %v892_v43, %v891_v40 }
 0x157   : > { %vm896_vm13 = vcmp.lt.s32.totalorder %v11251_v12, 3  ;;  %vm897_vm14 = vcmp.lt.s32.totalorder %v11251_v12, 4  ;;  %vm895_vm15 = vcmp.lt.s32.totalorder %v11251_v12, 2  ;;  %v902_v28 = vsel %vm894_vm11, %v881_v48, %v884_v8 }
 0x158   : > { %v738_v38 = vxor.u32 2147483648, %v737_v49  ;;  %v899_v42 = vsel %vm897_vm14, %v887_v59, 2102212464  ;;  %vm642_vm1 = vweird.f32 %v11018_v20  ;;  %v824_v47 = vsub.s32 0, %v11282_v62 }
 0x159   : > { %v844_v4 = vsub.s32 4, %v820_v13  ;;  %v903_v41 = vsel %vm897_vm14, %v890_v6, 920167782  ;;  %v898_v10 = vsel %vm894_vm11, %v878_v51, %v881_v48  ;;  %v900_v11 = vsel %vm896_vm13, %v884_v8, %v899_v42 }
 0x15a   : > { %v739_v36 = vsel %vm656_vm2, %v738_v38, %v737_v49  ;;  %v904_v24 = vsel %vm896_vm13, %v887_v59, %v903_v41  ;;  %vm11308_vm3 = vcmp.le.f32.partialorder %v758_v34, 0.7853982  ;;  %v8584_v14 = vmin.u32 %v824_v47, %v11282_v62 }
 0x15b   : > { %v742_v57 = vsel %vm11186_vm6, %v11022_v21, %v739_v36  ;;  %v905_v33 = vsel %vm895_vm15, %v902_v28, %v904_v24  ;;  %v906_v31 = vsel %vm894_vm11, %v884_v8, %v887_v59  ;;  %v907_v53 = vsel %vm897_vm14, %v893_v39, 1326507024 }
 0x15c   : > { %10130 = vcosq.f32 %v742_v57  ;;  %v11320_v2 = vmul.u32.u64.low %v11279_v54, %v905_v33  ;;  %v11321_v23 = vmul.u32.u64.high %v11279_v54, %v905_v33, %v11320_v2  ;;  %vm645_vm2 = vcmp.lt.s32.totalorder %v11244_v56, 2 }
 0x15d   : > { %vm649_vm4 = vcmp.eq.s32.totalorder %v11244_v56, 2  ;;  %10132 = vsinq.f32 %v742_v57  ;;  %v826_v27 = vclz %v8584_v14  ;;  %vm646_vm5 = vcmp.eq.s32.totalorder %v11244_v56, 0 }
 0x15e   : > { %v10127_v34 = vpop.eup %10126  ;;  %v901_v8 = vsel %vm895_vm15, %v898_v10, %v900_v11  ;;  %v908_v9 = vsel %vm896_vm13, %v890_v6, %v907_v53  ;;  %v814_v40 = vadd.s32 %v11238_v30, %v11235_v26  ;;  %vm749_vm6 = vcmp.lt.s32.totalorder %v11273_v44, 2 }
 0x15f   : > { %v10129_v32 = vpop.eup %10128  ;;  %v650_v48 = vxor.u32 2147483648, %v10127_v34  ;;  %v8585_v43 = vadd.s32 4294967294, %v826_v27  ;;  %v909_v46 = vsel %vm895_vm15, %v906_v31, %v908_v9  ;;  %v845_v51 = vsel %vm760_vm12, %v844_v4, %v820_v13 }
 0x160   : > { %v647_v58 = vxor.u32 2147483648, %v10129_v32  ;;  %v11339_v59 = vmul.u32.u64.low %v11279_v54, %v909_v46  ;;  %v11340_v39 = vmul.u32.u64.high %v11279_v54, %v909_v46, %v11339_v59  ;;  %v917_v6 = vmul.u32 %v11279_v54, %v901_v8 }
 0x161   : > { %v651_v49 = vsel %vm649_vm4, %v650_v48, %v10129_v32  ;;  %vm8586_vm7 = vcmp.lt.s32.totalorder %v8585_v43, 0  ;;  %v920_v26 = vadd.s32 1, %v11321_v23  ;;  %v966_v42 = vand.u32 2147483647, %v11255_v52 }
 0x162   : > { %v648_v38 = vsel %vm646_vm5, %v10127_v34, %v647_v58  ;;  %v829_v12 = vsel %vm8586_vm7, 0, %v8585_v43  ;;  %v969_v28 = vand.u32 2139095040, %v11255_v52  ;;  %v847_v54 = vsel %vm11308_vm3, 0, %v845_v51 }
 0x163   : > { %v652_v30 = vsel %vm645_vm2, %v648_v38, %v651_v49  ;;  %v830_v47 = vsub.s32 32, %v829_v12  ;;  %v831_v4 = vshll.u32 %v11282_v62, %v829_v12  ;;  %v834_v41 = vsub.s32 4294967266, %v829_v12 }
 0x164   : > { %v653_v13 = vsel %vm642_vm1, nan, %v652_v30  ;;  %vm919_vm8 = vc.u32 %v11340_v39, %v11320_v2  ;;  %v970_v56 = vshrl.u32 %v969_v28, 23  ;;  %vm750_vm9 = vcmp.eq.s32.totalorder %v11273_v44, 0 }
 0x165   : > { %v1070_v36 = vmul.f32 %v653_v13, %v653_v13  ;;  %v832_v10 = vshrl.u32 %v814_v40, %v830_v47  ;;  %v835_v11 = vadd.s32 127, %v834_v41  ;;  %v921_v24 = vsel %vm919_vm8, %v920_v26, %v11321_v23 }
 0x166   : > { %v10131_v20 = vpop.eup %10130  ;;  %vm753_vm10 = vcmp.eq.s32.totalorder %v11273_v44, 2  ;;  %v922_v57 = vadd.s32 %v921_v24, %v917_v6  ;;  %v8591_v62 = vadd.s32 4294967169, %v970_v56  ;;  %v851_v34 = vadd.s32 3, %v847_v54 }
 0x167   : > { %v10133_v14 = vpop.eup %10132  ;;  %v754_v33 = vxor.u32 2147483648, %v10131_v20  ;;  %v833_v31 = vor.u32 %v832_v10, %v831_v4  ;;  %v836_v53 = vshll.u32 %v835_v11, 23  ;;  %v1079_v32 = vmul.f32 %v11192_v29, %v1070_v36 }
 0x168   : > { %v751_v27 = vxor.u32 2147483648, %v10133_v14  ;;  %v923_v48 = vadd.s32 536870912, %v922_v57  ;;  %v976_v8 = vadd.s32 1, %v8591_v62  ;;  %vm746_vm11 = vweird.f32 %v11022_v21 }
 0x169   : > { %v755_v9 = vsel %vm753_vm10, %v754_v33, %v10133_v14  ;;  %v837_v58 = vor.u32 4788187, %v836_v53  ;;  %v840_v23 = vcvt.s32.f32 %v833_v31  ;;  %vm1094_vm13 = vcmask 1041408  }
 0x16a   : > { %v752_v40 = vsel %vm750_vm9, %v10131_v20, %v751_v27  ;;  %v11362_v43 = vshrl.u32 %v923_v48, 30  ;;  %v973_v46 = vand.u32 8388607, %v966_v42  ;;  %vm977_vm14 = vcmp.gt.s32.totalorder %v976_v8, 0  ;;  %vm11387_vm15 = vmneg %vm1094_vm13 }
 0x16b   : > { %v756_v49 = vsel %vm749_vm6, %v752_v40, %v755_v9  ;;  %v838_v51 = vand.u32 2147483647, %v837_v58  ;;  %v11369_v21 = vadd.f32 %v1079_v32, %v11007_v15  ;;  %v978_v6 = vsel %vm977_vm14, %v976_v8, 0 }
 0x16c   : > { %v757_v59 = vsel %vm746_vm11, nan, %v756_v49  ;;  %v925_v38 = vshll.u32 %v11362_v43, 30  ;;  %v11372_v12 = vand.u32 3, %v851_v34  ;;  %v980_v28 = vand.u32 31, %v978_v6 }
 0x16d   : > { %v1071_v26 = vmul.f32 %v757_v59, %v757_v59  ;;  %v841_v30 = vmul.f32 %v840_v23, %v838_v51  ;;  %v974_v4 = vor.u32 8388608, %v973_v46  ;;  %v1095_v36 = vrot.slane %v11369_v21, 6 }
 0x16e   : > { %v11374_v13 = vsub.s32 %v922_v57, %v925_v38  ;;  %v981_v41 = vsub.s32 32, %v980_v28  ;;  %v983_v11 = vshll.u32 %v15378_v61, %v980_v28  ;;  %vm864_vm1 = vcmp.lt.s32.totalorder %v11042_v35, 0 }
 0x16f   : > { %v1080_v47 = vmul.f32 %v11192_v29, %v1071_v26  ;;  %v842_v44 = vxor.u32 2147483648, %v841_v30  ;;  %v986_v14 = vshll.u32 %v15369_v1, %v980_v28  ;;  %v918_v34 = vadd.s32 %v11320_v2, %v11340_v39 }
 0x170   : > { %v928_v54 = vsub.s32 0, %v11374_v13  ;;  %v984_v24 = vshrl.u32 %v15369_v1, %v981_v41  ;;  %v987_v33 = vshrl.u32 %v15367_v3, %v981_v41  ;;  %v11403_v27 = vshrl.u32 %v978_v6, 5 }
 0x171   : > { %v11380_v56 = vadd.f32 %v1080_v47, %v11009_v16  ;;  %v843_v10 = vsel %vm760_vm12, %v842_v44, %v841_v30  ;;  %v11405_v32 = vshll.u32 %v974_v4, 8  ;;  %v1117_v48 = vrot.slane %v11369_v21, 2 }
 0x172   : > { %v846_v57 = vsel %vm11308_vm3, %v11026_v22, %v843_v10  ;;  %v8588_v62 = vmin.u32 %v928_v54, %v11374_v13  ;;  %vm10625_vm12 = vmmov 1   ;;  %vm857_vm2 = vcmp.eq.s32.totalorder %v11372_v12, 2 }
 0x173   : > { %v1096_v31 = vrot.slane %v11380_v56, 6  ;;  %v1113_v53 = vpack.c.bf16 %v11380_v56, %v11369_v21  ;;  %10134 = vcosq.f32 %v846_v57  ;;  %vm11414_vm3 = vmpackc.low %vm10625_vm12, %vm11387_vm15  ;;  %v948_v2 = vsub.s32 4, %v11362_v43 }
 0x174   : > { %10136 = vsinq.f32 %v846_v57  ;;  %v930_v50 = vclz %v8588_v62  ;;  %v985_v39 = vor.u32 %v984_v24, %v983_v11  ;;  %vm854_vm4 = vcmp.eq.s32.totalorder %v11372_v12, 0 }
 0x175   : > { %1315 = vmatprep.mubr.bf16.mxu0 %v1113_v53  ;;  %v1097_v8 = vsel %vm1094_vm13, %v1095_v36, %v1096_v31  ;;  %vm11423_vm5 = vcmp.le.f32.partialorder %v862_v45, 0.7853982  ;;  %v988_v46 = vor.u32 %v987_v33, %v986_v14  ;;  %v989_v49 = vshll.u32 %v15367_v3, %v980_v28 }
 0x176   : > { %v8621_v58 = vpack.c.bf16 %v1097_v8, %v1095_v36  ;;  %v8589_v40 = vadd.s32 4294967294, %v930_v50  ;;  %vm853_vm6 = vcmp.lt.s32.totalorder %v11372_v12, 2  ;;  %v990_v51 = vshrl.u32 %v15365_v5, %v981_v41 }
 0x177   : > { %v992_v59 = vshll.u32 %v15365_v5, %v980_v28  ;;  %v993_v38 = vshrl.u32 %v15363_v7, %v981_v41  ;;  %v995_v6 = vshll.u32 %v15363_v7, %v980_v28  ;;  %vm850_vm7 = vweird.f32 %v11026_v22 }
 0x178   : > { %8622 = vmatmul.mubr.msk.bf16.vlgmr.msra.gmra.mrb[0].mxu0 %vm11414_vm3, %v8621_v58  ;;  %vm8590_vm8 = vcmp.lt.s32.totalorder %v8589_v40, 0  ;;  %v982_v45 = vshrl.u32 %v15378_v61, %v981_v41  ;;  %v996_v26 = vshrl.u32 %v15360_v18, %v981_v41  ;;  %vm998_vm9 = vcmp.lt.s32.totalorder %v11403_v27, 1 }
 0x179   : > { %v933_v30 = vsel %vm8590_vm8, 0, %v8589_v40  ;;  %v991_v47 = vor.u32 %v990_v51, %v989_v49  ;;  %v994_v44 = vor.u32 %v993_v38, %v992_v59  ;;  %vm1000_vm10 = vcmp.lt.s32.totalorder %v11403_v27, 3 }
 0x17a   : > { %v934_v4 = vsub.s32 32, %v933_v30  ;;  %v935_v28 = vshll.u32 %v11374_v13, %v933_v30  ;;  %v938_v36 = vsub.s32 4294967266, %v933_v30  ;;  %v997_v54 = vor.u32 %v996_v26, %v995_v6 }
 0x17b   : > { %v949_v10 = vsel %vm864_vm1, %v948_v2, %v11362_v43  ;;  %vm999_vm11 = vcmp.lt.s32.totalorder %v11403_v27, 2  ;;  %vm1001_vm14 = vcmp.lt.s32.totalorder %v11403_v27, 4  ;;  %v1006_v41 = vsel %vm998_vm9, %v985_v39, %v988_v46 }
 0x17c   : > { %v936_v11 = vshrl.u32 %v918_v34, %v934_v4  ;;  %v939_v24 = vadd.s32 127, %v938_v36  ;;  %v1003_v20 = vsel %vm1001_vm14, %v991_v47, 2102212464  ;;  %v1007_v57 = vsel %vm1001_vm14, %v994_v44, 920167782 }
 0x17d   : > { %v10135_v62 = vpop.eup %10134  ;;  %v1002_v13 = vsel %vm998_vm9, %v982_v45, %v985_v39  ;;  %v1008_v14 = vsel %vm1000_vm10, %v991_v47, %v1007_v57  ;;  %v1010_v43 = vsel %vm998_vm9, %v988_v46, %v991_v47  ;;  %v1011_v33 = vsel %vm1001_vm14, %v997_v54, 1326507024 }
 0x17e   : > { %v10137_v53 = vpop.eup %10136  ;;  %v858_v50 = vxor.u32 2147483648, %v10135_v62  ;;  %v937_v8 = vor.u32 %v936_v11, %v935_v28  ;;  %v940_v2 = vshll.u32 %v939_v24, 23  ;;  %v1004_v34 = vsel %vm1000_vm10, %v988_v46, %v1003_v20 }
 0x17f   : > { %v855_v58 = vxor.u32 2147483648, %v10137_v53  ;;  %vm15412_vm15 = vcmask 1045504   ;;  %v951_v40 = vsel %vm11423_vm5, 0, %v949_v10  ;;  %v1009_v39 = vsel %vm999_vm11, %v1006_v41, %v1008_v14 }
 0x180   : > { %v1012_v49 = vsel %vm1000_vm10, %v994_v44, %v1011_v33  ;;  %v859_v51 = vsel %vm857_vm2, %v858_v50, %v10137_v53  ;;  %v941_v59 = vor.u32 4788187, %v940_v2  ;;  %v944_v38 = vcvt.s32.f32 %v937_v8 }
 0x181   : > { %v1013_v6 = vsel %vm999_vm11, %v1010_v43, %v1012_v49  ;;  %v856_v46 = vsel %vm854_vm4, %v10135_v62, %v855_v58  ;;  %v1005_v45 = vsel %vm999_vm11, %v1002_v13, %v1004_v34  ;;  %v1118_v36 = vrot.slane %v11380_v56, 2 }
 0x182   : > { %v11471_v26 = vmul.u32.u64.low %v11405_v32, %v1013_v6  ;;  %v11472_v30 = vmul.u32.u64.high %v11405_v32, %v1013_v6, %v11471_v26  ;;  %v860_v47 = vsel %vm853_vm6, %v856_v46, %v859_v51  ;;  %v942_v44 = vand.u32 2147483647, %v941_v59 }
 0x183   : > { %v11477_v4 = vmul.u32.u64.low %v11405_v32, %v1009_v39  ;;  %v11478_v28 = vmul.u32.u64.high %v11405_v32, %v1009_v39, %v11477_v4  ;;  %v861_v54 = vsel %vm850_vm7, nan, %v860_v47  ;;  %v1021_v41 = vmul.u32 %v11405_v32, %v1005_v45 }
 0x184   : > { %v1072_v10 = vmul.f32 %v861_v54, %v861_v54  ;;  %v945_v27 = vmul.f32 %v944_v38, %v942_v44  ;;  %v1119_v13 = vsel %vm15412_vm15, %v1117_v48, %v1118_v36  ;;  %v955_v43 = vadd.s32 3, %v951_v40 }
 0x185   : > { %vm1023_vm2 = vc.u32 %v11472_v30, %v11477_v4  ;;  %v1024_v24 = vadd.s32 1, %v11478_v28  ;;  %vm954_vm6 = vweird.f32 %v11042_v35  ;;  %v1022_v47 = vadd.s32 %v11477_v4, %v11472_v30 }
 0x186   : > { %v1081_v11 = vmul.f32 %v11192_v29, %v1072_v10  ;;  %v946_v12 = vxor.u32 2147483648, %v945_v27  ;;  %v956_v2 = vand.u32 3, %v955_v43  ;;  %vm968_vm8 = vcmp.lt.s32.totalorder %v11255_v52, 0 }
 0x187   : > { %v1025_v22 = vsel %vm1023_vm2, %v1024_v24, %v11478_v28  ;;  %vm967_vm9 = vcmp.le.f32.partialorder %v966_v42, 0.7853982  ;;  %vm1058_vm2 = vweird.f32 %v11255_v52 }
 0x188   : > { %v11488_v20 = vadd.f32 %v1081_v11, %v11011_v17  ;;  %v947_v57 = vsel %vm864_vm1, %v946_v12, %v945_v27  ;;  %v1026_v32 = vadd.s32 %v1025_v22, %v1021_v41  ;;  %vm961_vm1 = vcmp.eq.s32.totalorder %v956_v2, 2 }
 0x189   : > { %v950_v62 = vsel %vm11423_vm5, %v11042_v35, %v947_v57  ;;  %vm958_vm4 = vcmp.eq.s32.totalorder %v956_v2, 0  ;;  %vm957_vm5 = vcmp.lt.s32.totalorder %v956_v2, 2 }
 0x18a   : > { %v1120_v14 = vrot.slane %v11488_v20, 2  ;;  %10138 = vcosq.f32 %v950_v62  ;;  %v1027_v33 = vadd.s32 536870912, %v1026_v32  ;;  %v1098_v44 = vrot.slane %v11488_v20, 6 }
 0x18b   : > { %10140 = vsinq.f32 %v950_v62 }
 0x18c   : > { %v1121_v53 = vsel %vm15412_vm15, %v1118_v36, %v1120_v14  ;;  %v1028_v8 = vshrl.u32 %v1027_v33, 30  ;;  %v1099_v12 = vsel %vm1094_vm13, %v1096_v31, %v1098_v44 }
 0x18d   : > { %v1132_v50 = vpack.c.bf16 %v1121_v53, %v1119_v13 }
 0x18e   : > { %v1029_v23 = vshll.u32 %v1028_v8, 30  ;;  %v1052_v33 = vsub.s32 4, %v1028_v8 }
 0x18f   : > { %9385 = vmatmul.mubr.bf16.vlgmr.msra.gmra.mrb[0].mxu1 %v1132_v50 }
 0x190   : > { %9388 = vmatprep.mubr.msk.bf16.mxu1 %vm15399_vm0, %v15355_v0  ;;  %v1030_v21 = vsub.s32 %v1026_v32, %v1029_v23  ;;  %v1053_v31 = vsel %vm968_vm8, %v1052_v33, %v1028_v8 }
 0x191   : > { %v1055_v2 = vsel %vm967_vm9, 0, %v1053_v31 }
 0x192   : > { %v1032_v48 = vsub.s32 0, %v1030_v21 }
 0x194   : > { %v10139_v34 = vpop.eup %10138  ;;  %v8592_v39 = vmin.u32 %v1032_v48, %v1030_v21 }
 0x195   : > { %v10141_v58 = vpop.eup %10140  ;;  %v962_v40 = vxor.u32 2147483648, %v10139_v34 }
 0x196   : > { %v959_v49 = vxor.u32 2147483648, %v10141_v58  ;;  %v1034_v59 = vclz %v8592_v39 }
 0x197   : > { %v963_v51 = vsel %vm961_vm1, %v962_v40, %v10141_v58  ;;  %vm11531_vm1 = vmpackc.low %vm15412_vm15, %vm15412_vm15 }
 0x198   : > { %v960_v38 = vsel %vm958_vm4, %v10139_v34, %v959_v49  ;;  %v8593_v46 = vadd.s32 4294967294, %v1034_v59 }
 0x199   : > { %v964_v6 = vsel %vm957_vm5, %v960_v38, %v963_v51 }
 0x19a   : > { %v965_v45 = vsel %vm954_vm6, nan, %v964_v6  ;;  %vm8594_vm7 = vcmp.lt.s32.totalorder %v8593_v46, 0 }
 0x19b   : > { %v1073_v26 = vmul.f32 %v965_v45, %v965_v45  ;;  %v1037_v28 = vsel %vm8594_vm7, 0, %v8593_v46 }
 0x19c   : > { %v1038_v54 = vsub.s32 32, %v1037_v28  ;;  %v1039_v10 = vshll.u32 %v1030_v21, %v1037_v28  ;;  %v1042_v27 = vsub.s32 4294967266, %v1037_v28  ;;  %v1059_v21 = vadd.s32 3, %v1055_v2 }
 0x19d   : > { %v1082_v36 = vmul.f32 %v11192_v29, %v1073_v26 }
 0x19e   : > { %v1040_v41 = vshrl.u32 %v1022_v47, %v1038_v54  ;;  %v1043_v11 = vadd.s32 127, %v1042_v27  ;;  %v1060_v48 = vand.u32 3, %v1059_v21 }
 0x19f   : > { %v1087_v35 = vadd.f32 %v1082_v36, %v11030_v25 }
 0x1a0   : > { %v1041_v4 = vor.u32 %v1040_v41, %v1039_v10  ;;  %v1044_v57 = vshll.u32 %v1043_v11, 23  ;;  %vm1065_vm10 = vcmp.eq.s32.totalorder %v1060_v48, 2  ;;  %vm1062_vm11 = vcmp.eq.s32.totalorder %v1060_v48, 0 }
 0x1a1   : > { %v1114_v24 = vpack.c.bf16 %v1087_v35, %v11488_v20  ;;  %v1100_v30 = vrot.slane %v1087_v35, 6  ;;  %vm1061_vm14 = vcmp.lt.s32.totalorder %v1060_v48, 2  ;;  %v1122_v6 = vrot.slane %v1087_v35, 2 }
 0x1a2   : > { %v1045_v62 = vor.u32 4788187, %v1044_v57  ;;  %v1048_v32 = vcvt.s32.f32 %v1041_v4 }
 0x1a3   : > { %1323 = vmatprep.mubr.bf16.mxu0 %v1114_v24  ;;  %v1101_v22 = vsel %vm1094_vm13, %v1098_v44, %v1100_v30  ;;  %v1123_v45 = vsel %vm15412_vm15, %v1120_v14, %v1122_v6  ;;  %v11542_v24 = vld [vmem:[#allocation7] sm:$0xff] }
 0x1a4   : > { %v1111_v13 = vpack.c.bf16 %v1101_v22, %v1099_v12  ;;  %v1046_v43 = vand.u32 2147483647, %v1045_v62  ;;  %v11540_v12 = vsub.s32 1, %v10991_v60 }
 0x1a6   : > { %1324 = vmatmul.mubr.bf16.gmra.mrb[4].mxu0 %v1111_v13  ;;  %v1049_v53 = vmul.f32 %v1048_v32, %v1046_v43 }
 0x1a8   : > { %v1050_v56 = vxor.u32 2147483648, %v1049_v53 }
 0x1aa   : > { %v1051_v50 = vsel %vm968_vm8, %v1050_v56, %v1049_v53 }
 0x1ab   : > { %v1054_v23 = vsel %vm967_vm9, %v11255_v52, %v1051_v50 }
 0x1ac   : > { %10142 = vcosq.f32 %v1054_v23 }
 0x1ad   : > { %10144 = vsinq.f32 %v1054_v23 }
 0x1b6   : > { %v10143_v34 = vpop.eup %10142 }
 0x1b7   : > { %v10145_v58 = vpop.eup %10144  ;;  %v1066_v40 = vxor.u32 2147483648, %v10143_v34 }
 0x1b8   : > { %v1063_v39 = vxor.u32 2147483648, %v10145_v58 }
 0x1b9   : > { %v1067_v42 = vsel %vm1065_vm10, %v1066_v40, %v10145_v58  ;;  %v9946_v40 = vld [vmem:[#allocation10 + $0x40] sm:$0xff]  }
 0x1ba   : > { %v1064_v49 = vsel %vm1062_vm11, %v10143_v34, %v1063_v39  ;;  %v9947_v39 = vld [vmem:[#allocation10] sm:$0xff]   ;;  %9042 = vmatprep.subr.bf16.mxu0 %v9946_v40 }
 0x1bb   : > { %v1068_v8 = vsel %vm1061_vm14, %v1064_v49, %v1067_v42  ;;  %v9948_v42 = vld [vmem:[#allocation10 + $0x80] sm:$0xff]   ;;  %9043 = vmatpush3.bf16.msra.mxu0 %v9947_v39  ;;  %v9949_v49 = vld [vmem:[#allocation10 + $0x48] sm:$0xff]  }
 0x1bc   : > { %v1069_v51 = vsel %vm1058_vm2, nan, %v1068_v8  ;;  %9397 = vmatpush3.bf16.msra.mxu1 %v9948_v42  ;;  %9044 = vmatprep.subr.bf16.mxu0 %v9949_v49  ;;  %v9962_v49 = vld [vmem:[#allocation10 + $0x28] sm:$0xff]  }
 0x1bd   : > { %v1074_v59 = vmul.f32 %v1069_v51, %v1069_v51  ;;  %9398 = vmatprep.subr.bf16.mxu1 %v15355_v0  ;;  %v9950_v51 = vld [vmem:[#allocation10 + $0x8] sm:$0xff]  }
 0x1bf   : > { %v1083_v38 = vmul.f32 %v11192_v29, %v1074_v59  ;;  %v9951_v59 = vld [vmem:[#allocation10 + $0x88] sm:$0xff]   ;;  %9045 = vmatpush3.bf16.msra.mxu0 %v9950_v51 }
 0x1c0   : > { %9399 = vmatpush3.bf16.msra.mxu1 %v9951_v59 }
 0x1c1   : > { %v1088_v46 = vadd.f32 %v1083_v38, %v11014_v19  ;;  %9400 = vmatprep.subr.bf16.mxu1 %v15355_v0 }
 0x1c3   : > { %v1124_v26 = vrot.slane %v1088_v46, 2  ;;  %v1115_v47 = vpack.c.bf16 %v1088_v46, %v1088_v46  ;;  %v1102_v44 = vrot.slane %v1088_v46, 6 }
 0x1c5   : > { %v1125_v28 = vsel %vm15412_vm15, %v1122_v6, %v1124_v26  ;;  %1331 = vmatprep.mubr.bf16.mxu0 %v1115_v47  ;;  %v1103_v52 = vsel %vm1094_vm13, %v1100_v30, %v1102_v44  ;;  %v8624_v29 = vpack.c.bf16 %v1124_v26, %v1124_v26  ;;  %v1138_v30 = vrot.slane %v11542_v24, %v11540_v12 }
 0x1c6   : > { %v1133_v36 = vpack.c.bf16 %v1125_v28, %v1123_v45  ;;  %v1112_v54 = vpack.c.bf16 %v1103_v52, %v1103_v52  ;;  %v9952_v45 = vld [vmem:[#allocation10 + $0x50] sm:$0xff]  }
 0x1c7   : > { %v9953_v28 = vld [vmem:[#allocation10 + $0x10] sm:$0xff]   ;;  %9046 = vmatprep.subr.bf16.mxu0 %v9952_v45 }
 0x1c8   : > { %9389 = vmatmul.mubr.bf16.gmra.mrb[4].mxu1 %v1133_v36  ;;  %1332 = vmatmul.mubr.bf16.gmra.mrb[8].mxu0 %v1112_v54  ;;  %v9954_v52 = vld [vmem:[#allocation10 + $0x90] sm:$0xff]  }
 0x1c9   : > { %9392 = vmatprep.mubr.msk.bf16.mxu1 %vm15399_vm0, %v15355_v0  ;;  %9047 = vmatpush3.bf16.msra.mxu0 %v9953_v28  ;;  %v9965_v45 = vld [vmem:[#allocation10 + $0x30] sm:$0xff]  }
 0x1ca   : > { %9401 = vmatpush3.bf16.msra.mxu1 %v9954_v52 }
 0x1cb   : > { %9402 = vmatprep.subr.bf16.mxu1 %v15355_v0 }
 0x1d0   : > { %9393 = vmatmul.mubr.msk.bf16.gmra.mrb[8].mxu1 %vm11531_vm1, %v8624_v29 }
 0x1d1   : > { %9412 = vmatprep.mubr.msk.bf16.mxu1 %vm15399_vm0, %v15355_v0 }
 0x24b   : > { %v9013_v14 = vpop.f32.mrb[0].mxu0 }
 0x24c   : > { %v9014_v10 = vpop.f32.mrb[1].mxu0 }
 0x24d   : > { %v9015_v27 = vadd.f32 %v9014_v10, %v9013_v14  ;;  %v9016_v35 = vpop.f32.mrb[2].mxu0 }
 0x24e   : > { %v9017_v41 = vpop.f32.mrb[3].mxu0 }
 0x24f   : > { %v9018_v11 = vadd.f32 %v9017_v41, %v9016_v35  ;;  %v1318_v4 = vadd.f32 %v9015_v27, %v1138_v30 }
 0x251   : > { %v1321_v57 = vadd.f32 %v9018_v11, %v1138_v30  ;;  %v9955_v11 = vld [vmem:[#allocation10 + $0x58] sm:$0xff]  }
 0x252   : > { %9048 = vmatprep.subr.bf16.mxu0 %v9955_v11 }
 0x262   : > { %v1373_v22 = vpop.f32.mrb[0].mxu1 }
 0x263   : > { %v11546_v62 = vadd.f32 %v1373_v22, %v1318_v4  ;;  %v9386_v32 = vpop.f32.mrb[1].mxu1 }
 0x264   : > { %v1376_v13 = vpop.f32.mrb[2].mxu1 }
 0x265   : > { %v11548_v43 = vadd.f32 %v1376_v13, %v1321_v57  ;;  %v9387_v33 = vpop.f32.mrb[3].mxu1  ;;  %v1405_v53 = vmul.f32 %v11546_v62, %v11546_v62  ;;  %v9956_v13 = vld [vmem:[#allocation10 + $0x18] sm:$0xff]  }
 0x266   : > { %v9957_v33 = vld [vmem:[#allocation10 + $0x98] sm:$0xff]   ;;  %9049 = vmatpush3.bf16.msra.mxu0 %v9956_v13  ;;  %v11574_v13 = vsub.s32 2, %v10991_v60 }
 0x267   : > { %v1395_v56 = vadd.f32 %v11548_v43, %v11546_v62  ;;  %v1406_v31 = vmul.f32 %v11548_v43, %v11548_v43  ;;  %9403 = vmatpush3.bf16.msra.mxu1 %v9957_v33 }
 0x268   : > { %9404 = vmatprep.subr.bf16.mxu1 %v15355_v0  ;;  %15459 = vst [vmem:[#allocation21_spill] sm:$0xff] %v11574_v13 }
 0x269   : > { %v1410_v50 = vadd.f32 %v1406_v31, %v1405_v53  ;;  %v9958_v31 = vld [vmem:[#allocation10 + $0x60] sm:$0xff]  }
 0x26a   : > { %9050 = vmatprep.subr.bf16.mxu0 %v9958_v31 }
 0x279   : > { %v9019_v23 = vpop.f32.mrb[4].mxu0 }
 0x27a   : > { %v9020_v2 = vpop.f32.mrb[5].mxu0 }
 0x27b   : > { %v9021_v21 = vadd.f32 %v9020_v2, %v9019_v23  ;;  %v9022_v48 = vpop.f32.mrb[6].mxu0 }
 0x27c   : > { %v9023_v34 = vpop.f32.mrb[7].mxu0 }
 0x27d   : > { %v9024_v58 = vadd.f32 %v9023_v34, %v9022_v48  ;;  %v1326_v8 = vadd.f32 %v9021_v21, %v1138_v30  ;;  %v9959_v21 = vld [vmem:[#allocation10 + $0x20] sm:$0xff]  }
 0x27e   : > { %9051 = vmatpush3.bf16.msra.mxu0 %v9959_v21  ;;  %v11582_v21 = vsub.s32 4, %v10991_v60 }
 0x27f   : > { %v1329_v38 = vadd.f32 %v9024_v58, %v1138_v30 }
 0x280   : > { %15461 = vst [vmem:[#allocation23_spill] sm:$0xff] %v11582_v21 }
 0x29b   : > { %v1381_v6 = vpop.f32.mrb[4].mxu1  ;;  %v9025_v46 = vpop.f32.mrb[8].mxu0 }
 0x29c   : > { %v11558_v26 = vadd.f32 %v1381_v6, %v1326_v8  ;;  %v9390_v47 = vpop.f32.mrb[5].mxu1  ;;  %v9026_v44 = vpop.f32.mrb[9].mxu0  ;;  %v9963_v8 = vld [vmem:[#allocation10 + $0xa8] sm:$0xff]  }
 0x29d   : > { %v1384_v36 = vpop.f32.mrb[6].mxu1  ;;  %v9027_v54 = vadd.f32 %v9026_v44, %v9025_v46  ;;  %v9028_v29 = vpop.f32.mrb[10].mxu0  ;;  %v9966_v47 = vld [vmem:[#allocation10 + $0xb0] sm:$0xff]   ;;  %v9967_v44 = vld [vmem:[#allocation10 + $0x78] sm:$0xff]  }
 0x29e   : > { %v1396_v14 = vadd.f32 %v1395_v56, %v11558_v26  ;;  %v1407_v10 = vmul.f32 %v11558_v26, %v11558_v26  ;;  %v11563_v27 = vadd.f32 %v1384_v36, %v1329_v38  ;;  %v9391_v35 = vpop.f32.mrb[7].mxu1  ;;  %v9029_v41 = vpop.f32.mrb[11].mxu0  ;;  %v9964_v38 = vld [vmem:[#allocation10 + $0x70] sm:$0xff]   ;;  %v9968_v36 = vld [vmem:[#allocation10 + $0x38] sm:$0xff]  }
 0x29f   : > { %v1334_v32 = vadd.f32 %v9027_v54, %v1138_v30  ;;  %v9961_v30 = vld [vmem:[#allocation10 + $0x68] sm:$0xff]  }
 0x2a0   : > { %v1411_v4 = vadd.f32 %v1410_v50, %v1407_v10  ;;  %v1397_v57 = vadd.f32 %v1396_v14, %v11563_v27  ;;  %v1408_v22 = vmul.f32 %v11563_v27, %v11563_v27  ;;  %v9960_v50 = vld [vmem:[#allocation10 + $0xa0] sm:$0xff]   ;;  %9052 = vmatprep.subr.bf16.mxu0 %v9961_v30 }
 0x2a1   : > { %9405 = vmatpush3.bf16.msra.mxu1 %v9960_v50  ;;  %9053 = vmatpush3.bf16.msra.mxu0 %v9962_v49 }
 0x2a2   : > { %v1412_v53 = vadd.f32 %v1411_v4, %v1408_v22  ;;  %9406 = vmatprep.subr.bf16.mxu1 %v15355_v0  ;;  %9054 = vmatprep.subr.bf16.mxu0 %v9964_v38 }
 0x2a3   : > { %v1389_v56 = vpop.f32.mrb[8].mxu1 }
 0x2a4   : > { %v1390_v23 = vadd.f32 %v1389_v56, %v1334_v32  ;;  %v9394_v2 = vpop.f32.mrb[9].mxu1 }
 0x2a5   : > { %v1392_v48 = vpop.f32.mrb[10].mxu1  ;;  %9407 = vmatpush3.bf16.msra.mxu1 %v9963_v8  ;;  %9055 = vmatpush3.bf16.msra.mxu0 %v9965_v45  ;;  %v11579_v2 = vsub.s32 3, %v10991_v60  ;;  %v11592_v8 = vrot.slane %v11542_v24, %v11582_v21 }
 0x2a6   : > { %v1398_v34 = vadd.f32 %v1397_v57, %v1390_v23  ;;  %v1409_v58 = vmul.f32 %v1390_v23, %v1390_v23  ;;  %v9395_v40 = vpop.f32.mrb[11].mxu1  ;;  %9408 = vmatprep.subr.bf16.mxu1 %v15355_v0  ;;  %9056 = vmatprep.subr.bf16.mxu0 %v9967_v44 }
 0x2a7   : > { %15460 = vst [vmem:[#allocation22_spill] sm:$0xff] %v11579_v2 }
 0x2a8   : > { %v1399_v39 = vrot.slane %v1398_v34, 4  ;;  %v1413_v42 = vadd.f32 %v1412_v53, %v1409_v58 }
 0x2a9   : > { %9409 = vmatpush3.bf16.msra.mxu1 %v9966_v47  ;;  %9057 = vmatpush3.bf16.msra.mxu0 %v9968_v36 }
 0x2aa   : > { %v1400_v51 = vadd.f32 %v1399_v39, %v1398_v34  ;;  %v1414_v59 = vrot.slane %v1413_v42, 4  ;;  %9410 = vmatprep.subr.bf16.mxu1 %v15355_v0 }
 0x2ac   : > { %v1401_v6 = vrot.slane %v1400_v51, 2  ;;  %v1415_v46 = vadd.f32 %v1414_v59, %v1413_v42  ;;  %v9969_v42 = vld [vmem:[#allocation10 + $0xb8] sm:$0xff]  }
 0x2ad   : > { %9411 = vmatpush3.bf16.msra.mxu1 %v9969_v42 }
 0x2ae   : > { %v1402_v28 = vadd.f32 %v1401_v6, %v1400_v51  ;;  %v1416_v52 = vrot.slane %v1415_v46, 2  ;;  %9424 = vmatprep.subr.bf16.mxu1 %v15355_v0 }
 0x2b0   : > { %v1403_v54 = vrot.slane %v1402_v28, 1  ;;  %v1417_v29 = vadd.f32 %v1416_v52, %v1415_v46 }
 0x2b2   : > { %v1404_v14 = vadd.f32 %v1403_v54, %v1402_v28  ;;  %v1418_v10 = vrot.slane %v1417_v29, 1 }
 0x2b4   : > { %v1419_v35 = vadd.f32 %v1418_v10, %v1417_v29  ;;  %v1420_v41 = vmul.f32 0.025, %v1404_v14 }
 0x2b6   : > { %v1421_v11 = vmul.f32 0.025, %v1419_v35  ;;  %v1422_v4 = vmul.f32 %v1420_v41, %v1420_v41 }
 0x2b8   : > { %v1423_v57 = vsub.f32 %v1421_v11, %v1422_v4 }
 0x2ba   : > { %v1424_v22 = vmax.f32 %v1423_v57, 0.0 }
 0x2bc   : > { %v1425_v32 = vadd.f32 1e-05, %v1424_v22 }
 0x2be   : > { %10146 = vrsqrt.f32 %v1425_v32 }
 0x2c8   : > { %v10147_v33 = vpop.eup %10146 }
 0x2c9   : > { %v1427_v53 = vmul.f32 %v11542_v24, %v10147_v33 }
 0x2cb   : > { %v1431_v56 = vrot.slane %v1427_v53, %v11574_v13  ;;  %v1437_v31 = vmul.f32 %v1427_v53, %v1420_v41 }
 0x2cd   : > { %v1436_v50 = vmul.f32 %v1431_v56, %v1390_v23  ;;  %v1439_v48 = vrot.slane %v1437_v31, 7  ;;  %v1432_v34 = vmul.f32 %v1431_v56, %v11546_v62  ;;  %v1433_v58 = vmul.f32 %v1431_v56, %v11548_v43 }
 0x2ce   : > { %v1434_v40 = vmul.f32 %v1431_v56, %v11558_v26  ;;  %v1435_v30 = vmul.f32 %v1431_v56, %v11563_v27 }
 0x2cf   : > { %v1441_v39 = vsub.f32 %v11542_v24, %v1439_v48 }
 0x2d1   : > { %v1445_v49 = vrot.slane %v1441_v39, %v11579_v2 }
 0x2d3   : > { %v11595_v23 = vadd.f32 %v1445_v49, %v1436_v50  ;;  %v11597_v62 = vadd.f32 %v1445_v49, %v1432_v34  ;;  %v11599_v43 = vadd.f32 %v1445_v49, %v1433_v58  ;;  %v11601_v26 = vadd.f32 %v1445_v49, %v1434_v40 }
 0x2d4   : > { %v11603_v27 = vadd.f32 %v1445_v49, %v1435_v30 }
 0x2d5   : > { %v11607_v51 = vmul.f32 %v11592_v8, %v11595_v23  ;;  %v11611_v24 = vmul.f32 %v11592_v8, %v11597_v62  ;;  %v11615_v59 = vmul.f32 %v11592_v8, %v11599_v43 }
 0x2d7   : > { %v15357_v38 = vand.u32 2147483647, %v11607_v51  ;;  %v1879_v6 = vand.u32 2139095040, %v11607_v51  ;;  %v15359_v46 = vand.u32 2147483647, %v11611_v24  ;;  %v1463_v45 = vand.u32 2139095040, %v11611_v24 }
 0x2d8   : > { %v1567_v36 = vand.u32 2139095040, %v11615_v59 }
 0x2d9   : > { %v1880_v47 = vshrl.u32 %v1879_v6, 23  ;;  %v1883_v44 = vand.u32 8388607, %v15357_v38  ;;  %v1464_v28 = vshrl.u32 %v1463_v45, 23  ;;  %v1467_v52 = vand.u32 8388607, %v15359_v46 }
 0x2da   : > { %v1568_v14 = vshrl.u32 %v1567_v36, 23 }
 0x2db   : > { %v8642_v54 = vadd.s32 4294967169, %v1880_v47  ;;  %v8626_v29 = vadd.s32 4294967169, %v1464_v28  ;;  %v1884_v35 = vor.u32 8388608, %v1883_v44  ;;  %v1468_v41 = vor.u32 8388608, %v1467_v52 }
 0x2dc   : > { %v8630_v4 = vadd.s32 4294967169, %v1568_v14 }
 0x2dd   : > { %v1886_v10 = vadd.s32 1, %v8642_v54  ;;  %v1470_v11 = vadd.s32 1, %v8626_v29  ;;  %v11626_v53 = vshll.u32 %v1884_v35, 8  ;;  %v11628_v56 = vshll.u32 %v1468_v41, 8 }
 0x2de   : > { %v11632_v34 = vadd.s32 1, %v8630_v4 }
 0x2df   : > { %vm1887_vm4 = vcmp.gt.s32.totalorder %v1886_v10, 0  ;;  %vm1471_vm5 = vcmp.gt.s32.totalorder %v1470_v11, 0 }
 0x2e0   : > { %v1888_v57 = vsel %vm1887_vm4, %v1886_v10, 0  ;;  %v1472_v32 = vsel %vm1471_vm5, %v1470_v11, 0  ;;  %vm1575_vm10 = vcmp.gt.s32.totalorder %v11632_v34, 0 }
 0x2e1   : > { %v1890_v22 = vand.u32 31, %v1888_v57  ;;  %v1889_v33 = vshrl.u32 %v1888_v57, 5  ;;  %v11630_v50 = vshrl.u32 %v1472_v32, 5  ;;  %v1474_v48 = vand.u32 31, %v1472_v32 }
 0x2e3   : > { %v1891_v31 = vsub.s32 32, %v1890_v22  ;;  %v1893_v58 = vshll.u32 %v15378_v61, %v1890_v22  ;;  %v1896_v40 = vshll.u32 %v15369_v1, %v1890_v22  ;;  %v1899_v30 = vshll.u32 %v15367_v3, %v1890_v22 }
 0x2e4   : > { %v1902_v39 = vshll.u32 %v15365_v5, %v1890_v22  ;;  %v1905_v45 = vshll.u32 %v15363_v7, %v1890_v22  ;;  %vm1908_vm6 = vcmp.lt.s32.totalorder %v1889_v33, 1  ;;  %vm1909_vm7 = vcmp.lt.s32.totalorder %v1889_v33, 2 }
 0x2e5   : > { %v1894_v42 = vshrl.u32 %v15369_v1, %v1891_v31  ;;  %v1897_v49 = vshrl.u32 %v15367_v3, %v1891_v31  ;;  %v1900_v6 = vshrl.u32 %v15365_v5, %v1891_v31  ;;  %v1903_v47 = vshrl.u32 %v15363_v7, %v1891_v31 }
 0x2e6   : > { %v1906_v44 = vshrl.u32 %v15360_v18, %v1891_v31  ;;  %v1475_v54 = vsub.s32 32, %v1474_v48  ;;  %v1892_v29 = vshrl.u32 %v15378_v61, %v1891_v31  ;;  %vm1911_vm8 = vcmp.lt.s32.totalorder %v1889_v33, 4 }
 0x2e7   : > { %v1895_v28 = vor.u32 %v1894_v42, %v1893_v58  ;;  %v1898_v52 = vor.u32 %v1897_v49, %v1896_v40  ;;  %v1901_v36 = vor.u32 %v1900_v6, %v1899_v30  ;;  %v1904_v14 = vor.u32 %v1903_v47, %v1902_v39 }
 0x2e8   : > { %v1907_v10 = vor.u32 %v1906_v44, %v1905_v45  ;;  %vm1910_vm9 = vcmp.lt.s32.totalorder %v1889_v33, 3  ;;  %v1477_v22 = vshll.u32 %v15378_v61, %v1474_v48  ;;  %v1480_v32 = vshll.u32 %v15369_v1, %v1474_v48 }
 0x2e9   : > { %v1913_v35 = vsel %vm1911_vm8, %v1901_v36, 2102212464  ;;  %v1916_v41 = vsel %vm1908_vm6, %v1895_v28, %v1898_v52  ;;  %v1920_v11 = vsel %vm1908_vm6, %v1898_v52, %v1901_v36  ;;  %v1917_v4 = vsel %vm1911_vm8, %v1904_v14, 920167782 }
 0x2ea   : > { %v1921_v57 = vsel %vm1911_vm8, %v1907_v10, 1326507024  ;;  %v1912_v58 = vsel %vm1908_vm6, %v1892_v29, %v1895_v28  ;;  %v1918_v40 = vsel %vm1910_vm9, %v1901_v36, %v1917_v4  ;;  %v1478_v31 = vshrl.u32 %v15369_v1, %v1475_v54 }
 0x2eb   : > { %v1922_v30 = vsel %vm1910_vm9, %v1904_v14, %v1921_v57  ;;  %v1914_v39 = vsel %vm1910_vm9, %v1898_v52, %v1913_v35  ;;  %v1919_v42 = vsel %vm1909_vm7, %v1916_v41, %v1918_v40  ;;  %v1481_v6 = vshrl.u32 %v15367_v3, %v1475_v54 }
 0x2ec   : > { %v1923_v49 = vsel %vm1909_vm7, %v1920_v11, %v1922_v30  ;;  %v11659_v44 = vmul.u32.u64.low %v11626_v53, %v1919_v42  ;;  %v11660_v10 = vmul.u32.u64.high %v11626_v53, %v1919_v42, %v11659_v44  ;;  %v1479_v28 = vor.u32 %v1478_v31, %v1477_v22 }
 0x2ed   : > { %v11655_v45 = vmul.u32.u64.low %v11626_v53, %v1923_v49  ;;  %v11656_v47 = vmul.u32.u64.high %v11626_v53, %v1923_v49, %v11655_v45  ;;  %v1482_v36 = vor.u32 %v1481_v6, %v1480_v32  ;;  %v1483_v29 = vshll.u32 %v15367_v3, %v1474_v48 }
 0x2ee   : > { %v1484_v52 = vshrl.u32 %v15365_v5, %v1475_v54  ;;  %v1486_v14 = vshll.u32 %v15365_v5, %v1474_v48  ;;  %v1487_v35 = vshrl.u32 %v15363_v7, %v1475_v54  ;;  %v1490_v41 = vshrl.u32 %v15360_v18, %v1475_v54 }
 0x2ef   : > { %v1915_v11 = vsel %vm1909_vm7, %v1912_v58, %v1914_v39  ;;  %v1476_v4 = vshrl.u32 %v15378_v61, %v1475_v54  ;;  %v1489_v22 = vshll.u32 %v15363_v7, %v1474_v48  ;;  %vm1933_vm11 = vc.u32 %v11656_v47, %v11659_v44 }
 0x2f0   : > { %v1485_v57 = vor.u32 %v1484_v52, %v1483_v29  ;;  %v1934_v32 = vadd.s32 1, %v11660_v10  ;;  %v1488_v40 = vor.u32 %v1487_v35, %v1486_v14  ;;  %vm1492_vm14 = vcmp.lt.s32.totalorder %v11630_v50, 1 }
 0x2f1   : > { %v1491_v30 = vor.u32 %v1490_v41, %v1489_v22  ;;  %vm1493_vm2 = vcmp.lt.s32.totalorder %v11630_v50, 2  ;;  %vm1495_vm4 = vcmp.lt.s32.totalorder %v11630_v50, 4  ;;  %v1500_v33 = vsel %vm1492_vm14, %v1479_v28, %v1482_v36 }
 0x2f2   : > { %vm1494_vm5 = vcmp.lt.s32.totalorder %v11630_v50, 3  ;;  %v1497_v54 = vsel %vm1495_vm4, %v1485_v57, 2102212464  ;;  %v1501_v58 = vsel %vm1495_vm4, %v1488_v40, 920167782  ;;  %v1504_v31 = vsel %vm1492_vm14, %v1482_v36, %v1485_v57 }
 0x2f3   : > { %v1935_v48 = vsel %vm1933_vm11, %v1934_v32, %v11660_v10  ;;  %v1496_v39 = vsel %vm1492_vm14, %v1476_v4, %v1479_v28  ;;  %v1502_v42 = vsel %vm1494_vm5, %v1485_v57, %v1501_v58  ;;  %v1505_v49 = vsel %vm1495_vm4, %v1491_v30, 1326507024 }
 0x2f4   : > { %v1498_v6 = vsel %vm1494_vm5, %v1482_v36, %v1497_v54  ;;  %v1503_v45 = vsel %vm1493_vm2, %v1500_v33, %v1502_v42  ;;  %v1506_v29 = vsel %vm1494_vm5, %v1488_v40, %v1505_v49  ;;  %v1576_v52 = vsel %vm1575_vm10, %v11632_v34, 0 }
 0x2f5   : > { %v1931_v14 = vmul.u32 %v11626_v53, %v1915_v11  ;;  %v1507_v35 = vsel %vm1493_vm2, %v1504_v31, %v1506_v29  ;;  %v11689_v41 = vmul.u32.u64.low %v11628_v56, %v1503_v45  ;;  %v11690_v10 = vmul.u32.u64.high %v11628_v56, %v1503_v45, %v11689_v41 }
 0x2f6   : > { %v11694_v28 = vmul.u32.u64.low %v11628_v56, %v1507_v35  ;;  %v11695_v36 = vmul.u32.u64.high %v11628_v56, %v1507_v35, %v11694_v28  ;;  %v1499_v57 = vsel %vm1493_vm2, %v1496_v39, %v1498_v6  ;;  %v1578_v22 = vand.u32 31, %v1576_v52 }
 0x2f7   : > { %v1936_v4 = vadd.s32 %v1935_v48, %v1931_v14  ;;  %v1518_v34 = vadd.s32 1, %v11690_v10  ;;  %v15358_v53 = vand.u32 2147483647, %v11615_v59  ;;  %v11703_v32 = vmul.f32 %v11592_v8, %v11601_v26 }
 0x2f8   : > { %v1579_v11 = vsub.s32 32, %v1578_v22  ;;  %v1515_v40 = vmul.u32 %v11628_v56, %v1499_v57  ;;  %vm1517_vm6 = vc.u32 %v11695_v36, %v11689_v41  ;;  %v1577_v39 = vshrl.u32 %v1576_v52, 5 }
 0x2f9   : > { %v1937_v30 = vadd.s32 536870912, %v1936_v4  ;;  %v1519_v33 = vsel %vm1517_vm6, %v1518_v34, %v11690_v10  ;;  %v1571_v54 = vand.u32 8388607, %v15358_v53  ;;  %v1671_v31 = vand.u32 2139095040, %v11703_v32 }
 0x2fa   : > { %v1520_v50 = vadd.s32 %v1519_v33, %v1515_v40  ;;  %v1582_v58 = vshrl.u32 %v15369_v1, %v1579_v11  ;;  %v1585_v42 = vshrl.u32 %v15367_v3, %v1579_v11  ;;  %v1588_v56 = vshrl.u32 %v15365_v5, %v1579_v11 }
 0x2fb   : > { %v11715_v49 = vshrl.u32 %v1937_v30, 30  ;;  %v1581_v6 = vshll.u32 %v15378_v61, %v1578_v22  ;;  %v1584_v45 = vshll.u32 %v15369_v1, %v1578_v22  ;;  %v1591_v29 = vshrl.u32 %v15363_v7, %v1579_v11 }
 0x2fc   : > { %v1521_v48 = vadd.s32 536870912, %v1520_v50  ;;  %v1587_v35 = vshll.u32 %v15367_v3, %v1578_v22  ;;  %v1590_v10 = vshll.u32 %v15365_v5, %v1578_v22  ;;  %v1594_v52 = vshrl.u32 %v15360_v18, %v1579_v11 }
 0x2fd   : > { %v1583_v28 = vor.u32 %v1582_v58, %v1581_v6  ;;  %v1593_v57 = vshll.u32 %v15363_v7, %v1578_v22  ;;  %v1672_v34 = vshrl.u32 %v1671_v31, 23  ;;  %v1586_v30 = vor.u32 %v1585_v42, %v1584_v45 }
 0x2fe   : > { %v11720_v14 = vshrl.u32 %v1521_v48, 30  ;;  %v1589_v33 = vor.u32 %v1588_v56, %v1587_v35  ;;  %v1592_v55 = vor.u32 %v1591_v29, %v1590_v10  ;;  %v1572_v0 = vor.u32 8388608, %v1571_v54 }
 0x2ff   : > { %v1595_v38 = vor.u32 %v1594_v52, %v1593_v57  ;;  %vm1599_vm7 = vcmp.lt.s32.totalorder %v1577_v39, 4  ;;  %v1939_v48 = vshll.u32 %v11715_v49, 30  ;;  %vm1596_vm8 = vcmp.lt.s32.totalorder %v1577_v39, 1 }
 0x300   : > { %v1523_v40 = vshll.u32 %v11720_v14, 30  ;;  %v1605_v46 = vsel %vm1599_vm7, %v1592_v55, 920167782  ;;  %vm1598_vm9 = vcmp.lt.s32.totalorder %v1577_v39, 3  ;;  %v8634_v18 = vadd.s32 4294967169, %v1672_v34 }
 0x301   : > { %v1604_v22 = vsel %vm1596_vm8, %v1583_v28, %v1586_v30  ;;  %v1606_v31 = vsel %vm1598_vm9, %v1589_v33, %v1605_v46  ;;  %v1608_v42 = vsel %vm1596_vm8, %v1586_v30, %v1589_v33  ;;  %vm1597_vm10 = vcmp.lt.s32.totalorder %v1577_v39, 2 }
 0x302   : > { %v1524_v53 = vsub.s32 %v1520_v50, %v1523_v40  ;;  %v1609_v54 = vsel %vm1599_vm7, %v1595_v38, 1326507024  ;;  %v1612_v56 = vshll.u32 %v1572_v0, 8  ;;  %v11733_v6 = vsub.s32 %v1936_v4, %v1939_v48 }
 0x303   : > { %v1601_v50 = vsel %vm1599_vm7, %v1589_v33, 2102212464  ;;  %v1610_v29 = vsel %vm1598_vm9, %v1592_v55, %v1609_v54  ;;  %v1580_v35 = vshrl.u32 %v15378_v61, %v1579_v11  ;;  %v1607_v10 = vsel %vm1597_vm10, %v1604_v22, %v1606_v31 }
 0x304   : > { %v1526_v58 = vsub.s32 0, %v1524_v53  ;;  %v1611_v52 = vsel %vm1597_vm10, %v1608_v42, %v1610_v29  ;;  %v1678_v46 = vadd.s32 1, %v8634_v18  ;;  %v15362_v34 = vand.u32 2147483647, %v11703_v32 }
 0x305   : > { %v1600_v38 = vsel %vm1596_vm8, %v1580_v35, %v1583_v28  ;;  %v1602_v0 = vsel %vm1598_vm9, %v1586_v30, %v1601_v50  ;;  %v11743_v4 = vmul.u32.u64.low %v1612_v56, %v1611_v52  ;;  %v11744_v40 = vmul.u32.u64.high %v1612_v56, %v1611_v52, %v11743_v4 }
 0x306   : > { %v8627_v45 = vmin.u32 %v1526_v58, %v1524_v53  ;;  %v11746_v48 = vmul.u32.u64.low %v1612_v56, %v1607_v10  ;;  %v11747_v55 = vmul.u32.u64.high %v1612_v56, %v1607_v10, %v11746_v48  ;;  %vm1679_vm11 = vcmp.gt.s32.totalorder %v1678_v46, 0 }
 0x307   : > { %v1942_v11 = vsub.s32 0, %v11733_v6  ;;  %v1680_v58 = vsel %vm1679_vm11, %v1678_v46, 0  ;;  %v1603_v18 = vsel %vm1597_vm10, %v1600_v38, %v1602_v0  ;;  %v1675_v28 = vand.u32 8388607, %v15362_v34 }
 0x308   : > { %v1528_v57 = vclz %v8627_v45  ;;  %v1682_v22 = vand.u32 31, %v1680_v58  ;;  %vm1621_vm2 = vc.u32 %v11744_v40, %v11746_v48  ;;  %v1516_v30 = vadd.s32 %v11689_v41, %v11695_v36 }
 0x309   : > { %v1622_v45 = vadd.s32 1, %v11747_v55  ;;  %v8643_v50 = vmin.u32 %v1942_v11, %v11733_v6  ;;  %v1619_v29 = vmul.u32 %v1612_v56, %v1603_v18  ;;  %v1681_v7 = vshrl.u32 %v1680_v58, 5 }
 0x30a   : > { %v8628_v33 = vadd.s32 4294967294, %v1528_v57  ;;  %v1683_v39 = vsub.s32 32, %v1682_v22  ;;  %v1685_v11 = vshll.u32 %v15378_v61, %v1682_v22  ;;  %v1691_v18 = vshll.u32 %v15367_v3, %v1682_v22 }
 0x30b   : > { %v1623_v46 = vsel %vm1621_vm2, %v1622_v45, %v11747_v55  ;;  %v1944_v36 = vclz %v8643_v50  ;;  %v15463_v58 = vmov 1326507024   ;;  %vm1462_vm5 = vcmp.lt.s32.totalorder %v11611_v24, 0 }
 0x30c   : > { %vm8629_vm14 = vcmp.lt.s32.totalorder %v8628_v33, 0  ;;  %v1624_v57 = vadd.s32 %v1623_v46, %v1619_v29  ;;  %v1686_v38 = vshrl.u32 %v15369_v1, %v1683_v39  ;;  %v1689_v41 = vshrl.u32 %v15367_v3, %v1683_v39 }
 0x30d   : > { %v1531_v31 = vsel %vm8629_vm14, 0, %v8628_v33  ;;  %v1676_v33 = vor.u32 8388608, %v1675_v28  ;;  %v1692_v55 = vshrl.u32 %v15365_v5, %v1683_v39  ;;  %v15462_v28 = vmov 920167782  }
 0x30e   : > { %v1532_v42 = vsub.s32 32, %v1531_v31  ;;  %v1536_v54 = vsub.s32 4294967266, %v1531_v31  ;;  %v1533_v35 = vshll.u32 %v1524_v53, %v1531_v31  ;;  %v1625_v34 = vadd.s32 536870912, %v1624_v57 }
 0x30f   : > { %v1688_v53 = vshll.u32 %v15369_v1, %v1682_v22  ;;  %vm1700_vm6 = vcmp.lt.s32.totalorder %v1681_v7, 1  ;;  %vm1703_vm7 = vcmp.lt.s32.totalorder %v1681_v7, 4  ;;  %v1684_v2 = vshrl.u32 %v15378_v61, %v1683_v39 }
 0x310   : > { %v1534_v10 = vshrl.u32 %v1516_v30, %v1532_v42  ;;  %v1537_v52 = vadd.s32 127, %v1536_v54  ;;  %v11767_v31 = vshrl.u32 %v1625_v34, 30  ;;  %v1687_v30 = vor.u32 %v1686_v38, %v1685_v11 }
 0x311   : > { %v1694_v42 = vshll.u32 %v15365_v5, %v1682_v22  ;;  %v1695_v54 = vshrl.u32 %v15462_v28, %v1683_v39  ;;  %v1690_v29 = vor.u32 %v1689_v41, %v1688_v53  ;;  %v1693_v11 = vor.u32 %v1692_v55, %v1691_v18 }
 0x312   : > { %v1535_v0 = vor.u32 %v1534_v10, %v1533_v35  ;;  %v1538_v4 = vshll.u32 %v1537_v52, 23  ;;  %v1698_v35 = vshrl.u32 %v15463_v58, %v1683_v39  ;;  %v15464_v10 = vand.u32 2147483647, %v11611_v24 }
 0x313   : > { %v1627_v34 = vshll.u32 %v11767_v31, 30  ;;  %v1696_v46 = vor.u32 %v1695_v54, %v1694_v42  ;;  %v8644_v41 = vadd.s32 4294967294, %v1944_v36  ;;  %v1716_v53 = vshll.u32 %v1676_v33, 8 }
 0x314   : > { %v1539_v56 = vor.u32 4788187, %v1538_v4  ;;  %v1542_v50 = vcvt.s32.f32 %v1535_v0  ;;  %vm11774_vm4 = vcmp.le.f32.partialorder %v15464_v10, 0.7853982  ;;  %v1546_v4 = vsub.s32 4, %v11720_v14 }
 0x315   : > { %v1697_v0 = vshll.u32 %v15462_v28, %v1682_v22  ;;  %v1708_v3 = vsel %vm1700_vm6, %v1687_v30, %v1690_v29  ;;  %vm1702_vm8 = vcmp.lt.s32.totalorder %v1681_v7, 3  ;;  %v1709_v42 = vsel %vm1703_vm7, %v1696_v46, 920167782 }
 0x316   : > { %v1540_v45 = vand.u32 2147483647, %v1539_v56  ;;  %v1628_v56 = vsub.s32 %v1624_v57, %v1627_v34  ;;  %vm1701_vm9 = vcmp.lt.s32.totalorder %v1681_v7, 2  ;;  %v1705_v18 = vsel %vm1703_vm7, %v1693_v11, 2102212464 }
 0x317   : > { %v1699_v10 = vor.u32 %v1698_v35, %v1697_v0  ;;  %v1710_v22 = vsel %vm1702_vm8, %v1693_v11, %v1709_v42  ;;  %v1712_v55 = vsel %vm1700_vm6, %v1690_v29, %v1693_v11  ;;  %v11798_v35 = vmul.f32 %v11592_v8, %v11603_v27 }
 0x318   : > { %v1543_v38 = vmul.f32 %v1542_v50, %v1540_v45  ;;  %v1630_v1 = vsub.s32 0, %v1628_v56  ;;  %v1711_v36 = vsel %vm1701_vm9, %v1708_v3, %v1710_v22  ;;  %v1704_v3 = vsel %vm1700_vm6, %v1684_v2, %v1687_v30 }
 0x319   : > { %v1713_v39 = vsel %vm1703_vm7, %v1699_v10, 1326507024  ;;  %v11792_v45 = vmul.u32.u64.low %v1716_v53, %v1711_v36  ;;  %v11793_v50 = vmul.u32.u64.high %v1716_v53, %v1711_v36, %v11792_v45  ;;  %v1706_v34 = vsel %vm1702_vm8, %v1690_v29, %v1705_v18 }
 0x31a   : > { %v1544_v5 = vxor.u32 2147483648, %v1543_v38  ;;  %v8631_v33 = vmin.u32 %v1630_v1, %v1628_v56  ;;  %v1547_v1 = vsel %vm1462_vm5, %v1546_v4, %v11720_v14  ;;  %vm8645_vm10 = vcmp.lt.s32.totalorder %v8644_v41, 0 }
 0x31b   : > { %v1549_v8 = vsel %vm11774_vm4, 0, %v1547_v1  ;;  %v1726_v14 = vadd.s32 1, %v11793_v50  ;;  %v11814_v2 = vsel %vm8645_vm10, 0, %v8644_v41  ;;  %v1775_v29 = vand.u32 2139095040, %v11798_v35 }
 0x31c   : > { %v1545_v54 = vsel %vm1462_vm5, %v1544_v5, %v1543_v38  ;;  %v1632_v5 = vclz %v8631_v33  ;;  %v1714_v38 = vsel %vm1702_vm8, %v1696_v46, %v1713_v39  ;;  %v1620_v46 = vadd.s32 %v11746_v48, %v11744_v40 }
 0x31d   : > { %v1548_v57 = vsel %vm11774_vm4, %v11611_v24, %v1545_v54  ;;  %v1715_v0 = vsel %vm1701_vm9, %v1712_v55, %v1714_v38  ;;  %v1707_v54 = vsel %vm1701_vm9, %v1704_v3, %v1706_v34  ;;  %v1650_v22 = vsub.s32 4, %v11767_v31 }
 0x31e   : > { %10148 = vcosq.f32 %v1548_v57  ;;  %v8632_v11 = vadd.s32 4294967294, %v1632_v5  ;;  %v11807_v10 = vmul.u32.u64.low %v1716_v53, %v1715_v0  ;;  %v11808_v42 = vmul.u32.u64.high %v1716_v53, %v1715_v0, %v11807_v10 }
 0x31f   : > { %10150 = vsinq.f32 %v1548_v57  ;;  %v1553_v57 = vadd.s32 3, %v1549_v8  ;;  %v1723_v33 = vmul.u32 %v1716_v53, %v1707_v54  ;;  %v1776_v55 = vshrl.u32 %v1775_v29, 23 }
 0x320   : > { %vm8633_vm11 = vcmp.lt.s32.totalorder %v8632_v11, 0  ;;  %vm1725_vm14 = vc.u32 %v11808_v42, %v11792_v45  ;;  %vm1566_vm2 = vcmp.lt.s32.totalorder %v11615_v59, 0  ;;  %v1952_v3 = vsub.s32 4294967266, %v11814_v2 }
 0x321   : > { %v1635_v30 = vsel %vm8633_vm11, 0, %v8632_v11  ;;  %v1727_v41 = vsel %vm1725_vm14, %v1726_v14, %v11793_v50  ;;  %v8638_v53 = vadd.s32 4294967169, %v1776_v55  ;;  %v1554_v38 = vand.u32 3, %v1553_v57 }
 0x322   : > { %v1636_v4 = vsub.s32 32, %v1635_v30  ;;  %v1640_v18 = vsub.s32 4294967266, %v1635_v30  ;;  %v1637_v52 = vshll.u32 %v1628_v56, %v1635_v30  ;;  %v1728_v5 = vadd.s32 %v1727_v41, %v1723_v33 }
 0x323   : > { %v1651_v56 = vsel %vm1566_vm2, %v1650_v22, %v11767_v31  ;;  %v15467_v11 = vand.u32 2147483647, %v11615_v59  ;;  %v1782_v10 = vadd.s32 1, %v8638_v53  ;;  %vm1556_vm6 = vcmp.eq.s32.totalorder %v1554_v38, 0 }
 0x324   : > { %v1638_v7 = vshrl.u32 %v1620_v46, %v1636_v4  ;;  %v1641_v36 = vadd.s32 127, %v1640_v18  ;;  %v1729_v34 = vadd.s32 536870912, %v1728_v5  ;;  %v15373_v46 = vand.u32 2147483647, %v11798_v35 }
 0x325   : > { %vm11830_vm4 = vcmp.le.f32.partialorder %v15467_v11, 0.7853982  ;;  %vm1783_vm5 = vcmp.gt.s32.totalorder %v1782_v10, 0  ;;  %v11839_v4 = vadd.s32 127, %v1952_v3  ;;  %vm1559_vm7 = vcmp.eq.s32.totalorder %v1554_v38, 2 }
 0x326   : > { %v1639_v48 = vor.u32 %v1638_v7, %v1637_v52  ;;  %v1642_v1 = vshll.u32 %v1641_v36, 23  ;;  %v1653_v14 = vsel %vm11830_vm4, 0, %v1651_v56  ;;  %v11836_v30 = vshrl.u32 %v1729_v34, 30 }
 0x327   : > { %v1784_v22 = vsel %vm1783_vm5, %v1782_v10, 0  ;;  %v1657_v36 = vadd.s32 3, %v1653_v14  ;;  %v11846_v55 = vrot.slane %v11109_v37, %v11582_v21  ;;  %v11852_v53 = vadd.s32 %v11659_v44, %v11656_v47 }
 0x328   : > { %v10149_v39 = vpop.eup %10148  ;;  %v1643_v0 = vor.u32 4788187, %v1642_v1  ;;  %v1646_v29 = vcvt.s32.f32 %v1639_v48  ;;  %v1731_v18 = vshll.u32 %v11836_v30, 30  ;;  %v1786_v52 = vand.u32 31, %v1784_v22 }
 0x329   : > { %v10151_v40 = vpop.eup %10150  ;;  %v1560_v54 = vxor.u32 2147483648, %v10149_v39  ;;  %v1779_v1 = vand.u32 8388607, %v15373_v46  ;;  %vm1552_vm8 = vweird.f32 %v11611_v24  ;;  %vm1555_vm9 = vcmp.lt.s32.totalorder %v1554_v38, 2 }
 0x32a   : > { %v1557_v8 = vxor.u32 2147483648, %v10151_v40  ;;  %v1644_v31 = vand.u32 2147483647, %v1643_v0  ;;  %v11842_v41 = vsub.s32 %v1728_v5, %v1731_v18  ;;  %v1787_v56 = vsub.s32 32, %v1786_v52 }
 0x32b   : > { %v1561_v7 = vsel %vm1559_vm7, %v1560_v54, %v10151_v40  ;;  %v11863_v11 = vand.u32 3, %v1657_v36  ;;  %v15470_v24 = vmov 2475754826   ;;  %v1724_v38 = vadd.s32 %v11792_v45, %v11808_v42 }
 0x32c   : > { %v1647_v57 = vmul.f32 %v1646_v29, %v1644_v31  ;;  %v1558_v33 = vsel %vm1556_vm6, %v10149_v39, %v1557_v8  ;;  %v1734_v39 = vsub.s32 0, %v11842_v41  ;;  %v1790_v44 = vshrl.u32 %v15470_v24, %v1787_v56 }
 0x32d   : > { %v1562_v37 = vsel %vm1555_vm9, %v1558_v33, %v1561_v7  ;;  %v1780_v0 = vor.u32 8388608, %v1779_v1  ;;  %v15471_v10 = vmov 2131351028   ;;  %v1789_v31 = vshll.u32 %v15378_v61, %v1786_v52 }
 0x32e   : > { %v1648_v48 = vxor.u32 2147483648, %v1647_v57  ;;  %v8635_v47 = vmin.u32 %v1734_v39, %v11842_v41  ;;  %v1793_v8 = vshrl.u32 %v15471_v10, %v1787_v56  ;;  %v1563_v54 = vsel %vm1552_vm8, nan, %v1562_v37 }
 0x32f   : > { %v11871_v50 = vshrl.u32 %v1784_v22, 5  ;;  %v1792_v29 = vshll.u32 %v15470_v24, %v1786_v52  ;;  %v1795_v18 = vshll.u32 %v15471_v10, %v1786_v52  ;;  %v1791_v36 = vor.u32 %v1790_v44, %v1789_v31 }
 0x330   : > { %v1649_v3 = vsel %vm1566_vm2, %v1648_v48, %v1647_v57  ;;  %v1736_v14 = vclz %v8635_v47  ;;  %v15472_v57 = vmov 2102212464   ;;  %v1799_v42 = vshrl.u32 %v15462_v28, %v1787_v56 }
 0x331   : > { %v1652_v34 = vsel %vm11830_vm4, %v11615_v59, %v1649_v3  ;;  %v1796_v33 = vshrl.u32 %v15472_v57, %v1787_v56  ;;  %v1798_v45 = vshll.u32 %v15472_v57, %v1786_v52  ;;  %vm1663_vm10 = vcmp.eq.s32.totalorder %v11863_v11, 2 }
 0x332   : > { %10152 = vcosq.f32 %v1652_v34  ;;  %v8636_v7 = vadd.s32 4294967294, %v1736_v14  ;;  %v1794_v48 = vor.u32 %v1793_v8, %v1792_v29  ;;  %v1801_v39 = vshll.u32 %v15462_v28, %v1786_v52 }
 0x333   : > { %10154 = vsinq.f32 %v1652_v34  ;;  %v1797_v1 = vor.u32 %v1796_v33, %v1795_v18  ;;  %v1802_v22 = vshrl.u32 %v15463_v58, %v1787_v56  ;;  %vm1660_vm11 = vcmp.eq.s32.totalorder %v11863_v11, 0 }
 0x334   : > { %v1980_v37 = vmul.f32 %v1563_v54, %v1563_v54  ;;  %vm8637_vm14 = vcmp.lt.s32.totalorder %v8636_v7, 0  ;;  %v1800_v3 = vor.u32 %v1799_v42, %v1798_v45  ;;  %v11882_v34 = vshll.u32 %v1780_v0, 8 }
 0x335   : > { %v1739_v47 = vsel %vm8637_vm14, 0, %v8636_v7  ;;  %v1803_v44 = vor.u32 %v1802_v22, %v1801_v39  ;;  %vm1804_vm2 = vcmp.lt.s32.totalorder %v11871_v50, 1  ;;  %vm1805_vm4 = vcmp.lt.s32.totalorder %v11871_v50, 2 }
 0x336   : > { %v1740_v14 = vsub.s32 32, %v1739_v47  ;;  %v1744_v8 = vsub.s32 4294967266, %v1739_v47  ;;  %vm1806_vm5 = vcmp.lt.s32.totalorder %v11871_v50, 3  ;;  %vm1807_vm6 = vcmp.lt.s32.totalorder %v11871_v50, 4 }
 0x337   : > { %v1741_v52 = vshll.u32 %v11842_v41, %v1739_v47  ;;  %v1812_v54 = vsel %vm1804_vm2, %v1791_v36, %v1794_v48  ;;  %v1813_v31 = vsel %vm1807_vm6, %v1800_v3, 920167782  ;;  %v1816_v0 = vsel %vm1804_vm2, %v1794_v48, %v1797_v1 }
 0x338   : > { %v1742_v29 = vshrl.u32 %v1724_v38, %v1740_v14  ;;  %v1745_v18 = vadd.s32 127, %v1744_v8  ;;  %v1814_v33 = vsel %vm1806_vm5, %v1797_v1, %v1813_v31  ;;  %v1817_v7 = vsel %vm1807_vm6, %v1803_v44, 1326507024 }
 0x339   : > { %v1788_v42 = vshrl.u32 %v15378_v61, %v1787_v56  ;;  %v1809_v39 = vsel %vm1807_vm6, %v1797_v1, 2102212464  ;;  %v1815_v41 = vsel %vm1805_vm4, %v1812_v54, %v1814_v33  ;;  %v1818_v22 = vsel %vm1806_vm5, %v1800_v3, %v1817_v7 }
 0x33a   : > { %v1743_v40 = vor.u32 %v1742_v29, %v1741_v52  ;;  %v1746_v5 = vshll.u32 %v1745_v18, 23  ;;  %v1819_v38 = vsel %vm1805_vm4, %v1816_v0, %v1818_v22  ;;  %v1989_v44 = vmul.f32 %v11846_v55, %v1980_v37 }
 0x33b   : > { %v11904_v8 = vmul.u32.u64.low %v11882_v34, %v1819_v38  ;;  %v11905_v56 = vmul.u32.u64.high %v11882_v34, %v1819_v38, %v11904_v8  ;;  %v1808_v3 = vsel %vm1804_vm2, %v1788_v42, %v1791_v36  ;;  %v1810_v52 = vsel %vm1806_vm5, %v1794_v48, %v1809_v39 }
 0x33c   : > { %v10153_v45 = vpop.eup %10152  ;;  %v1747_v54 = vor.u32 4788187, %v1746_v5  ;;  %vm1659_vm7 = vcmp.lt.s32.totalorder %v11863_v11, 2  ;;  %v11917_v37 = vmul.u32.u64.low %v11882_v34, %v1815_v41  ;;  %v11918_v0 = vmul.u32.u64.high %v11882_v34, %v1815_v41, %v11917_v37 }
 0x33d   : > { %v10155_v47 = vpop.eup %10154  ;;  %v1664_v46 = vxor.u32 2147483648, %v10153_v45  ;;  %vm1656_vm8 = vweird.f32 %v11615_v59  ;;  %v1750_v29 = vcvt.s32.f32 %v1743_v40  ;;  %v15473_v36 = vsub.s32 32, %v11814_v2 }
 0x33e   : > { %v1661_v14 = vxor.u32 2147483648, %v10155_v47  ;;  %v1748_v5 = vand.u32 2147483647, %v1747_v54  ;;  %v1754_v33 = vsub.s32 4, %v11836_v30  ;;  %v1811_v11 = vsel %vm1805_vm4, %v1808_v3, %v1810_v52 }
 0x33f   : > { %v1665_v1 = vsel %vm1663_vm10, %v1664_v46, %v10155_v47  ;;  %v1950_v18 = vshrl.u32 %v11852_v53, %v15473_v36  ;;  %vm1829_vm9 = vc.u32 %v11905_v56, %v11917_v37  ;;  %vm15398_vm10 = vcmask 1040384  }
 0x340   : > { %v1662_v31 = vsel %vm1660_vm11, %v10153_v45, %v1661_v14  ;;  %v11929_v45 = vadd.f32 %v1989_v44, %v11597_v62  ;;  %v1751_v42 = vmul.f32 %v1750_v29, %v1748_v5  ;;  %v1949_v59 = vshll.u32 %v11733_v6, %v11814_v2  ;;  %vm8670_vm2 = vmneg %vm15398_vm10 }
 0x341   : > { %v1666_v46 = vsel %vm1659_vm7, %v1662_v31, %v1665_v1  ;;  %v15474_v53 = vshll.u32 %v11839_v4, 23  ;;  %v1830_v39 = vadd.s32 1, %v11918_v0  ;;  %vm1670_vm11 = vcmp.lt.s32.totalorder %v11703_v32, 0  ;;  %vm11963_vm4 = vmpackc.low %vm10625_vm12, %vm8670_vm2 }
 0x342   : > { %v1667_v48 = vsel %vm1656_vm8, nan, %v1666_v46  ;;  %v1752_v41 = vxor.u32 2147483648, %v1751_v42  ;;  %v1827_v62 = vmul.u32 %v11882_v34, %v1811_v11  ;;  %v1951_v22 = vor.u32 %v1950_v18, %v1949_v59 }
 0x343   : > { %v1981_v7 = vmul.f32 %v1667_v48, %v1667_v48  ;;  %v1955_v40 = vor.u32 4788187, %v15474_v53  ;;  %v15475_v47 = vand.u32 2147483647, %v11703_v32  ;;  %v1755_v6 = vsel %vm1670_vm11, %v1754_v33, %v11836_v30 }
 0x344   : > { %v1831_v2 = vsel %vm1829_vm9, %v1830_v39, %v11918_v0  ;;  %v2005_v14 = vrot.slane %v11929_v45, 7  ;;  %v1753_v44 = vsel %vm1670_vm11, %v1752_v41, %v1751_v42  ;;  %v1958_v3 = vcvt.s32.f32 %v1951_v22 }
 0x345   : > { %v1990_v50 = vmul.f32 %v11846_v55, %v1981_v7  ;;  %vm11943_vm14 = vcmp.le.f32.partialorder %v15475_v47, 0.7853982  ;;  %v1832_v8 = vadd.s32 %v1831_v2, %v1827_v62  ;;  %v1956_v34 = vand.u32 2147483647, %v1955_v40 }
 0x346   : > { %v1756_v1 = vsel %vm11943_vm14, %v11703_v32, %v1753_v44  ;;  %v15478_v31 = vmov 0  ;;  %vm1878_vm12 = vcmp.lt.s32.totalorder %v11607_v51, 0  ;;  %v1962_v22 = vsub.s32 4, %v11715_v49 }
 0x347   : > { %v11950_v4 = vadd.f32 %v1990_v50, %v11599_v43  ;;  %10156 = vcosq.f32 %v1756_v1  ;;  %v1757_v43 = vsel %vm11943_vm14, 0, %v1755_v6  ;;  %v1833_v52 = vadd.s32 536870912, %v1832_v8 }
 0x348   : > { %10158 = vsinq.f32 %v1756_v1  ;;  %v15479_v31 = vsel %vm11963_vm4, 4294967295, %v15478_v31  ;;  %v1959_v46 = vmul.f32 %v1958_v3, %v1956_v34  ;;  %v1761_v36 = vadd.s32 3, %v1757_v43 }
 0x349   : > { %v2006_v54 = vrot.slane %v11950_v4, 7  ;;  %v2023_v30 = vpack.c.bf16 %v11950_v4, %v11929_v45  ;;  %15480 = vst [vmem:[#allocation24_spill] sm:$0xff] %v15479_v31  ;;  %v11970_v29 = vshrl.u32 %v1833_v52, 30  ;;  %v15481_v50 = vand.u32 2147483647, %v11607_v51 }
 0x34a   : > { %v1960_v48 = vxor.u32 2147483648, %v1959_v46  ;;  %v1762_v11 = vand.u32 3, %v1761_v36  ;;  %vm1760_vm9 = vweird.f32 %v11703_v32  ;;  %v1963_v34 = vsel %vm1878_vm12, %v1962_v22, %v11715_v49 }
 0x34b   : > { %v2007_v0 = vsel %vm15398_vm10, %v2005_v14, %v2006_v54  ;;  %2225 = vmatprep.mubr.bf16.mxu0 %v2023_v30  ;;  %v1835_v18 = vshll.u32 %v11970_v29, 30  ;;  %vm11980_vm5 = vcmp.le.f32.partialorder %v15481_v50, 0.7853982  ;;  %v2027_v30 = vrot.slane %v11929_v45, 1 }
 0x34c   : > { %v8672_v5 = vpack.c.bf16 %v2007_v0, %v2005_v14  ;;  %v1961_v53 = vsel %vm1878_vm12, %v1960_v48, %v1959_v46  ;;  %vm1767_vm6 = vcmp.eq.s32.totalorder %v1762_v11, 2  ;;  %vm1764_vm7 = vcmp.eq.s32.totalorder %v1762_v11, 0 }
 0x34d   : > { %v1836_v33 = vsub.s32 %v1832_v8, %v1835_v18  ;;  %v1964_v6 = vsel %vm11980_vm5, %v11607_v51, %v1961_v53  ;;  %vm1763_vm8 = vcmp.lt.s32.totalorder %v1762_v11, 2  ;;  %v1828_v3 = vadd.s32 %v11917_v37, %v11905_v56 }
 0x34e   : > { %8673 = vmatmul.mubr.msk.bf16.vlgmr.msra.gmra.mrb[12].mxu0 %vm11963_vm4, %v8672_v5  ;;  %10160 = vcosq.f32 %v1964_v6  ;;  %v2028_v52 = vrot.slane %v11950_v4, 1  ;;  %vm15390_vm14 = vcmask 1046528   ;;  %v1965_v45 = vsel %vm11980_vm5, 0, %v1963_v34 }
 0x34f   : > { %v1838_v7 = vsub.s32 0, %v1836_v33  ;;  %10162 = vsinq.f32 %v1964_v6  ;;  %v1858_v41 = vsub.s32 4, %v11970_v29  ;;  %vm1774_vm2 = vcmp.lt.s32.totalorder %v11798_v35, 0 }
 0x350   : > { %v2029_v48 = vsel %vm15390_vm14, %v2027_v30, %v2028_v52 }
 0x351   : > { %v10157_v42 = vpop.eup %10156  ;;  %v8639_v39 = vmin.u32 %v1838_v7, %v1836_v33 }
 0x352   : > { %v10159_v59 = vpop.eup %10158  ;;  %v1768_v40 = vxor.u32 2147483648, %v10157_v42 }
 0x353   : > { %v1765_v62 = vxor.u32 2147483648, %v10159_v59  ;;  %v1840_v38 = vclz %v8639_v39 }
 0x354   : > { %v1769_v47 = vsel %vm1767_vm6, %v1768_v40, %v10159_v59  ;;  %v1969_v59 = vadd.s32 3, %v1965_v45 }
 0x355   : > { %v1766_v2 = vsel %vm1764_vm7, %v10157_v42, %v1765_v62  ;;  %v8640_v44 = vadd.s32 4294967294, %v1840_v38  ;;  %v15484_v62 = vmov 0.0  }
 0x356   : > { %v1770_v14 = vsel %vm1763_vm8, %v1766_v2, %v1769_v47  ;;  %v1970_v22 = vand.u32 3, %v1969_v59  ;;  %v15485_v2 = vand.u32 2147483647, %v11798_v35  ;;  %vm1968_vm8 = vweird.f32 %v11607_v51 }
 0x357   : > { %v1771_v8 = vsel %vm1760_vm9, nan, %v1770_v14  ;;  %vm8641_vm11 = vcmp.lt.s32.totalorder %v8640_v44, 0 }
 0x358   : > { %v1982_v1 = vmul.f32 %v1771_v8, %v1771_v8  ;;  %v1843_v43 = vsel %vm8641_vm11, 0, %v8640_v44  ;;  %v10161_v53 = vpop.eup %10160  ;;  %vm1773_vm12 = vcmp.le.f32.partialorder %v15485_v2, 0.7853982  ;;  %v1859_v44 = vsel %vm1774_vm2, %v1858_v41, %v11970_v29 }
 0x359   : > { %v1844_v0 = vsub.s32 32, %v1843_v43  ;;  %v1848_v46 = vsub.s32 4294967266, %v1843_v43  ;;  %v1845_v49 = vshll.u32 %v1836_v33, %v1843_v43  ;;  %v10163_v39 = vpop.eup %10162  ;;  %v1976_v38 = vxor.u32 2147483648, %v10161_v53 }
 0x35a   : > { %v1991_v32 = vmul.f32 %v11846_v55, %v1982_v1  ;;  %v1973_v47 = vxor.u32 2147483648, %v10163_v39  ;;  %vm1972_vm5 = vcmp.eq.s32.totalorder %v1970_v22, 0  ;;  %vm1975_vm6 = vcmp.eq.s32.totalorder %v1970_v22, 2 }
 0x35b   : > { %v1846_v36 = vshrl.u32 %v1828_v3, %v1844_v0  ;;  %v1849_v18 = vadd.s32 127, %v1848_v46  ;;  %v1977_v1 = vsel %vm1975_vm6, %v1976_v38, %v10163_v39  ;;  %v1861_v30 = vsel %vm1773_vm12, 0, %v1859_v44 }
 0x35c   : > { %v11998_v5 = vadd.f32 %v1991_v32, %v11601_v26  ;;  %v1974_v34 = vsel %vm1972_vm5, %v10161_v53, %v1973_v47  ;;  %vm1971_vm7 = vcmp.lt.s32.totalorder %v1970_v22, 2  ;;  %v1865_v43 = vadd.s32 3, %v1861_v30  ;;  %vm12036_vm5 = vmpackc.low %vm15390_vm14, %vm15390_vm14  ;;  %v9971_v30 = vld [vmem:[#allocation8 + $0xc0] sm:$0xff]  }
 0x35d   : > { %v1847_v37 = vor.u32 %v1846_v36, %v1845_v49  ;;  %v1850_v11 = vshll.u32 %v1849_v18, 23  ;;  %v1978_v3 = vsel %vm1971_vm7, %v1974_v34, %v1977_v1  ;;  %v12045_v34 = vsub.s32 5, %v10991_v60  ;;  %v9970_v1 = vld [vmem:[#allocation8 + $0x100] sm:$0xff]  }
 0x35e   : > { %v2030_v56 = vrot.slane %v11998_v5, 1  ;;  %v1866_v32 = vand.u32 3, %v1865_v43  ;;  %v2008_v59 = vrot.slane %v11998_v5, 7  ;;  %v12047_v43 = vld [vmem:[#allocation7] sm:$0xff]  ;;  %9087 = vmatprep.subr.bf16.mxu0 %v9970_v1 }
 0x35f   : > { %v1851_v42 = vor.u32 4788187, %v1850_v11  ;;  %v1854_v40 = vcvt.s32.f32 %v1847_v37  ;;  %15489 = vst [vmem:[#allocation26_spill] sm:$0xff] %v12045_v34  ;;  %9088 = vmatpush3.bf16.msra.mxu0 %v9971_v30 }
 0x360   : > { %v2031_v7 = vsel %vm15390_vm14, %v2028_v52, %v2030_v56  ;;  %v1979_v52 = vsel %vm1968_vm8, nan, %v1978_v3  ;;  %vm1871_vm9 = vcmp.eq.s32.totalorder %v1866_v32, 2  ;;  %vm1868_vm11 = vcmp.eq.s32.totalorder %v1866_v32, 0  ;;  %v9972_v3 = vld [vmem:[#allocation8 + $0x140] sm:$0xff]  }
 0x361   : > { %v2042_v26 = vpack.c.bf16 %v2031_v7, %v2029_v48  ;;  %v1852_v33 = vand.u32 2147483647, %v1851_v42  ;;  %v1984_v0 = vmul.f32 %v1979_v52, %v1979_v52  ;;  %v12051_v52 = vrot.slane %v12047_v43, %v12045_v34 }
 0x363   : > { %9413 = vmatmul.mubr.bf16.vlgmr.msra.gmra.mrb[12].mxu1 %v2042_v26  ;;  %v1855_v50 = vmul.f32 %v1854_v40, %v1852_v33  ;;  %v1993_v18 = vmul.f32 %v11846_v55, %v1984_v0  ;;  %v2009_v40 = vsel %vm15398_vm10, %v2006_v54, %v2008_v59  ;;  %v15486_v54 = vmov 0  ;;  %v9975_v0 = vld [vmem:[#allocation8 + $0x148] sm:$0xff]  }
 0x364   : > { %9416 = vmatprep.mubr.msk.bf16.mxu1 %vm15399_vm0, %v15484_v62  ;;  %v15487_v54 = vsel %vm12036_vm5, 4294967295, %v15486_v54  ;;  %9425 = vmatpush3.bf16.msra.mxu1 %v9972_v3 }
 0x365   : > { %v1856_v6 = vxor.u32 2147483648, %v1855_v50  ;;  %v1998_v51 = vadd.f32 %v1993_v18, %v11595_v23  ;;  %15488 = vst [vmem:[#allocation25_spill] sm:$0xff] %v15487_v54  ;;  %9426 = vmatprep.subr.bf16.mxu1 %v15484_v62 }
 0x367   : > { %v1857_v14 = vsel %vm1774_vm2, %v1856_v6, %v1855_v50  ;;  %vm1867_vm2 = vcmp.lt.s32.totalorder %v1866_v32, 2  ;;  %v2034_v53 = vrot.slane %v1998_v51, 1  ;;  %v2025_v22 = vpack.c.bf16 %v1998_v51, %v1998_v51  ;;  %v9973_v32 = vld [vmem:[#allocation8 + $0x108] sm:$0xff]  }
 0x368   : > { %v1860_v8 = vsel %vm1773_vm12, %v11798_v35, %v1857_v14  ;;  %vm1864_vm12 = vweird.f32 %v11798_v35  ;;  %v2012_v47 = vrot.slane %v1998_v51, 7  ;;  %9089 = vmatprep.subr.bf16.mxu0 %v9973_v32  ;;  %9427 = vmatpush3.bf16.msra.mxu1 %v9975_v0 }
 0x369   : > { %10164 = vcosq.f32 %v1860_v8  ;;  %9428 = vmatprep.subr.bf16.mxu1 %v15484_v62 }
 0x36a   : > { %10166 = vsinq.f32 %v1860_v8 }
 0x373   : > { %v10165_v46 = vpop.eup %10164 }
 0x374   : > { %v10167_v49 = vpop.eup %10166  ;;  %v1872_v29 = vxor.u32 2147483648, %v10165_v46 }
 0x375   : > { %v1869_v36 = vxor.u32 2147483648, %v10167_v49 }
 0x376   : > { %v1873_v45 = vsel %vm1871_vm9, %v1872_v29, %v10167_v49  ;;  %v9976_v49 = vld [vmem:[#allocation8 + $0x110] sm:$0xff]  }
 0x377   : > { %v1870_v48 = vsel %vm1868_vm11, %v10165_v46, %v1869_v36  ;;  %v9974_v46 = vld [vmem:[#allocation8 + $0xc8] sm:$0xff]   ;;  %v9978_v36 = vld [vmem:[#allocation8 + $0x150] sm:$0xff]  }
 0x378   : > { %v1874_v37 = vsel %vm1867_vm2, %v1870_v48, %v1873_v45  ;;  %9090 = vmatpush3.bf16.msra.mxu0 %v9974_v46  ;;  %v9977_v45 = vld [vmem:[#allocation8 + $0xd0] sm:$0xff]   ;;  %9429 = vmatpush3.bf16.msra.mxu1 %v9978_v36 }
 0x379   : > { %v1875_v11 = vsel %vm1864_vm12, nan, %v1874_v37  ;;  %9091 = vmatprep.subr.bf16.mxu0 %v9976_v49  ;;  %v9979_v37 = vld [vmem:[#allocation8 + $0x118] sm:$0xff]   ;;  %9430 = vmatprep.subr.bf16.mxu1 %v15484_v62 }
 0x37a   : > { %v1983_v7 = vmul.f32 %v1875_v11, %v1875_v11 }
 0x37c   : > { %v1992_v42 = vmul.f32 %v11846_v55, %v1983_v7  ;;  %9092 = vmatpush3.bf16.msra.mxu0 %v9977_v45 }
 0x37d   : > { %9093 = vmatprep.subr.bf16.mxu0 %v9979_v37 }
 0x37e   : > { %v1997_v26 = vadd.f32 %v1992_v42, %v11603_v27  ;;  %v9981_v42 = vld [vmem:[#allocation8 + $0x158] sm:$0xff]  }
 0x37f   : > { %9431 = vmatpush3.bf16.msra.mxu1 %v9981_v42 }
 0x380   : > { %v2024_v33 = vpack.c.bf16 %v1997_v26, %v11998_v5  ;;  %v2010_v39 = vrot.slane %v1997_v26, 7  ;;  %v2032_v35 = vrot.slane %v1997_v26, 1  ;;  %9432 = vmatprep.subr.bf16.mxu1 %v15484_v62 }
 0x382   : > { %2233 = vmatprep.mubr.bf16.mxu0 %v2024_v33  ;;  %v2011_v50 = vsel %vm15398_vm10, %v2008_v59, %v2010_v39  ;;  %v2033_v23 = vsel %vm15390_vm14, %v2030_v56, %v2032_v35  ;;  %v2035_v55 = vsel %vm15390_vm14, %v2032_v35, %v2034_v53  ;;  %v2013_v4 = vsel %vm15398_vm10, %v2010_v39, %v2012_v47  ;;  %v9982_v33 = vld [vmem:[#allocation8 + $0x120] sm:$0xff]   ;;  %v9988_v47 = vld [vmem:[#allocation8 + $0x130] sm:$0xff]  }
 0x383   : > { %v2021_v41 = vpack.c.bf16 %v2011_v50, %v2009_v40  ;;  %v2043_v27 = vpack.c.bf16 %v2035_v55, %v2033_v23  ;;  %v2022_v5 = vpack.c.bf16 %v2013_v4, %v2013_v4  ;;  %v8675_v56 = vpack.c.bf16 %v2034_v53, %v2034_v53  ;;  %v9980_v53 = vld [vmem:[#allocation8 + $0xd8] sm:$0xff]   ;;  %v9984_v50 = vld [vmem:[#allocation8 + $0x160] sm:$0xff]   ;;  %v9990_v4 = vld [vmem:[#allocation8 + $0x170] sm:$0xff]  }
 0x384   : > { %9094 = vmatpush3.bf16.msra.mxu0 %v9980_v53  ;;  %v9983_v55 = vld [vmem:[#allocation8 + $0xe0] sm:$0xff]   ;;  %9433 = vmatpush3.bf16.msra.mxu1 %v9984_v50 }
 0x385   : > { %2234 = vmatmul.mubr.bf16.gmra.mrb[16].mxu0 %v2021_v41  ;;  %9417 = vmatmul.mubr.bf16.gmra.mrb[16].mxu1 %v2043_v27  ;;  %v9985_v41 = vld [vmem:[#allocation8 + $0x128] sm:$0xff]  }
 0x386   : > { %2241 = vmatprep.mubr.bf16.mxu0 %v2025_v22  ;;  %9420 = vmatprep.mubr.msk.bf16.mxu1 %vm15399_vm0, %v15484_v62  ;;  %v9987_v27 = vld [vmem:[#allocation8 + $0x168] sm:$0xff]  }
 0x387   : > { %9095 = vmatprep.subr.bf16.mxu0 %v9982_v33  ;;  %9434 = vmatprep.subr.bf16.mxu1 %v15484_v62  ;;  %v9986_v22 = vld [vmem:[#allocation8 + $0xe8] sm:$0xff]  }
 0x388   : > { %9096 = vmatpush3.bf16.msra.mxu0 %v9983_v55  ;;  %9435 = vmatpush3.bf16.msra.mxu1 %v9987_v27 }
 0x389   : > { %9097 = vmatprep.subr.bf16.mxu0 %v9985_v41  ;;  %9436 = vmatprep.subr.bf16.mxu1 %v15484_v62 }
 0x38c   : > { %9098 = vmatpush3.bf16.msra.mxu0 %v9986_v22  ;;  %9437 = vmatpush3.bf16.msra.mxu1 %v9990_v4 }
 0x38d   : > { %2242 = vmatmul.mubr.bf16.gmra.mrb[20].mxu0 %v2022_v5  ;;  %9421 = vmatmul.mubr.msk.bf16.gmra.mrb[20].mxu1 %vm12036_vm5, %v8675_v56  ;;  %v9989_v5 = vld [vmem:[#allocation8 + $0xf0] sm:$0xff]   ;;  %v9991_v56 = vld [vmem:[#allocation8 + $0x138] sm:$0xff]  }
 0x38e   : > { %9440 = vmatprep.mubr.msk.bf16.mxu1 %vm15399_vm0, %v15484_v62  ;;  %9099 = vmatprep.subr.bf16.mxu0 %v9988_v47 }
 0x38f   : > { %9438 = vmatprep.subr.bf16.mxu1 %v15484_v62 }
 0x390   : > { %9100 = vmatpush3.bf16.msra.mxu0 %v9989_v5 }
 0x391   : > { %9101 = vmatprep.subr.bf16.mxu0 %v9991_v56 }
 0x421   : > { %v9058_v38 = vpop.f32.mrb[12].mxu0 }
 0x422   : > { %v9059_v6 = vpop.f32.mrb[13].mxu0 }
 0x423   : > { %v9060_v2 = vadd.f32 %v9059_v6, %v9058_v38  ;;  %v9061_v14 = vpop.f32.mrb[14].mxu0  ;;  %v9992_v38 = vld [vmem:[#allocation8 + $0xf8] sm:$0xff]  }
 0x424   : > { %v9062_v44 = vpop.f32.mrb[15].mxu0  ;;  %9102 = vmatpush3.bf16.msra.mxu0 %v9992_v38 }
 0x425   : > { %v9063_v8 = vadd.f32 %v9062_v44, %v9061_v14  ;;  %v2228_v29 = vadd.f32 %v9060_v2, %v12051_v52 }
 0x427   : > { %v2231_v18 = vadd.f32 %v9063_v8, %v12051_v52 }
 0x436   : > { %v2283_v48 = vpop.f32.mrb[12].mxu1 }
 0x437   : > { %v12057_v11 = vadd.f32 %v2283_v48, %v2228_v29  ;;  %v9414_v51 = vpop.f32.mrb[13].mxu1 }
 0x438   : > { %v2286_v7 = vpop.f32.mrb[14].mxu1 }
 0x439   : > { %v12059_v59 = vadd.f32 %v2286_v7, %v2231_v18  ;;  %v9415_v26 = vpop.f32.mrb[15].mxu1  ;;  %v2315_v40 = vmul.f32 %v12057_v11, %v12057_v11 }
 0x43b   : > { %v2305_v39 = vadd.f32 %v12059_v59, %v12057_v11  ;;  %v2316_v35 = vmul.f32 %v12059_v59, %v12059_v59 }
 0x43d   : > { %v2320_v23 = vadd.f32 %v2316_v35, %v2315_v40 }
 0x458   : > { %v9064_v6 = vpop.f32.mrb[16].mxu0  ;;  %v2291_v2 = vpop.f32.mrb[16].mxu1 }
 0x459   : > { %v9065_v14 = vpop.f32.mrb[17].mxu0  ;;  %v9418_v44 = vpop.f32.mrb[17].mxu1 }
 0x45a   : > { %v9066_v8 = vadd.f32 %v9065_v14, %v9064_v6  ;;  %v9067_v1 = vpop.f32.mrb[18].mxu0  ;;  %v2294_v30 = vpop.f32.mrb[18].mxu1 }
 0x45b   : > { %v9068_v3 = vpop.f32.mrb[19].mxu0  ;;  %v9419_v32 = vpop.f32.mrb[19].mxu1 }
 0x45c   : > { %v2236_v0 = vadd.f32 %v9066_v8, %v12051_v52  ;;  %v9069_v46 = vadd.f32 %v9068_v3, %v9067_v1 }
 0x45e   : > { %v2292_v49 = vadd.f32 %v2291_v2, %v2236_v0  ;;  %v2239_v29 = vadd.f32 %v9069_v46, %v12051_v52 }
 0x460   : > { %v2306_v36 = vadd.f32 %v2305_v39, %v2292_v49  ;;  %v2317_v18 = vmul.f32 %v2292_v49, %v2292_v49  ;;  %v2295_v45 = vadd.f32 %v2294_v30, %v2239_v29  ;;  %v9070_v48 = vpop.f32.mrb[20].mxu0  ;;  %v2299_v37 = vpop.f32.mrb[20].mxu1 }
 0x461   : > { %v9071_v51 = vpop.f32.mrb[21].mxu0  ;;  %v9422_v7 = vpop.f32.mrb[21].mxu1 }
 0x462   : > { %v2321_v42 = vadd.f32 %v2320_v23, %v2317_v18  ;;  %v2307_v26 = vadd.f32 %v2306_v36, %v2295_v45  ;;  %v2318_v53 = vmul.f32 %v2295_v45, %v2295_v45  ;;  %v9072_v33 = vadd.f32 %v9071_v51, %v9070_v48  ;;  %v9073_v40 = vpop.f32.mrb[22].mxu0  ;;  %v2302_v35 = vpop.f32.mrb[22].mxu1  ;;  %v9993_v18 = vld [vmem:[#allocation8 + $0x178] sm:$0xff]  }
 0x463   : > { %v9074_v50 = vpop.f32.mrb[23].mxu0  ;;  %v9423_v55 = vpop.f32.mrb[23].mxu1  ;;  %9439 = vmatpush3.bf16.msra.mxu1 %v9993_v18  ;;  %v12077_v48 = vsub.s32 6, %v10991_v60 }
 0x464   : > { %v2322_v41 = vadd.f32 %v2321_v42, %v2318_v53  ;;  %v2244_v27 = vadd.f32 %v9072_v33, %v12051_v52  ;;  %9452 = vmatprep.subr.bf16.mxu1 %v15484_v62 }
 0x465   : > { %15490 = vst [vmem:[#allocation27_spill] sm:$0xff] %v12077_v48 }
 0x466   : > { %v2300_v22 = vadd.f32 %v2299_v37, %v2244_v27  ;;  %v2367_v27 = vld [vmem:[#allocation7 + $0x8] sm:$0xff] }
 0x468   : > { %v2308_v47 = vadd.f32 %v2307_v26, %v2300_v22  ;;  %v2319_v39 = vmul.f32 %v2300_v22, %v2300_v22  ;;  %v12082_v26 = vsub.s32 7, %v10991_v60 }
 0x46a   : > { %v2309_v4 = vrot.slane %v2308_v47, 4  ;;  %v2323_v5 = vadd.f32 %v2322_v41, %v2319_v39  ;;  %15491 = vst [vmem:[#allocation28_spill] sm:$0xff] %v12082_v26  ;;  %v12089_v39 = vrot.slane %v2367_v27, %v10997_v63 }
 0x46c   : > { %v2310_v56 = vadd.f32 %v2309_v4, %v2308_v47  ;;  %v2324_v38 = vrot.slane %v2323_v5, 4 }
 0x46e   : > { %v2311_v6 = vrot.slane %v2310_v56, 2  ;;  %v2325_v2 = vadd.f32 %v2324_v38, %v2323_v5 }
 0x470   : > { %v2312_v23 = vadd.f32 %v2311_v6, %v2310_v56  ;;  %v2326_v14 = vrot.slane %v2325_v2, 2 }
 0x472   : > { %v2313_v44 = vrot.slane %v2312_v23, 1  ;;  %v2327_v8 = vadd.f32 %v2326_v14, %v2325_v2 }
 0x474   : > { %v2314_v1 = vadd.f32 %v2313_v44, %v2312_v23  ;;  %v2328_v30 = vrot.slane %v2327_v8, 1 }
 0x476   : > { %v2329_v3 = vadd.f32 %v2328_v30, %v2327_v8  ;;  %v2330_v32 = vmul.f32 0.025, %v2314_v1 }
 0x478   : > { %v2331_v0 = vmul.f32 0.025, %v2329_v3  ;;  %v2332_v46 = vmul.f32 %v2330_v32, %v2330_v32 }
 0x47a   : > { %v2333_v52 = vsub.f32 %v2331_v0, %v2332_v46 }
 0x47c   : > { %v2334_v29 = vmax.f32 %v2333_v52, 0.0 }
 0x47e   : > { %v2335_v36 = vadd.f32 1e-05, %v2334_v29 }
 0x480   : > { %10168 = vrsqrt.f32 %v2335_v36 }
 0x48a   : > { %v10169_v37 = vpop.eup %10168 }
 0x48b   : > { %v2337_v51 = vmul.f32 %v12047_v43, %v10169_v37 }
 0x48d   : > { %v2341_v7 = vrot.slane %v2337_v51, %v12077_v48  ;;  %v2347_v42 = vmul.f32 %v2337_v51, %v2330_v32 }
 0x48f   : > { %v2346_v53 = vmul.f32 %v2341_v7, %v2300_v22  ;;  %v2349_v33 = vrot.slane %v2347_v42, 7  ;;  %v2342_v40 = vmul.f32 %v2341_v7, %v12057_v11  ;;  %v2343_v35 = vmul.f32 %v2341_v7, %v12059_v59 }
 0x490   : > { %v2344_v50 = vmul.f32 %v2341_v7, %v2292_v49  ;;  %v2345_v55 = vmul.f32 %v2341_v7, %v2295_v45 }
 0x491   : > { %v2351_v41 = vsub.f32 %v12047_v43, %v2349_v33 }
 0x493   : > { %v2355_v47 = vrot.slane %v2351_v41, %v12082_v26 }
 0x495   : > { %v2360_v4 = vadd.f32 %v2355_v47, %v2346_v53  ;;  %v2356_v5 = vadd.f32 %v2355_v47, %v2342_v40  ;;  %v2357_v60 = vadd.f32 %v2355_v47, %v2343_v35  ;;  %v2358_v56 = vadd.f32 %v2355_v47, %v2344_v50 }
 0x496   : > { %v2359_v22 = vadd.f32 %v2355_v47, %v2345_v55  ;;  %v12129_v53 = vadd.f32 1e-09, %v2367_v27 }
 0x497   : > { %v12092_v38 = vadd.f32 %v2360_v4, %v11014_v19  ;;  %v12095_v11 = vadd.f32 %v2356_v5, %v11007_v15  ;;  %v12098_v59 = vadd.f32 %v2357_v60, %v11009_v16  ;;  %v12113_v19 = vadd.f32 %v2358_v56, %v11011_v17 }
 0x498   : > { %v12135_v35 = vadd.f32 %v2359_v22, %v11030_v25  ;;  %10170 = vrcp.f32 %v12129_v53 }
 0x499   : > { %v12102_v43 = vmul.f32 %v12089_v39, %v12092_v38  ;;  %v12106_v49 = vmul.f32 %v12089_v39, %v12095_v11  ;;  %v12110_v45 = vmul.f32 %v12089_v39, %v12098_v59  ;;  %v12122_v8 = vmul.f32 %v12089_v39, %v12113_v19 }
 0x49b   : > { %v2897_v15 = vand.u32 2139095040, %v12102_v43  ;;  %v15375_v16 = vand.u32 2147483647, %v12106_v49  ;;  %v2481_v6 = vand.u32 2139095040, %v12106_v49  ;;  %v15374_v2 = vand.u32 2147483647, %v12110_v45 }
 0x49c   : > { %v2585_v23 = vand.u32 2139095040, %v12110_v45  ;;  %v2689_v29 = vand.u32 2139095040, %v12122_v8 }
 0x49d   : > { %v2898_v14 = vshrl.u32 %v2897_v15, 23  ;;  %v2482_v44 = vshrl.u32 %v2481_v6, 23  ;;  %v2485_v3 = vand.u32 8388607, %v15375_v16  ;;  %v2589_v0 = vand.u32 8388607, %v15374_v2 }
 0x49e   : > { %v2586_v1 = vshrl.u32 %v2585_v23, 23  ;;  %v2690_v42 = vshrl.u32 %v2689_v29, 23 }
 0x49f   : > { %v8693_v30 = vadd.s32 4294967169, %v2898_v14  ;;  %v8677_v17 = vadd.s32 4294967169, %v2482_v44  ;;  %v2486_v36 = vor.u32 8388608, %v2485_v3  ;;  %v2590_v37 = vor.u32 8388608, %v2589_v0 }
 0x4a0   : > { %v8681_v32 = vadd.s32 4294967169, %v2586_v1  ;;  %v8685_v27 = vadd.s32 4294967169, %v2690_v42 }
 0x4a1   : > { %v2904_v46 = vadd.s32 1, %v8693_v30  ;;  %v2488_v52 = vadd.s32 1, %v8677_v17  ;;  %v12131_v33 = vshll.u32 %v2486_v36, 8  ;;  %v12139_v41 = vshll.u32 %v2590_v37, 8 }
 0x4a2   : > { %v2592_v51 = vadd.s32 1, %v8681_v32 }
 0x4a3   : > { %vm2489_vm6 = vcmp.gt.s32.totalorder %v2488_v52, 0  ;;  %vm2905_vm7 = vcmp.gt.s32.totalorder %v2904_v46, 0 }
 0x4a4   : > { %v2490_v18 = vsel %vm2489_vm6, %v2488_v52, 0  ;;  %v12137_v50 = vsel %vm2905_vm7, %v2904_v46, 0  ;;  %vm2593_vm8 = vcmp.gt.s32.totalorder %v2592_v51, 0 }
 0x4a5   : > { %v2492_v7 = vand.u32 31, %v2490_v18  ;;  %v2491_v47 = vshrl.u32 %v2490_v18, 5  ;;  %v12153_v3 = vand.u32 31, %v12137_v50  ;;  %v2594_v52 = vsel %vm2593_vm8, %v2592_v51, 0 }
 0x4a7   : > { %v2493_v55 = vsub.s32 32, %v2492_v7  ;;  %v2495_v4 = vshll.u32 %v15378_v61, %v2492_v7  ;;  %v2498_v5 = vshll.u32 %v15470_v24, %v2492_v7  ;;  %v2501_v15 = vshll.u32 %v15471_v10, %v2492_v7 }
 0x4a8   : > { %v2504_v22 = vshll.u32 %v15472_v57, %v2492_v7  ;;  %v2507_v23 = vshll.u32 %v15462_v28, %v2492_v7  ;;  %vm2510_vm9 = vcmp.lt.s32.totalorder %v2491_v47, 1  ;;  %vm2512_vm11 = vcmp.lt.s32.totalorder %v2491_v47, 3 }
 0x4a9   : > { %v2496_v60 = vshrl.u32 %v15470_v24, %v2493_v55  ;;  %v2499_v56 = vshrl.u32 %v15471_v10, %v2493_v55  ;;  %v2502_v25 = vshrl.u32 %v15472_v57, %v2493_v55  ;;  %v2505_v6 = vshrl.u32 %v15462_v28, %v2493_v55 }
 0x4aa   : > { %v2508_v14 = vshrl.u32 %v15463_v58, %v2493_v55  ;;  %v2494_v44 = vshrl.u32 %v15378_v61, %v2493_v55  ;;  %vm2513_vm2 = vcmp.lt.s32.totalorder %v2491_v47, 4  ;;  %vm2511_vm12 = vcmp.lt.s32.totalorder %v2491_v47, 2 }
 0x4ab   : > { %v2497_v1 = vor.u32 %v2496_v60, %v2495_v4  ;;  %v2500_v30 = vor.u32 %v2499_v56, %v2498_v5  ;;  %v2503_v17 = vor.u32 %v2502_v25, %v2501_v15  ;;  %v2506_v32 = vor.u32 %v2505_v6, %v2504_v22 }
 0x4ac   : > { %v2509_v0 = vor.u32 %v2508_v14, %v2507_v23  ;;  %v2596_v56 = vand.u32 31, %v2594_v52  ;;  %v2696_v6 = vadd.s32 1, %v8685_v27  ;;  %v2595_v14 = vshrl.u32 %v2594_v52, 5 }
 0x4ad   : > { %v2514_v46 = vsel %vm2510_vm9, %v2494_v44, %v2497_v1  ;;  %v2515_v29 = vsel %vm2513_vm2, %v2503_v17, 2102212464  ;;  %v2518_v36 = vsel %vm2510_vm9, %v2497_v1, %v2500_v30  ;;  %v2519_v18 = vsel %vm2513_vm2, %v2506_v32, 920167782 }
 0x4ae   : > { %v2522_v37 = vsel %vm2510_vm9, %v2500_v30, %v2503_v17  ;;  %v2516_v7 = vsel %vm2512_vm11, %v2500_v30, %v2515_v29  ;;  %v2520_v42 = vsel %vm2512_vm11, %v2503_v17, %v2519_v18  ;;  %v2523_v55 = vsel %vm2513_vm2, %v2509_v0, 1326507024 }
 0x4af   : > { %v2517_v4 = vsel %vm2511_vm12, %v2514_v46, %v2516_v7  ;;  %v2521_v5 = vsel %vm2511_vm12, %v2518_v36, %v2520_v42  ;;  %v2524_v60 = vsel %vm2512_vm11, %v2506_v32, %v2523_v55  ;;  %v2597_v47 = vsub.s32 32, %v2596_v56 }
 0x4b0   : > { %v2525_v15 = vsel %vm2511_vm12, %v2522_v37, %v2524_v60  ;;  %v12157_v25 = vmul.u32.u64.low %v12131_v33, %v2521_v5  ;;  %v12158_v22 = vmul.u32.u64.high %v12131_v33, %v2521_v5, %v12157_v25  ;;  %v2533_v44 = vmul.u32 %v12131_v33, %v2517_v4 }
 0x4b1   : > { %v12162_v51 = vmul.u32.u64.low %v12131_v33, %v2525_v15  ;;  %v12163_v23 = vmul.u32.u64.high %v12131_v33, %v2525_v15, %v12162_v51  ;;  %v2599_v1 = vshll.u32 %v15378_v61, %v2596_v56  ;;  %v2602_v30 = vshll.u32 %v15470_v24, %v2596_v56 }
 0x4b2   : > { %v2605_v17 = vshll.u32 %v15471_v10, %v2596_v56  ;;  %v2600_v32 = vshrl.u32 %v15470_v24, %v2597_v47  ;;  %v2603_v0 = vshrl.u32 %v15471_v10, %v2597_v47  ;;  %v2606_v27 = vshrl.u32 %v15472_v57, %v2597_v47 }
 0x4b3   : > { %v2608_v46 = vshll.u32 %v15472_v57, %v2596_v56  ;;  %v2536_v29 = vadd.s32 1, %v12158_v22  ;;  %v2609_v52 = vshrl.u32 %v15462_v28, %v2597_v47  ;;  %v2611_v33 = vshll.u32 %v15462_v28, %v2596_v56 }
 0x4b4   : > { %v2612_v36 = vshrl.u32 %v15463_v58, %v2597_v47  ;;  %vm2535_vm6 = vc.u32 %v12163_v23, %v12157_v25  ;;  %v2598_v18 = vshrl.u32 %v15378_v61, %v2597_v47  ;;  %v2601_v37 = vor.u32 %v2600_v32, %v2599_v1 }
 0x4b5   : > { %v2604_v7 = vor.u32 %v2603_v0, %v2602_v30  ;;  %v2537_v42 = vsel %vm2535_vm6, %v2536_v29, %v12158_v22  ;;  %v2607_v55 = vor.u32 %v2606_v27, %v2605_v17  ;;  %v2610_v4 = vor.u32 %v2609_v52, %v2608_v46 }
 0x4b6   : > { %v2613_v5 = vor.u32 %v2612_v36, %v2611_v33  ;;  %v2538_v60 = vadd.s32 %v2537_v42, %v2533_v44  ;;  %vm2614_vm7 = vcmp.lt.s32.totalorder %v2595_v14, 1  ;;  %vm2615_vm8 = vcmp.lt.s32.totalorder %v2595_v14, 2 }
 0x4b7   : > { %vm2617_vm9 = vcmp.lt.s32.totalorder %v2595_v14, 4  ;;  %vm2616_vm11 = vcmp.lt.s32.totalorder %v2595_v14, 3  ;;  %v2622_v15 = vsel %vm2614_vm7, %v2601_v37, %v2604_v7  ;;  %v2618_v16 = vsel %vm2614_vm7, %v2598_v18, %v2601_v37 }
 0x4b8   : > { %v2619_v56 = vsel %vm2617_vm9, %v2607_v55, 2102212464  ;;  %v2623_v51 = vsel %vm2617_vm9, %v2610_v4, 920167782  ;;  %v2539_v2 = vadd.s32 536870912, %v2538_v60  ;;  %v2626_v26 = vsel %vm2614_vm7, %v2604_v7, %v2607_v55 }
 0x4b9   : > { %v2624_v40 = vsel %vm2616_vm11, %v2607_v55, %v2623_v51  ;;  %v2620_v47 = vsel %vm2616_vm11, %v2604_v7, %v2619_v56  ;;  %v2627_v30 = vsel %vm2617_vm9, %v2613_v5, 1326507024  ;;  %vm2697_vm2 = vcmp.gt.s32.totalorder %v2696_v6, 0 }
 0x4ba   : > { %v2625_v1 = vsel %vm2615_vm8, %v2622_v15, %v2624_v40  ;;  %v2540_v22 = vshrl.u32 %v2539_v2, 30  ;;  %v2628_v17 = vsel %vm2616_vm11, %v2610_v4, %v2627_v30  ;;  %v15492_v27 = vand.u32 2147483647, %v12122_v8 }
 0x4bb   : > { %v12183_v44 = vmul.u32.u64.low %v12139_v41, %v2625_v1  ;;  %v12184_v32 = vmul.u32.u64.high %v12139_v41, %v2625_v1, %v12183_v44  ;;  %v2629_v0 = vsel %vm2615_vm8, %v2626_v26, %v2628_v17  ;;  %v2698_v29 = vsel %vm2697_vm2, %v2696_v6, 0 }
 0x4bc   : > { %v2693_v46 = vand.u32 8388607, %v15492_v27  ;;  %v2541_v52 = vshll.u32 %v2540_v22, 30  ;;  %v2621_v33 = vsel %vm2615_vm8, %v2618_v16, %v2620_v47  ;;  %v2700_v2 = vand.u32 31, %v2698_v29 }
 0x4bd   : > { %v12192_v40 = vmul.u32.u64.low %v12139_v41, %v2629_v0  ;;  %v12193_v36 = vmul.u32.u64.high %v12139_v41, %v2629_v0, %v12192_v40  ;;  %v12197_v18 = vmul.f32 %v12089_v39, %v12135_v35  ;;  %v12200_v37 = vsub.s32 32, %v12153_v3 }
 0x4be   : > { %v12203_v26 = vsub.s32 %v2538_v60, %v2541_v52  ;;  %v2640_v6 = vadd.s32 1, %v12184_v32  ;;  %v15493_v16 = vand.u32 2147483647, %v12106_v49  ;;  %vm2480_vm6 = vcmp.lt.s32.totalorder %v12106_v49, 0 }
 0x4bf   : > { %v2637_v39 = vmul.u32 %v12139_v41, %v2621_v33  ;;  %v2694_v7 = vor.u32 8388608, %v2693_v46  ;;  %v2564_v55 = vsub.s32 4, %v2540_v22  ;;  %vm2639_vm7 = vc.u32 %v12193_v36, %v12183_v44 }
 0x4c0   : > { %vm12208_vm12 = vcmp.le.f32.partialorder %v15493_v16, 0.7853982  ;;  %v2544_v42 = vsub.s32 0, %v12203_v26  ;;  %v2701_v53 = vsub.s32 32, %v2700_v2  ;;  %v12218_v4 = vshrl.u32 %v12137_v50, 5 }
 0x4c1   : > { %v12222_v5 = vshll.u32 %v15472_v57, %v12153_v3  ;;  %v2641_v60 = vsel %vm2639_vm7, %v2640_v6, %v12184_v32  ;;  %v12228_v41 = vshrl.u32 %v15462_v28, %v12200_v37  ;;  %v12232_v15 = vshll.u32 %v15462_v28, %v12153_v3 }
 0x4c2   : > { %v8678_v51 = vmin.u32 %v2544_v42, %v12203_v26  ;;  %v2642_v50 = vadd.s32 %v2641_v60, %v2637_v39  ;;  %v12237_v47 = vshrl.u32 %v15463_v58, %v12200_v37  ;;  %v2534_v1 = vadd.s32 %v12157_v25, %v12163_v23 }
 0x4c3   : > { %v12241_v30 = vshrl.u32 %v2698_v29, 5  ;;  %v12243_v17 = vshll.u32 %v2694_v7, 8  ;;  %v12247_v0 = vsel %vm2480_vm6, %v2564_v55, %v2540_v22  ;;  %v2704_v27 = vshrl.u32 %v15470_v24, %v2701_v53  ;;  %v12259_v55 = vpop.eup %10170 }
 0x4c4   : > { %v2546_v32 = vclz %v8678_v51  ;;  %v2707_v46 = vshrl.u32 %v15471_v10, %v2701_v53  ;;  %v2643_v52 = vadd.s32 536870912, %v2642_v50  ;;  %v2710_v33 = vshrl.u32 %v15472_v57, %v2701_v53  ;;  %15496 = vst [vmem:[#allocation29_spill] sm:$0xff] %v12259_v55 }
 0x4c5   : > { %v2712_v40 = vshll.u32 %v15472_v57, %v2700_v2  ;;  %v2713_v25 = vshrl.u32 %v15462_v28, %v2701_v53  ;;  %v2703_v29 = vshll.u32 %v15378_v61, %v2700_v2  ;;  %v2716_v6 = vshrl.u32 %v15463_v58, %v2701_v53 }
 0x4c6   : > { %v8679_v23 = vadd.s32 4294967294, %v2546_v32  ;;  %v2793_v16 = vand.u32 2139095040, %v12197_v18  ;;  %v2644_v22 = vshrl.u32 %v2643_v52, 30  ;;  %v2706_v39 = vshll.u32 %v15470_v24, %v2700_v2 }
 0x4c7   : > { %v2709_v7 = vshll.u32 %v15471_v10, %v2700_v2  ;;  %v2714_v42 = vor.u32 %v2713_v25, %v2712_v40  ;;  %v2567_v60 = vsel %vm12208_vm12, 0, %v12247_v0  ;;  %v2705_v51 = vor.u32 %v2704_v27, %v2703_v29 }
 0x4c8   : > { %vm8680_vm8 = vcmp.lt.s32.totalorder %v8679_v23, 0  ;;  %v2715_v32 = vshll.u32 %v15462_v28, %v2700_v2  ;;  %v2645_v61 = vshll.u32 %v2644_v22, 30  ;;  %v2708_v48 = vor.u32 %v2707_v46, %v2706_v39 }
 0x4c9   : > { %v2549_v56 = vsel %vm8680_vm8, 0, %v8679_v23  ;;  %v2711_v34 = vor.u32 %v2710_v33, %v2709_v7  ;;  %vm2721_vm9 = vcmp.lt.s32.totalorder %v12241_v30, 4  ;;  %vm2584_vm11 = vcmp.lt.s32.totalorder %v12110_v45, 0 }
 0x4ca   : > { %v2550_v52 = vsub.s32 32, %v2549_v56  ;;  %v2554_v54 = vsub.s32 4294967266, %v2549_v56  ;;  %v2717_v31 = vor.u32 %v2716_v6, %v2715_v32  ;;  %v12267_v40 = vsub.s32 %v2642_v50, %v2645_v61 }
 0x4cb   : > { %v15497_v25 = vmov 683565275   ;;  %vm2718_vm2 = vcmp.lt.s32.totalorder %v12241_v30, 1  ;;  %v2727_v2 = vsel %vm2721_vm9, %v2714_v42, 920167782  ;;  %v2551_v0 = vshll.u32 %v12203_v26, %v2549_v56 }
 0x4cc   : > { %v2702_v21 = vshrl.u32 %v15497_v25, %v2701_v53  ;;  %v2552_v27 = vshrl.u32 %v2534_v1, %v2550_v52  ;;  %v2555_v46 = vadd.s32 127, %v2554_v54  ;;  %vm2720_vm7 = vcmp.lt.s32.totalorder %v12241_v30, 3 }
 0x4cd   : > { %v2648_v33 = vsub.s32 0, %v12267_v40  ;;  %v2726_v23 = vsel %vm2718_vm2, %v2705_v51, %v2708_v48  ;;  %v2728_v61 = vsel %vm2720_vm7, %v2711_v34, %v2727_v2  ;;  %v2730_v53 = vsel %vm2718_vm2, %v2708_v48, %v2711_v34 }
 0x4ce   : > { %v2553_v50 = vor.u32 %v2552_v27, %v2551_v0  ;;  %v2556_v29 = vshll.u32 %v2555_v46, 23  ;;  %v15498_v6 = vand.u32 2147483647, %v12110_v45  ;;  %v2723_v54 = vsel %vm2721_vm9, %v2711_v34, 2102212464 }
 0x4cf   : > { %v2731_v56 = vsel %vm2721_vm9, %v2717_v31, 1326507024  ;;  %v8682_v1 = vmin.u32 %v2648_v33, %v12267_v40  ;;  %vm2719_vm14 = vcmp.lt.s32.totalorder %v12241_v30, 2  ;;  %v2794_v7 = vshrl.u32 %v2793_v16, 23 }
 0x4d0   : > { %vm12284_vm8 = vcmp.le.f32.partialorder %v15498_v6, 0.7853982  ;;  %v2732_v39 = vsel %vm2720_vm7, %v2714_v42, %v2731_v56  ;;  %v2557_v32 = vor.u32 4788187, %v2556_v29  ;;  %v2668_v52 = vsub.s32 4, %v2644_v22 }
 0x4d1   : > { %v2729_v2 = vsel %vm2719_vm14, %v2726_v23, %v2728_v61  ;;  %v2733_v0 = vsel %vm2719_vm14, %v2730_v53, %v2732_v39  ;;  %v2560_v34 = vcvt.s32.f32 %v2553_v50  ;;  %v2650_v27 = vclz %v8682_v1 }
 0x4d2   : > { %v2722_v31 = vsel %vm2718_vm2, %v2702_v21, %v2705_v51  ;;  %v2724_v46 = vsel %vm2720_vm7, %v2708_v48, %v2723_v54  ;;  %v2558_v33 = vand.u32 2147483647, %v2557_v32  ;;  %v8689_v29 = vadd.s32 4294967169, %v2794_v7 }
 0x4d3   : > { %v12305_v42 = vmul.u32.u64.low %v12243_v17, %v2733_v0  ;;  %v12306_v16 = vmul.u32.u64.high %v12243_v17, %v2733_v0, %v12305_v42  ;;  %v12310_v23 = vor.u32 %v12228_v41, %v12222_v5  ;;  %v8683_v61 = vadd.s32 4294967294, %v2650_v27 }
 0x4d4   : > { %v12313_v53 = vmul.u32.u64.low %v12243_v17, %v2729_v2  ;;  %v12314_v50 = vmul.u32.u64.high %v12243_v17, %v2729_v2, %v12313_v53  ;;  %v2925_v21 = vor.u32 %v12237_v47, %v12232_v15  ;;  %v2561_v48 = vmul.f32 %v2560_v34, %v2558_v33 }
 0x4d5   : > { %v2669_v51 = vsel %vm2584_vm11, %v2668_v52, %v2644_v22  ;;  %v2800_v6 = vadd.s32 1, %v8689_v29  ;;  %v2571_v54 = vadd.s32 3, %v2567_v60  ;;  %vm8684_vm9 = vcmp.lt.s32.totalorder %v8683_v61, 0 }
 0x4d6   : > { %v2725_v5 = vsel %vm2719_vm14, %v2722_v31, %v2724_v46  ;;  %v15501_v41 = vand.u32 2147483647, %v12197_v18  ;;  %v2562_v1 = vxor.u32 2147483648, %v2561_v48  ;;  %v2638_v39 = vadd.s32 %v12183_v44, %v12193_v36 }
 0x4d7   : > { %v2653_v7 = vsel %vm8684_vm9, 0, %v8683_v61  ;;  %vm2743_vm2 = vc.u32 %v12306_v16, %v12313_v53  ;;  %v2671_v22 = vsel %vm12284_vm8, 0, %v2669_v51  ;;  %v2744_v60 = vadd.s32 1, %v12314_v50 }
 0x4d8   : > { %v2797_v56 = vand.u32 8388607, %v15501_v41  ;;  %v2654_v15 = vsub.s32 32, %v2653_v7  ;;  %v2658_v47 = vsub.s32 4294967266, %v2653_v7  ;;  %v2563_v30 = vsel %vm2480_vm6, %v2562_v1, %v2561_v48 }
 0x4d9   : > { %v2655_v32 = vshll.u32 %v12267_v40, %v2653_v7  ;;  %v2741_v52 = vmul.u32 %v12243_v17, %v2725_v5  ;;  %vm2801_vm14 = vcmp.gt.s32.totalorder %v2800_v6, 0  ;;  %v2566_v44 = vsel %vm12208_vm12, %v12106_v49, %v2563_v30 }
 0x4da   : > { %v2656_v36 = vshrl.u32 %v2638_v39, %v2654_v15  ;;  %v2659_v2 = vadd.s32 127, %v2658_v47  ;;  %v2745_v0 = vsel %vm2743_vm2, %v2744_v60, %v12314_v50  ;;  %10172 = vcosq.f32 %v2566_v44 }
 0x4db   : > { %v12340_v34 = vand.u32 3, %v2571_v54  ;;  %v2746_v27 = vadd.s32 %v2745_v0, %v2741_v52  ;;  %v2802_v31 = vsel %vm2801_vm14, %v2800_v6, 0  ;;  %10174 = vsinq.f32 %v2566_v44 }
 0x4dc   : > { %v2657_v46 = vor.u32 %v2656_v36, %v2655_v32  ;;  %v2660_v33 = vshll.u32 %v2659_v2, 23  ;;  %v2675_v40 = vadd.s32 3, %v2671_v22  ;;  %v2798_v17 = vor.u32 8388608, %v2797_v56 }
 0x4dd   : > { %v2747_v42 = vadd.s32 536870912, %v2746_v27  ;;  %v2804_v29 = vand.u32 31, %v2802_v31  ;;  %vm2929_vm6 = vcmp.lt.s32.totalorder %v12218_v4, 4  ;;  %v12345_v61 = vrot.slane %v12259_v55, %v10997_v63 }
 0x4de   : > { %v2661_v14 = vor.u32 4788187, %v2660_v33  ;;  %v12350_v50 = vsel %vm2929_vm6, %v12310_v23, 920167782  ;;  %v12354_v48 = vsel %vm2929_vm6, %v2925_v21, 1326507024  ;;  %v2664_v5 = vcvt.s32.f32 %v2657_v46 }
 0x4df   : > { %v12356_v51 = vshrl.u32 %v2747_v42, 30  ;;  %v2805_v6 = vsub.s32 32, %v2804_v29  ;;  %vm2574_vm12 = vcmp.eq.s32.totalorder %v12340_v34, 0  ;;  %vm2577_vm7 = vcmp.eq.s32.totalorder %v12340_v34, 2 }
 0x4e0   : > { %v2662_v54 = vand.u32 2147483647, %v2661_v14  ;;  %v12360_v41 = vand.u32 3, %v2675_v40  ;;  %vm2573_vm9 = vcmp.lt.s32.totalorder %v12340_v34, 2  ;;  %v12364_v1 = vshll.u32 %v2798_v17, 8 }
 0x4e1   : > { %v2749_v56 = vshll.u32 %v12356_v51, 30  ;;  %v12369_v39 = vshrl.u32 %v15497_v25, %v12200_v37  ;;  %v2808_v15 = vshrl.u32 %v15470_v24, %v2805_v6  ;;  %v2811_v47 = vshrl.u32 %v15471_v10, %v2805_v6 }
 0x4e2   : > { %v2665_v7 = vmul.f32 %v2664_v5, %v2662_v54  ;;  %v12375_v22 = vshll.u32 %v15497_v25, %v12153_v3  ;;  %v12379_v30 = vshrl.u32 %v2802_v31, 5  ;;  %v2807_v32 = vshll.u32 %v15497_v25, %v2804_v29 }
 0x4e3   : > { %v12377_v60 = vsub.s32 %v2746_v27, %v2749_v56  ;;  %v2814_v52 = vshrl.u32 %v15472_v57, %v2805_v6  ;;  %vm2570_vm2 = vweird.f32 %v12106_v49  ;;  %v2810_v36 = vshll.u32 %v15470_v24, %v2804_v29 }
 0x4e4   : > { %v2666_v44 = vxor.u32 2147483648, %v2665_v7  ;;  %v2817_v2 = vshrl.u32 %v15462_v28, %v2805_v6  ;;  %v2820_v0 = vshrl.u32 %v15463_v58, %v2805_v6  ;;  %v10173_v46 = vpop.eup %10172  ;;  %v2813_v27 = vshll.u32 %v15471_v10, %v2804_v29 }
 0x4e5   : > { %v2752_v33 = vsub.s32 0, %v12377_v60  ;;  %v2816_v31 = vshll.u32 %v15472_v57, %v2804_v29  ;;  %v2819_v40 = vshll.u32 %v15462_v28, %v2804_v29  ;;  %v10175_v42 = vpop.eup %10174  ;;  %v2578_v17 = vxor.u32 2147483648, %v10173_v46 }
 0x4e6   : > { %v2667_v14 = vsel %vm2584_vm11, %v2666_v44, %v2665_v7  ;;  %v2809_v54 = vor.u32 %v2808_v15, %v2807_v32  ;;  %v2812_v5 = vor.u32 %v2811_v47, %v2810_v36  ;;  %v2575_v56 = vxor.u32 2147483648, %v10175_v42 }
 0x4e7   : > { %v2670_v21 = vsel %vm12284_vm8, %v12110_v45, %v2667_v14  ;;  %v8686_v63 = vmin.u32 %v2752_v33, %v12377_v60  ;;  %v2815_v55 = vor.u32 %v2814_v52, %v2813_v27  ;;  %v2579_v58 = vsel %vm2577_vm7, %v2578_v17, %v10175_v42 }
 0x4e8   : > { %10176 = vcosq.f32 %v2670_v21  ;;  %v2818_v29 = vor.u32 %v2817_v2, %v2816_v31  ;;  %v2821_v28 = vor.u32 %v2820_v0, %v2819_v40  ;;  %v2576_v13 = vsel %vm2574_vm12, %v10173_v46, %v2575_v56 }
 0x4e9   : > { %10178 = vsinq.f32 %v2670_v21  ;;  %v2742_v7 = vadd.s32 %v12313_v53, %v12306_v16  ;;  %v2754_v15 = vclz %v8686_v63  ;;  %v2580_v26 = vsel %vm2573_vm9, %v2576_v13, %v2579_v58 }
 0x4ea   : > { %v2806_v47 = vshrl.u32 %v15497_v25, %v2805_v6  ;;  %vm2822_vm11 = vcmp.lt.s32.totalorder %v12379_v30, 1  ;;  %vm2823_vm8 = vcmp.lt.s32.totalorder %v12379_v30, 2  ;;  %vm2824_vm14 = vcmp.lt.s32.totalorder %v12379_v30, 3 }
 0x4eb   : > { %v8687_v32 = vadd.s32 4294967294, %v2754_v15  ;;  %vm2825_vm7 = vcmp.lt.s32.totalorder %v12379_v30, 4  ;;  %v2830_v21 = vsel %vm2822_vm11, %v2809_v54, %v2812_v5  ;;  %vm2681_vm12 = vcmp.eq.s32.totalorder %v12360_v41, 2 }
 0x4ec   : > { %v2827_v63 = vsel %vm2825_vm7, %v2815_v55, 2102212464  ;;  %v2831_v16 = vsel %vm2825_vm7, %v2818_v29, 920167782  ;;  %v2834_v13 = vsel %vm2822_vm11, %v2812_v5, %v2815_v55  ;;  %v2835_v58 = vsel %vm2825_vm7, %v2821_v28, 1326507024 }
 0x4ed   : > { %v2581_v53 = vsel %vm2570_vm2, nan, %v2580_v26  ;;  %vm2678_vm9 = vcmp.eq.s32.totalorder %v12360_v41, 0  ;;  %vm8688_vm10 = vcmp.lt.s32.totalorder %v8687_v32, 0  ;;  %v2832_v34 = vsel %vm2824_vm14, %v2815_v55, %v2831_v16 }
 0x4ee   : > { %v2836_v6 = vsel %vm2824_vm14, %v2818_v29, %v2835_v58  ;;  %vm2677_vm0 = vcmp.lt.s32.totalorder %v12360_v41, 2  ;;  %v2757_v52 = vsel %vm8688_vm10, 0, %v8687_v32  ;;  %v2833_v44 = vsel %vm2823_vm8, %v2830_v21, %v2832_v34 }
 0x4ef   : > { %v2837_v28 = vsel %vm2823_vm8, %v2834_v13, %v2836_v6  ;;  %v15502_v49 = vand.u32 2147483647, %v12102_v43  ;;  %vm2674_vm2 = vweird.f32 %v12110_v45  ;;  %v2758_v2 = vsub.s32 32, %v2757_v52 }
 0x4f0   : > { %v2762_v0 = vsub.s32 4294967266, %v2757_v52  ;;  %v2826_v55 = vsel %vm2822_vm11, %v2806_v47, %v2809_v54  ;;  %v2828_v46 = vsel %vm2824_vm14, %v2812_v5, %v2827_v63  ;;  %v2998_v33 = vmul.f32 %v2581_v53, %v2581_v53 }
 0x4f1   : > { %v2901_v36 = vand.u32 8388607, %v15502_v49  ;;  %v2759_v27 = vshll.u32 %v12377_v60, %v2757_v52  ;;  %v12436_v31 = vmul.u32.u64.low %v12364_v1, %v2837_v28  ;;  %v12437_v40 = vmul.u32.u64.high %v12364_v1, %v2837_v28, %v12436_v31 }
 0x4f2   : > { %vm2688_vm10 = vcmp.lt.s32.totalorder %v12122_v8, 0  ;;  %v2760_v42 = vshrl.u32 %v2742_v7, %v2758_v2  ;;  %v2763_v17 = vadd.s32 127, %v2762_v0  ;;  %v10177_v54 = vpop.eup %10176  ;;  %v2829_v5 = vsel %vm2823_vm8, %v2826_v55, %v2828_v46 }
 0x4f3   : > { %v12441_v14 = vmul.u32.u64.low %v12364_v1, %v2833_v44  ;;  %v12442_v56 = vmul.u32.u64.high %v12364_v1, %v2833_v44, %v12441_v14  ;;  %v2912_v60 = vshrl.u32 %v15470_v24, %v12200_v37  ;;  %v2914_v29 = vshll.u32 %v15470_v24, %v12153_v3  ;;  %v10179_v7 = vpop.eup %10178 }
 0x4f4   : > { %v2915_v15 = vshrl.u32 %v15471_v10, %v12200_v37  ;;  %v2682_v26 = vxor.u32 2147483648, %v10177_v54  ;;  %v2761_v47 = vor.u32 %v2760_v42, %v2759_v27  ;;  %v2764_v32 = vshll.u32 %v2763_v17, 23 }
 0x4f5   : > { %v2918_v21 = vshrl.u32 %v15472_v57, %v12200_v37  ;;  %v2679_v63 = vxor.u32 2147483648, %v10179_v7  ;;  %v3007_v30 = vmul.f32 %v12345_v61, %v2998_v33  ;;  %vm2847_vm11 = vc.u32 %v12437_v40, %v12441_v14 }
 0x4f6   : > { %v2917_v16 = vshll.u32 %v15471_v10, %v12153_v3  ;;  %v2683_v13 = vsel %vm2681_vm12, %v2682_v26, %v10179_v7  ;;  %v15503_v58 = vand.u32 2147483647, %v12122_v8  ;;  %v2765_v34 = vor.u32 4788187, %v2764_v32 }
 0x4f7   : > { %v2772_v37 = vsub.s32 4, %v12356_v51  ;;  %v2848_v6 = vadd.s32 1, %v12442_v56  ;;  %v2680_v52 = vsel %vm2678_vm9, %v10177_v54, %v2679_v63  ;;  %v2845_v44 = vmul.u32 %v12364_v1, %v2829_v5 }
 0x4f8   : > { %vm12464_vm8 = vcmp.le.f32.partialorder %v15503_v58, 0.7853982  ;;  %v2916_v3 = vor.u32 %v2915_v15, %v2914_v29  ;;  %v2919_v28 = vor.u32 %v2918_v21, %v2917_v16  ;;  %v2684_v49 = vsel %vm2677_vm0, %v2680_v52, %v2683_v13 }
 0x4f9   : > { %v2766_v2 = vand.u32 2147483647, %v2765_v34  ;;  %v2768_v0 = vcvt.s32.f32 %v2761_v47  ;;  %v2849_v55 = vsel %vm2847_vm11, %v2848_v6, %v12442_v56  ;;  %v2685_v46 = vsel %vm2674_vm2, nan, %v2684_v49 }
 0x4fa   : > { %v12479_v33 = vadd.f32 %v3007_v30, %v12095_v11  ;;  %v2850_v27 = vadd.s32 %v2849_v55, %v2845_v44  ;;  %v2902_v31 = vor.u32 8388608, %v2901_v36  ;;  %v2999_v42 = vmul.f32 %v2685_v46, %v2685_v46 }
 0x4fb   : > { %v2769_v17 = vmul.f32 %v2768_v0, %v2766_v2  ;;  %v2913_v1 = vor.u32 %v2912_v60, %v12375_v22  ;;  %vm2926_vm14 = vcmp.lt.s32.totalorder %v12218_v4, 1  ;;  %v2773_v41 = vsel %vm2688_vm10, %v2772_v37, %v12356_v51 }
 0x4fc   : > { %v2851_v54 = vadd.s32 536870912, %v2850_v27  ;;  %vm2928_vm0 = vcmp.lt.s32.totalorder %v12218_v4, 3  ;;  %v2938_v45 = vsel %vm2926_vm14, %v2916_v3, %v2919_v28  ;;  %v3008_v56 = vmul.f32 %v12345_v61, %v2999_v42 }
 0x4fd   : > { %v2770_v5 = vxor.u32 2147483648, %v2769_v17  ;;  %vm2927_vm7 = vcmp.lt.s32.totalorder %v12218_v4, 2  ;;  %v2940_v22 = vsel %vm2928_vm0, %v12310_v23, %v12354_v48  ;;  %v3022_v36 = vrot.slane %v12479_v33, 6 }
 0x4fe   : > { %v12496_v60 = vshrl.u32 %v2851_v54, 30  ;;  %v2941_v51 = vsel %vm2927_vm7, %v2938_v45, %v2940_v22  ;;  %v2942_v29 = vshll.u32 %v2902_v31, 8  ;;  %v12501_v15 = vadd.f32 %v3008_v56, %v12098_v59 }
 0x4ff   : > { %v2771_v7 = vsel %vm2688_vm10, %v2770_v5, %v2769_v17  ;;  %v2934_v26 = vsel %vm2926_vm14, %v2913_v1, %v2916_v3  ;;  %v2936_v23 = vsel %vm2928_vm0, %v2919_v28, %v12350_v50  ;;  %v2931_v16 = vsel %vm2929_vm6, %v2919_v28, 2102212464 }
 0x500   : > { %v2774_v48 = vsel %vm12464_vm8, %v12122_v8, %v2771_v7  ;;  %v2853_v47 = vshll.u32 %v12496_v60, 30  ;;  %v12514_v32 = vmul.u32.u64.low %v2942_v29, %v2941_v51  ;;  %v12515_v21 = vmul.u32.u64.high %v2942_v29, %v2941_v51, %v12514_v32 }
 0x501   : > { %v3023_v63 = vrot.slane %v12501_v15, 6  ;;  %v3040_v30 = vpack.c.bf16 %v12501_v15, %v12479_v33  ;;  %10180 = vcosq.f32 %v2774_v48  ;;  %v2775_v50 = vsel %vm12464_vm8, 0, %v2773_v41 }
 0x502   : > { %10182 = vsinq.f32 %v2774_v48  ;;  %v2854_v13 = vsub.s32 %v2850_v27, %v2853_v47  ;;  %v2937_v58 = vsel %vm2927_vm7, %v2934_v26, %v2936_v23  ;;  %v2930_v52 = vsel %vm2926_vm14, %v12369_v39, %v2913_v1 }
 0x503   : > { %v3024_v34 = vsel %vm1094_vm13, %v3022_v36, %v3023_v63  ;;  %3241 = vmatprep.mubr.bf16.mxu0 %v3040_v30  ;;  %v2932_v53 = vsel %vm2928_vm0, %v2916_v3, %v2931_v16  ;;  %v2779_v44 = vadd.s32 3, %v2775_v50  ;;  %v2846_v56 = vadd.s32 %v12441_v14, %v12437_v40 }
 0x504   : > { %v8723_v37 = vpack.c.bf16 %v3024_v34, %v3022_v36  ;;  %v2856_v6 = vsub.s32 0, %v2854_v13  ;;  %v12534_v28 = vmul.u32.u64.low %v2942_v29, %v2937_v58  ;;  %v12535_v49 = vmul.u32.u64.high %v2942_v29, %v2937_v58, %v12534_v28 }
 0x505   : > { %v2933_v0 = vsel %vm2927_vm7, %v2930_v52, %v2932_v53  ;;  %v2780_v39 = vand.u32 3, %v2779_v44  ;;  %vm2778_vm10 = vweird.f32 %v12122_v8  ;;  %v3043_v40 = vrot.slane %v12479_v33, 2 }
 0x506   : > { %8724 = vmatmul.mubr.msk.bf16.vlgmr.msra.gmra.mrb[24].mxu0 %vm11414_vm3, %v8723_v37  ;;  %v8690_v2 = vmin.u32 %v2856_v6, %v2854_v13  ;;  %vm2951_vm6 = vc.u32 %v12515_v21, %v12534_v28  ;;  %v2952_v46 = vadd.s32 1, %v12535_v49  ;;  %v2949_v27 = vmul.u32 %v2942_v29, %v2933_v0 }
 0x507   : > { %vm2782_vm9 = vcmp.eq.s32.totalorder %v2780_v39, 0  ;;  %vm2785_vm2 = vcmp.eq.s32.totalorder %v2780_v39, 2  ;;  %vm2781_vm11 = vcmp.lt.s32.totalorder %v2780_v39, 2  ;;  %v3044_v14 = vrot.slane %v12501_v15, 2 }
 0x508   : > { %v2858_v55 = vclz %v8690_v2  ;;  %v2953_v42 = vsel %vm2951_vm6, %v2952_v46, %v12535_v49  ;;  %v2876_v2 = vsub.s32 4, %v12496_v60  ;;  %vm2792_vm8 = vcmp.lt.s32.totalorder %v12197_v18, 0 }
 0x509   : > { %v2954_v41 = vadd.s32 %v2953_v42, %v2949_v27  ;;  %v3045_v53 = vsel %vm15412_vm15, %v3043_v40, %v3044_v14  ;;  %vm15507_vm0 = vmmov 0  }
 0x50a   : > { %v8691_v3 = vadd.s32 4294967294, %v2858_v55 }
 0x50b   : > { %v10181_v31 = vpop.eup %10180  ;;  %v2955_v51 = vadd.s32 536870912, %v2954_v41 }
 0x50c   : > { %v10183_v17 = vpop.eup %10182  ;;  %v2786_v1 = vxor.u32 2147483648, %v10181_v31  ;;  %vm8692_vm12 = vcmp.lt.s32.totalorder %v8691_v3, 0 }
 0x50d   : > { %v2783_v54 = vxor.u32 2147483648, %v10183_v17  ;;  %v2861_v4 = vsel %vm8692_vm12, 0, %v8691_v3  ;;  %v12549_v47 = vshrl.u32 %v2955_v51, 30  ;;  %v15506_v3 = vand.u32 2147483647, %v12197_v18 }
 0x50e   : > { %v2787_v45 = vsel %vm2785_vm2, %v2786_v1, %v10183_v17  ;;  %v2862_v5 = vsub.s32 32, %v2861_v4  ;;  %v2866_v22 = vsub.s32 4294967266, %v2861_v4  ;;  %v2863_v7 = vshll.u32 %v2854_v13, %v2861_v4 }
 0x50f   : > { %v2784_v36 = vsel %vm2782_vm9, %v10181_v31, %v2783_v54  ;;  %v2957_v50 = vshll.u32 %v12549_v47, 30  ;;  %vm2791_vm14 = vcmp.le.f32.partialorder %v15506_v3, 0.7853982  ;;  %v2877_v31 = vsel %vm2792_vm8, %v2876_v2, %v12496_v60 }
 0x510   : > { %v2788_v29 = vsel %vm2781_vm11, %v2784_v36, %v2787_v45  ;;  %v2864_v26 = vshrl.u32 %v2846_v56, %v2862_v5  ;;  %v2867_v23 = vadd.s32 127, %v2866_v22  ;;  %v2879_v1 = vsel %vm2791_vm14, 0, %v2877_v31 }
 0x511   : > { %v2789_v48 = vsel %vm2778_vm10, nan, %v2788_v29  ;;  %v2958_v34 = vsub.s32 %v2954_v41, %v2957_v50  ;;  %v2950_v54 = vadd.s32 %v12534_v28, %v12515_v21  ;;  %v2883_v56 = vadd.s32 3, %v2879_v1 }
 0x512   : > { %v3000_v32 = vmul.f32 %v2789_v48, %v2789_v48  ;;  %v2865_v30 = vor.u32 %v2864_v26, %v2863_v7  ;;  %v2868_v16 = vshll.u32 %v2867_v23, 23  ;;  %v2980_v28 = vsub.s32 4, %v12549_v47 }
 0x513   : > { %v2960_v52 = vsub.s32 0, %v2958_v34  ;;  %v2884_v29 = vand.u32 3, %v2883_v56  ;;  %vm2882_vm2 = vweird.f32 %v12197_v18  ;;  %vm2896_vm10 = vcmp.lt.s32.totalorder %v12102_v43, 0 }
 0x514   : > { %v3009_v8 = vmul.f32 %v12345_v61, %v3000_v32  ;;  %v2869_v58 = vor.u32 4788187, %v2868_v16  ;;  %v2872_v6 = vcvt.s32.f32 %v2865_v30 }
 0x515   : > { %v8694_v33 = vmin.u32 %v2960_v52, %v2958_v34  ;;  %vm2889_vm6 = vcmp.eq.s32.totalorder %v2884_v29, 2  ;;  %vm2886_vm12 = vcmp.eq.s32.totalorder %v2884_v29, 0  ;;  %vm2885_vm9 = vcmp.lt.s32.totalorder %v2884_v29, 2 }
 0x516   : > { %v12556_v13 = vadd.f32 %v3009_v8, %v12113_v19  ;;  %v2870_v37 = vand.u32 2147483647, %v2869_v58  ;;  %v2981_v52 = vsel %vm2896_vm10, %v2980_v28, %v12549_v47 }
 0x517   : > { %v2962_v46 = vclz %v8694_v33 }
 0x518   : > { %v3046_v44 = vrot.slane %v12556_v13, 2  ;;  %v2873_v49 = vmul.f32 %v2872_v6, %v2870_v37  ;;  %v15508_v37 = vand.u32 2147483647, %v12102_v43  ;;  %v3025_v2 = vrot.slane %v12556_v13, 6 }
 0x519   : > { %v8695_v17 = vadd.s32 4294967294, %v2962_v46 }
 0x51a   : > { %v3047_v0 = vsel %vm15412_vm15, %v3044_v14, %v3046_v44  ;;  %v2874_v55 = vxor.u32 2147483648, %v2873_v49  ;;  %vm2895_vm11 = vcmp.le.f32.partialorder %v15508_v37, 0.7853982 }
 0x51b   : > { %v3058_v39 = vpack.c.bf16 %v3047_v0, %v3045_v53  ;;  %vm8696_vm7 = vcmp.lt.s32.totalorder %v8695_v17, 0 }
 0x51c   : > { %v2875_v27 = vsel %vm2792_vm8, %v2874_v55, %v2873_v49  ;;  %v2965_v41 = vsel %vm8696_vm7, 0, %v8695_v17  ;;  %v3026_v55 = vsel %vm1094_vm13, %v3023_v63, %v3025_v2 }
 0x51d   : > { %9441 = vmatmul.mubr.bf16.vlgmr.msra.gmra.mrb[24].mxu1 %v3058_v39  ;;  %v2878_v42 = vsel %vm2791_vm14, %v12197_v18, %v2875_v27  ;;  %v2966_v4 = vsub.s32 32, %v2965_v41  ;;  %v2970_v45 = vsub.s32 4294967266, %v2965_v41  ;;  %v2967_v5 = vshll.u32 %v2958_v34, %v2965_v41 }
 0x51e   : > { %10184 = vcosq.f32 %v2878_v42  ;;  %9444 = vmatprep.mubr.msk.bf16.mxu1 %vm15507_vm0, %v15484_v62  ;;  %v2983_v18 = vsel %vm2895_vm11, 0, %v2981_v52 }
 0x51f   : > { %10186 = vsinq.f32 %v2878_v42  ;;  %v2968_v60 = vshrl.u32 %v2950_v54, %v2966_v4  ;;  %v2971_v22 = vadd.s32 127, %v2970_v45  ;;  %v2987_v46 = vadd.s32 3, %v2983_v18 }
 0x521   : > { %v2969_v36 = vor.u32 %v2968_v60, %v2967_v5  ;;  %v2972_v51 = vshll.u32 %v2971_v22, 23  ;;  %v2988_v27 = vand.u32 3, %v2987_v46 }
 0x523   : > { %v2973_v7 = vor.u32 4788187, %v2972_v51  ;;  %v2976_v30 = vcvt.s32.f32 %v2969_v36  ;;  %vm2993_vm8 = vcmp.eq.s32.totalorder %v2988_v27, 2  ;;  %vm2990_vm14 = vcmp.eq.s32.totalorder %v2988_v27, 0 }
 0x524   : > { %vm2989_vm7 = vcmp.lt.s32.totalorder %v2988_v27, 2 }
 0x525   : > { %v2974_v32 = vand.u32 2147483647, %v2973_v7 }
 0x527   : > { %v2977_v21 = vmul.f32 %v2976_v30, %v2974_v32 }
 0x528   : > { %v10185_v26 = vpop.eup %10184 }
 0x529   : > { %v10187_v23 = vpop.eup %10186  ;;  %v2890_v48 = vxor.u32 2147483648, %v10185_v26  ;;  %v2978_v8 = vxor.u32 2147483648, %v2977_v21 }
 0x52a   : > { %v2887_v16 = vxor.u32 2147483648, %v10187_v23 }
 0x52b   : > { %v2891_v50 = vsel %vm2889_vm6, %v2890_v48, %v10187_v23  ;;  %v2979_v6 = vsel %vm2896_vm10, %v2978_v8, %v2977_v21  ;;  %vm2986_vm6 = vweird.f32 %v12102_v43 }
 0x52c   : > { %v2888_v40 = vsel %vm2886_vm12, %v10185_v26, %v2887_v16  ;;  %v2982_v53 = vsel %vm2895_vm11, %v12102_v43, %v2979_v6  ;;  %v12602_v16 = vld [vmem:[#allocation7 + $0x8] sm:$0xff] }
 0x52d   : > { %v2892_v14 = vsel %vm2885_vm9, %v2888_v40, %v2891_v50  ;;  %10188 = vcosq.f32 %v2982_v53  ;;  %v3064_v50 = vrot.slane %v12602_v16, %v11540_v12 }
 0x52e   : > { %v2893_v58 = vsel %vm2882_vm2, nan, %v2892_v14  ;;  %10190 = vsinq.f32 %v2982_v53 }
 0x52f   : > { %v3001_v34 = vmul.f32 %v2893_v58, %v2893_v58 }
 0x531   : > { %v3010_v49 = vmul.f32 %v12345_v61, %v3001_v34 }
 0x533   : > { %v3015_v33 = vadd.f32 %v3010_v49, %v12135_v35 }
 0x535   : > { %v3041_v0 = vpack.c.bf16 %v3015_v33, %v12556_v13  ;;  %v3027_v39 = vrot.slane %v3015_v33, 6  ;;  %v3048_v56 = vrot.slane %v3015_v33, 2 }
 0x537   : > { %3249 = vmatprep.mubr.bf16.mxu0 %v3041_v0  ;;  %v3028_v47 = vsel %vm1094_vm13, %v3025_v2, %v3027_v39  ;;  %v10189_v31 = vpop.eup %10188  ;;  %v3049_v60 = vsel %vm15412_vm15, %v3046_v44, %v3048_v56 }
 0x538   : > { %v3038_v3 = vpack.c.bf16 %v3028_v47, %v3026_v55  ;;  %v10191_v42 = vpop.eup %10190  ;;  %v2994_v17 = vxor.u32 2147483648, %v10189_v31 }
 0x539   : > { %v2991_v1 = vxor.u32 2147483648, %v10191_v42 }
 0x53a   : > { %3250 = vmatmul.mubr.bf16.gmra.mrb[28].mxu0 %v3038_v3  ;;  %v2995_v41 = vsel %vm2993_vm8, %v2994_v17, %v10191_v42 }
 0x53b   : > { %v2992_v54 = vsel %vm2990_vm14, %v10189_v31, %v2991_v1 }
 0x53c   : > { %v2996_v15 = vsel %vm2989_vm7, %v2992_v54, %v2995_v41 }
 0x53d   : > { %v2997_v63 = vsel %vm2986_vm6, nan, %v2996_v15 }
 0x53e   : > { %v3002_v4 = vmul.f32 %v2997_v63, %v2997_v63 }
 0x540   : > { %v3011_v45 = vmul.f32 %v12345_v61, %v3002_v4 }
 0x542   : > { %v3016_v5 = vadd.f32 %v3011_v45, %v12092_v38 }
 0x544   : > { %v3050_v22 = vrot.slane %v3016_v5, 2  ;;  %v3042_v36 = vpack.c.bf16 %v3016_v5, %v3016_v5  ;;  %v3029_v51 = vrot.slane %v3016_v5, 6 }
 0x546   : > { %v3051_v29 = vsel %vm15412_vm15, %v3048_v56, %v3050_v22  ;;  %3257 = vmatprep.mubr.bf16.mxu0 %v3042_v36  ;;  %v3030_v43 = vsel %vm1094_vm13, %v3027_v39, %v3029_v51  ;;  %v8726_v61 = vpack.c.bf16 %v3050_v22, %v3050_v22 }
 0x547   : > { %v3059_v7 = vpack.c.bf16 %v3051_v29, %v3049_v60  ;;  %v3039_v26 = vpack.c.bf16 %v3030_v43, %v3030_v43 }
 0x549   : > { %9445 = vmatmul.mubr.bf16.gmra.mrb[28].mxu1 %v3059_v7  ;;  %3258 = vmatmul.mubr.bf16.gmra.mrb[32].mxu0 %v3039_v26 }
 0x54a   : > { %9448 = vmatprep.mubr.msk.bf16.mxu1 %vm15507_vm0, %v15484_v62 }
 0x551   : > { %9449 = vmatmul.mubr.msk.bf16.gmra.mrb[32].mxu1 %vm11531_vm1, %v8726_v61 }
 0x552   : > { %9468 = vmatprep.mubr.msk.bf16.mxu1 %vm15507_vm0, %v15484_v62 }
 0x5d9   : > { %v9103_v13 = vpop.f32.mrb[24].mxu0 }
 0x5da   : > { %v9104_v44 = vpop.f32.mrb[25].mxu0 }
 0x5db   : > { %v9105_v23 = vadd.f32 %v9104_v44, %v9103_v13  ;;  %v9106_v48 = vpop.f32.mrb[26].mxu0 }
 0x5dc   : > { %v9107_v32 = vpop.f32.mrb[27].mxu0 }
 0x5dd   : > { %v9108_v30 = vadd.f32 %v9107_v32, %v9106_v48  ;;  %v3244_v21 = vadd.f32 %v9105_v23, %v3064_v50  ;;  %v9994_v32 = vld [vmem:[#allocation10 + $0x100] sm:$0xff]  }
 0x5de   : > { %9132 = vmatprep.subr.bf16.mxu0 %v9994_v32 }
 0x5df   : > { %v3247_v28 = vadd.f32 %v9108_v30, %v3064_v50 }
 0x5f0   : > { %v3299_v40 = vpop.f32.mrb[24].mxu1 }
 0x5f1   : > { %v12606_v14 = vadd.f32 %v3299_v40, %v3244_v21  ;;  %v9442_v8 = vpop.f32.mrb[25].mxu1  ;;  %v9996_v40 = vld [vmem:[#allocation10 + $0x140] sm:$0xff]  }
 0x5f2   : > { %v3302_v58 = vpop.f32.mrb[26].mxu1  ;;  %9453 = vmatpush3.bf16.msra.mxu1 %v9996_v40 }
 0x5f3   : > { %v12608_v34 = vadd.f32 %v3302_v58, %v3247_v28  ;;  %v9443_v37 = vpop.f32.mrb[27].mxu1  ;;  %v3331_v6 = vmul.f32 %v12606_v14, %v12606_v14  ;;  %v9995_v28 = vld [vmem:[#allocation10 + $0xc0] sm:$0xff]   ;;  %v9997_v58 = vld [vmem:[#allocation10 + $0x108] sm:$0xff]   ;;  %9454 = vmatprep.subr.bf16.mxu1 %v15484_v62 }
 0x5f4   : > { %9133 = vmatpush3.bf16.msra.mxu0 %v9995_v28  ;;  %v9998_v37 = vld [vmem:[#allocation10 + $0xc8] sm:$0xff]  }
 0x5f5   : > { %v3321_v52 = vadd.f32 %v12608_v34, %v12606_v14  ;;  %v3332_v53 = vmul.f32 %v12608_v34, %v12608_v34  ;;  %9134 = vmatprep.subr.bf16.mxu0 %v9997_v58  ;;  %v10017_v58 = vld [vmem:[#allocation10 + $0x178] sm:$0xff]  }
 0x5f7   : > { %v3336_v49 = vadd.f32 %v3332_v53, %v3331_v6  ;;  %v9999_v6 = vld [vmem:[#allocation10 + $0x148] sm:$0xff]  }
 0x5f8   : > { %9135 = vmatpush3.bf16.msra.mxu0 %v9998_v37  ;;  %9455 = vmatpush3.bf16.msra.mxu1 %v9999_v6  ;;  %v15510_v37 = vld [vmem:[#allocation22_spill] sm:$0xff] }
 0x5f9   : > { %9456 = vmatprep.subr.bf16.mxu1 %v15484_v62 }
 0x60d   : > { %v9109_v2 = vpop.f32.mrb[28].mxu0 }
 0x60e   : > { %v9110_v18 = vpop.f32.mrb[29].mxu0 }
 0x60f   : > { %v9111_v33 = vadd.f32 %v9110_v18, %v9109_v2  ;;  %v9112_v0 = vpop.f32.mrb[30].mxu0 }
 0x610   : > { %v9113_v55 = vpop.f32.mrb[31].mxu0 }
 0x611   : > { %v9114_v39 = vadd.f32 %v9113_v55, %v9112_v0  ;;  %v3252_v46 = vadd.f32 %v9111_v33, %v3064_v50  ;;  %v10001_v33 = vld [vmem:[#allocation10 + $0xd0] sm:$0xff]   ;;  %v10003_v55 = vld [vmem:[#allocation10 + $0x118] sm:$0xff]  }
 0x612   : > { %v10002_v0 = vld [vmem:[#allocation10 + $0x150] sm:$0xff]  }
 0x613   : > { %v3255_v47 = vadd.f32 %v9114_v39, %v3064_v50  ;;  %9457 = vmatpush3.bf16.msra.mxu1 %v10002_v0 }
 0x614   : > { %9458 = vmatprep.subr.bf16.mxu1 %v15484_v62 }
 0x61c   : > { %v3307_v3 = vpop.f32.mrb[28].mxu1  ;;  %v9115_v27 = vpop.f32.mrb[32].mxu0 }
 0x61d   : > { %v12616_v31 = vadd.f32 %v3307_v3, %v3252_v46  ;;  %v9446_v42 = vpop.f32.mrb[29].mxu1  ;;  %v9116_v17 = vpop.f32.mrb[33].mxu0 }
 0x61e   : > { %v3310_v1 = vpop.f32.mrb[30].mxu1  ;;  %v9117_v41 = vadd.f32 %v9116_v17, %v9115_v27  ;;  %v9118_v54 = vpop.f32.mrb[34].mxu0  ;;  %v10004_v27 = vld [vmem:[#allocation10 + $0xd8] sm:$0xff]   ;;  %v10006_v17 = vld [vmem:[#allocation10 + $0x120] sm:$0xff]  }
 0x61f   : > { %v3322_v15 = vadd.f32 %v3321_v52, %v12616_v31  ;;  %v3333_v63 = vmul.f32 %v12616_v31, %v12616_v31  ;;  %v12621_v4 = vadd.f32 %v3310_v1, %v3255_v47  ;;  %v9447_v45 = vpop.f32.mrb[31].mxu1  ;;  %v9119_v56 = vpop.f32.mrb[35].mxu0  ;;  %v10005_v42 = vld [vmem:[#allocation10 + $0x158] sm:$0xff]  }
 0x620   : > { %v3260_v36 = vadd.f32 %v9117_v41, %v3064_v50  ;;  %9459 = vmatpush3.bf16.msra.mxu1 %v10005_v42  ;;  %v10009_v45 = vld [vmem:[#allocation10 + $0x128] sm:$0xff]  }
 0x621   : > { %v3337_v5 = vadd.f32 %v3336_v49, %v3333_v63  ;;  %v3323_v60 = vadd.f32 %v3322_v15, %v12621_v4  ;;  %v3334_v22 = vmul.f32 %v12621_v4, %v12621_v4  ;;  %v10000_v49 = vld [vmem:[#allocation10 + $0x110] sm:$0xff]   ;;  %v10007_v15 = vld [vmem:[#allocation10 + $0xe0] sm:$0xff]   ;;  %9460 = vmatprep.subr.bf16.mxu1 %v15484_v62 }
 0x622   : > { %9136 = vmatprep.subr.bf16.mxu0 %v10000_v49  ;;  %v10008_v63 = vld [vmem:[#allocation10 + $0x160] sm:$0xff]  }
 0x623   : > { %v3338_v51 = vadd.f32 %v3337_v5, %v3334_v22  ;;  %9137 = vmatpush3.bf16.msra.mxu0 %v10001_v33  ;;  %v10011_v22 = vld [vmem:[#allocation10 + $0x168] sm:$0xff]  }
 0x624   : > { %v3315_v29 = vpop.f32.mrb[32].mxu1  ;;  %9138 = vmatprep.subr.bf16.mxu0 %v10003_v55  ;;  %9461 = vmatpush3.bf16.msra.mxu1 %v10008_v63 }
 0x625   : > { %v12626_v43 = vadd.f32 %v3315_v29, %v3260_v36  ;;  %v9450_v7 = vpop.f32.mrb[33].mxu1  ;;  %9462 = vmatprep.subr.bf16.mxu1 %v15484_v62  ;;  %v10012_v36 = vld [vmem:[#allocation10 + $0x130] sm:$0xff]  }
 0x626   : > { %v3318_v26 = vpop.f32.mrb[34].mxu1  ;;  %v10014_v29 = vld [vmem:[#allocation10 + $0x170] sm:$0xff]   ;;  %v10015_v7 = vld [vmem:[#allocation10 + $0x138] sm:$0xff]  }
 0x627   : > { %v3324_v61 = vadd.f32 %v3323_v60, %v12626_v43  ;;  %v3335_v13 = vmul.f32 %v12626_v43, %v12626_v43  ;;  %v9451_v44 = vpop.f32.mrb[35].mxu1  ;;  %9139 = vmatpush3.bf16.msra.mxu0 %v10004_v27  ;;  %v10010_v60 = vld [vmem:[#allocation10 + $0xe8] sm:$0xff]   ;;  %v10016_v26 = vld [vmem:[#allocation10 + $0xf8] sm:$0xff]  }
 0x628   : > { %9140 = vmatprep.subr.bf16.mxu0 %v10006_v17  ;;  %9463 = vmatpush3.bf16.msra.mxu1 %v10011_v22  ;;  %v15509_v44 = vld [vmem:[#allocation21_spill] sm:$0xff] }
 0x629   : > { %v3325_v23 = vrot.slane %v3324_v61, 4  ;;  %v3339_v48 = vadd.f32 %v3338_v51, %v3335_v13  ;;  %v10013_v51 = vld [vmem:[#allocation10 + $0xf0] sm:$0xff]   ;;  %9464 = vmatprep.subr.bf16.mxu1 %v15484_v62 }
 0x62b   : > { %v3326_v30 = vadd.f32 %v3325_v23, %v3324_v61  ;;  %v3340_v21 = vrot.slane %v3339_v48, 4  ;;  %9141 = vmatpush3.bf16.msra.mxu0 %v10007_v15 }
 0x62c   : > { %9142 = vmatprep.subr.bf16.mxu0 %v10009_v45  ;;  %9465 = vmatpush3.bf16.msra.mxu1 %v10014_v29 }
 0x62d   : > { %v3327_v50 = vrot.slane %v3326_v30, 2  ;;  %v3341_v8 = vadd.f32 %v3340_v21, %v3339_v48  ;;  %9466 = vmatprep.subr.bf16.mxu1 %v15484_v62 }
 0x62f   : > { %v3328_v52 = vadd.f32 %v3327_v50, %v3326_v30  ;;  %v3342_v53 = vrot.slane %v3341_v8, 2  ;;  %9143 = vmatpush3.bf16.msra.mxu0 %v10010_v60 }
 0x630   : > { %9144 = vmatprep.subr.bf16.mxu0 %v10012_v36  ;;  %9467 = vmatpush3.bf16.msra.mxu1 %v10017_v58  ;;  %v15513_v58 = vmov 1326507024  }
 0x631   : > { %v3329_v2 = vrot.slane %v3328_v52, 1  ;;  %v3343_v18 = vadd.f32 %v3342_v53, %v3341_v8  ;;  %9480 = vmatprep.subr.bf16.mxu1 %v15484_v62 }
 0x633   : > { %v3330_v39 = vadd.f32 %v3329_v2, %v3328_v52  ;;  %v3344_v46 = vrot.slane %v3343_v18, 1  ;;  %9145 = vmatpush3.bf16.msra.mxu0 %v10013_v51  ;;  %v15511_v52 = vld [vmem:[#allocation23_spill] sm:$0xff] }
 0x634   : > { %9146 = vmatprep.subr.bf16.mxu0 %v10015_v7  ;;  %v12649_v53 = vrot.slane %v12602_v16, %v15511_v52 }
 0x635   : > { %v3345_v47 = vadd.f32 %v3344_v46, %v3343_v18  ;;  %v3346_v3 = vmul.f32 0.025, %v3330_v39 }
 0x637   : > { %v3347_v1 = vmul.f32 0.025, %v3345_v47  ;;  %v3348_v41 = vmul.f32 %v3346_v3, %v3346_v3  ;;  %9147 = vmatpush3.bf16.msra.mxu0 %v10016_v26 }
 0x639   : > { %v3349_v54 = vsub.f32 %v3347_v1, %v3348_v41 }
 0x63b   : > { %v3350_v56 = vmax.f32 %v3349_v54, 0.0 }
 0x63d   : > { %v3351_v5 = vadd.f32 1e-05, %v3350_v56 }
 0x63f   : > { %10192 = vrsqrt.f32 %v3351_v5 }
 0x649   : > { %v10193_v61 = vpop.eup %10192 }
 0x64a   : > { %v3353_v13 = vmul.f32 %v12602_v16, %v10193_v61 }
 0x64c   : > { %v3357_v23 = vrot.slane %v3353_v13, %v15509_v44  ;;  %v3363_v48 = vmul.f32 %v3353_v13, %v3346_v3 }
 0x64e   : > { %v3362_v32 = vmul.f32 %v3357_v23, %v12626_v43  ;;  %v3365_v30 = vrot.slane %v3363_v48, 7  ;;  %v3358_v21 = vmul.f32 %v3357_v23, %v12606_v14  ;;  %v3359_v28 = vmul.f32 %v3357_v23, %v12608_v34 }
 0x64f   : > { %v3360_v40 = vmul.f32 %v3357_v23, %v12616_v31  ;;  %v3361_v50 = vmul.f32 %v3357_v23, %v12621_v4 }
 0x650   : > { %v3367_v8 = vsub.f32 %v12602_v16, %v3365_v30 }
 0x652   : > { %v3371_v6 = vrot.slane %v3367_v8, %v15510_v37 }
 0x654   : > { %v12652_v43 = vadd.f32 %v3371_v6, %v3362_v32  ;;  %v12654_v14 = vadd.f32 %v3371_v6, %v3358_v21  ;;  %v12656_v34 = vadd.f32 %v3371_v6, %v3359_v28  ;;  %v12658_v31 = vadd.f32 %v3371_v6, %v3360_v40 }
 0x655   : > { %v12660_v4 = vadd.f32 %v3371_v6, %v3361_v50  ;;  %v15512_v40 = vmov 920167782  }
 0x656   : > { %v12664_v49 = vmul.f32 %v12649_v53, %v12652_v43  ;;  %v12668_v16 = vmul.f32 %v12649_v53, %v12654_v14  ;;  %v12672_v2 = vmul.f32 %v12649_v53, %v12656_v34 }
 0x658   : > { %v15401_v18 = vand.u32 2147483647, %v12664_v49  ;;  %v3805_v33 = vand.u32 2139095040, %v12664_v49  ;;  %v3386_v0 = vand.u32 2147483647, %v12668_v16  ;;  %v3389_v55 = vand.u32 2139095040, %v12668_v16 }
 0x659   : > { %v3493_v3 = vand.u32 2139095040, %v12672_v2 }
 0x65a   : > { %v3806_v39 = vshrl.u32 %v3805_v33, 23  ;;  %v3809_v46 = vand.u32 8388607, %v15401_v18  ;;  %v3390_v47 = vshrl.u32 %v3389_v55, 23  ;;  %v3393_v42 = vand.u32 8388607, %v3386_v0 }
 0x65b   : > { %v3494_v1 = vshrl.u32 %v3493_v3, 23 }
 0x65c   : > { %v8744_v27 = vadd.s32 4294967169, %v3806_v39  ;;  %v8728_v17 = vadd.s32 4294967169, %v3390_v47  ;;  %v3810_v54 = vor.u32 8388608, %v3809_v46  ;;  %v3394_v63 = vor.u32 8388608, %v3393_v42 }
 0x65d   : > { %v8732_v45 = vadd.s32 4294967169, %v3494_v1 }
 0x65e   : > { %v3812_v41 = vadd.s32 1, %v8744_v27  ;;  %v3396_v15 = vadd.s32 1, %v8728_v17  ;;  %v12683_v22 = vshll.u32 %v3810_v54, 8  ;;  %v12685_v29 = vshll.u32 %v3394_v63, 8 }
 0x65f   : > { %v12687_v7 = vadd.s32 1, %v8732_v45 }
 0x660   : > { %vm3813_vm12 = vcmp.gt.s32.totalorder %v3812_v41, 0  ;;  %vm3397_vm9 = vcmp.gt.s32.totalorder %v3396_v15, 0 }
 0x661   : > { %v3814_v56 = vsel %vm3813_vm12, %v3812_v41, 0  ;;  %v3398_v60 = vsel %vm3397_vm9, %v3396_v15, 0  ;;  %vm3501_vm14 = vcmp.gt.s32.totalorder %v12687_v7, 0 }
 0x662   : > { %v3816_v5 = vand.u32 31, %v3814_v56  ;;  %v3400_v51 = vand.u32 31, %v3398_v60  ;;  %v12689_v26 = vshrl.u32 %v3814_v56, 5  ;;  %v12693_v23 = vshrl.u32 %v3398_v60, 5 }
 0x664   : > { %v3817_v36 = vsub.s32 32, %v3816_v5  ;;  %v3819_v61 = vshll.u32 %v15497_v25, %v3816_v5  ;;  %v3822_v13 = vshll.u32 %v15470_v24, %v3816_v5  ;;  %v3825_v30 = vshll.u32 %v15471_v10, %v3816_v5 }
 0x665   : > { %v3828_v28 = vshll.u32 %v15472_v57, %v3816_v5  ;;  %v3831_v8 = vshll.u32 %v15512_v40, %v3816_v5  ;;  %v3401_v46 = vsub.s32 32, %v3400_v51  ;;  %vm3834_vm2 = vcmp.lt.s32.totalorder %v12689_v26, 1 }
 0x666   : > { %v3820_v48 = vshrl.u32 %v15470_v24, %v3817_v36  ;;  %v3823_v32 = vshrl.u32 %v15471_v10, %v3817_v36  ;;  %v3826_v21 = vshrl.u32 %v15472_v57, %v3817_v36  ;;  %v3829_v50 = vshrl.u32 %v15512_v40, %v3817_v36 }
 0x667   : > { %v3832_v6 = vshrl.u32 %v15513_v58, %v3817_v36  ;;  %vm3835_vm10 = vcmp.lt.s32.totalorder %v12689_v26, 2  ;;  %v3818_v27 = vshrl.u32 %v15497_v25, %v3817_v36  ;;  %vm3837_vm11 = vcmp.lt.s32.totalorder %v12689_v26, 4 }
 0x668   : > { %v3821_v33 = vor.u32 %v3820_v48, %v3819_v61  ;;  %v3824_v55 = vor.u32 %v3823_v32, %v3822_v13  ;;  %v3827_v39 = vor.u32 %v3826_v21, %v3825_v30  ;;  %v3830_v47 = vor.u32 %v3829_v50, %v3828_v28 }
 0x669   : > { %v3833_v3 = vor.u32 %v3832_v6, %v3831_v8  ;;  %vm3836_vm8 = vcmp.lt.s32.totalorder %v12689_v26, 3  ;;  %v3403_v54 = vshll.u32 %v15497_v25, %v3400_v51  ;;  %v3404_v45 = vshrl.u32 %v15470_v24, %v3401_v46 }
 0x66a   : > { %v3842_v42 = vsel %vm3834_vm2, %v3821_v33, %v3824_v55  ;;  %v3846_v17 = vsel %vm3834_vm2, %v3824_v55, %v3827_v39  ;;  %v3843_v1 = vsel %vm3837_vm11, %v3830_v47, 920167782  ;;  %v3406_v56 = vshll.u32 %v15470_v24, %v3400_v51 }
 0x66b   : > { %v3847_v41 = vsel %vm3837_vm11, %v3833_v3, 1326507024  ;;  %v3844_v15 = vsel %vm3836_vm8, %v3827_v39, %v3843_v1  ;;  %v3839_v5 = vsel %vm3837_vm11, %v3827_v39, 2102212464  ;;  %v3407_v61 = vshrl.u32 %v15471_v10, %v3401_v46 }
 0x66c   : > { %v3848_v63 = vsel %vm3836_vm8, %v3830_v47, %v3847_v41  ;;  %v3845_v60 = vsel %vm3835_vm10, %v3842_v42, %v3844_v15  ;;  %v3405_v21 = vor.u32 %v3404_v45, %v3403_v54  ;;  %v3409_v50 = vshll.u32 %v15471_v10, %v3400_v51 }
 0x66d   : > { %v3849_v36 = vsel %vm3835_vm10, %v3846_v17, %v3848_v63  ;;  %v12729_v32 = vmul.u32.u64.low %v12683_v22, %v3845_v60  ;;  %v12730_v30 = vmul.u32.u64.high %v12683_v22, %v3845_v60, %v12729_v32  ;;  %v3408_v28 = vor.u32 %v3407_v61, %v3406_v56 }
 0x66e   : > { %v12725_v13 = vmul.u32.u64.low %v12683_v22, %v3849_v36  ;;  %v12726_v48 = vmul.u32.u64.high %v12683_v22, %v3849_v36, %v12725_v13  ;;  %v3410_v8 = vshrl.u32 %v15472_v57, %v3401_v46  ;;  %v3412_v6 = vshll.u32 %v15472_v57, %v3400_v51 }
 0x66f   : > { %v3413_v39 = vshrl.u32 %v15512_v40, %v3401_v46  ;;  %v3416_v47 = vshrl.u32 %v15513_v58, %v3401_v46  ;;  %v3838_v3 = vsel %vm3834_vm2, %v3818_v27, %v3821_v33  ;;  %v3840_v42 = vsel %vm3836_vm8, %v3824_v55, %v3839_v5 }
 0x670   : > { %v3411_v17 = vor.u32 %v3410_v8, %v3409_v50  ;;  %v3415_v1 = vshll.u32 %v15512_v40, %v3400_v51  ;;  %v3402_v41 = vshrl.u32 %v15497_v25, %v3401_v46  ;;  %vm3418_vm7 = vcmp.lt.s32.totalorder %v12693_v23, 1 }
 0x671   : > { %v3414_v54 = vor.u32 %v3413_v39, %v3412_v6  ;;  %vm3419_vm6 = vcmp.lt.s32.totalorder %v12693_v23, 2  ;;  %vm3420_vm12 = vcmp.lt.s32.totalorder %v12693_v23, 3  ;;  %vm3421_vm9 = vcmp.lt.s32.totalorder %v12693_v23, 4 }
 0x672   : > { %v3417_v15 = vor.u32 %v3416_v47, %v3415_v1  ;;  %v3426_v63 = vsel %vm3418_vm7, %v3405_v21, %v3408_v28  ;;  %vm3859_vm2 = vc.u32 %v12726_v48, %v12729_v32  ;;  %v3423_v33 = vsel %vm3421_vm9, %v3411_v17, 2102212464 }
 0x673   : > { %v3427_v55 = vsel %vm3421_vm9, %v3414_v54, 920167782  ;;  %v3430_v27 = vsel %vm3418_vm7, %v3408_v28, %v3411_v17  ;;  %v3860_v51 = vadd.s32 1, %v12730_v30  ;;  %v3422_v46 = vsel %vm3418_vm7, %v3402_v41, %v3405_v21 }
 0x674   : > { %v3428_v45 = vsel %vm3420_vm12, %v3411_v17, %v3427_v55  ;;  %v3431_v56 = vsel %vm3421_vm9, %v3417_v15, 1326507024  ;;  %v3424_v5 = vsel %vm3420_vm12, %v3408_v28, %v3423_v33  ;;  %v3502_v61 = vsel %vm3501_vm14, %v12687_v7, 0 }
 0x675   : > { %v3429_v60 = vsel %vm3419_vm6, %v3426_v63, %v3428_v45  ;;  %v3432_v36 = vsel %vm3420_vm12, %v3414_v54, %v3431_v56  ;;  %v3841_v13 = vsel %vm3835_vm10, %v3838_v3, %v3840_v42  ;;  %v3861_v7 = vsel %vm3859_vm2, %v3860_v51, %v12730_v30 }
 0x676   : > { %v3433_v50 = vsel %vm3419_vm6, %v3430_v27, %v3432_v36  ;;  %v12762_v8 = vmul.u32.u64.low %v12685_v29, %v3429_v60  ;;  %v12763_v21 = vmul.u32.u64.high %v12685_v29, %v3429_v60, %v12762_v8  ;;  %v3425_v26 = vsel %vm3419_vm6, %v3422_v46, %v3424_v5 }
 0x677   : > { %v12767_v28 = vmul.u32.u64.low %v12685_v29, %v3433_v50  ;;  %v12768_v6 = vmul.u32.u64.high %v12685_v29, %v3433_v50, %v12767_v28  ;;  %v3504_v39 = vand.u32 31, %v3502_v61  ;;  %v3857_v47 = vmul.u32 %v12683_v22, %v3841_v13 }
 0x678   : > { %v3444_v3 = vadd.s32 1, %v12763_v21  ;;  %v15402_v42 = vand.u32 2147483647, %v12672_v2  ;;  %v12781_v1 = vmul.f32 %v12649_v53, %v12658_v31  ;;  %v3441_v54 = vmul.u32 %v12685_v29, %v3425_v26 }
 0x679   : > { %v3505_v17 = vsub.s32 32, %v3504_v39  ;;  %v3862_v41 = vadd.s32 %v3861_v7, %v3857_v47  ;;  %vm3443_vm10 = vc.u32 %v12768_v6, %v12762_v8  ;;  %v3503_v29 = vshrl.u32 %v3502_v61, 5 }
 0x67a   : > { %v3445_v23 = vsel %vm3443_vm10, %v3444_v3, %v12763_v21  ;;  %v3497_v22 = vand.u32 8388607, %v15402_v42  ;;  %v3597_v63 = vand.u32 2139095040, %v12781_v1  ;;  %v3507_v46 = vshll.u32 %v15497_v25, %v3504_v39 }
 0x67b   : > { %v3446_v30 = vadd.s32 %v3445_v23, %v3441_v54  ;;  %v3508_v15 = vshrl.u32 %v15470_v24, %v3505_v17  ;;  %v3863_v33 = vadd.s32 536870912, %v3862_v41  ;;  %v3511_v27 = vshrl.u32 %v15471_v10, %v3505_v17 }
 0x67c   : > { %v3514_v51 = vshrl.u32 %v15472_v57, %v3505_v17  ;;  %v3510_v45 = vshll.u32 %v15470_v24, %v3504_v39  ;;  %v3517_v56 = vshrl.u32 %v15512_v40, %v3505_v17  ;;  %v3513_v60 = vshll.u32 %v15471_v10, %v3504_v39 }
 0x67d   : > { %v3447_v55 = vadd.s32 536870912, %v3446_v30  ;;  %v3516_v36 = vshll.u32 %v15472_v57, %v3504_v39  ;;  %v3520_v13 = vshrl.u32 %v15513_v58, %v3505_v17  ;;  %v3509_v50 = vor.u32 %v3508_v15, %v3507_v46 }
 0x67e   : > { %v3519_v21 = vshll.u32 %v15512_v40, %v3504_v39  ;;  %v3598_v28 = vshrl.u32 %v3597_v63, 23  ;;  %v3512_v7 = vor.u32 %v3511_v27, %v3510_v45  ;;  %v3515_v26 = vor.u32 %v3514_v51, %v3513_v60 }
 0x67f   : > { %v12796_v5 = vshrl.u32 %v3447_v55, 30  ;;  %v3518_v47 = vor.u32 %v3517_v56, %v3516_v36  ;;  %v3498_v3 = vor.u32 8388608, %v3497_v22  ;;  %vm3525_vm11 = vcmp.lt.s32.totalorder %v3503_v29, 4 }
 0x680   : > { %v3521_v54 = vor.u32 %v3520_v13, %v3519_v21  ;;  %v12803_v23 = vshrl.u32 %v3863_v33, 30  ;;  %vm3522_vm8 = vcmp.lt.s32.totalorder %v3503_v29, 1  ;;  %vm3524_vm14 = vcmp.lt.s32.totalorder %v3503_v29, 3 }
 0x681   : > { %v3449_v61 = vshll.u32 %v12796_v5, 30  ;;  %v3531_v18 = vsel %vm3525_vm11, %v3518_v47, 920167782  ;;  %v8736_v42 = vadd.s32 4294967169, %v3598_v28  ;;  %v3530_v39 = vsel %vm3522_vm8, %v3509_v50, %v3512_v7 }
 0x682   : > { %v3532_v63 = vsel %vm3524_vm14, %v3515_v26, %v3531_v18  ;;  %v3534_v27 = vsel %vm3522_vm8, %v3512_v7, %v3515_v26  ;;  %vm3523_vm7 = vcmp.lt.s32.totalorder %v3503_v29, 2  ;;  %v3535_v22 = vsel %vm3525_vm11, %v3521_v54, 1326507024 }
 0x683   : > { %v3450_v55 = vsub.s32 %v3446_v30, %v3449_v61  ;;  %v3538_v51 = vshll.u32 %v3498_v3, 8  ;;  %v3865_v33 = vshll.u32 %v12803_v23, 30  ;;  %v3527_v30 = vsel %vm3525_vm11, %v3515_v26, 2102212464 }
 0x684   : > { %v3536_v45 = vsel %vm3524_vm14, %v3518_v47, %v3535_v22  ;;  %v3506_v56 = vshrl.u32 %v15497_v25, %v3505_v17  ;;  %v3533_v60 = vsel %vm3523_vm7, %v3530_v39, %v3532_v63  ;;  %v3604_v18 = vadd.s32 1, %v8736_v42 }
 0x685   : > { %v3452_v15 = vsub.s32 0, %v3450_v55  ;;  %v3537_v36 = vsel %vm3523_vm7, %v3534_v27, %v3536_v45  ;;  %v3528_v28 = vsel %vm3524_vm14, %v3512_v7, %v3527_v30  ;;  %v12825_v17 = vsub.s32 %v3862_v41, %v3865_v33 }
 0x686   : > { %v3526_v21 = vsel %vm3522_vm8, %v3506_v56, %v3509_v50  ;;  %v12818_v61 = vmul.u32.u64.low %v3538_v51, %v3537_v36  ;;  %v12819_v3 = vmul.u32.u64.high %v3538_v51, %v3537_v36, %v12818_v61  ;;  %vm3605_vm6 = vcmp.gt.s32.totalorder %v3604_v18, 0 }
 0x687   : > { %v8729_v46 = vmin.u32 %v3452_v15, %v3450_v55  ;;  %v12821_v15 = vmul.u32.u64.low %v3538_v51, %v3533_v60  ;;  %v12822_v26 = vmul.u32.u64.high %v3538_v51, %v3533_v60, %v12821_v15  ;;  %v3606_v47 = vsel %vm3605_vm6, %v3604_v18, 0 }
 0x688   : > { %v3529_v42 = vsel %vm3523_vm7, %v3526_v21, %v3528_v28  ;;  %v3608_v39 = vand.u32 31, %v3606_v47  ;;  %v15403_v50 = vand.u32 2147483647, %v12781_v1  ;;  %v3442_v7 = vadd.s32 %v12762_v8, %v12768_v6 }
 0x689   : > { %v3454_v13 = vclz %v8729_v46  ;;  %vm3547_vm9 = vc.u32 %v12819_v3, %v12821_v15  ;;  %v3548_v46 = vadd.s32 1, %v12822_v26  ;;  %v3868_v41 = vsub.s32 0, %v12825_v17 }
 0x68a   : > { %v3545_v33 = vmul.u32 %v3538_v51, %v3529_v42  ;;  %v3609_v30 = vsub.s32 32, %v3608_v39  ;;  %v3601_v8 = vand.u32 8388607, %v15403_v50  ;;  %v3607_v51 = vshrl.u32 %v3606_v47, 5 }
 0x68b   : > { %v8730_v54 = vadd.s32 4294967294, %v3454_v13  ;;  %v3549_v60 = vsel %vm3547_vm9, %v3548_v46, %v12822_v26  ;;  %v8745_v28 = vmin.u32 %v3868_v41, %v12825_v17  ;;  %v3614_v42 = vshll.u32 %v15470_v24, %v3608_v39 }
 0x68c   : > { %v3550_v36 = vadd.s32 %v3549_v60, %v3545_v33  ;;  %v3612_v18 = vshrl.u32 %v15470_v24, %v3609_v30  ;;  %v3615_v6 = vshrl.u32 %v15471_v10, %v3609_v30  ;;  %v3617_v26 = vshll.u32 %v15471_v10, %v3608_v39 }
 0x68d   : > { %vm8731_vm12 = vcmp.lt.s32.totalorder %v8730_v54, 0  ;;  %v3621_v46 = vshrl.u32 %v15512_v40, %v3609_v30  ;;  %v3624_v47 = vshrl.u32 %v15513_v58, %v3609_v30  ;;  %vm3388_vm2 = vcmp.lt.s32.totalorder %v12668_v16, 0 }
 0x68e   : > { %v3457_v63 = vsel %vm8731_vm12, 0, %v8730_v54  ;;  %v3551_v61 = vadd.s32 536870912, %v3550_v36  ;;  %vm12854_vm10 = vcmp.le.f32.partialorder %v3386_v0, 0.7853982  ;;  %vm3626_vm11 = vcmp.lt.s32.totalorder %v3607_v51, 1 }
 0x68f   : > { %v3458_v27 = vsub.s32 32, %v3457_v63  ;;  %v3462_v22 = vsub.s32 4294967266, %v3457_v63  ;;  %v3459_v29 = vshll.u32 %v3450_v55, %v3457_v63  ;;  %v3611_v55 = vshll.u32 %v15497_v25, %v3608_v39 }
 0x690   : > { %v3618_v63 = vshrl.u32 %v15472_v57, %v3609_v30  ;;  %vm3629_vm8 = vcmp.lt.s32.totalorder %v3607_v51, 4  ;;  %vm3628_vm14 = vcmp.lt.s32.totalorder %v3607_v51, 3  ;;  %vm3627_vm7 = vcmp.lt.s32.totalorder %v3607_v51, 2 }
 0x691   : > { %v3460_v45 = vshrl.u32 %v3442_v7, %v3458_v27  ;;  %v3463_v56 = vadd.s32 127, %v3462_v22  ;;  %v12845_v7 = vshrl.u32 %v3551_v61, 30  ;;  %v3613_v27 = vor.u32 %v3612_v18, %v3611_v55 }
 0x692   : > { %v3620_v22 = vshll.u32 %v15472_v57, %v3608_v39  ;;  %v3619_v61 = vor.u32 %v3618_v63, %v3617_v26  ;;  %v3623_v55 = vshll.u32 %v15512_v40, %v3608_v39  ;;  %v3610_v26 = vshrl.u32 %v15497_v25, %v3609_v30 }
 0x693   : > { %v3461_v13 = vor.u32 %v3460_v45, %v3459_v29  ;;  %v3464_v21 = vshll.u32 %v3463_v56, 23  ;;  %v3616_v29 = vor.u32 %v3615_v6, %v3614_v42  ;;  %v3553_v45 = vshll.u32 %v12845_v7, 30 }
 0x694   : > { %v3602_v56 = vor.u32 8388608, %v3601_v8  ;;  %v3622_v60 = vor.u32 %v3621_v46, %v3620_v22  ;;  %v3472_v6 = vsub.s32 4, %v12796_v5  ;;  %v3625_v50 = vor.u32 %v3624_v47, %v3623_v55 }
 0x695   : > { %v3465_v54 = vor.u32 4788187, %v3464_v21  ;;  %v3468_v41 = vcvt.s32.f32 %v3461_v13  ;;  %v3870_v13 = vclz %v8745_v28  ;;  %v3634_v8 = vsel %vm3626_vm11, %v3613_v27, %v3616_v29 }
 0x696   : > { %v3635_v0 = vsel %vm3629_vm8, %v3622_v60, 920167782  ;;  %v3642_v46 = vshll.u32 %v3602_v56, 8  ;;  %v3631_v63 = vsel %vm3629_vm8, %v3619_v61, 2102212464  ;;  %v3638_v47 = vsel %vm3626_vm11, %v3616_v29, %v3619_v61 }
 0x697   : > { %v3466_v33 = vand.u32 2147483647, %v3465_v54  ;;  %v3554_v54 = vsub.s32 %v3550_v36, %v3553_v45  ;;  %v3636_v39 = vsel %vm3628_vm14, %v3619_v61, %v3635_v0  ;;  %v3639_v45 = vsel %vm3629_vm8, %v3625_v50, 1326507024 }
 0x698   : > { %v3473_v30 = vsel %vm3388_vm2, %v3472_v6, %v12796_v5  ;;  %v3632_v61 = vsel %vm3628_vm14, %v3616_v29, %v3631_v63  ;;  %v3640_v50 = vsel %vm3628_vm14, %v3622_v60, %v3639_v45  ;;  %vm3492_vm12 = vcmp.lt.s32.totalorder %v12672_v2, 0 }
 0x699   : > { %v3469_v18 = vmul.f32 %v3468_v41, %v3466_v33  ;;  %v3556_v22 = vsub.s32 0, %v3554_v54  ;;  %v3637_v41 = vsel %vm3627_vm7, %v3634_v8, %v3636_v39  ;;  %v3630_v8 = vsel %vm3626_vm11, %v3610_v26, %v3613_v27 }
 0x69a   : > { %v12870_v56 = vmul.u32.u64.low %v3642_v46, %v3637_v41  ;;  %v12871_v55 = vmul.u32.u64.high %v3642_v46, %v3637_v41, %v12870_v56  ;;  %v3475_v5 = vsel %vm12854_vm10, 0, %v3473_v30  ;;  %v3576_v29 = vsub.s32 4, %v12845_v7 }
 0x69b   : > { %v3470_v42 = vxor.u32 2147483648, %v3469_v18  ;;  %v8733_v28 = vmin.u32 %v3556_v22, %v3554_v54  ;;  %v8746_v22 = vadd.s32 4294967294, %v3870_v13  ;;  %v3546_v13 = vadd.s32 %v12821_v15, %v12819_v3 }
 0x69c   : > { %v3652_v6 = vadd.s32 1, %v12871_v55  ;;  %v3479_v21 = vadd.s32 3, %v3475_v5 }
 0x69d   : > { %v3471_v33 = vsel %vm3388_vm2, %v3470_v42, %v3469_v18  ;;  %v3558_v18 = vclz %v8733_v28  ;;  %v12879_v42 = vmul.f32 %v12649_v53, %v12660_v4  ;;  %v3633_v53 = vsel %vm3627_vm7, %v3630_v8, %v3632_v61 }
 0x69e   : > { %v3474_v36 = vsel %vm12854_vm10, %v12668_v16, %v3471_v33  ;;  %v3641_v33 = vsel %vm3627_vm7, %v3638_v47, %v3640_v50  ;;  %vm8747_vm9 = vcmp.lt.s32.totalorder %v8746_v22, 0  ;;  %v3649_v28 = vmul.u32 %v3642_v46, %v3633_v53 }
 0x69f   : > { %10194 = vcosq.f32 %v3474_v36  ;;  %v8734_v0 = vadd.s32 4294967294, %v3558_v18  ;;  %v12885_v39 = vmul.u32.u64.low %v3642_v46, %v3641_v33  ;;  %v12886_v41 = vmul.u32.u64.high %v3642_v46, %v3641_v33, %v12885_v39 }
 0x6a0   : > { %10196 = vsinq.f32 %v3474_v36  ;;  %v3701_v60 = vand.u32 2139095040, %v12879_v42  ;;  %v12900_v18 = vsel %vm8747_vm9, 0, %v8746_v22  ;;  %v3577_v8 = vsel %vm3492_vm12, %v3576_v29, %v12845_v7 }
 0x6a1   : > { %vm8735_vm6 = vcmp.lt.s32.totalorder %v8734_v0, 0  ;;  %vm3651_vm2 = vc.u32 %v12886_v41, %v12870_v56  ;;  %v15516_v33 = vand.u32 2147483647, %v12672_v2  ;;  %v3878_v22 = vsub.s32 4294967266, %v12900_v18 }
 0x6a2   : > { %v3561_v27 = vsel %vm8735_vm6, 0, %v8734_v0  ;;  %v3702_v51 = vshrl.u32 %v3701_v60, 23  ;;  %v3653_v30 = vsel %vm3651_vm2, %v3652_v6, %v12871_v55  ;;  %v3480_v5 = vand.u32 3, %v3479_v21 }
 0x6a3   : > { %v3562_v26 = vsub.s32 32, %v3561_v27  ;;  %v3566_v36 = vsub.s32 4294967266, %v3561_v27  ;;  %v3563_v63 = vshll.u32 %v3554_v54, %v3561_v27  ;;  %v3654_v3 = vadd.s32 %v3653_v30, %v3649_v28  ;;  %v15519_v28 = vld [vmem:[#allocation29_spill] sm:$0xff] }
 0x6a4   : > { %v8740_v15 = vadd.s32 4294967169, %v3702_v51  ;;  %vm12907_vm10 = vcmp.le.f32.partialorder %v15516_v33, 0.7853982  ;;  %v15404_v29 = vand.u32 2147483647, %v12879_v42  ;;  %v12919_v51 = vrot.slane %v15519_v28, %v15511_v52 }
 0x6a5   : > { %v3564_v47 = vshrl.u32 %v3546_v13, %v3562_v26  ;;  %v3567_v45 = vadd.s32 127, %v3566_v36  ;;  %v3655_v39 = vadd.s32 536870912, %v3654_v3  ;;  %v3579_v7 = vsel %vm12907_vm10, 0, %v3577_v8 }
 0x6a6   : > { %v3708_v55 = vadd.s32 1, %v8740_v15  ;;  %vm3482_vm8 = vcmp.eq.s32.totalorder %v3480_v5, 0  ;;  %vm3485_vm14 = vcmp.eq.s32.totalorder %v3480_v5, 2  ;;  %v12928_v15 = vand.u32 8388607, %v15404_v29 }
 0x6a7   : > { %v3565_v50 = vor.u32 %v3564_v47, %v3563_v63  ;;  %v3568_v46 = vshll.u32 %v3567_v45, 23  ;;  %v12914_v27 = vshrl.u32 %v3655_v39, 30  ;;  %v12922_v63 = vadd.s32 127, %v3878_v22 }
 0x6a8   : > { %vm3709_vm11 = vcmp.gt.s32.totalorder %v3708_v55, 0  ;;  %v3583_v45 = vadd.s32 3, %v3579_v7  ;;  %vm3478_vm7 = vweird.f32 %v12668_v16  ;;  %vm3481_vm6 = vcmp.lt.s32.totalorder %v3480_v5, 2 }
 0x6a9   : > { %v10195_v61 = vpop.eup %10194  ;;  %v3569_v53 = vor.u32 4788187, %v3568_v46  ;;  %v3572_v26 = vcvt.s32.f32 %v3565_v50  ;;  %v3710_v36 = vsel %vm3709_vm11, %v3708_v55, 0  ;;  %v3657_v21 = vshll.u32 %v12914_v27, 30 }
 0x6aa   : > { %v10197_v0 = vpop.eup %10196  ;;  %v3486_v6 = vxor.u32 2147483648, %v10195_v61  ;;  %v3712_v30 = vand.u32 31, %v3710_v36  ;;  %v12932_v55 = vadd.s32 %v12729_v32, %v12726_v48  ;;  %v3706_v5 = vor.u32 8388608, %v12928_v15 }
 0x6ab   : > { %v3483_v60 = vxor.u32 2147483648, %v10197_v0  ;;  %v3570_v13 = vand.u32 2147483647, %v3569_v53  ;;  %v12924_v8 = vsub.s32 %v3654_v3, %v3657_v21  ;;  %v12951_v28 = vshrl.u32 %v3710_v36, 5 }
 0x6ac   : > { %v3487_v46 = vsel %vm3485_vm14, %v3486_v6, %v10197_v0  ;;  %v3713_v39 = vsub.s32 32, %v3712_v30  ;;  %v3718_v21 = vshll.u32 %v15470_v24, %v3712_v30  ;;  %v3724_v15 = vshll.u32 %v15472_v57, %v3712_v30 }
 0x6ad   : > { %v3573_v47 = vmul.f32 %v3572_v26, %v3570_v13  ;;  %v3484_v50 = vsel %vm3482_vm8, %v10195_v61, %v3483_v60  ;;  %v3660_v53 = vsub.s32 0, %v12924_v8  ;;  %v12940_v61 = vand.u32 3, %v3583_v45 }
 0x6ae   : > { %v3488_v0 = vsel %vm3481_vm6, %v3484_v50, %v3487_v46  ;;  %v3719_v6 = vshrl.u32 %v15471_v10, %v3713_v39  ;;  %v3650_v60 = vadd.s32 %v12870_v56, %v12886_v41  ;;  %v3716_v13 = vshrl.u32 %v15470_v24, %v3713_v39 }
 0x6af   : > { %v3574_v33 = vxor.u32 2147483648, %v3573_v47  ;;  %v8737_v32 = vmin.u32 %v3660_v53, %v12924_v8  ;;  %v3489_v54 = vsel %vm3478_vm7, nan, %v3488_v0  ;;  %v3721_v45 = vshll.u32 %v15471_v10, %v3712_v30 }
 0x6b0   : > { %v3722_v50 = vshrl.u32 %v15472_v57, %v3713_v39  ;;  %v3720_v41 = vor.u32 %v3719_v6, %v3718_v21  ;;  %v3725_v46 = vshrl.u32 %v15512_v40, %v3713_v39  ;;  %v3727_v53 = vshll.u32 %v15512_v40, %v3712_v30 }
 0x6b1   : > { %v3575_v7 = vsel %vm3492_vm12, %v3574_v33, %v3573_v47  ;;  %v3662_v26 = vclz %v8737_v32  ;;  %v3715_v47 = vshll.u32 %v15497_v25, %v3712_v30  ;;  %vm3589_vm12 = vcmp.eq.s32.totalorder %v12940_v61, 2 }
 0x6b2   : > { %v3578_v48 = vsel %vm12907_vm10, %v12672_v2, %v3575_v7  ;;  %v3723_v33 = vor.u32 %v3722_v50, %v3721_v45  ;;  %v3728_v16 = vshrl.u32 %v15513_v58, %v3713_v39  ;;  %vm3586_vm9 = vcmp.eq.s32.totalorder %v12940_v61, 0 }
 0x6b3   : > { %10198 = vcosq.f32 %v3578_v48  ;;  %v8738_v56 = vadd.s32 4294967294, %v3662_v26  ;;  %v3717_v36 = vor.u32 %v3716_v13, %v3715_v47  ;;  %v3906_v7 = vmul.f32 %v3489_v54, %v3489_v54 }
 0x6b4   : > { %10200 = vsinq.f32 %v3578_v48  ;;  %v3726_v0 = vor.u32 %v3725_v46, %v3724_v15  ;;  %vm3730_vm10 = vcmp.lt.s32.totalorder %v12951_v28, 1  ;;  %v3729_v32 = vor.u32 %v3728_v16, %v3727_v53 }
 0x6b5   : > { %vm8739_vm2 = vcmp.lt.s32.totalorder %v8738_v56, 0  ;;  %vm3731_vm11 = vcmp.lt.s32.totalorder %v12951_v28, 2  ;;  %vm3732_vm8 = vcmp.lt.s32.totalorder %v12951_v28, 3  ;;  %vm3733_vm14 = vcmp.lt.s32.totalorder %v12951_v28, 4 }
 0x6b6   : > { %v3665_v48 = vsel %vm8739_vm2, 0, %v8738_v56  ;;  %v3742_v30 = vsel %vm3730_vm10, %v3720_v41, %v3723_v33  ;;  %v3738_v21 = vsel %vm3730_vm10, %v3717_v36, %v3720_v41  ;;  %v3739_v54 = vsel %vm3733_vm14, %v3726_v0, 920167782 }
 0x6b7   : > { %v3666_v6 = vsub.s32 32, %v3665_v48  ;;  %v3670_v13 = vsub.s32 4294967266, %v3665_v48  ;;  %v3667_v26 = vshll.u32 %v12924_v8, %v3665_v48  ;;  %v3743_v47 = vsel %vm3733_vm14, %v3729_v32, 1326507024 }
 0x6b8   : > { %v3740_v56 = vsel %vm3732_vm8, %v3723_v33, %v3739_v54  ;;  %v3744_v15 = vsel %vm3732_vm8, %v3726_v0, %v3743_v47  ;;  %v3714_v53 = vshrl.u32 %v15497_v25, %v3713_v39  ;;  %v3735_v16 = vsel %vm3733_vm14, %v3723_v33, 2102212464 }
 0x6b9   : > { %v3668_v45 = vshrl.u32 %v3650_v60, %v3666_v6  ;;  %v3671_v50 = vadd.s32 127, %v3670_v13  ;;  %v3745_v8 = vsel %vm3731_vm11, %v3742_v30, %v3744_v15  ;;  %v3746_v48 = vshll.u32 %v3706_v5, 8 }
 0x6ba   : > { %v3741_v60 = vsel %vm3731_vm11, %v3738_v21, %v3740_v56  ;;  %v3915_v13 = vmul.f32 %v12919_v51, %v3906_v7  ;;  %v3734_v5 = vsel %vm3730_vm10, %v3714_v53, %v3717_v36  ;;  %v3736_v30 = vsel %vm3732_vm8, %v3720_v41, %v3735_v16 }
 0x6bb   : > { %v3669_v22 = vor.u32 %v3668_v45, %v3667_v26  ;;  %v3672_v32 = vshll.u32 %v3671_v50, 23  ;;  %v12984_v54 = vmul.u32.u64.low %v3746_v48, %v3745_v8  ;;  %v12985_v0 = vmul.u32.u64.high %v3746_v48, %v3745_v8, %v12984_v54 }
 0x6bc   : > { %vm3585_vm7 = vcmp.lt.s32.totalorder %v12940_v61, 2  ;;  %v12996_v21 = vmul.u32.u64.low %v3746_v48, %v3741_v60  ;;  %v12997_v7 = vmul.u32.u64.high %v3746_v48, %v3741_v60, %v12996_v21  ;;  %vm3582_vm6 = vweird.f32 %v12672_v2 }
 0x6bd   : > { %v10199_v46 = vpop.eup %10198  ;;  %v3673_v33 = vor.u32 4788187, %v3672_v32  ;;  %v15520_v45 = vsub.s32 32, %v12900_v18  ;;  %v3680_v41 = vsub.s32 4, %v12914_v27  ;;  %v3737_v61 = vsel %vm3731_vm11, %v3734_v5, %v3736_v30 }
 0x6be   : > { %v10201_v29 = vpop.eup %10200  ;;  %v3590_v3 = vxor.u32 2147483648, %v10199_v46  ;;  %v13008_v15 = vadd.f32 %v3915_v13, %v12654_v14  ;;  %v3875_v2 = vshll.u32 %v12825_v17, %v12900_v18  ;;  %v3756_v53 = vadd.s32 1, %v12997_v7 }
 0x6bf   : > { %v3587_v6 = vxor.u32 2147483648, %v10201_v29  ;;  %v3876_v36 = vshrl.u32 %v12932_v55, %v15520_v45  ;;  %v3753_v8 = vmul.u32 %v3746_v48, %v3737_v61  ;;  %v15522_v32 = vand.u32 2147483647, %v12781_v1 }
 0x6c0   : > { %v3591_v39 = vsel %vm3589_vm12, %v3590_v3, %v10201_v29  ;;  %v3674_v29 = vand.u32 2147483647, %v3673_v33  ;;  %v3676_v3 = vcvt.s32.f32 %v3669_v22  ;;  %vm3755_vm12 = vc.u32 %v12985_v0, %v12996_v21 }
 0x6c1   : > { %v3588_v26 = vsel %vm3586_vm9, %v10199_v46, %v3587_v6  ;;  %v15521_v22 = vshll.u32 %v12922_v63, 23  ;;  %vm3596_vm9 = vcmp.lt.s32.totalorder %v12781_v1, 0  ;;  %v3877_v14 = vor.u32 %v3876_v36, %v3875_v2 }
 0x6c2   : > { %v3592_v47 = vsel %vm3585_vm7, %v3588_v26, %v3591_v39  ;;  %v3677_v46 = vmul.f32 %v3676_v3, %v3674_v29  ;;  %vm13021_vm2 = vcmp.le.f32.partialorder %v15522_v32, 0.7853982  ;;  %v3681_v17 = vsel %vm3596_vm9, %v3680_v41, %v12914_v27 }
 0x6c3   : > { %v3593_v50 = vsel %vm3582_vm6, nan, %v3592_v47  ;;  %v3881_v55 = vor.u32 4788187, %v15521_v22  ;;  %v3757_v18 = vsel %vm3755_vm12, %v3756_v53, %v12997_v7  ;;  %v3930_v6 = vrot.slane %v13008_v15, 7 }
 0x6c4   : > { %v3907_v56 = vmul.f32 %v3593_v50, %v3593_v50  ;;  %v3678_v28 = vxor.u32 2147483648, %v3677_v46  ;;  %v3758_v54 = vadd.s32 %v3757_v18, %v3753_v8  ;;  %v3884_v27 = vcvt.s32.f32 %v3877_v14 }
 0x6c5   : > { %v3882_v39 = vand.u32 2147483647, %v3881_v55  ;;  %vm15525_vm10 = vcmask 1040384   ;;  %vm3804_vm11 = vcmp.lt.s32.totalorder %v12664_v49, 0  ;;  %v3888_v14 = vsub.s32 4, %v12803_v23 }
 0x6c6   : > { %v3916_v16 = vmul.f32 %v12919_v51, %v3907_v56  ;;  %v3679_v13 = vsel %vm3596_vm9, %v3678_v28, %v3677_v46  ;;  %v3759_v30 = vadd.s32 536870912, %v3758_v54  ;;  %vm3686_vm12 = vweird.f32 %v12781_v1 }
 0x6c7   : > { %v3682_v48 = vsel %vm13021_vm2, %v12781_v1, %v3679_v13  ;;  %v3885_v7 = vmul.f32 %v3884_v27, %v3882_v39  ;;  %v3889_v39 = vsel %vm3804_vm11, %v3888_v14, %v12803_v23  ;;  %v3754_v27 = vadd.s32 %v12996_v21, %v12985_v0 }
 0x6c8   : > { %v13028_v63 = vadd.f32 %v3916_v16, %v12656_v34  ;;  %10202 = vcosq.f32 %v3682_v48  ;;  %v3683_v34 = vsel %vm13021_vm2, 0, %v3681_v17  ;;  %v13042_v29 = vshrl.u32 %v3759_v30, 30 }
 0x6c9   : > { %10204 = vsinq.f32 %v3682_v48  ;;  %v3687_v3 = vadd.s32 3, %v3683_v34  ;;  %v3886_v50 = vxor.u32 2147483648, %v3885_v7  ;;  %v15527_v16 = vand.u32 2147483647, %v12664_v49 }
 0x6ca   : > { %v3931_v33 = vrot.slane %v13028_v63, 7  ;;  %v3948_v5 = vpack.c.bf16 %v13028_v63, %v13008_v15  ;;  %v3761_v36 = vshll.u32 %v13042_v29, 30  ;;  %v3952_v30 = vrot.slane %v13028_v63, 1 }
 0x6cb   : > { %v3688_v61 = vand.u32 3, %v3687_v3  ;;  %v3887_v22 = vsel %vm3804_vm11, %v3886_v50, %v3885_v7  ;;  %vm13052_vm8 = vcmp.le.f32.partialorder %v15527_v16, 0.7853982  ;;  %vm15530_vm2 = vcmask 1046528  }
 0x6cc   : > { %v3932_v26 = vsel %vm15525_vm10, %v3930_v6, %v3931_v33  ;;  %4149 = vmatprep.mubr.bf16.mxu0 %v3948_v5  ;;  %v3762_v41 = vsub.s32 %v3758_v54, %v3761_v36  ;;  %v3890_v17 = vsel %vm13052_vm8, %v12664_v49, %v3887_v22  ;;  %v3951_v5 = vrot.slane %v13008_v15, 1  ;;  %vm15531_vm10 = vmmov %vm15530_vm2 }
 0x6cd   : > { %v8774_v47 = vpack.c.bf16 %v3932_v26, %v3930_v6  ;;  %vm3693_vm14 = vcmp.eq.s32.totalorder %v3688_v61, 2  ;;  %vm3690_vm7 = vcmp.eq.s32.totalorder %v3688_v61, 0  ;;  %vm3689_vm6 = vcmp.lt.s32.totalorder %v3688_v61, 2 }
 0x6ce   : > { %v3764_v56 = vsub.s32 0, %v3762_v41  ;;  %10206 = vcosq.f32 %v3890_v17  ;;  %v3891_v50 = vsel %vm13052_vm8, 0, %v3889_v39  ;;  %v3953_v15 = vsel %vm15530_vm2, %v3951_v5, %v3952_v30 }
 0x6cf   : > { %8775 = vmatmul.mubr.msk.bf16.vlgmr.msra.gmra.mrb[36].mxu0 %vm11963_vm4, %v8774_v47  ;;  %10208 = vsinq.f32 %v3890_v17  ;;  %v3784_v28 = vsub.s32 4, %v13042_v29  ;;  %vm3700_vm11 = vcmp.lt.s32.totalorder %v12879_v42, 0  ;;  %v15532_v17 = vand.u32 2147483647, %v12879_v42 }
 0x6d0   : > { %v8741_v53 = vmin.u32 %v3764_v56, %v3762_v41 }
 0x6d1   : > { %vm3699_vm8 = vcmp.le.f32.partialorder %v15532_v17, 0.7853982 }
 0x6d2   : > { %v10203_v46 = vpop.eup %10202  ;;  %v3766_v60 = vclz %v8741_v53 }
 0x6d3   : > { %v10205_v2 = vpop.eup %10204  ;;  %v3694_v55 = vxor.u32 2147483648, %v10203_v46 }
 0x6d4   : > { %v3691_v8 = vxor.u32 2147483648, %v10205_v2  ;;  %v8742_v13 = vadd.s32 4294967294, %v3766_v60 }
 0x6d5   : > { %v3695_v32 = vsel %vm3693_vm14, %v3694_v55, %v10205_v2  ;;  %v3895_v2 = vadd.s32 3, %v3891_v50 }
 0x6d6   : > { %v3692_v18 = vsel %vm3690_vm7, %v10203_v46, %v3691_v8  ;;  %vm8743_vm9 = vcmp.lt.s32.totalorder %v8742_v13, 0 }
 0x6d7   : > { %v3696_v6 = vsel %vm3689_vm6, %v3692_v18, %v3695_v32  ;;  %v3769_v34 = vsel %vm8743_vm9, 0, %v8742_v13  ;;  %v3896_v8 = vand.u32 3, %v3895_v2 }
 0x6d8   : > { %v3697_v54 = vsel %vm3686_vm12, nan, %v3696_v6  ;;  %v3770_v26 = vsub.s32 32, %v3769_v34  ;;  %v3774_v7 = vsub.s32 4294967266, %v3769_v34  ;;  %v3771_v23 = vshll.u32 %v3762_v41, %v3769_v34  ;;  %v10207_v22 = vpop.eup %10206 }
 0x6d9   : > { %v3908_v48 = vmul.f32 %v3697_v54, %v3697_v54  ;;  %v10209_v53 = vpop.eup %10208  ;;  %v3902_v32 = vxor.u32 2147483648, %v10207_v22  ;;  %v3785_v6 = vsel %vm3700_vm11, %v3784_v28, %v13042_v29  ;;  %vm3898_vm14 = vcmp.eq.s32.totalorder %v3896_v8, 0 }
 0x6da   : > { %v3772_v3 = vshrl.u32 %v3754_v27, %v3770_v26  ;;  %v3775_v36 = vadd.s32 127, %v3774_v7  ;;  %v3899_v14 = vxor.u32 2147483648, %v10209_v53  ;;  %vm3901_vm7 = vcmp.eq.s32.totalorder %v3896_v8, 2 }
 0x6db   : > { %v3917_v1 = vmul.f32 %v12919_v51, %v3908_v48  ;;  %v3903_v39 = vsel %vm3901_vm7, %v3902_v32, %v10209_v53  ;;  %v3787_v48 = vsel %vm3699_vm8, 0, %v3785_v6  ;;  %vm3897_vm6 = vcmp.lt.s32.totalorder %v3896_v8, 2 }
 0x6dc   : > { %v3773_v21 = vor.u32 %v3772_v3, %v3771_v23  ;;  %v3776_v61 = vshll.u32 %v3775_v36, 23  ;;  %v3900_v54 = vsel %vm3898_vm14, %v10207_v22, %v3899_v14  ;;  %v3791_v27 = vadd.s32 3, %v3787_v48  ;;  %v13110_v48 = vld [vmem:[#allocation7 + $0x8] sm:$0xff] }
 0x6dd   : > { %v13070_v47 = vadd.f32 %v3917_v1, %v12658_v31  ;;  %v3904_v5 = vsel %vm3897_vm6, %v3900_v54, %v3903_v39  ;;  %vm3894_vm12 = vweird.f32 %v12664_v49  ;;  %vm15535_vm7 = vcmask 1046528   ;;  %v10019_v54 = vld [vmem:[#allocation8 + $0x180] sm:$0xff]  }
 0x6de   : > { %v3777_v46 = vor.u32 4788187, %v3776_v61  ;;  %v3780_v55 = vcvt.s32.f32 %v3773_v21  ;;  %v3905_v34 = vsel %vm3894_vm12, nan, %v3904_v5  ;;  %vm15536_vm6 = vmmov %vm15535_vm7  ;;  %v10020_v39 = vld [vmem:[#allocation8 + $0x200] sm:$0xff]  }
 0x6df   : > { %v3954_v0 = vrot.slane %v13070_v47, 1  ;;  %v3910_v1 = vmul.f32 %v3905_v34, %v3905_v34  ;;  %v15539_v5 = vld [vmem:[#allocation26_spill] sm:$0xff] }
 0x6e0   : > { %v3778_v41 = vand.u32 2147483647, %v3777_v46  ;;  %v3933_v46 = vrot.slane %v13070_v47, 7  ;;  %v10021_v34 = vld [vmem:[#allocation8 + $0x1c8] sm:$0xff]  }
 0x6e1   : > { %v3955_v56 = vsel %vm15531_vm10, %v3952_v30, %v3954_v0  ;;  %v3792_v30 = vand.u32 3, %v3791_v27  ;;  %v3919_v3 = vmul.f32 %v12919_v51, %v3910_v1  ;;  %v13114_v27 = vrot.slane %v13110_v48, %v15539_v5  ;;  %v10022_v1 = vld [vmem:[#allocation8 + $0x188] sm:$0xff]  }
 0x6e2   : > { %v3966_v31 = vpack.c.bf16 %v3955_v56, %v3953_v15  ;;  %v3781_v16 = vmul.f32 %v3780_v55, %v3778_v41 }
 0x6e3   : > { %vm3797_vm9 = vcmp.eq.s32.totalorder %v3792_v30, 2  ;;  %vm3794_vm2 = vcmp.eq.s32.totalorder %v3792_v30, 0  ;;  %vm3793_vm10 = vcmp.lt.s32.totalorder %v3792_v30, 2  ;;  %v3924_v49 = vadd.f32 %v3919_v3, %v12652_v43  ;;  %v10023_v30 = vld [vmem:[#allocation8 + $0x208] sm:$0xff]   ;;  %v10025_v3 = vld [vmem:[#allocation8 + $0x190] sm:$0xff]  }
 0x6e4   : > { %9469 = vmatmul.mubr.bf16.vlgmr.msra.gmra.mrb[36].mxu1 %v3966_v31  ;;  %v3782_v60 = vxor.u32 2147483648, %v3781_v16 }
 0x6e5   : > { %9472 = vmatprep.mubr.msk.bf16.mxu1 %vm15507_vm0, %v15484_v62  ;;  %v3958_v31 = vrot.slane %v3924_v49, 1  ;;  %v3950_v28 = vpack.c.bf16 %v3924_v49, %v3924_v49  ;;  %v3937_v8 = vrot.slane %v3924_v49, 7  ;;  %9481 = vmatpush3.bf16.msra.mxu1 %v10020_v39 }
 0x6e6   : > { %v3783_v18 = vsel %vm3700_vm11, %v3782_v60, %v3781_v16  ;;  %vm3790_vm11 = vweird.f32 %v12879_v42  ;;  %9482 = vmatprep.subr.bf16.mxu1 %v15484_v62 }
 0x6e7   : > { %v3786_v13 = vsel %vm3699_vm8, %v12879_v42, %v3783_v18  ;;  %vm15533_vm8 = vcmask 1040384   ;;  %v8777_v14 = vpack.c.bf16 %v3958_v31, %v3958_v31 }
 0x6e8   : > { %10210 = vcosq.f32 %v3786_v13  ;;  %v3934_v41 = vsel %vm15533_vm8, %v3931_v33, %v3933_v46  ;;  %vm15534_vm14 = vmmov %vm15533_vm8 }
 0x6e9   : > { %10212 = vsinq.f32 %v3786_v13  ;;  %vm15537_vm12 = vmmov %vm15533_vm8  ;;  %v10018_v13 = vld [vmem:[#allocation8 + $0x1c0] sm:$0xff]   ;;  %9483 = vmatpush3.bf16.msra.mxu1 %v10023_v30 }
 0x6ea   : > { %9177 = vmatprep.subr.bf16.mxu0 %v10018_v13  ;;  %9484 = vmatprep.subr.bf16.mxu1 %v15484_v62 }
 0x6eb   : > { %9178 = vmatpush3.bf16.msra.mxu0 %v10019_v54 }
 0x6ec   : > { %9179 = vmatprep.subr.bf16.mxu0 %v10021_v34 }
 0x6ef   : > { %9180 = vmatpush3.bf16.msra.mxu0 %v10022_v1 }
 0x6f2   : > { %v10211_v26 = vpop.eup %10210 }
 0x6f3   : > { %v10213_v7 = vpop.eup %10212  ;;  %v3798_v29 = vxor.u32 2147483648, %v10211_v26 }
 0x6f4   : > { %v3795_v23 = vxor.u32 2147483648, %v10213_v7 }
 0x6f5   : > { %v3799_v36 = vsel %vm3797_vm9, %v3798_v29, %v10213_v7  ;;  %v10026_v29 = vld [vmem:[#allocation8 + $0x210] sm:$0xff]  }
 0x6f6   : > { %v3796_v50 = vsel %vm3794_vm2, %v10211_v26, %v3795_v23  ;;  %v10024_v26 = vld [vmem:[#allocation8 + $0x1d0] sm:$0xff]   ;;  %9485 = vmatpush3.bf16.msra.mxu1 %v10026_v29 }
 0x6f7   : > { %v3800_v15 = vsel %vm3793_vm10, %v3796_v50, %v3799_v36  ;;  %9181 = vmatprep.subr.bf16.mxu0 %v10024_v26  ;;  %v10027_v50 = vld [vmem:[#allocation8 + $0x1d8] sm:$0xff]   ;;  %9486 = vmatprep.subr.bf16.mxu1 %v15484_v62 }
 0x6f8   : > { %v3801_v21 = vsel %vm3790_vm11, nan, %v3800_v15  ;;  %9182 = vmatpush3.bf16.msra.mxu0 %v10025_v3 }
 0x6f9   : > { %v3909_v61 = vmul.f32 %v3801_v21, %v3801_v21  ;;  %9183 = vmatprep.subr.bf16.mxu0 %v10027_v50 }
 0x6fb   : > { %v3918_v56 = vmul.f32 %v12919_v51, %v3909_v61  ;;  %v10029_v61 = vld [vmem:[#allocation8 + $0x218] sm:$0xff]  }
 0x6fc   : > { %9487 = vmatpush3.bf16.msra.mxu1 %v10029_v61 }
 0x6fd   : > { %v3923_v2 = vadd.f32 %v3918_v56, %v12660_v4  ;;  %9488 = vmatprep.subr.bf16.mxu1 %v15484_v62 }
 0x6ff   : > { %v3949_v22 = vpack.c.bf16 %v3923_v2, %v13070_v47  ;;  %v3935_v55 = vrot.slane %v3923_v2, 7  ;;  %v3956_v42 = vrot.slane %v3923_v2, 1  ;;  %v10028_v2 = vld [vmem:[#allocation8 + $0x198] sm:$0xff]  }
 0x700   : > { %9184 = vmatpush3.bf16.msra.mxu0 %v10028_v2 }
 0x701   : > { %4157 = vmatprep.mubr.bf16.mxu0 %v3949_v22  ;;  %v3936_v53 = vsel %vm15534_vm14, %v3933_v46, %v3935_v55  ;;  %v3957_v43 = vsel %vm15535_vm7, %v3954_v0, %v3956_v42  ;;  %v3959_v51 = vsel %vm15536_vm6, %v3956_v42, %v3958_v31  ;;  %v3938_v63 = vsel %vm15537_vm12, %v3935_v55, %v3937_v8  ;;  %v10030_v31 = vld [vmem:[#allocation8 + $0x1e0] sm:$0xff]   ;;  %v10038_v8 = vld [vmem:[#allocation8 + $0x230] sm:$0xff]  }
 0x702   : > { %v3946_v16 = vpack.c.bf16 %v3936_v53, %v3934_v41  ;;  %v3967_v4 = vpack.c.bf16 %v3959_v51, %v3957_v43  ;;  %v3947_v33 = vpack.c.bf16 %v3938_v63, %v3938_v63  ;;  %v10032_v42 = vld [vmem:[#allocation8 + $0x220] sm:$0xff]   ;;  %9185 = vmatprep.subr.bf16.mxu0 %v10030_v31  ;;  %v10033_v51 = vld [vmem:[#allocation8 + $0x1e8] sm:$0xff]   ;;  %v10037_v63 = vld [vmem:[#allocation8 + $0x1b0] sm:$0xff]  }
 0x703   : > { %v10031_v43 = vld [vmem:[#allocation8 + $0x1a0] sm:$0xff]   ;;  %9489 = vmatpush3.bf16.msra.mxu1 %v10032_v42 }
 0x704   : > { %4158 = vmatmul.mubr.bf16.gmra.mrb[40].mxu0 %v3946_v16  ;;  %9473 = vmatmul.mubr.bf16.gmra.mrb[40].mxu1 %v3967_v4  ;;  %v10035_v16 = vld [vmem:[#allocation8 + $0x228] sm:$0xff]  }
 0x705   : > { %4165 = vmatprep.mubr.bf16.mxu0 %v3950_v28  ;;  %9476 = vmatprep.mubr.msk.bf16.mxu1 %vm15507_vm0, %v15484_v62  ;;  %v10034_v4 = vld [vmem:[#allocation8 + $0x1a8] sm:$0xff]   ;;  %v10036_v28 = vld [vmem:[#allocation8 + $0x1f0] sm:$0xff]  }
 0x706   : > { %9186 = vmatpush3.bf16.msra.mxu0 %v10031_v43  ;;  %9490 = vmatprep.subr.bf16.mxu1 %v15484_v62 }
 0x707   : > { %9187 = vmatprep.subr.bf16.mxu0 %v10033_v51  ;;  %9491 = vmatpush3.bf16.msra.mxu1 %v10035_v16 }
 0x708   : > { %9492 = vmatprep.subr.bf16.mxu1 %v15484_v62 }
 0x70a   : > { %9188 = vmatpush3.bf16.msra.mxu0 %v10034_v4 }
 0x70b   : > { %9189 = vmatprep.subr.bf16.mxu0 %v10036_v28  ;;  %9493 = vmatpush3.bf16.msra.mxu1 %v10038_v8 }
 0x70c   : > { %4166 = vmatmul.mubr.bf16.gmra.mrb[44].mxu0 %v3947_v33  ;;  %9477 = vmatmul.mubr.msk.bf16.gmra.mrb[44].mxu1 %vm12036_vm5, %v8777_v14  ;;  %v10039_v33 = vld [vmem:[#allocation8 + $0x1f8] sm:$0xff]  }
 0x70d   : > { %9496 = vmatprep.mubr.msk.bf16.mxu1 %vm15507_vm0, %v15484_v62  ;;  %9494 = vmatprep.subr.bf16.mxu1 %v15484_v62  ;;  %v10040_v14 = vld [vmem:[#allocation8 + $0x1b8] sm:$0xff]  }
 0x70e   : > { %9190 = vmatpush3.bf16.msra.mxu0 %v10037_v63 }
 0x70f   : > { %9191 = vmatprep.subr.bf16.mxu0 %v10039_v33 }
 0x712   : > { %9192 = vmatpush3.bf16.msra.mxu0 %v10040_v14 }
 0x7a2   : > { %v9148_v0 = vpop.f32.mrb[36].mxu0 }
 0x7a3   : > { %v9149_v32 = vpop.f32.mrb[37].mxu0 }
 0x7a4   : > { %v9150_v60 = vadd.f32 %v9149_v32, %v9148_v0  ;;  %v9151_v17 = vpop.f32.mrb[38].mxu0 }
 0x7a5   : > { %v9152_v18 = vpop.f32.mrb[39].mxu0 }
 0x7a6   : > { %v9153_v6 = vadd.f32 %v9152_v18, %v9151_v17  ;;  %v4152_v7 = vadd.f32 %v9150_v60, %v13114_v27 }
 0x7a8   : > { %v4155_v23 = vadd.f32 %v9153_v6, %v13114_v27 }
 0x7b7   : > { %v4207_v36 = vpop.f32.mrb[36].mxu1 }
 0x7b8   : > { %v13120_v15 = vadd.f32 %v4207_v36, %v4152_v7  ;;  %v9470_v21 = vpop.f32.mrb[37].mxu1 }
 0x7b9   : > { %v4210_v49 = vpop.f32.mrb[38].mxu1 }
 0x7ba   : > { %v13122_v56 = vadd.f32 %v4210_v49, %v4155_v23  ;;  %v9471_v46 = vpop.f32.mrb[39].mxu1  ;;  %v4239_v22 = vmul.f32 %v13120_v15, %v13120_v15 }
 0x7bc   : > { %v4229_v41 = vadd.f32 %v13122_v56, %v13120_v15  ;;  %v4240_v55 = vmul.f32 %v13122_v56, %v13122_v56 }
 0x7be   : > { %v4244_v53 = vadd.f32 %v4240_v55, %v4239_v22 }
 0x7d7   : > { %v9154_v0 = vpop.f32.mrb[40].mxu0  ;;  %v4215_v32 = vpop.f32.mrb[40].mxu1 }
 0x7d8   : > { %v9155_v60 = vpop.f32.mrb[41].mxu0  ;;  %v9474_v17 = vpop.f32.mrb[41].mxu1 }
 0x7d9   : > { %v9156_v18 = vadd.f32 %v9155_v60, %v9154_v0  ;;  %v9157_v6 = vpop.f32.mrb[42].mxu0  ;;  %v4218_v13 = vpop.f32.mrb[42].mxu1 }
 0x7da   : > { %v9158_v54 = vpop.f32.mrb[43].mxu0  ;;  %v9475_v39 = vpop.f32.mrb[43].mxu1 }
 0x7db   : > { %v4160_v34 = vadd.f32 %v9156_v18, %v13114_v27  ;;  %v9159_v30 = vadd.f32 %v9158_v54, %v9157_v6 }
 0x7dd   : > { %v4216_v1 = vadd.f32 %v4215_v32, %v4160_v34  ;;  %v4163_v26 = vadd.f32 %v9159_v30, %v13114_v27 }
 0x7df   : > { %v4230_v7 = vadd.f32 %v4229_v41, %v4216_v1  ;;  %v4241_v29 = vmul.f32 %v4216_v1, %v4216_v1  ;;  %v4219_v23 = vadd.f32 %v4218_v13, %v4163_v26  ;;  %v9160_v3 = vpop.f32.mrb[44].mxu0  ;;  %v4223_v36 = vpop.f32.mrb[44].mxu1 }
 0x7e0   : > { %v9161_v50 = vpop.f32.mrb[45].mxu0  ;;  %v9478_v21 = vpop.f32.mrb[45].mxu1 }
 0x7e1   : > { %v4245_v49 = vadd.f32 %v4244_v53, %v4241_v29  ;;  %v4231_v61 = vadd.f32 %v4230_v7, %v4219_v23  ;;  %v4242_v46 = vmul.f32 %v4219_v23, %v4219_v23  ;;  %v9162_v2 = vadd.f32 %v9161_v50, %v9160_v3  ;;  %v9163_v31 = vpop.f32.mrb[46].mxu0  ;;  %v4226_v22 = vpop.f32.mrb[46].mxu1  ;;  %v10041_v7 = vld [vmem:[#allocation8 + $0x238] sm:$0xff]  }
 0x7e2   : > { %v9164_v55 = vpop.f32.mrb[47].mxu0  ;;  %v9479_v42 = vpop.f32.mrb[47].mxu1  ;;  %9495 = vmatpush3.bf16.msra.mxu1 %v10041_v7 }
 0x7e3   : > { %v4246_v43 = vadd.f32 %v4245_v49, %v4242_v46  ;;  %v4168_v51 = vadd.f32 %v9162_v2, %v13114_v27  ;;  %9508 = vmatprep.subr.bf16.mxu1 %v15484_v62  ;;  %v4291_v42 = vld [vmem:[#allocation7 + $0x10] sm:$0xff] }
 0x7e5   : > { %v4224_v16 = vadd.f32 %v4223_v36, %v4168_v51  ;;  %v15540_v36 = vld [vmem:[#allocation27_spill] sm:$0xff] }
 0x7e7   : > { %v4232_v4 = vadd.f32 %v4231_v61, %v4224_v16  ;;  %v4243_v41 = vmul.f32 %v4224_v16, %v4224_v16 }
 0x7e9   : > { %v4233_v28 = vrot.slane %v4232_v4, 4  ;;  %v4247_v8 = vadd.f32 %v4246_v43, %v4243_v41  ;;  %v15541_v43 = vld [vmem:[#allocation28_spill] sm:$0xff] }
 0x7eb   : > { %v4234_v63 = vadd.f32 %v4233_v28, %v4232_v4  ;;  %v4248_v33 = vrot.slane %v4247_v8, 4  ;;  %v15542_v4 = vld [vmem:[#allocation20_spill] sm:$0xff] }
 0x7ec   : > { %v13146_v41 = vrot.slane %v4291_v42, %v15542_v4 }
 0x7ed   : > { %v4235_v14 = vrot.slane %v4234_v63, 2  ;;  %v4249_v0 = vadd.f32 %v4248_v33, %v4247_v8 }
 0x7ef   : > { %v4236_v53 = vadd.f32 %v4235_v14, %v4234_v63  ;;  %v4250_v32 = vrot.slane %v4249_v0, 2 }
 0x7f1   : > { %v4237_v60 = vrot.slane %v4236_v53, 1  ;;  %v4251_v17 = vadd.f32 %v4250_v32, %v4249_v0 }
 0x7f3   : > { %v4238_v18 = vadd.f32 %v4237_v60, %v4236_v53  ;;  %v4252_v6 = vrot.slane %v4251_v17, 1 }
 0x7f5   : > { %v4253_v13 = vadd.f32 %v4252_v6, %v4251_v17  ;;  %v4254_v54 = vmul.f32 0.025, %v4238_v18 }
 0x7f7   : > { %v4255_v39 = vmul.f32 0.025, %v4253_v13  ;;  %v4256_v34 = vmul.f32 %v4254_v54, %v4254_v54 }
 0x7f9   : > { %v4257_v27 = vsub.f32 %v4255_v39, %v4256_v34 }
 0x7fb   : > { %v4258_v30 = vmax.f32 %v4257_v27, 0.0 }
 0x7fd   : > { %v4259_v26 = vadd.f32 1e-05, %v4258_v30 }
 0x7ff   : > { %10214 = vrsqrt.f32 %v4259_v26 }
 0x809   : > { %v10215_v29 = vpop.eup %10214 }
 0x80a   : > { %v4261_v3 = vmul.f32 %v13110_v48, %v10215_v29 }
 0x80c   : > { %v4265_v50 = vrot.slane %v4261_v3, %v15540_v36  ;;  %v4271_v21 = vmul.f32 %v4261_v3, %v4254_v54 }
 0x80e   : > { %v4270_v49 = vmul.f32 %v4265_v50, %v4224_v16  ;;  %v4273_v61 = vrot.slane %v4271_v21, 7  ;;  %v4266_v46 = vmul.f32 %v4265_v50, %v13120_v15  ;;  %v4267_v2 = vmul.f32 %v4265_v50, %v13122_v56 }
 0x80f   : > { %v4268_v31 = vmul.f32 %v4265_v50, %v4216_v1  ;;  %v4269_v22 = vmul.f32 %v4265_v50, %v4219_v23 }
 0x810   : > { %v4275_v55 = vsub.f32 %v13110_v48, %v4273_v61  ;;  %v13186_v61 = vadd.f32 1e-09, %v4291_v42 }
 0x812   : > { %v4279_v51 = vrot.slane %v4275_v55, %v15541_v43  ;;  %10216 = vrcp.f32 %v13186_v61 }
 0x814   : > { %v4284_v28 = vadd.f32 %v4279_v51, %v4270_v49  ;;  %v4280_v8 = vadd.f32 %v4279_v51, %v4266_v46  ;;  %v4281_v63 = vadd.f32 %v4279_v51, %v4267_v2  ;;  %v4282_v33 = vadd.f32 %v4279_v51, %v4268_v31 }
 0x815   : > { %v4283_v16 = vadd.f32 %v4279_v51, %v4269_v22 }
 0x816   : > { %v13149_v14 = vadd.f32 %v4284_v28, %v12092_v38  ;;  %v13152_v15 = vadd.f32 %v4280_v8, %v12095_v11  ;;  %v13155_v56 = vadd.f32 %v4281_v63, %v12098_v59  ;;  %v13170_v38 = vadd.f32 %v4282_v33, %v12113_v19 }
 0x817   : > { %v13192_v31 = vadd.f32 %v4283_v16, %v12135_v35 }
 0x818   : > { %v13159_v48 = vmul.f32 %v13146_v41, %v13149_v14  ;;  %v13163_v1 = vmul.f32 %v13146_v41, %v13152_v15  ;;  %v13167_v23 = vmul.f32 %v13146_v41, %v13155_v56  ;;  %v13179_v18 = vmul.f32 %v13146_v41, %v13170_v38 }
 0x81a   : > { %v4821_v11 = vand.u32 2139095040, %v13159_v48  ;;  %v15406_v59 = vand.u32 2147483647, %v13163_v1  ;;  %v4405_v0 = vand.u32 2139095040, %v13163_v1  ;;  %v15405_v53 = vand.u32 2147483647, %v13167_v23 }
 0x81b   : > { %v4509_v32 = vand.u32 2139095040, %v13167_v23  ;;  %v4613_v26 = vand.u32 2139095040, %v13179_v18 }
 0x81c   : > { %v4822_v60 = vshrl.u32 %v4821_v11, 23  ;;  %v4406_v17 = vshrl.u32 %v4405_v0, 23  ;;  %v4409_v54 = vand.u32 8388607, %v15406_v59  ;;  %v4513_v34 = vand.u32 8388607, %v15405_v53 }
 0x81d   : > { %v4510_v6 = vshrl.u32 %v4509_v32, 23  ;;  %v4614_v49 = vshrl.u32 %v4613_v26, 23 }
 0x81e   : > { %v8795_v13 = vadd.s32 4294967169, %v4822_v60  ;;  %v8779_v19 = vadd.s32 4294967169, %v4406_v17  ;;  %v4410_v7 = vor.u32 8388608, %v4409_v54  ;;  %v4514_v3 = vor.u32 8388608, %v4513_v34 }
 0x81f   : > { %v8783_v39 = vadd.s32 4294967169, %v4510_v6  ;;  %v8787_v42 = vadd.s32 4294967169, %v4614_v49 }
 0x820   : > { %v4828_v27 = vadd.s32 1, %v8795_v13  ;;  %v4412_v30 = vadd.s32 1, %v8779_v19  ;;  %v13188_v46 = vshll.u32 %v4410_v7, 8  ;;  %v13196_v51 = vshll.u32 %v4514_v3, 8 }
 0x821   : > { %v4516_v50 = vadd.s32 1, %v8783_v39 }
 0x822   : > { %vm4413_vm9 = vcmp.gt.s32.totalorder %v4412_v30, 0  ;;  %vm4829_vm2 = vcmp.gt.s32.totalorder %v4828_v27, 0 }
 0x823   : > { %v4414_v29 = vsel %vm4413_vm9, %v4412_v30, 0  ;;  %v13194_v22 = vsel %vm4829_vm2, %v4828_v27, 0  ;;  %vm4517_vm10 = vcmp.gt.s32.totalorder %v4516_v50, 0 }
 0x824   : > { %v4416_v21 = vand.u32 31, %v4414_v29  ;;  %v4415_v28 = vshrl.u32 %v4414_v29, 5  ;;  %v13210_v39 = vand.u32 31, %v13194_v22  ;;  %v4518_v26 = vsel %vm4517_vm10, %v4516_v50, 0 }
 0x826   : > { %v4417_v55 = vsub.s32 32, %v4416_v21  ;;  %v4419_v8 = vshll.u32 %v15497_v25, %v4416_v21  ;;  %v4422_v63 = vshll.u32 %v15470_v24, %v4416_v21  ;;  %v4425_v0 = vshll.u32 %v15471_v10, %v4416_v21 }
 0x827   : > { %v4428_v16 = vshll.u32 %v15472_v57, %v4416_v21  ;;  %v4431_v60 = vshll.u32 %v15512_v40, %v4416_v21  ;;  %vm4434_vm11 = vcmp.lt.s32.totalorder %v4415_v28, 1  ;;  %vm4436_vm8 = vcmp.lt.s32.totalorder %v4415_v28, 3 }
 0x828   : > { %v4420_v33 = vshrl.u32 %v15470_v24, %v4417_v55  ;;  %v4423_v11 = vshrl.u32 %v15471_v10, %v4417_v55  ;;  %v4426_v35 = vshrl.u32 %v15472_v57, %v4417_v55  ;;  %v4429_v32 = vshrl.u32 %v15512_v40, %v4417_v55 }
 0x829   : > { %v4432_v17 = vshrl.u32 %v15513_v58, %v4417_v55  ;;  %v4418_v6 = vshrl.u32 %v15497_v25, %v4417_v55  ;;  %vm4437_vm14 = vcmp.lt.s32.totalorder %v4415_v28, 4  ;;  %vm4435_vm7 = vcmp.lt.s32.totalorder %v4415_v28, 2 }
 0x82a   : > { %v4421_v13 = vor.u32 %v4420_v33, %v4419_v8  ;;  %v4424_v19 = vor.u32 %v4423_v11, %v4422_v63  ;;  %v4427_v54 = vor.u32 %v4426_v35, %v4425_v0  ;;  %v4430_v34 = vor.u32 %v4429_v32, %v4428_v16 }
 0x82b   : > { %v4433_v27 = vor.u32 %v4432_v17, %v4431_v60  ;;  %v4520_v0 = vand.u32 31, %v4518_v26  ;;  %v4620_v60 = vadd.s32 1, %v8787_v42 }
 0x82c   : > { %v4438_v30 = vsel %vm4434_vm11, %v4418_v6, %v4421_v13  ;;  %v4439_v7 = vsel %vm4437_vm14, %v4427_v54, 2102212464  ;;  %v4442_v29 = vsel %vm4434_vm11, %v4421_v13, %v4424_v19  ;;  %v4443_v3 = vsel %vm4437_vm14, %v4430_v34, 920167782 }
 0x82d   : > { %v4446_v21 = vsel %vm4434_vm11, %v4424_v19, %v4427_v54  ;;  %v4440_v49 = vsel %vm4436_vm8, %v4424_v19, %v4439_v7  ;;  %v4444_v55 = vsel %vm4436_vm8, %v4427_v54, %v4443_v3  ;;  %v4447_v8 = vsel %vm4437_vm14, %v4433_v27, 1326507024 }
 0x82e   : > { %v4441_v63 = vsel %vm4435_vm7, %v4438_v30, %v4440_v49  ;;  %v4445_v33 = vsel %vm4435_vm7, %v4442_v29, %v4444_v55  ;;  %v4448_v11 = vsel %vm4436_vm8, %v4430_v34, %v4447_v8  ;;  %v4519_v6 = vshrl.u32 %v4518_v26, 5 }
 0x82f   : > { %v4449_v35 = vsel %vm4435_vm7, %v4446_v21, %v4448_v11  ;;  %v13214_v16 = vmul.u32.u64.low %v13188_v46, %v4445_v33  ;;  %v13215_v32 = vmul.u32.u64.high %v13188_v46, %v4445_v33, %v13214_v16  ;;  %v4521_v28 = vsub.s32 32, %v4520_v0 }
 0x830   : > { %v13219_v50 = vmul.u32.u64.low %v13188_v46, %v4449_v35  ;;  %v13220_v17 = vmul.u32.u64.high %v13188_v46, %v4449_v35, %v13219_v50  ;;  %v4457_v13 = vmul.u32 %v13188_v46, %v4441_v63  ;;  %v4523_v19 = vshll.u32 %v15497_v25, %v4520_v0 }
 0x831   : > { %v4526_v54 = vshll.u32 %v15470_v24, %v4520_v0  ;;  %v4529_v34 = vshll.u32 %v15471_v10, %v4520_v0  ;;  %v4524_v27 = vshrl.u32 %v15470_v24, %v4521_v28  ;;  %v4527_v30 = vshrl.u32 %v15471_v10, %v4521_v28 }
 0x832   : > { %v4530_v42 = vshrl.u32 %v15472_v57, %v4521_v28  ;;  %v4532_v7 = vshll.u32 %v15472_v57, %v4520_v0  ;;  %v4460_v29 = vadd.s32 1, %v13215_v32  ;;  %v4533_v26 = vshrl.u32 %v15512_v40, %v4521_v28 }
 0x833   : > { %v4535_v46 = vshll.u32 %v15512_v40, %v4520_v0  ;;  %v4536_v3 = vshrl.u32 %v15513_v58, %v4521_v28  ;;  %vm4459_vm6 = vc.u32 %v13220_v17, %v13214_v16  ;;  %v4522_v21 = vshrl.u32 %v15497_v25, %v4521_v28 }
 0x834   : > { %v4525_v49 = vor.u32 %v4524_v27, %v4523_v19  ;;  %v4528_v55 = vor.u32 %v4527_v30, %v4526_v54  ;;  %v4461_v8 = vsel %vm4459_vm6, %v4460_v29, %v13215_v32  ;;  %v4531_v63 = vor.u32 %v4530_v42, %v4529_v34 }
 0x835   : > { %v4534_v33 = vor.u32 %v4533_v26, %v4532_v7  ;;  %v4537_v11 = vor.u32 %v4536_v3, %v4535_v46  ;;  %v4462_v35 = vadd.s32 %v4461_v8, %v4457_v13  ;;  %vm4538_vm12 = vcmp.lt.s32.totalorder %v4519_v6, 1 }
 0x836   : > { %vm4539_vm9 = vcmp.lt.s32.totalorder %v4519_v6, 2  ;;  %vm4541_vm2 = vcmp.lt.s32.totalorder %v4519_v6, 4  ;;  %vm4540_vm10 = vcmp.lt.s32.totalorder %v4519_v6, 3  ;;  %v4546_v50 = vsel %vm4538_vm12, %v4525_v49, %v4528_v55 }
 0x837   : > { %v4543_v0 = vsel %vm4541_vm2, %v4531_v63, 2102212464  ;;  %v4547_v53 = vsel %vm4541_vm2, %v4534_v33, 920167782  ;;  %v4463_v59 = vadd.s32 536870912, %v4462_v35  ;;  %v4542_v2 = vsel %vm4538_vm12, %v4522_v21, %v4525_v49 }
 0x838   : > { %v4548_v43 = vsel %vm4540_vm10, %v4531_v63, %v4547_v53  ;;  %v4550_v36 = vsel %vm4538_vm12, %v4528_v55, %v4531_v63  ;;  %v4544_v28 = vsel %vm4540_vm10, %v4528_v55, %v4543_v0  ;;  %v4551_v54 = vsel %vm4541_vm2, %v4537_v11, 1326507024 }
 0x839   : > { %v4549_v19 = vsel %vm4539_vm9, %v4546_v50, %v4548_v43  ;;  %vm4621_vm11 = vcmp.gt.s32.totalorder %v4620_v60, 0  ;;  %v4464_v32 = vshrl.u32 %v4463_v59, 30  ;;  %v4552_v34 = vsel %vm4540_vm10, %v4534_v33, %v4551_v54 }
 0x83a   : > { %v13240_v13 = vmul.u32.u64.low %v13196_v51, %v4549_v19  ;;  %v13241_v27 = vmul.u32.u64.high %v13196_v51, %v4549_v19, %v13240_v13  ;;  %v4553_v30 = vsel %vm4539_vm9, %v4550_v36, %v4552_v34  ;;  %v15543_v42 = vand.u32 2147483647, %v13179_v18 }
 0x83b   : > { %v4622_v29 = vsel %vm4621_vm11, %v4620_v60, 0  ;;  %v4465_v53 = vshll.u32 %v4464_v32, 30  ;;  %v4545_v26 = vsel %vm4539_vm9, %v4542_v2, %v4544_v28  ;;  %v13254_v3 = vmul.f32 %v13146_v41, %v13192_v31 }
 0x83c   : > { %v4617_v7 = vand.u32 8388607, %v15543_v42  ;;  %v13249_v43 = vmul.u32.u64.low %v13196_v51, %v4553_v30  ;;  %v13250_v46 = vmul.u32.u64.high %v13196_v51, %v4553_v30, %v13249_v43  ;;  %v4624_v59 = vand.u32 31, %v4622_v29 }
 0x83d   : > { %v13257_v21 = vsub.s32 32, %v13210_v39  ;;  %v13260_v36 = vsub.s32 %v4462_v35, %v4465_v53  ;;  %v4564_v60 = vadd.s32 1, %v13241_v27  ;;  %v15544_v2 = vand.u32 2147483647, %v13163_v1 }
 0x83e   : > { %vm4404_vm14 = vcmp.lt.s32.totalorder %v13163_v1, 0  ;;  %v4561_v41 = vmul.u32 %v13196_v51, %v4545_v26  ;;  %v4618_v49 = vor.u32 8388608, %v4617_v7  ;;  %v4488_v8 = vsub.s32 4, %v4464_v32 }
 0x83f   : > { %vm13265_vm8 = vcmp.le.f32.partialorder %v15544_v2, 0.7853982  ;;  %v4468_v55 = vsub.s32 0, %v13260_v36  ;;  %vm4563_vm7 = vc.u32 %v13250_v46, %v13240_v13  ;;  %v4625_v61 = vsub.s32 32, %v4624_v59 }
 0x840   : > { %v13275_v63 = vshrl.u32 %v13194_v22, 5  ;;  %v13279_v33 = vshll.u32 %v15472_v57, %v13210_v39  ;;  %v4565_v11 = vsel %vm4563_vm7, %v4564_v60, %v13241_v27  ;;  %v13285_v51 = vshrl.u32 %v15512_v40, %v13257_v21 }
 0x841   : > { %v13289_v0 = vshll.u32 %v15512_v40, %v13210_v39  ;;  %v8780_v50 = vmin.u32 %v4468_v55, %v13260_v36  ;;  %v4566_v22 = vadd.s32 %v4565_v11, %v4561_v41  ;;  %v13294_v28 = vshrl.u32 %v15513_v58, %v13257_v21 }
 0x842   : > { %v4458_v19 = vadd.s32 %v13214_v16, %v13220_v17  ;;  %v13298_v54 = vshrl.u32 %v4622_v29, 5  ;;  %v13300_v34 = vshll.u32 %v4618_v49, 8  ;;  %v13304_v30 = vsel %vm4404_vm14, %v4488_v8, %v4464_v32  ;;  %v13316_v8 = vpop.eup %10216 }
 0x843   : > { %v4470_v27 = vclz %v8780_v50  ;;  %v4628_v42 = vshrl.u32 %v15470_v24, %v4625_v61  ;;  %v4631_v7 = vshrl.u32 %v15471_v10, %v4625_v61  ;;  %v4567_v53 = vadd.s32 536870912, %v4566_v22  ;;  %15547 = vst [vmem:[#allocation29_spill] sm:$0xff] %v13316_v8 }
 0x844   : > { %v4634_v26 = vshrl.u32 %v15472_v57, %v4625_v61  ;;  %v4636_v43 = vshll.u32 %v15472_v57, %v4624_v59  ;;  %v4637_v16 = vshrl.u32 %v15512_v40, %v4625_v61  ;;  %v4627_v29 = vshll.u32 %v15497_v25, %v4624_v59 }
 0x845   : > { %v8781_v17 = vadd.s32 4294967294, %v4470_v27  ;;  %v4640_v60 = vshrl.u32 %v15513_v58, %v4625_v61  ;;  %v4717_v2 = vand.u32 2139095040, %v13254_v3  ;;  %v4568_v32 = vshrl.u32 %v4567_v53, 30 }
 0x846   : > { %v4630_v41 = vshll.u32 %v15470_v24, %v4624_v59  ;;  %v4633_v49 = vshll.u32 %v15471_v10, %v4624_v59  ;;  %v4638_v55 = vor.u32 %v4637_v16, %v4636_v43  ;;  %v4491_v11 = vsel %vm13265_vm8, 0, %v13304_v30 }
 0x847   : > { %vm8782_vm6 = vcmp.lt.s32.totalorder %v8781_v17, 0  ;;  %v4629_v50 = vor.u32 %v4628_v42, %v4627_v29  ;;  %v4639_v27 = vshll.u32 %v15512_v40, %v4624_v59  ;;  %v4569_v5 = vshll.u32 %v4568_v32, 30 }
 0x848   : > { %v4473_v35 = vsel %vm8782_vm6, 0, %v8781_v17  ;;  %v4632_v47 = vor.u32 %v4631_v7, %v4630_v41  ;;  %v4635_v45 = vor.u32 %v4634_v26, %v4633_v49  ;;  %vm4645_vm12 = vcmp.lt.s32.totalorder %v13298_v54, 4 }
 0x849   : > { %v4474_v53 = vsub.s32 32, %v4473_v35  ;;  %v4478_v52 = vsub.s32 4294967266, %v4473_v35  ;;  %v4641_v37 = vor.u32 %v4640_v60, %v4639_v27  ;;  %vm4508_vm9 = vcmp.lt.s32.totalorder %v13167_v23, 0 }
 0x84a   : > { %v13324_v43 = vsub.s32 %v4566_v22, %v4569_v5  ;;  %v4626_v16 = vshrl.u32 %v15497_v25, %v4625_v61  ;;  %vm4642_vm2 = vcmp.lt.s32.totalorder %v13298_v54, 1  ;;  %v4651_v59 = vsel %vm4645_vm12, %v4638_v55, 920167782 }
 0x84b   : > { %v4475_v30 = vshll.u32 %v13260_v36, %v4473_v35  ;;  %v4476_v42 = vshrl.u32 %v4458_v19, %v4474_v53  ;;  %v4479_v7 = vadd.s32 127, %v4478_v52  ;;  %vm4644_vm10 = vcmp.lt.s32.totalorder %v13298_v54, 3 }
 0x84c   : > { %v4572_v26 = vsub.s32 0, %v13324_v43  ;;  %v4650_v17 = vsel %vm4642_vm2, %v4629_v50, %v4632_v47  ;;  %v4652_v5 = vsel %vm4644_vm10, %v4635_v45, %v4651_v59  ;;  %v4654_v61 = vsel %vm4642_vm2, %v4632_v47, %v4635_v45 }
 0x84d   : > { %v4477_v22 = vor.u32 %v4476_v42, %v4475_v30  ;;  %v4480_v29 = vshll.u32 %v4479_v7, 23  ;;  %v15548_v60 = vand.u32 2147483647, %v13167_v23  ;;  %v4647_v52 = vsel %vm4645_vm12, %v4635_v45, 2102212464 }
 0x84e   : > { %v4655_v35 = vsel %vm4645_vm12, %v4641_v37, 1326507024  ;;  %v8784_v19 = vmin.u32 %v4572_v26, %v13324_v43  ;;  %vm4643_vm7 = vcmp.lt.s32.totalorder %v13298_v54, 2  ;;  %v4718_v49 = vshrl.u32 %v4717_v2, 23 }
 0x84f   : > { %vm13341_vm11 = vcmp.le.f32.partialorder %v15548_v60, 0.7853982  ;;  %v4656_v41 = vsel %vm4644_vm10, %v4638_v55, %v4655_v35  ;;  %v4481_v27 = vor.u32 4788187, %v4480_v29  ;;  %v4592_v53 = vsub.s32 4, %v4568_v32 }
 0x850   : > { %v4653_v59 = vsel %vm4643_vm7, %v4650_v17, %v4652_v5  ;;  %v4657_v30 = vsel %vm4643_vm7, %v4654_v61, %v4656_v41  ;;  %v4484_v45 = vcvt.s32.f32 %v4477_v22  ;;  %v4574_v42 = vclz %v8784_v19 }
 0x851   : > { %v4646_v37 = vsel %vm4642_vm2, %v4626_v16, %v4629_v50  ;;  %v4648_v7 = vsel %vm4644_vm10, %v4632_v47, %v4647_v52  ;;  %v4482_v26 = vand.u32 2147483647, %v4481_v27  ;;  %v8791_v29 = vadd.s32 4294967169, %v4718_v49 }
 0x852   : > { %v13362_v55 = vmul.u32.u64.low %v13300_v34, %v4657_v30  ;;  %v13363_v2 = vmul.u32.u64.high %v13300_v34, %v4657_v30, %v13362_v55  ;;  %v13367_v17 = vor.u32 %v13285_v51, %v13279_v33  ;;  %v8785_v5 = vadd.s32 4294967294, %v4574_v42 }
 0x853   : > { %v13370_v61 = vmul.u32.u64.low %v13300_v34, %v4653_v59  ;;  %v13371_v22 = vmul.u32.u64.high %v13300_v34, %v4653_v59, %v13370_v61  ;;  %v4849_v50 = vor.u32 %v13294_v28, %v13289_v0  ;;  %v4485_v47 = vmul.f32 %v4484_v45, %v4482_v26 }
 0x854   : > { %v4593_v16 = vsel %vm4508_vm9, %v4592_v53, %v4568_v32  ;;  %v4724_v60 = vadd.s32 1, %v8791_v29  ;;  %v4495_v52 = vadd.s32 3, %v4491_v11  ;;  %vm8786_vm6 = vcmp.lt.s32.totalorder %v8785_v5, 0 }
 0x855   : > { %v4649_v33 = vsel %vm4643_vm7, %v4646_v37, %v4648_v7  ;;  %v15551_v51 = vand.u32 2147483647, %v13254_v3  ;;  %v4486_v19 = vxor.u32 2147483648, %v4485_v47  ;;  %v4562_v41 = vadd.s32 %v13240_v13, %v13250_v46 }
 0x856   : > { %v4577_v49 = vsel %vm8786_vm6, 0, %v8785_v5  ;;  %vm4667_vm12 = vc.u32 %v13363_v2, %v13370_v61  ;;  %v4595_v32 = vsel %vm13341_vm11, 0, %v4593_v16  ;;  %v4668_v11 = vadd.s32 1, %v13371_v22 }
 0x857   : > { %v4721_v35 = vand.u32 8388607, %v15551_v51  ;;  %v4578_v0 = vsub.s32 32, %v4577_v49  ;;  %v4582_v28 = vsub.s32 4294967266, %v4577_v49  ;;  %v4487_v54 = vsel %vm4404_vm14, %v4486_v19, %v4485_v47 }
 0x858   : > { %v4579_v27 = vshll.u32 %v13324_v43, %v4577_v49  ;;  %v4665_v53 = vmul.u32 %v13300_v34, %v4649_v33  ;;  %vm4725_vm2 = vcmp.gt.s32.totalorder %v4724_v60, 0  ;;  %v4490_v13 = vsel %vm13265_vm8, %v13163_v1, %v4487_v54 }
 0x859   : > { %v4580_v46 = vshrl.u32 %v4562_v41, %v4578_v0  ;;  %v4583_v59 = vadd.s32 127, %v4582_v28  ;;  %v4669_v30 = vsel %vm4667_vm12, %v4668_v11, %v13371_v22  ;;  %10218 = vcosq.f32 %v4490_v13 }
 0x85a   : > { %v13397_v45 = vand.u32 3, %v4495_v52  ;;  %v4670_v42 = vadd.s32 %v4669_v30, %v4665_v53  ;;  %v4726_v37 = vsel %vm4725_vm2, %v4724_v60, 0  ;;  %10220 = vsinq.f32 %v4490_v13 }
 0x85b   : > { %v4581_v7 = vor.u32 %v4580_v46, %v4579_v27  ;;  %v4584_v26 = vshll.u32 %v4583_v59, 23  ;;  %v4599_v43 = vadd.s32 3, %v4595_v32  ;;  %v4722_v34 = vor.u32 8388608, %v4721_v35 }
 0x85c   : > { %v4671_v55 = vadd.s32 536870912, %v4670_v42  ;;  %v4728_v29 = vand.u32 31, %v4726_v37  ;;  %vm4853_vm14 = vcmp.lt.s32.totalorder %v13275_v63, 4  ;;  %v13402_v5 = vrot.slane %v13316_v8, %v15542_v4 }
 0x85d   : > { %v4585_v6 = vor.u32 4788187, %v4584_v26  ;;  %v13407_v22 = vsel %vm4853_vm14, %v13367_v17, 920167782  ;;  %v13411_v47 = vsel %vm4853_vm14, %v4849_v50, 1326507024  ;;  %v4588_v33 = vcvt.s32.f32 %v4581_v7 }
 0x85e   : > { %v13413_v16 = vshrl.u32 %v4671_v55, 30  ;;  %v4729_v60 = vsub.s32 32, %v4728_v29  ;;  %vm4498_vm8 = vcmp.eq.s32.totalorder %v13397_v45, 0  ;;  %vm4501_vm10 = vcmp.eq.s32.totalorder %v13397_v45, 2 }
 0x85f   : > { %v4586_v52 = vand.u32 2147483647, %v4585_v6  ;;  %v13417_v51 = vand.u32 3, %v4599_v43  ;;  %vm4497_vm7 = vcmp.lt.s32.totalorder %v13397_v45, 2  ;;  %v13421_v19 = vshll.u32 %v4722_v34, 8 }
 0x860   : > { %v4673_v35 = vshll.u32 %v13413_v16, 30  ;;  %v13426_v41 = vshrl.u32 %v15497_v25, %v13257_v21  ;;  %v4732_v0 = vshrl.u32 %v15470_v24, %v4729_v60  ;;  %v4735_v28 = vshrl.u32 %v15471_v10, %v4729_v60 }
 0x861   : > { %v4589_v49 = vmul.f32 %v4588_v33, %v4586_v52  ;;  %v13432_v32 = vshll.u32 %v15497_v25, %v13210_v39  ;;  %v13436_v54 = vshrl.u32 %v4726_v37, 5  ;;  %v4731_v27 = vshll.u32 %v15497_v25, %v4728_v29 }
 0x862   : > { %v13434_v11 = vsub.s32 %v4670_v42, %v4673_v35  ;;  %v4738_v53 = vshrl.u32 %v15472_v57, %v4729_v60  ;;  %vm4494_vm6 = vweird.f32 %v13163_v1  ;;  %v4734_v46 = vshll.u32 %v15470_v24, %v4728_v29 }
 0x863   : > { %v4590_v13 = vxor.u32 2147483648, %v4589_v49  ;;  %v4741_v59 = vshrl.u32 %v15512_v40, %v4729_v60  ;;  %v4744_v30 = vshrl.u32 %v15513_v58, %v4729_v60  ;;  %v10219_v7 = vpop.eup %10218  ;;  %v4737_v42 = vshll.u32 %v15471_v10, %v4728_v29 }
 0x864   : > { %v4676_v26 = vsub.s32 0, %v13434_v11  ;;  %v4740_v37 = vshll.u32 %v15472_v57, %v4728_v29  ;;  %v4743_v43 = vshll.u32 %v15512_v40, %v4728_v29  ;;  %v10221_v55 = vpop.eup %10220  ;;  %v4502_v34 = vxor.u32 2147483648, %v10219_v7 }
 0x865   : > { %v4591_v6 = vsel %vm4508_vm9, %v4590_v13, %v4589_v49  ;;  %v4733_v52 = vor.u32 %v4732_v0, %v4731_v27  ;;  %v4736_v33 = vor.u32 %v4735_v28, %v4734_v46  ;;  %v4499_v35 = vxor.u32 2147483648, %v10221_v55 }
 0x866   : > { %v4594_v50 = vsel %vm13341_vm11, %v13167_v23, %v4591_v6  ;;  %v8788_v4 = vmin.u32 %v4676_v26, %v13434_v11  ;;  %v4739_v8 = vor.u32 %v4738_v53, %v4737_v42  ;;  %v4503_v58 = vsel %vm4501_vm10, %v4502_v34, %v10221_v55 }
 0x867   : > { %10222 = vcosq.f32 %v4594_v50  ;;  %v4742_v29 = vor.u32 %v4741_v59, %v4740_v37  ;;  %v4745_v40 = vor.u32 %v4744_v30, %v4743_v43  ;;  %v4500_v44 = vsel %vm4498_vm8, %v10219_v7, %v4499_v35 }
 0x868   : > { %10224 = vsinq.f32 %v4594_v50  ;;  %v4666_v49 = vadd.s32 %v13370_v61, %v13363_v2  ;;  %v4678_v0 = vclz %v8788_v4  ;;  %v4504_v36 = vsel %vm4497_vm7, %v4500_v44, %v4503_v58 }
 0x869   : > { %v4730_v28 = vshrl.u32 %v15497_v25, %v4729_v60  ;;  %vm4746_vm9 = vcmp.lt.s32.totalorder %v13436_v54, 1  ;;  %vm4747_vm11 = vcmp.lt.s32.totalorder %v13436_v54, 2  ;;  %vm4748_vm12 = vcmp.lt.s32.totalorder %v13436_v54, 3 }
 0x86a   : > { %v8789_v27 = vadd.s32 4294967294, %v4678_v0  ;;  %vm4749_vm2 = vcmp.lt.s32.totalorder %v13436_v54, 4  ;;  %v4754_v50 = vsel %vm4746_vm9, %v4733_v52, %v4736_v33  ;;  %vm4605_vm8 = vcmp.eq.s32.totalorder %v13417_v51, 2 }
 0x86b   : > { %v4751_v4 = vsel %vm4749_vm2, %v4739_v8, 2102212464  ;;  %v4755_v2 = vsel %vm4749_vm2, %v4742_v29, 920167782  ;;  %v4758_v44 = vsel %vm4746_vm9, %v4736_v33, %v4739_v8  ;;  %v4759_v58 = vsel %vm4749_vm2, %v4745_v40, 1326507024 }
 0x86c   : > { %v4505_v61 = vsel %vm4494_vm6, nan, %v4504_v36  ;;  %vm4602_vm10 = vcmp.eq.s32.totalorder %v13417_v51, 0  ;;  %vm8790_vm7 = vcmp.lt.s32.totalorder %v8789_v27, 0  ;;  %v4756_v45 = vsel %vm4748_vm12, %v4739_v8, %v4755_v2 }
 0x86d   : > { %v4760_v60 = vsel %vm4748_vm12, %v4742_v29, %v4759_v58  ;;  %vm4601_vm15 = vcmp.lt.s32.totalorder %v13417_v51, 2  ;;  %v4681_v53 = vsel %vm8790_vm7, 0, %v8789_v27  ;;  %v4757_v13 = vsel %vm4747_vm11, %v4754_v50, %v4756_v45 }
 0x86e   : > { %v4761_v40 = vsel %vm4747_vm11, %v4758_v44, %v4760_v60  ;;  %v15552_v1 = vand.u32 2147483647, %v13159_v48  ;;  %vm4598_vm6 = vweird.f32 %v13167_v23  ;;  %v4682_v59 = vsub.s32 32, %v4681_v53 }
 0x86f   : > { %v4686_v30 = vsub.s32 4294967266, %v4681_v53  ;;  %v4750_v8 = vsel %vm4746_vm9, %v4730_v28, %v4733_v52  ;;  %v4752_v7 = vsel %vm4748_vm12, %v4736_v33, %v4751_v4  ;;  %v4922_v26 = vmul.f32 %v4505_v61, %v4505_v61 }
 0x870   : > { %v4825_v46 = vand.u32 8388607, %v15552_v1  ;;  %v4683_v42 = vshll.u32 %v13434_v11, %v4681_v53  ;;  %v13493_v37 = vmul.u32.u64.low %v13421_v19, %v4761_v40  ;;  %v13494_v43 = vmul.u32.u64.high %v13421_v19, %v4761_v40, %v13493_v37 }
 0x871   : > { %vm4612_vm2 = vcmp.lt.s32.totalorder %v13179_v18, 0  ;;  %v4684_v55 = vshrl.u32 %v4666_v49, %v4682_v59  ;;  %v4687_v34 = vadd.s32 127, %v4686_v30  ;;  %v10223_v52 = vpop.eup %10222  ;;  %v4753_v33 = vsel %vm4747_vm11, %v4750_v8, %v4752_v7 }
 0x872   : > { %v13498_v6 = vmul.u32.u64.low %v13421_v19, %v4757_v13  ;;  %v13499_v35 = vmul.u32.u64.high %v13421_v19, %v4757_v13, %v13498_v6  ;;  %v4836_v11 = vshrl.u32 %v15470_v24, %v13257_v21  ;;  %v4838_v29 = vshll.u32 %v15470_v24, %v13210_v39  ;;  %v10225_v49 = vpop.eup %10224 }
 0x873   : > { %v4839_v0 = vshrl.u32 %v15471_v10, %v13257_v21  ;;  %v4606_v36 = vxor.u32 2147483648, %v10223_v52  ;;  %v4685_v28 = vor.u32 %v4684_v55, %v4683_v42  ;;  %v4688_v27 = vshll.u32 %v4687_v34, 23 }
 0x874   : > { %v4842_v50 = vshrl.u32 %v15472_v57, %v13257_v21  ;;  %v4603_v4 = vxor.u32 2147483648, %v10225_v49  ;;  %v4931_v54 = vmul.f32 %v13402_v5, %v4922_v26  ;;  %vm4771_vm9 = vc.u32 %v13494_v43, %v13498_v6 }
 0x875   : > { %v4841_v2 = vshll.u32 %v15471_v10, %v13210_v39  ;;  %v4607_v44 = vsel %vm4605_vm8, %v4606_v36, %v10225_v49  ;;  %v15553_v58 = vand.u32 2147483647, %v13179_v18  ;;  %v4689_v45 = vor.u32 4788187, %v4688_v27 }
 0x876   : > { %v4696_v21 = vsub.s32 4, %v13413_v16  ;;  %v4772_v60 = vadd.s32 1, %v13499_v35  ;;  %v4604_v53 = vsel %vm4602_vm10, %v10223_v52, %v4603_v4  ;;  %v4769_v13 = vmul.u32 %v13421_v19, %v4753_v33 }
 0x877   : > { %vm13521_vm11 = vcmp.le.f32.partialorder %v15553_v58, 0.7853982  ;;  %v4840_v39 = vor.u32 %v4839_v0, %v4838_v29  ;;  %v4843_v40 = vor.u32 %v4842_v50, %v4841_v2  ;;  %v4608_v1 = vsel %vm4601_vm15, %v4604_v53, %v4607_v44 }
 0x878   : > { %v4690_v59 = vand.u32 2147483647, %v4689_v45  ;;  %v4692_v30 = vcvt.s32.f32 %v4685_v28  ;;  %v4773_v8 = vsel %vm4771_vm9, %v4772_v60, %v13499_v35  ;;  %v4609_v7 = vsel %vm4598_vm6, nan, %v4608_v1 }
 0x879   : > { %v13536_v26 = vadd.f32 %v4931_v54, %v13152_v15  ;;  %v4774_v42 = vadd.s32 %v4773_v8, %v4769_v13  ;;  %v4826_v37 = vor.u32 8388608, %v4825_v46  ;;  %v4923_v55 = vmul.f32 %v4609_v7, %v4609_v7 }
 0x87a   : > { %v4693_v34 = vmul.f32 %v4692_v30, %v4690_v59  ;;  %v4837_v19 = vor.u32 %v4836_v11, %v13432_v32  ;;  %vm4850_vm12 = vcmp.lt.s32.totalorder %v13275_v63, 1  ;;  %v4697_v51 = vsel %vm4612_vm2, %v4696_v21, %v13413_v16 }
 0x87b   : > { %v4775_v52 = vadd.s32 536870912, %v4774_v42  ;;  %vm4852_vm15 = vcmp.lt.s32.totalorder %v13275_v63, 3  ;;  %v4862_v23 = vsel %vm4850_vm12, %v4840_v39, %v4843_v40  ;;  %v4932_v35 = vmul.f32 %v13402_v5, %v4923_v55 }
 0x87c   : > { %v4694_v33 = vxor.u32 2147483648, %v4693_v34  ;;  %vm4851_vm8 = vcmp.lt.s32.totalorder %v13275_v63, 2  ;;  %v4864_v32 = vsel %vm4852_vm15, %v13367_v17, %v13411_v47  ;;  %v4946_v46 = vrot.slane %v13536_v26, 6 }
 0x87d   : > { %v13553_v11 = vshrl.u32 %v4775_v52, 30  ;;  %v4865_v16 = vsel %vm4851_vm8, %v4862_v23, %v4864_v32  ;;  %v4866_v29 = vshll.u32 %v4826_v37, 8  ;;  %v13558_v0 = vadd.f32 %v4932_v35, %v13155_v56 }
 0x87e   : > { %v4695_v49 = vsel %vm4612_vm2, %v4694_v33, %v4693_v34  ;;  %v4858_v36 = vsel %vm4850_vm12, %v4837_v19, %v4840_v39  ;;  %v4860_v17 = vsel %vm4852_vm15, %v4843_v40, %v13407_v22  ;;  %v4855_v2 = vsel %vm4853_vm14, %v4843_v40, 2102212464 }
 0x87f   : > { %v4698_v47 = vsel %vm13521_vm11, %v13179_v18, %v4695_v49  ;;  %v4777_v28 = vshll.u32 %v13553_v11, 30  ;;  %v13571_v27 = vmul.u32.u64.low %v4866_v29, %v4865_v16  ;;  %v13572_v50 = vmul.u32.u64.high %v4866_v29, %v4865_v16, %v13571_v27 }
 0x880   : > { %v4947_v4 = vrot.slane %v13558_v0, 6  ;;  %v4964_v54 = vpack.c.bf16 %v13558_v0, %v13536_v26  ;;  %10226 = vcosq.f32 %v4698_v47  ;;  %v4699_v22 = vsel %vm13521_vm11, 0, %v4697_v51 }
 0x881   : > { %10228 = vsinq.f32 %v4698_v47  ;;  %v4778_v44 = vsub.s32 %v4774_v42, %v4777_v28  ;;  %v4861_v58 = vsel %vm4851_vm8, %v4858_v36, %v4860_v17  ;;  %v4854_v53 = vsel %vm4850_vm12, %v13426_v41, %v4837_v19 }
 0x882   : > { %v4948_v45 = vsel %vm1094_vm13, %v4946_v46, %v4947_v4  ;;  %5165 = vmatprep.mubr.bf16.mxu0 %v4964_v54  ;;  %v4856_v61 = vsel %vm4852_vm15, %v4840_v39, %v4855_v2  ;;  %v4703_v13 = vadd.s32 3, %v4699_v22  ;;  %v4770_v35 = vadd.s32 %v13498_v6, %v13494_v43 }
 0x883   : > { %v8825_v21 = vpack.c.bf16 %v4948_v45, %v4946_v46  ;;  %v4780_v60 = vsub.s32 0, %v4778_v44  ;;  %v13591_v40 = vmul.u32.u64.low %v4866_v29, %v4861_v58  ;;  %v13592_v1 = vmul.u32.u64.high %v4866_v29, %v4861_v58, %v13591_v40 }
 0x884   : > { %v4857_v30 = vsel %vm4851_vm8, %v4854_v53, %v4856_v61  ;;  %v4704_v41 = vand.u32 3, %v4703_v13  ;;  %vm4702_vm2 = vweird.f32 %v13179_v18  ;;  %v4967_v43 = vrot.slane %v13536_v26, 2 }
 0x885   : > { %8826 = vmatmul.mubr.msk.bf16.vlgmr.msra.gmra.mrb[48].mxu0 %vm11414_vm3, %v8825_v21  ;;  %v8792_v59 = vmin.u32 %v4780_v60, %v4778_v44  ;;  %vm4875_vm14 = vc.u32 %v13572_v50, %v13591_v40  ;;  %v4876_v7 = vadd.s32 1, %v13592_v1  ;;  %v4873_v42 = vmul.u32 %v4866_v29, %v4857_v30 }
 0x886   : > { %vm4706_vm7 = vcmp.eq.s32.totalorder %v4704_v41, 0  ;;  %vm4709_vm6 = vcmp.eq.s32.totalorder %v4704_v41, 2  ;;  %vm4705_vm9 = vcmp.lt.s32.totalorder %v4704_v41, 2  ;;  %v4968_v6 = vrot.slane %v13558_v0, 2 }
 0x887   : > { %v4782_v8 = vclz %v8792_v59  ;;  %v4877_v55 = vsel %vm4875_vm14, %v4876_v7, %v13592_v1  ;;  %vm15556_vm11 = vcmask 1045504   ;;  %v4800_v59 = vsub.s32 4, %v13553_v11 }
 0x888   : > { %v4878_v51 = vadd.s32 %v4877_v55, %v4873_v42  ;;  %v4969_v61 = vsel %vm15556_vm11, %v4967_v43, %v4968_v6  ;;  %vm15557_vm12 = vmmov %vm15556_vm11  ;;  %vm4716_vm15 = vcmp.lt.s32.totalorder %v13254_v3, 0 }
 0x889   : > { %v8793_v39 = vadd.s32 4294967294, %v4782_v8 }
 0x88a   : > { %v10227_v37 = vpop.eup %10226  ;;  %v4879_v16 = vadd.s32 536870912, %v4878_v51 }
 0x88b   : > { %v10229_v34 = vpop.eup %10228  ;;  %v4710_v19 = vxor.u32 2147483648, %v10227_v37  ;;  %vm8794_vm10 = vcmp.lt.s32.totalorder %v8793_v39, 0 }
 0x88c   : > { %v4707_v52 = vxor.u32 2147483648, %v10229_v34  ;;  %v4785_v63 = vsel %vm8794_vm10, 0, %v8793_v39  ;;  %v13606_v28 = vshrl.u32 %v4879_v16, 30  ;;  %v15558_v39 = vand.u32 2147483647, %v13254_v3 }
 0x88d   : > { %v4711_v23 = vsel %vm4709_vm6, %v4710_v19, %v10229_v34  ;;  %v4786_v33 = vsub.s32 32, %v4785_v63  ;;  %v4790_v32 = vsub.s32 4294967266, %v4785_v63  ;;  %v4787_v49 = vshll.u32 %v4778_v44, %v4785_v63 }
 0x88e   : > { %v4708_v46 = vsel %vm4706_vm7, %v10227_v37, %v4707_v52  ;;  %v4881_v22 = vshll.u32 %v13606_v28, 30  ;;  %vm4715_vm8 = vcmp.le.f32.partialorder %v15558_v39, 0.7853982  ;;  %v4801_v37 = vsel %vm4716_vm15, %v4800_v59, %v13553_v11 }
 0x88f   : > { %v4712_v29 = vsel %vm4705_vm9, %v4708_v46, %v4711_v23  ;;  %v4788_v36 = vshrl.u32 %v4770_v35, %v4786_v33  ;;  %v4791_v17 = vadd.s32 127, %v4790_v32  ;;  %v4803_v19 = vsel %vm4715_vm8, 0, %v4801_v37 }
 0x890   : > { %v4713_v47 = vsel %vm4702_vm2, nan, %v4712_v29  ;;  %v4882_v45 = vsub.s32 %v4878_v51, %v4881_v22  ;;  %v4874_v52 = vadd.s32 %v13591_v40, %v13572_v50  ;;  %v4807_v35 = vadd.s32 3, %v4803_v19 }
 0x891   : > { %v4924_v27 = vmul.f32 %v4713_v47, %v4713_v47  ;;  %v4789_v54 = vor.u32 %v4788_v36, %v4787_v49  ;;  %v4792_v2 = vshll.u32 %v4791_v17, 23  ;;  %v4904_v40 = vsub.s32 4, %v13606_v28 }
 0x892   : > { %v4884_v53 = vsub.s32 0, %v4882_v45  ;;  %v4808_v29 = vand.u32 3, %v4807_v35  ;;  %vm4806_vm2 = vweird.f32 %v13254_v3  ;;  %vm4820_vm9 = vcmp.lt.s32.totalorder %v13159_v48, 0 }
 0x893   : > { %v4933_v18 = vmul.f32 %v13402_v5, %v4924_v27  ;;  %v4793_v58 = vor.u32 4788187, %v4792_v2  ;;  %v4796_v60 = vcvt.s32.f32 %v4789_v54 }
 0x894   : > { %v8796_v26 = vmin.u32 %v4884_v53, %v4882_v45  ;;  %vm4813_vm10 = vcmp.eq.s32.totalorder %v4808_v29, 2  ;;  %vm4810_vm7 = vcmp.eq.s32.totalorder %v4808_v29, 0  ;;  %vm4809_vm6 = vcmp.lt.s32.totalorder %v4808_v29, 2 }
 0x895   : > { %v13613_v44 = vadd.f32 %v4933_v18, %v13170_v38  ;;  %v4794_v21 = vand.u32 2147483647, %v4793_v58  ;;  %v4905_v53 = vsel %vm4820_vm9, %v4904_v40, %v13606_v28 }
 0x896   : > { %v4886_v7 = vclz %v8796_v26 }
 0x897   : > { %v4970_v13 = vrot.slane %v13613_v44, 2  ;;  %v4797_v1 = vmul.f32 %v4796_v60, %v4794_v21  ;;  %v15559_v21 = vand.u32 2147483647, %v13159_v48  ;;  %v4949_v59 = vrot.slane %v13613_v44, 6 }
 0x898   : > { %v8797_v34 = vadd.s32 4294967294, %v4886_v7 }
 0x899   : > { %v4971_v30 = vsel %vm15557_vm12, %v4968_v6, %v4970_v13  ;;  %v4798_v8 = vxor.u32 2147483648, %v4797_v1  ;;  %vm4819_vm11 = vcmp.le.f32.partialorder %v15559_v21, 0.7853982 }
 0x89a   : > { %v4982_v41 = vpack.c.bf16 %v4971_v30, %v4969_v61  ;;  %vm8798_vm14 = vcmp.lt.s32.totalorder %v8797_v34, 0 }
 0x89b   : > { %v4799_v42 = vsel %vm4716_vm15, %v4798_v8, %v4797_v1  ;;  %v4889_v51 = vsel %vm8798_vm14, 0, %v8797_v34  ;;  %v4950_v8 = vsel %vm1094_vm13, %v4947_v4, %v4949_v59  ;;  %vm4910_vm14 = vweird.f32 %v13159_v48 }
 0x89c   : > { %9497 = vmatmul.mubr.bf16.vlgmr.msra.gmra.mrb[48].mxu1 %v4982_v41  ;;  %v4802_v55 = vsel %vm4715_vm8, %v13254_v3, %v4799_v42  ;;  %v4890_v63 = vsub.s32 32, %v4889_v51  ;;  %v4894_v23 = vsub.s32 4294967266, %v4889_v51  ;;  %v4891_v33 = vshll.u32 %v4882_v45, %v4889_v51 }
 0x89d   : > { %10230 = vcosq.f32 %v4802_v55  ;;  %9500 = vmatprep.mubr.msk.bf16.mxu1 %vm15507_vm0, %v15484_v62  ;;  %v4907_v3 = vsel %vm4819_vm11, 0, %v4905_v53 }
 0x89e   : > { %10232 = vsinq.f32 %v4802_v55  ;;  %v4892_v11 = vshrl.u32 %v4874_v52, %v4890_v63  ;;  %v4895_v32 = vadd.s32 127, %v4894_v23  ;;  %v4911_v7 = vadd.s32 3, %v4907_v3 }
 0x8a0   : > { %v4893_v46 = vor.u32 %v4892_v11, %v4891_v33  ;;  %v4896_v16 = vshll.u32 %v4895_v32, 23  ;;  %v4912_v42 = vand.u32 3, %v4911_v7 }
 0x8a2   : > { %v4897_v49 = vor.u32 4788187, %v4896_v16  ;;  %v4900_v54 = vcvt.s32.f32 %v4893_v46  ;;  %vm4917_vm12 = vcmp.eq.s32.totalorder %v4912_v42, 2  ;;  %vm4914_vm15 = vcmp.eq.s32.totalorder %v4912_v42, 0 }
 0x8a3   : > { %vm4913_vm8 = vcmp.lt.s32.totalorder %v4912_v42, 2 }
 0x8a4   : > { %v4898_v27 = vand.u32 2147483647, %v4897_v49 }
 0x8a6   : > { %v4901_v50 = vmul.f32 %v4900_v54, %v4898_v27 }
 0x8a7   : > { %v10231_v36 = vpop.eup %10230 }
 0x8a8   : > { %v10233_v17 = vpop.eup %10232  ;;  %v4814_v47 = vxor.u32 2147483648, %v10231_v36  ;;  %v4902_v18 = vxor.u32 2147483648, %v4901_v50 }
 0x8a9   : > { %v4811_v2 = vxor.u32 2147483648, %v10233_v17 }
 0x8aa   : > { %v4815_v22 = vsel %vm4813_vm10, %v4814_v47, %v10233_v17  ;;  %v4903_v60 = vsel %vm4820_vm9, %v4902_v18, %v4901_v50  ;;  %vm15560_vm10 = vcmask 1045504  }
 0x8ab   : > { %v4812_v43 = vsel %vm4810_vm7, %v10231_v36, %v4811_v2  ;;  %v4906_v61 = vsel %vm4819_vm11, %v13159_v48, %v4903_v60  ;;  %vm15561_vm7 = vmmov %vm15560_vm10  ;;  %v13659_v2 = vld [vmem:[#allocation7 + $0x10] sm:$0xff] }
 0x8ac   : > { %v4816_v6 = vsel %vm4809_vm6, %v4812_v43, %v4815_v22  ;;  %10234 = vcosq.f32 %v4906_v61  ;;  %v4988_v22 = vrot.slane %v13659_v2, %v11540_v12 }
 0x8ad   : > { %v4817_v58 = vsel %vm4806_vm2, nan, %v4816_v6  ;;  %10236 = vsinq.f32 %v4906_v61 }
 0x8ae   : > { %v4925_v45 = vmul.f32 %v4817_v58, %v4817_v58 }
 0x8b0   : > { %v4934_v1 = vmul.f32 %v13402_v5, %v4925_v45 }
 0x8b2   : > { %v4939_v26 = vadd.f32 %v4934_v1, %v13192_v31 }
 0x8b4   : > { %v4965_v30 = vpack.c.bf16 %v4939_v26, %v13613_v44  ;;  %v4951_v41 = vrot.slane %v4939_v26, 6  ;;  %v4972_v35 = vrot.slane %v4939_v26, 2 }
 0x8b6   : > { %5173 = vmatprep.mubr.bf16.mxu0 %v4965_v30  ;;  %v4952_v28 = vsel %vm1094_vm13, %v4949_v59, %v4951_v41  ;;  %v10235_v37 = vpop.eup %10234  ;;  %v4973_v11 = vsel %vm15560_vm10, %v4970_v13, %v4972_v35 }
 0x8b7   : > { %v4962_v39 = vpack.c.bf16 %v4952_v28, %v4950_v8  ;;  %v10237_v55 = vpop.eup %10236  ;;  %v4918_v34 = vxor.u32 2147483648, %v10235_v37 }
 0x8b8   : > { %v4915_v19 = vxor.u32 2147483648, %v10237_v55 }
 0x8b9   : > { %5174 = vmatmul.mubr.bf16.gmra.mrb[52].mxu0 %v4962_v39  ;;  %v4919_v51 = vsel %vm4917_vm12, %v4918_v34, %v10237_v55 }
 0x8ba   : > { %v4916_v52 = vsel %vm4914_vm15, %v10235_v37, %v4915_v19 }
 0x8bb   : > { %v4920_v0 = vsel %vm4913_vm8, %v4916_v52, %v4919_v51 }
 0x8bc   : > { %v4921_v4 = vsel %vm4910_vm14, nan, %v4920_v0 }
 0x8bd   : > { %v4926_v63 = vmul.f32 %v4921_v4, %v4921_v4 }
 0x8bf   : > { %v4935_v23 = vmul.f32 %v13402_v5, %v4926_v63 }
 0x8c1   : > { %v4940_v33 = vadd.f32 %v4935_v23, %v13149_v14 }
 0x8c3   : > { %v4974_v32 = vrot.slane %v4940_v33, 2  ;;  %v4966_v46 = vpack.c.bf16 %v4940_v33, %v4940_v33  ;;  %v4953_v16 = vrot.slane %v4940_v33, 6 }
 0x8c5   : > { %v4975_v29 = vsel %vm15561_vm7, %v4972_v35, %v4974_v32  ;;  %5181 = vmatprep.mubr.bf16.mxu0 %v4966_v46  ;;  %v4954_v48 = vsel %vm1094_vm13, %v4951_v41, %v4953_v16  ;;  %v8828_v5 = vpack.c.bf16 %v4974_v32, %v4974_v32 }
 0x8c6   : > { %v4983_v49 = vpack.c.bf16 %v4975_v29, %v4973_v11  ;;  %v4963_v36 = vpack.c.bf16 %v4954_v48, %v4954_v48 }
 0x8c8   : > { %9501 = vmatmul.mubr.bf16.gmra.mrb[52].mxu1 %v4983_v49  ;;  %5182 = vmatmul.mubr.bf16.gmra.mrb[56].mxu0 %v4963_v36 }
 0x8c9   : > { %9504 = vmatprep.mubr.msk.bf16.mxu1 %vm15507_vm0, %v15484_v62 }
 0x8d0   : > { %9505 = vmatmul.mubr.msk.bf16.gmra.mrb[56].mxu1 %vm11531_vm1, %v8828_v5 }
 0x8d1   : > { %9524 = vmatprep.mubr.msk.bf16.mxu1 %vm15507_vm0, %v15484_v62 }
 0x958   : > { %v9193_v44 = vpop.f32.mrb[48].mxu0 }
 0x959   : > { %v9194_v13 = vpop.f32.mrb[49].mxu0 }
 0x95a   : > { %v9195_v17 = vadd.f32 %v9194_v13, %v9193_v44  ;;  %v9196_v47 = vpop.f32.mrb[50].mxu0 }
 0x95b   : > { %v9197_v27 = vpop.f32.mrb[51].mxu0 }
 0x95c   : > { %v9198_v54 = vadd.f32 %v9197_v27, %v9196_v47  ;;  %v5168_v50 = vadd.f32 %v9195_v17, %v4988_v22  ;;  %v10042_v27 = vld [vmem:[#allocation10 + $0x1c0] sm:$0xff]  }
 0x95d   : > { %9222 = vmatprep.subr.bf16.mxu0 %v10042_v27 }
 0x95e   : > { %v5171_v40 = vadd.f32 %v9198_v54, %v4988_v22 }
 0x96f   : > { %v5223_v43 = vpop.f32.mrb[48].mxu1 }
 0x970   : > { %v13663_v6 = vadd.f32 %v5223_v43, %v5168_v50  ;;  %v9498_v18 = vpop.f32.mrb[49].mxu1  ;;  %v10044_v43 = vld [vmem:[#allocation10 + $0x200] sm:$0xff]  }
 0x971   : > { %v5226_v58 = vpop.f32.mrb[50].mxu1  ;;  %9509 = vmatpush3.bf16.msra.mxu1 %v10044_v43 }
 0x972   : > { %v13665_v45 = vadd.f32 %v5226_v58, %v5171_v40  ;;  %v9499_v21 = vpop.f32.mrb[51].mxu1  ;;  %v5255_v60 = vmul.f32 %v13663_v6, %v13663_v6  ;;  %v10043_v40 = vld [vmem:[#allocation10 + $0x180] sm:$0xff]   ;;  %v10045_v58 = vld [vmem:[#allocation10 + $0x1c8] sm:$0xff]   ;;  %9510 = vmatprep.subr.bf16.mxu1 %v15484_v62 }
 0x973   : > { %9223 = vmatpush3.bf16.msra.mxu0 %v10043_v40  ;;  %v10046_v21 = vld [vmem:[#allocation10 + $0x188] sm:$0xff]  }
 0x974   : > { %v5245_v53 = vadd.f32 %v13665_v45, %v13663_v6  ;;  %v5256_v61 = vmul.f32 %v13665_v45, %v13665_v45  ;;  %9224 = vmatprep.subr.bf16.mxu0 %v10045_v58  ;;  %v10065_v58 = vld [vmem:[#allocation10 + $0x238] sm:$0xff]  }
 0x976   : > { %v5260_v1 = vadd.f32 %v5256_v61, %v5255_v60  ;;  %v10047_v60 = vld [vmem:[#allocation10 + $0x208] sm:$0xff]  }
 0x977   : > { %9225 = vmatpush3.bf16.msra.mxu0 %v10046_v21  ;;  %9511 = vmatpush3.bf16.msra.mxu1 %v10047_v60  ;;  %v15563_v21 = vld [vmem:[#allocation22_spill] sm:$0xff] }
 0x978   : > { %9512 = vmatprep.subr.bf16.mxu1 %v15484_v62 }
 0x98c   : > { %v9199_v59 = vpop.f32.mrb[52].mxu0 }
 0x98d   : > { %v9200_v3 = vpop.f32.mrb[53].mxu0 }
 0x98e   : > { %v9201_v26 = vadd.f32 %v9200_v3, %v9199_v59  ;;  %v9202_v30 = vpop.f32.mrb[54].mxu0 }
 0x98f   : > { %v9203_v8 = vpop.f32.mrb[55].mxu0 }
 0x990   : > { %v9204_v41 = vadd.f32 %v9203_v8, %v9202_v30  ;;  %v5176_v7 = vadd.f32 %v9201_v26, %v4988_v22  ;;  %v10049_v26 = vld [vmem:[#allocation10 + $0x190] sm:$0xff]   ;;  %v10051_v8 = vld [vmem:[#allocation10 + $0x1d8] sm:$0xff]  }
 0x991   : > { %v10050_v30 = vld [vmem:[#allocation10 + $0x210] sm:$0xff]  }
 0x992   : > { %v5179_v28 = vadd.f32 %v9204_v41, %v4988_v22  ;;  %9513 = vmatpush3.bf16.msra.mxu1 %v10050_v30 }
 0x993   : > { %9514 = vmatprep.subr.bf16.mxu1 %v15484_v62 }
 0x99b   : > { %v5231_v39 = vpop.f32.mrb[52].mxu1  ;;  %v9205_v42 = vpop.f32.mrb[56].mxu0 }
 0x99c   : > { %v13673_v37 = vadd.f32 %v5231_v39, %v5176_v7  ;;  %v9502_v55 = vpop.f32.mrb[53].mxu1  ;;  %v9206_v34 = vpop.f32.mrb[57].mxu0 }
 0x99d   : > { %v5234_v19 = vpop.f32.mrb[54].mxu1  ;;  %v9207_v51 = vadd.f32 %v9206_v34, %v9205_v42  ;;  %v9208_v52 = vpop.f32.mrb[58].mxu0  ;;  %v10052_v42 = vld [vmem:[#allocation10 + $0x198] sm:$0xff]   ;;  %v10054_v34 = vld [vmem:[#allocation10 + $0x1e0] sm:$0xff]  }
 0x99e   : > { %v5246_v0 = vadd.f32 %v5245_v53, %v13673_v37  ;;  %v5257_v4 = vmul.f32 %v13673_v37, %v13673_v37  ;;  %v13678_v63 = vadd.f32 %v5234_v19, %v5179_v28  ;;  %v9503_v23 = vpop.f32.mrb[55].mxu1  ;;  %v9209_v35 = vpop.f32.mrb[59].mxu0  ;;  %v10053_v55 = vld [vmem:[#allocation10 + $0x218] sm:$0xff]  }
 0x99f   : > { %v5184_v46 = vadd.f32 %v9207_v51, %v4988_v22  ;;  %9515 = vmatpush3.bf16.msra.mxu1 %v10053_v55  ;;  %v10057_v23 = vld [vmem:[#allocation10 + $0x1e8] sm:$0xff]  }
 0x9a0   : > { %v5261_v33 = vadd.f32 %v5260_v1, %v5257_v4  ;;  %v5247_v11 = vadd.f32 %v5246_v0, %v13678_v63  ;;  %v5258_v32 = vmul.f32 %v13678_v63, %v13678_v63  ;;  %v10048_v1 = vld [vmem:[#allocation10 + $0x1d0] sm:$0xff]   ;;  %v10055_v0 = vld [vmem:[#allocation10 + $0x1a0] sm:$0xff]   ;;  %9516 = vmatprep.subr.bf16.mxu1 %v15484_v62 }
 0x9a1   : > { %9226 = vmatprep.subr.bf16.mxu0 %v10048_v1  ;;  %v10056_v4 = vld [vmem:[#allocation10 + $0x220] sm:$0xff]  }
 0x9a2   : > { %v5262_v16 = vadd.f32 %v5261_v33, %v5258_v32  ;;  %9227 = vmatpush3.bf16.msra.mxu0 %v10049_v26  ;;  %v10059_v32 = vld [vmem:[#allocation10 + $0x228] sm:$0xff]  }
 0x9a3   : > { %v5239_v29 = vpop.f32.mrb[56].mxu1  ;;  %9228 = vmatprep.subr.bf16.mxu0 %v10051_v8  ;;  %9517 = vmatpush3.bf16.msra.mxu1 %v10056_v4 }
 0x9a4   : > { %v13683_v48 = vadd.f32 %v5239_v29, %v5184_v46  ;;  %v9506_v49 = vpop.f32.mrb[57].mxu1  ;;  %9518 = vmatprep.subr.bf16.mxu1 %v15484_v62  ;;  %v10060_v46 = vld [vmem:[#allocation10 + $0x1f0] sm:$0xff]  }
 0x9a5   : > { %v5242_v36 = vpop.f32.mrb[58].mxu1  ;;  %v10062_v29 = vld [vmem:[#allocation10 + $0x230] sm:$0xff]   ;;  %v10063_v49 = vld [vmem:[#allocation10 + $0x1f8] sm:$0xff]  }
 0x9a6   : > { %v5248_v5 = vadd.f32 %v5247_v11, %v13683_v48  ;;  %v5259_v44 = vmul.f32 %v13683_v48, %v13683_v48  ;;  %v9507_v13 = vpop.f32.mrb[59].mxu1  ;;  %9229 = vmatpush3.bf16.msra.mxu0 %v10052_v42  ;;  %v10058_v11 = vld [vmem:[#allocation10 + $0x1a8] sm:$0xff]   ;;  %v10064_v36 = vld [vmem:[#allocation10 + $0x1b8] sm:$0xff]  }
 0x9a7   : > { %9230 = vmatprep.subr.bf16.mxu0 %v10054_v34  ;;  %9519 = vmatpush3.bf16.msra.mxu1 %v10059_v32  ;;  %v15562_v13 = vld [vmem:[#allocation21_spill] sm:$0xff] }
 0x9a8   : > { %v5249_v17 = vrot.slane %v5248_v5, 4  ;;  %v5263_v47 = vadd.f32 %v5262_v16, %v5259_v44  ;;  %v10061_v16 = vld [vmem:[#allocation10 + $0x1b0] sm:$0xff]   ;;  %9520 = vmatprep.subr.bf16.mxu1 %v15484_v62 }
 0x9aa   : > { %v5250_v54 = vadd.f32 %v5249_v17, %v5248_v5  ;;  %v5264_v50 = vrot.slane %v5263_v47, 4  ;;  %9231 = vmatpush3.bf16.msra.mxu0 %v10055_v0 }
 0x9ab   : > { %9232 = vmatprep.subr.bf16.mxu0 %v10057_v23  ;;  %9521 = vmatpush3.bf16.msra.mxu1 %v10062_v29 }
 0x9ac   : > { %v5251_v22 = vrot.slane %v5250_v54, 2  ;;  %v5265_v18 = vadd.f32 %v5264_v50, %v5263_v47  ;;  %9522 = vmatprep.subr.bf16.mxu1 %v15484_v62 }
 0x9ae   : > { %v5252_v53 = vadd.f32 %v5251_v22, %v5250_v54  ;;  %v5266_v61 = vrot.slane %v5265_v18, 2  ;;  %9233 = vmatpush3.bf16.msra.mxu0 %v10058_v11 }
 0x9af   : > { %9234 = vmatprep.subr.bf16.mxu0 %v10060_v46  ;;  %9523 = vmatpush3.bf16.msra.mxu1 %v10065_v58  ;;  %v15566_v58 = vmov 1326507024  }
 0x9b0   : > { %v5253_v59 = vrot.slane %v5252_v53, 1  ;;  %v5267_v3 = vadd.f32 %v5266_v61, %v5265_v18  ;;  %9536 = vmatprep.subr.bf16.mxu1 %v15484_v62 }
 0x9b2   : > { %v5254_v41 = vadd.f32 %v5253_v59, %v5252_v53  ;;  %v5268_v7 = vrot.slane %v5267_v3, 1  ;;  %9235 = vmatpush3.bf16.msra.mxu0 %v10061_v16  ;;  %v15564_v53 = vld [vmem:[#allocation23_spill] sm:$0xff] }
 0x9b3   : > { %9236 = vmatprep.subr.bf16.mxu0 %v10063_v49  ;;  %v13706_v61 = vrot.slane %v13659_v2, %v15564_v53 }
 0x9b4   : > { %v5269_v28 = vadd.f32 %v5268_v7, %v5267_v3  ;;  %v5270_v39 = vmul.f32 0.025, %v5254_v41 }
 0x9b6   : > { %v5271_v19 = vmul.f32 0.025, %v5269_v28  ;;  %v5272_v51 = vmul.f32 %v5270_v39, %v5270_v39  ;;  %9237 = vmatpush3.bf16.msra.mxu0 %v10064_v36 }
 0x9b8   : > { %v5273_v52 = vsub.f32 %v5271_v19, %v5272_v51 }
 0x9ba   : > { %v5274_v35 = vmax.f32 %v5273_v52, 0.0 }
 0x9bc   : > { %v5275_v33 = vadd.f32 1e-05, %v5274_v35 }
 0x9be   : > { %10238 = vrsqrt.f32 %v5275_v33 }
 0x9c8   : > { %v10239_v5 = vpop.eup %10238 }
 0x9c9   : > { %v5277_v44 = vmul.f32 %v13659_v2, %v10239_v5 }
 0x9cb   : > { %v5281_v17 = vrot.slane %v5277_v44, %v15562_v13  ;;  %v5287_v47 = vmul.f32 %v5277_v44, %v5270_v39 }
 0x9cd   : > { %v5286_v27 = vmul.f32 %v5281_v17, %v13683_v48  ;;  %v5289_v54 = vrot.slane %v5287_v47, 7  ;;  %v5282_v50 = vmul.f32 %v5281_v17, %v13663_v6  ;;  %v5283_v40 = vmul.f32 %v5281_v17, %v13665_v45 }
 0x9ce   : > { %v5284_v43 = vmul.f32 %v5281_v17, %v13673_v37  ;;  %v5285_v22 = vmul.f32 %v5281_v17, %v13678_v63 }
 0x9cf   : > { %v5291_v18 = vsub.f32 %v13659_v2, %v5289_v54 }
 0x9d1   : > { %v5295_v60 = vrot.slane %v5291_v18, %v15563_v21 }
 0x9d3   : > { %v13709_v48 = vadd.f32 %v5295_v60, %v5286_v27  ;;  %v13711_v6 = vadd.f32 %v5295_v60, %v5282_v50  ;;  %v13713_v45 = vadd.f32 %v5295_v60, %v5283_v40  ;;  %v13715_v37 = vadd.f32 %v5295_v60, %v5284_v43 }
 0x9d4   : > { %v13717_v63 = vadd.f32 %v5295_v60, %v5285_v22  ;;  %v15565_v43 = vmov 920167782  }
 0x9d5   : > { %v13721_v1 = vmul.f32 %v13706_v61, %v13709_v48  ;;  %v13725_v2 = vmul.f32 %v13706_v61, %v13711_v6  ;;  %v13729_v59 = vmul.f32 %v13706_v61, %v13713_v45 }
 0x9d7   : > { %v15413_v3 = vand.u32 2147483647, %v13721_v1  ;;  %v5729_v26 = vand.u32 2139095040, %v13721_v1  ;;  %v5310_v30 = vand.u32 2147483647, %v13725_v2  ;;  %v5313_v8 = vand.u32 2139095040, %v13725_v2 }
 0x9d8   : > { %v5417_v39 = vand.u32 2139095040, %v13729_v59 }
 0x9d9   : > { %v5730_v41 = vshrl.u32 %v5729_v26, 23  ;;  %v5733_v7 = vand.u32 8388607, %v15413_v3  ;;  %v5314_v28 = vshrl.u32 %v5313_v8, 23  ;;  %v5317_v55 = vand.u32 8388607, %v5310_v30 }
 0x9da   : > { %v5418_v19 = vshrl.u32 %v5417_v39, 23 }
 0x9db   : > { %v8846_v42 = vadd.s32 4294967169, %v5730_v41  ;;  %v8830_v34 = vadd.s32 4294967169, %v5314_v28  ;;  %v5734_v52 = vor.u32 8388608, %v5733_v7  ;;  %v5318_v4 = vor.u32 8388608, %v5317_v55 }
 0x9dc   : > { %v8834_v23 = vadd.s32 4294967169, %v5418_v19 }
 0x9dd   : > { %v5736_v51 = vadd.s32 1, %v8846_v42  ;;  %v5320_v0 = vadd.s32 1, %v8830_v34  ;;  %v13740_v32 = vshll.u32 %v5734_v52, 8  ;;  %v13742_v29 = vshll.u32 %v5318_v4, 8 }
 0x9de   : > { %v13744_v49 = vadd.s32 1, %v8834_v23 }
 0x9df   : > { %vm5737_vm6 = vcmp.gt.s32.totalorder %v5736_v51, 0  ;;  %vm5321_vm2 = vcmp.gt.s32.totalorder %v5320_v0, 0 }
 0x9e0   : > { %v5738_v35 = vsel %vm5737_vm6, %v5736_v51, 0  ;;  %v5322_v11 = vsel %vm5321_vm2, %v5320_v0, 0  ;;  %vm5425_vm8 = vcmp.gt.s32.totalorder %v13744_v49, 0 }
 0x9e1   : > { %v5740_v33 = vand.u32 31, %v5738_v35  ;;  %v5324_v16 = vand.u32 31, %v5322_v11  ;;  %v13746_v36 = vshrl.u32 %v5738_v35, 5  ;;  %v13750_v17 = vshrl.u32 %v5322_v11, 5 }
 0x9e3   : > { %v5741_v46 = vsub.s32 32, %v5740_v33  ;;  %v5743_v5 = vshll.u32 %v15497_v25, %v5740_v33  ;;  %v5746_v44 = vshll.u32 %v15470_v24, %v5740_v33  ;;  %v5749_v54 = vshll.u32 %v15471_v10, %v5740_v33 }
 0x9e4   : > { %v5752_v40 = vshll.u32 %v15472_v57, %v5740_v33  ;;  %v5755_v18 = vshll.u32 %v15565_v43, %v5740_v33  ;;  %v5325_v7 = vsub.s32 32, %v5324_v16  ;;  %vm5758_vm9 = vcmp.lt.s32.totalorder %v13746_v36, 1 }
 0x9e5   : > { %v5744_v47 = vshrl.u32 %v15470_v24, %v5741_v46  ;;  %v5747_v27 = vshrl.u32 %v15471_v10, %v5741_v46  ;;  %v5750_v50 = vshrl.u32 %v15472_v57, %v5741_v46  ;;  %v5753_v22 = vshrl.u32 %v15565_v43, %v5741_v46 }
 0x9e6   : > { %v5756_v60 = vshrl.u32 %v15566_v58, %v5741_v46  ;;  %vm5759_vm11 = vcmp.lt.s32.totalorder %v13746_v36, 2  ;;  %v5742_v42 = vshrl.u32 %v15497_v25, %v5741_v46  ;;  %vm5761_vm12 = vcmp.lt.s32.totalorder %v13746_v36, 4 }
 0x9e7   : > { %v5745_v26 = vor.u32 %v5744_v47, %v5743_v5  ;;  %v5748_v8 = vor.u32 %v5747_v27, %v5746_v44  ;;  %v5751_v41 = vor.u32 %v5750_v50, %v5749_v54  ;;  %v5754_v28 = vor.u32 %v5753_v22, %v5752_v40 }
 0x9e8   : > { %v5757_v39 = vor.u32 %v5756_v60, %v5755_v18  ;;  %vm5760_vm15 = vcmp.lt.s32.totalorder %v13746_v36, 3  ;;  %v5327_v52 = vshll.u32 %v15497_v25, %v5324_v16  ;;  %v5328_v23 = vshrl.u32 %v15470_v24, %v5325_v7 }
 0x9e9   : > { %v5766_v55 = vsel %vm5758_vm9, %v5745_v26, %v5748_v8  ;;  %v5770_v34 = vsel %vm5758_vm9, %v5748_v8, %v5751_v41  ;;  %v5767_v19 = vsel %vm5761_vm12, %v5754_v28, 920167782  ;;  %v5330_v35 = vshll.u32 %v15470_v24, %v5324_v16 }
 0x9ea   : > { %v5771_v51 = vsel %vm5761_vm12, %v5757_v39, 1326507024  ;;  %v5768_v0 = vsel %vm5760_vm15, %v5751_v41, %v5767_v19  ;;  %v5763_v33 = vsel %vm5761_vm12, %v5751_v41, 2102212464  ;;  %v5331_v5 = vshrl.u32 %v15471_v10, %v5325_v7 }
 0x9eb   : > { %v5772_v4 = vsel %vm5760_vm15, %v5754_v28, %v5771_v51  ;;  %v5769_v11 = vsel %vm5759_vm11, %v5766_v55, %v5768_v0  ;;  %v5329_v50 = vor.u32 %v5328_v23, %v5327_v52  ;;  %v5333_v22 = vshll.u32 %v15471_v10, %v5324_v16 }
 0x9ec   : > { %v5773_v46 = vsel %vm5759_vm11, %v5770_v34, %v5772_v4  ;;  %v13786_v27 = vmul.u32.u64.low %v13740_v32, %v5769_v11  ;;  %v13787_v54 = vmul.u32.u64.high %v13740_v32, %v5769_v11, %v13786_v27  ;;  %v5332_v40 = vor.u32 %v5331_v5, %v5330_v35 }
 0x9ed   : > { %v13782_v44 = vmul.u32.u64.low %v13740_v32, %v5773_v46  ;;  %v13783_v47 = vmul.u32.u64.high %v13740_v32, %v5773_v46, %v13782_v44  ;;  %v5334_v18 = vshrl.u32 %v15472_v57, %v5325_v7  ;;  %v5336_v60 = vshll.u32 %v15472_v57, %v5324_v16 }
 0x9ee   : > { %v5337_v41 = vshrl.u32 %v15565_v43, %v5325_v7  ;;  %v5340_v28 = vshrl.u32 %v15566_v58, %v5325_v7  ;;  %v5762_v39 = vsel %vm5758_vm9, %v5742_v42, %v5745_v26  ;;  %v5764_v55 = vsel %vm5760_vm15, %v5748_v8, %v5763_v33 }
 0x9ef   : > { %v5335_v34 = vor.u32 %v5334_v18, %v5333_v22  ;;  %v5339_v19 = vshll.u32 %v15565_v43, %v5324_v16  ;;  %v5326_v51 = vshrl.u32 %v15497_v25, %v5325_v7  ;;  %vm5342_vm14 = vcmp.lt.s32.totalorder %v13750_v17, 1 }
 0x9f0   : > { %v5338_v52 = vor.u32 %v5337_v41, %v5336_v60  ;;  %vm5343_vm10 = vcmp.lt.s32.totalorder %v13750_v17, 2  ;;  %vm5344_vm7 = vcmp.lt.s32.totalorder %v13750_v17, 3  ;;  %vm5345_vm6 = vcmp.lt.s32.totalorder %v13750_v17, 4 }
 0x9f1   : > { %v5341_v0 = vor.u32 %v5340_v28, %v5339_v19  ;;  %v5350_v4 = vsel %vm5342_vm14, %v5329_v50, %v5332_v40  ;;  %vm5783_vm2 = vc.u32 %v13783_v47, %v13786_v27  ;;  %v5347_v26 = vsel %vm5345_vm6, %v5335_v34, 2102212464 }
 0x9f2   : > { %v5351_v8 = vsel %vm5345_vm6, %v5338_v52, 920167782  ;;  %v5354_v42 = vsel %vm5342_vm14, %v5332_v40, %v5335_v34  ;;  %v5784_v16 = vadd.s32 1, %v13787_v54  ;;  %v5346_v7 = vsel %vm5342_vm14, %v5326_v51, %v5329_v50 }
 0x9f3   : > { %v5352_v23 = vsel %vm5344_vm7, %v5335_v34, %v5351_v8  ;;  %v5355_v35 = vsel %vm5345_vm6, %v5341_v0, 1326507024  ;;  %v5348_v33 = vsel %vm5344_vm7, %v5332_v40, %v5347_v26  ;;  %v5426_v5 = vsel %vm5425_vm8, %v13744_v49, 0 }
 0x9f4   : > { %v5353_v11 = vsel %vm5343_vm10, %v5350_v4, %v5352_v23  ;;  %v5356_v46 = vsel %vm5344_vm7, %v5338_v52, %v5355_v35  ;;  %v5765_v44 = vsel %vm5759_vm11, %v5762_v39, %v5764_v55  ;;  %v5785_v49 = vsel %vm5783_vm2, %v5784_v16, %v13787_v54 }
 0x9f5   : > { %v5357_v22 = vsel %vm5343_vm10, %v5354_v42, %v5356_v46  ;;  %v13819_v18 = vmul.u32.u64.low %v13742_v29, %v5353_v11  ;;  %v13820_v50 = vmul.u32.u64.high %v13742_v29, %v5353_v11, %v13819_v18  ;;  %v5349_v36 = vsel %vm5343_vm10, %v5346_v7, %v5348_v33 }
 0x9f6   : > { %v13824_v40 = vmul.u32.u64.low %v13742_v29, %v5357_v22  ;;  %v13825_v60 = vmul.u32.u64.high %v13742_v29, %v5357_v22, %v13824_v40  ;;  %v5428_v41 = vand.u32 31, %v5426_v5  ;;  %v5781_v28 = vmul.u32 %v13740_v32, %v5765_v44 }
 0x9f7   : > { %v5368_v39 = vadd.s32 1, %v13820_v50  ;;  %v15414_v55 = vand.u32 2147483647, %v13729_v59  ;;  %v13838_v19 = vmul.f32 %v13706_v61, %v13715_v37  ;;  %v5365_v52 = vmul.u32 %v13742_v29, %v5349_v36 }
 0x9f8   : > { %v5429_v34 = vsub.s32 32, %v5428_v41  ;;  %v5786_v51 = vadd.s32 %v5785_v49, %v5781_v28  ;;  %vm5367_vm9 = vc.u32 %v13825_v60, %v13819_v18  ;;  %v5427_v29 = vshrl.u32 %v5426_v5, 5 }
 0x9f9   : > { %v5369_v17 = vsel %vm5367_vm9, %v5368_v39, %v13820_v50  ;;  %v5421_v32 = vand.u32 8388607, %v15414_v55  ;;  %v5521_v4 = vand.u32 2139095040, %v13838_v19  ;;  %v5431_v7 = vshll.u32 %v15497_v25, %v5428_v41 }
 0x9fa   : > { %v5370_v54 = vadd.s32 %v5369_v17, %v5365_v52  ;;  %v5432_v0 = vshrl.u32 %v15470_v24, %v5429_v34  ;;  %v5787_v26 = vadd.s32 536870912, %v5786_v51  ;;  %v5435_v42 = vshrl.u32 %v15471_v10, %v5429_v34 }
 0x9fb   : > { %v5438_v16 = vshrl.u32 %v15472_v57, %v5429_v34  ;;  %v5434_v23 = vshll.u32 %v15470_v24, %v5428_v41  ;;  %v5441_v35 = vshrl.u32 %v15565_v43, %v5429_v34  ;;  %v5437_v11 = vshll.u32 %v15471_v10, %v5428_v41 }
 0x9fc   : > { %v5371_v8 = vadd.s32 536870912, %v5370_v54  ;;  %v5440_v46 = vshll.u32 %v15472_v57, %v5428_v41  ;;  %v5444_v44 = vshrl.u32 %v15566_v58, %v5429_v34  ;;  %v5433_v22 = vor.u32 %v5432_v0, %v5431_v7 }
 0x9fd   : > { %v5443_v50 = vshll.u32 %v15565_v43, %v5428_v41  ;;  %v5522_v40 = vshrl.u32 %v5521_v4, 23  ;;  %v5436_v49 = vor.u32 %v5435_v42, %v5434_v23  ;;  %v5439_v36 = vor.u32 %v5438_v16, %v5437_v11 }
 0x9fe   : > { %v13853_v33 = vshrl.u32 %v5371_v8, 30  ;;  %v5442_v28 = vor.u32 %v5441_v35, %v5440_v46  ;;  %v5422_v39 = vor.u32 8388608, %v5421_v32  ;;  %vm5449_vm11 = vcmp.lt.s32.totalorder %v5427_v29, 4 }
 0x9ff   : > { %v5445_v52 = vor.u32 %v5444_v44, %v5443_v50  ;;  %v13860_v17 = vshrl.u32 %v5787_v26, 30  ;;  %vm5446_vm12 = vcmp.lt.s32.totalorder %v5427_v29, 1  ;;  %vm5448_vm15 = vcmp.lt.s32.totalorder %v5427_v29, 3 }
 0xa00   : > { %v5373_v5 = vshll.u32 %v13853_v33, 30  ;;  %v5455_v3 = vsel %vm5449_vm11, %v5442_v28, 920167782  ;;  %v8838_v55 = vadd.s32 4294967169, %v5522_v40  ;;  %v5454_v41 = vsel %vm5446_vm12, %v5433_v22, %v5436_v49 }
 0xa01   : > { %v5456_v4 = vsel %vm5448_vm15, %v5439_v36, %v5455_v3  ;;  %v5458_v42 = vsel %vm5446_vm12, %v5436_v49, %v5439_v36  ;;  %vm5447_vm8 = vcmp.lt.s32.totalorder %v5427_v29, 2  ;;  %v5459_v32 = vsel %vm5449_vm11, %v5445_v52, 1326507024 }
 0xa02   : > { %v5374_v8 = vsub.s32 %v5370_v54, %v5373_v5  ;;  %v5462_v16 = vshll.u32 %v5422_v39, 8  ;;  %v5789_v26 = vshll.u32 %v13860_v17, 30  ;;  %v5451_v54 = vsel %vm5449_vm11, %v5439_v36, 2102212464 }
 0xa03   : > { %v5460_v23 = vsel %vm5448_vm15, %v5442_v28, %v5459_v32  ;;  %v5430_v35 = vshrl.u32 %v15497_v25, %v5429_v34  ;;  %v5457_v11 = vsel %vm5447_vm8, %v5454_v41, %v5456_v4  ;;  %v5528_v3 = vadd.s32 1, %v8838_v55 }
 0xa04   : > { %v5376_v0 = vsub.s32 0, %v5374_v8  ;;  %v5461_v46 = vsel %vm5447_vm8, %v5458_v42, %v5460_v23  ;;  %v5452_v40 = vsel %vm5448_vm15, %v5436_v49, %v5451_v54  ;;  %v13882_v34 = vsub.s32 %v5786_v51, %v5789_v26 }
 0xa05   : > { %v5450_v50 = vsel %vm5446_vm12, %v5430_v35, %v5433_v22  ;;  %v13875_v5 = vmul.u32.u64.low %v5462_v16, %v5461_v46  ;;  %v13876_v39 = vmul.u32.u64.high %v5462_v16, %v5461_v46, %v13875_v5  ;;  %vm5529_vm14 = vcmp.gt.s32.totalorder %v5528_v3, 0 }
 0xa06   : > { %v8831_v7 = vmin.u32 %v5376_v0, %v5374_v8  ;;  %v13878_v0 = vmul.u32.u64.low %v5462_v16, %v5457_v11  ;;  %v13879_v36 = vmul.u32.u64.high %v5462_v16, %v5457_v11, %v13878_v0  ;;  %v5530_v28 = vsel %vm5529_vm14, %v5528_v3, 0 }
 0xa07   : > { %v5453_v55 = vsel %vm5447_vm8, %v5450_v50, %v5452_v40  ;;  %v5532_v41 = vand.u32 31, %v5530_v28  ;;  %v15415_v22 = vand.u32 2147483647, %v13838_v19  ;;  %v5366_v49 = vadd.s32 %v13819_v18, %v13825_v60 }
 0xa08   : > { %v5378_v44 = vclz %v8831_v7  ;;  %vm5471_vm7 = vc.u32 %v13876_v39, %v13878_v0  ;;  %v5472_v7 = vadd.s32 1, %v13879_v36  ;;  %v5792_v51 = vsub.s32 0, %v13882_v34 }
 0xa09   : > { %v5469_v26 = vmul.u32 %v5462_v16, %v5453_v55  ;;  %v5533_v54 = vsub.s32 32, %v5532_v41  ;;  %v5525_v18 = vand.u32 8388607, %v15415_v22  ;;  %v5531_v16 = vshrl.u32 %v5530_v28, 5 }
 0xa0a   : > { %v8832_v52 = vadd.s32 4294967294, %v5378_v44  ;;  %v5473_v11 = vsel %vm5471_vm7, %v5472_v7, %v13879_v36  ;;  %v8847_v40 = vmin.u32 %v5792_v51, %v13882_v34  ;;  %v5538_v55 = vshll.u32 %v15470_v24, %v5532_v41 }
 0xa0b   : > { %v5474_v46 = vadd.s32 %v5473_v11, %v5469_v26  ;;  %v5536_v3 = vshrl.u32 %v15470_v24, %v5533_v54  ;;  %v5539_v60 = vshrl.u32 %v15471_v10, %v5533_v54  ;;  %v5541_v36 = vshll.u32 %v15471_v10, %v5532_v41 }
 0xa0c   : > { %vm8833_vm10 = vcmp.lt.s32.totalorder %v8832_v52, 0  ;;  %v5545_v7 = vshrl.u32 %v15565_v43, %v5533_v54  ;;  %v5548_v28 = vshrl.u32 %v15566_v58, %v5533_v54  ;;  %vm5312_vm6 = vcmp.lt.s32.totalorder %v13725_v2, 0 }
 0xa0d   : > { %v5381_v4 = vsel %vm8833_vm10, 0, %v8832_v52  ;;  %v5475_v5 = vadd.s32 536870912, %v5474_v46  ;;  %vm13911_vm2 = vcmp.le.f32.partialorder %v5310_v30, 0.7853982  ;;  %vm5550_vm9 = vcmp.lt.s32.totalorder %v5531_v16, 1 }
 0xa0e   : > { %v5382_v42 = vsub.s32 32, %v5381_v4  ;;  %v5386_v32 = vsub.s32 4294967266, %v5381_v4  ;;  %v5383_v29 = vshll.u32 %v5374_v8, %v5381_v4  ;;  %v5535_v8 = vshll.u32 %v15497_v25, %v5532_v41 }
 0xa0f   : > { %v5542_v4 = vshrl.u32 %v15472_v57, %v5533_v54  ;;  %vm5553_vm11 = vcmp.lt.s32.totalorder %v5531_v16, 4  ;;  %vm5552_vm12 = vcmp.lt.s32.totalorder %v5531_v16, 3  ;;  %vm5551_vm15 = vcmp.lt.s32.totalorder %v5531_v16, 2 }
 0xa10   : > { %v5384_v23 = vshrl.u32 %v5366_v49, %v5382_v42  ;;  %v5387_v35 = vadd.s32 127, %v5386_v32  ;;  %v13902_v49 = vshrl.u32 %v5475_v5, 30  ;;  %v5537_v42 = vor.u32 %v5536_v3, %v5535_v8 }
 0xa11   : > { %v5544_v32 = vshll.u32 %v15472_v57, %v5532_v41  ;;  %v5543_v5 = vor.u32 %v5542_v4, %v5541_v36  ;;  %v5547_v8 = vshll.u32 %v15565_v43, %v5532_v41  ;;  %v5534_v36 = vshrl.u32 %v15497_v25, %v5533_v54 }
 0xa12   : > { %v5385_v44 = vor.u32 %v5384_v23, %v5383_v29  ;;  %v5388_v50 = vshll.u32 %v5387_v35, 23  ;;  %v5540_v29 = vor.u32 %v5539_v60, %v5538_v55  ;;  %v5477_v23 = vshll.u32 %v13902_v49, 30 }
 0xa13   : > { %v5526_v35 = vor.u32 8388608, %v5525_v18  ;;  %v5546_v11 = vor.u32 %v5545_v7, %v5544_v32  ;;  %v5396_v60 = vsub.s32 4, %v13853_v33  ;;  %v5549_v22 = vor.u32 %v5548_v28, %v5547_v8 }
 0xa14   : > { %v5389_v52 = vor.u32 4788187, %v5388_v50  ;;  %v5392_v51 = vcvt.s32.f32 %v5385_v44  ;;  %v5794_v44 = vclz %v8847_v40  ;;  %v5558_v18 = vsel %vm5550_vm9, %v5537_v42, %v5540_v29 }
 0xa15   : > { %v5559_v30 = vsel %vm5553_vm11, %v5546_v11, 920167782  ;;  %v5566_v7 = vshll.u32 %v5526_v35, 8  ;;  %v5555_v4 = vsel %vm5553_vm11, %v5543_v5, 2102212464  ;;  %v5562_v28 = vsel %vm5550_vm9, %v5540_v29, %v5543_v5 }
 0xa16   : > { %v5390_v26 = vand.u32 2147483647, %v5389_v52  ;;  %v5478_v52 = vsub.s32 %v5474_v46, %v5477_v23  ;;  %v5560_v41 = vsel %vm5552_vm12, %v5543_v5, %v5559_v30  ;;  %v5563_v23 = vsel %vm5553_vm11, %v5549_v22, 1326507024 }
 0xa17   : > { %v5397_v54 = vsel %vm5312_vm6, %v5396_v60, %v13853_v33  ;;  %v5556_v5 = vsel %vm5552_vm12, %v5540_v29, %v5555_v4  ;;  %v5564_v22 = vsel %vm5552_vm12, %v5546_v11, %v5563_v23  ;;  %vm5416_vm14 = vcmp.lt.s32.totalorder %v13729_v59, 0 }
 0xa18   : > { %v5393_v3 = vmul.f32 %v5392_v51, %v5390_v26  ;;  %v5480_v32 = vsub.s32 0, %v5478_v52  ;;  %v5561_v51 = vsel %vm5551_vm15, %v5558_v18, %v5560_v41  ;;  %v5554_v18 = vsel %vm5550_vm9, %v5534_v36, %v5537_v42 }
 0xa19   : > { %v13927_v35 = vmul.u32.u64.low %v5566_v7, %v5561_v51  ;;  %v13928_v8 = vmul.u32.u64.high %v5566_v7, %v5561_v51, %v13927_v35  ;;  %v5399_v33 = vsel %vm13911_vm2, 0, %v5397_v54  ;;  %v5500_v29 = vsub.s32 4, %v13902_v49 }
 0xa1a   : > { %v5394_v55 = vxor.u32 2147483648, %v5393_v3  ;;  %v8835_v40 = vmin.u32 %v5480_v32, %v5478_v52  ;;  %v8848_v32 = vadd.s32 4294967294, %v5794_v44  ;;  %v5470_v44 = vadd.s32 %v13878_v0, %v13876_v39 }
 0xa1b   : > { %v5576_v60 = vadd.s32 1, %v13928_v8  ;;  %v5403_v50 = vadd.s32 3, %v5399_v33  ;;  %vm5402_vm12 = vweird.f32 %v13725_v2 }
 0xa1c   : > { %v5395_v26 = vsel %vm5312_vm6, %v5394_v55, %v5393_v3  ;;  %v5482_v3 = vclz %v8835_v40  ;;  %v13936_v55 = vmul.f32 %v13706_v61, %v13717_v63  ;;  %v5557_v61 = vsel %vm5551_vm15, %v5554_v18, %v5556_v5 }
 0xa1d   : > { %v5398_v46 = vsel %vm13911_vm2, %v13725_v2, %v5395_v26  ;;  %v5565_v26 = vsel %vm5551_vm15, %v5562_v28, %v5564_v22  ;;  %vm8849_vm10 = vcmp.lt.s32.totalorder %v8848_v32, 0  ;;  %v5573_v40 = vmul.u32 %v5566_v7, %v5557_v61 }
 0xa1e   : > { %10240 = vcosq.f32 %v5398_v46  ;;  %v8836_v30 = vadd.s32 4294967294, %v5482_v3  ;;  %v13942_v41 = vmul.u32.u64.low %v5566_v7, %v5565_v26  ;;  %v13943_v51 = vmul.u32.u64.high %v5566_v7, %v5565_v26, %v13942_v41 }
 0xa1f   : > { %10242 = vsinq.f32 %v5398_v46  ;;  %v5625_v11 = vand.u32 2139095040, %v13936_v55  ;;  %v13957_v3 = vsel %vm8849_vm10, 0, %v8848_v32  ;;  %v5501_v18 = vsel %vm5416_vm14, %v5500_v29, %v13902_v49 }
 0xa20   : > { %vm8837_vm8 = vcmp.lt.s32.totalorder %v8836_v30, 0  ;;  %vm5575_vm7 = vc.u32 %v13943_v51, %v13927_v35  ;;  %v15569_v26 = vand.u32 2147483647, %v13729_v59  ;;  %v5802_v32 = vsub.s32 4294967266, %v13957_v3 }
 0xa21   : > { %v5485_v42 = vsel %vm8837_vm8, 0, %v8836_v30  ;;  %v5626_v16 = vshrl.u32 %v5625_v11, 23  ;;  %v5577_v54 = vsel %vm5575_vm7, %v5576_v60, %v13928_v8  ;;  %v5404_v33 = vand.u32 3, %v5403_v50 }
 0xa22   : > { %v5486_v36 = vsub.s32 32, %v5485_v42  ;;  %v5490_v46 = vsub.s32 4294967266, %v5485_v42  ;;  %v5487_v4 = vshll.u32 %v5478_v52, %v5485_v42  ;;  %v5578_v39 = vadd.s32 %v5577_v54, %v5573_v40  ;;  %v15572_v40 = vld [vmem:[#allocation29_spill] sm:$0xff] }
 0xa23   : > { %v8842_v0 = vadd.s32 4294967169, %v5626_v16  ;;  %vm13964_vm6 = vcmp.le.f32.partialorder %v15569_v26, 0.7853982  ;;  %v15416_v29 = vand.u32 2147483647, %v13936_v55  ;;  %v13976_v16 = vrot.slane %v15572_v40, %v15564_v53 }
 0xa24   : > { %v5488_v28 = vshrl.u32 %v5470_v44, %v5486_v36  ;;  %v5491_v23 = vadd.s32 127, %v5490_v46  ;;  %v5579_v41 = vadd.s32 536870912, %v5578_v39  ;;  %v5503_v49 = vsel %vm13964_vm6, 0, %v5501_v18 }
 0xa25   : > { %v5632_v8 = vadd.s32 1, %v8842_v0  ;;  %vm5406_vm9 = vcmp.eq.s32.totalorder %v5404_v33, 0  ;;  %vm5409_vm11 = vcmp.eq.s32.totalorder %v5404_v33, 2  ;;  %v13985_v0 = vand.u32 8388607, %v15416_v29 }
 0xa26   : > { %v5489_v22 = vor.u32 %v5488_v28, %v5487_v4  ;;  %v5492_v7 = vshll.u32 %v5491_v23, 23  ;;  %v13971_v42 = vshrl.u32 %v5579_v41, 30  ;;  %v13979_v4 = vadd.s32 127, %v5802_v32 }
 0xa27   : > { %vm5633_vm2 = vcmp.gt.s32.totalorder %v5632_v8, 0  ;;  %v5507_v23 = vadd.s32 3, %v5503_v49  ;;  %vm5405_vm15 = vcmp.lt.s32.totalorder %v5404_v33, 2  ;;  %v5630_v33 = vor.u32 8388608, %v13985_v0 }
 0xa28   : > { %v10241_v5 = vpop.eup %10240  ;;  %v5493_v61 = vor.u32 4788187, %v5492_v7  ;;  %v5496_v36 = vcvt.s32.f32 %v5489_v22  ;;  %v5634_v46 = vsel %vm5633_vm2, %v5632_v8, 0  ;;  %v5581_v50 = vshll.u32 %v13971_v42, 30 }
 0xa29   : > { %v10243_v30 = vpop.eup %10242  ;;  %v5410_v60 = vxor.u32 2147483648, %v10241_v5  ;;  %v5636_v54 = vand.u32 31, %v5634_v46  ;;  %v13989_v8 = vadd.s32 %v13786_v27, %v13783_v47  ;;  %v14008_v40 = vshrl.u32 %v5634_v46, 5 }
 0xa2a   : > { %v5407_v11 = vxor.u32 2147483648, %v10243_v30  ;;  %v5494_v44 = vand.u32 2147483647, %v5493_v61  ;;  %v13981_v18 = vsub.s32 %v5578_v39, %v5581_v50 }
 0xa2b   : > { %v5411_v7 = vsel %vm5409_vm11, %v5410_v60, %v10243_v30  ;;  %v5637_v41 = vsub.s32 32, %v5636_v54  ;;  %v5642_v50 = vshll.u32 %v15470_v24, %v5636_v54  ;;  %v5648_v0 = vshll.u32 %v15472_v57, %v5636_v54 }
 0xa2c   : > { %v5497_v28 = vmul.f32 %v5496_v36, %v5494_v44  ;;  %v5408_v22 = vsel %vm5406_vm9, %v10241_v5, %v5407_v11  ;;  %v5584_v61 = vsub.s32 0, %v13981_v18  ;;  %v13997_v5 = vand.u32 3, %v5507_v23 }
 0xa2d   : > { %v5412_v30 = vsel %vm5405_vm15, %v5408_v22, %v5411_v7  ;;  %v5643_v60 = vshrl.u32 %v15471_v10, %v5637_v41  ;;  %v5574_v11 = vadd.s32 %v13927_v35, %v13943_v51  ;;  %v5640_v44 = vshrl.u32 %v15470_v24, %v5637_v41 }
 0xa2e   : > { %v5498_v26 = vxor.u32 2147483648, %v5497_v28  ;;  %v8839_v27 = vmin.u32 %v5584_v61, %v13981_v18  ;;  %v5413_v52 = vsel %vm5402_vm12, nan, %v5412_v30  ;;  %v5645_v23 = vshll.u32 %v15471_v10, %v5636_v54 }
 0xa2f   : > { %v5646_v22 = vshrl.u32 %v15472_v57, %v5637_v41  ;;  %v5644_v51 = vor.u32 %v5643_v60, %v5642_v50  ;;  %v5649_v7 = vshrl.u32 %v15565_v43, %v5637_v41  ;;  %vm5513_vm8 = vcmp.eq.s32.totalorder %v13997_v5, 2 }
 0xa30   : > { %v5499_v49 = vsel %vm5416_vm14, %v5498_v26, %v5497_v28  ;;  %v5586_v36 = vclz %v8839_v27  ;;  %v5639_v28 = vshll.u32 %v15497_v25, %v5636_v54  ;;  %v5651_v61 = vshll.u32 %v15565_v43, %v5636_v54 }
 0xa31   : > { %v5502_v47 = vsel %vm13964_vm6, %v13729_v59, %v5499_v49  ;;  %v5647_v26 = vor.u32 %v5646_v22, %v5645_v23  ;;  %v5652_v2 = vshrl.u32 %v15566_v58, %v5637_v41  ;;  %vm5510_vm14 = vcmp.eq.s32.totalorder %v13997_v5, 0 }
 0xa32   : > { %10244 = vcosq.f32 %v5502_v47  ;;  %v8840_v35 = vadd.s32 4294967294, %v5586_v36  ;;  %v5641_v46 = vor.u32 %v5640_v44, %v5639_v28  ;;  %v5830_v49 = vmul.f32 %v5413_v52, %v5413_v52 }
 0xa33   : > { %10246 = vsinq.f32 %v5502_v47  ;;  %v5650_v30 = vor.u32 %v5649_v7, %v5648_v0  ;;  %vm5654_vm7 = vcmp.lt.s32.totalorder %v14008_v40, 1  ;;  %v5653_v27 = vor.u32 %v5652_v2, %v5651_v61 }
 0xa34   : > { %vm8841_vm10 = vcmp.lt.s32.totalorder %v8840_v35, 0  ;;  %vm5655_vm6 = vcmp.lt.s32.totalorder %v14008_v40, 2  ;;  %vm5656_vm2 = vcmp.lt.s32.totalorder %v14008_v40, 3  ;;  %vm5657_vm9 = vcmp.lt.s32.totalorder %v14008_v40, 4 }
 0xa35   : > { %v5589_v47 = vsel %vm8841_vm10, 0, %v8840_v35  ;;  %v5666_v54 = vsel %vm5654_vm7, %v5644_v51, %v5647_v26  ;;  %v5662_v50 = vsel %vm5654_vm7, %v5641_v46, %v5644_v51  ;;  %v5663_v52 = vsel %vm5657_vm9, %v5650_v30, 920167782 }
 0xa36   : > { %v5590_v60 = vsub.s32 32, %v5589_v47  ;;  %v5594_v44 = vsub.s32 4294967266, %v5589_v47  ;;  %v5591_v36 = vshll.u32 %v13981_v18, %v5589_v47  ;;  %v5667_v28 = vsel %vm5657_vm9, %v5653_v27, 1326507024 }
 0xa37   : > { %v5664_v35 = vsel %vm5656_vm2, %v5647_v26, %v5663_v52  ;;  %v5668_v0 = vsel %vm5656_vm2, %v5650_v30, %v5667_v28  ;;  %v5638_v61 = vshrl.u32 %v15497_v25, %v5637_v41  ;;  %v5659_v2 = vsel %vm5657_vm9, %v5647_v26, 2102212464 }
 0xa38   : > { %v5592_v23 = vshrl.u32 %v5574_v11, %v5590_v60  ;;  %v5595_v22 = vadd.s32 127, %v5594_v44  ;;  %v5669_v18 = vsel %vm5655_vm6, %v5666_v54, %v5668_v0  ;;  %v5670_v47 = vshll.u32 %v5630_v33, 8 }
 0xa39   : > { %v5665_v11 = vsel %vm5655_vm6, %v5662_v50, %v5664_v35  ;;  %v5839_v44 = vmul.f32 %v13976_v16, %v5830_v49  ;;  %v5658_v33 = vsel %vm5654_vm7, %v5638_v61, %v5641_v46  ;;  %v5660_v54 = vsel %vm5656_vm2, %v5644_v51, %v5659_v2 }
 0xa3a   : > { %v5593_v32 = vor.u32 %v5592_v23, %v5591_v36  ;;  %v5596_v27 = vshll.u32 %v5595_v22, 23  ;;  %v14041_v52 = vmul.u32.u64.low %v5670_v47, %v5669_v18  ;;  %v14042_v30 = vmul.u32.u64.high %v5670_v47, %v5669_v18, %v14041_v52 }
 0xa3b   : > { %vm5509_vm11 = vcmp.lt.s32.totalorder %v13997_v5, 2  ;;  %v14053_v50 = vmul.u32.u64.low %v5670_v47, %v5665_v11  ;;  %v14054_v49 = vmul.u32.u64.high %v5670_v47, %v5665_v11, %v14053_v50  ;;  %vm5506_vm12 = vweird.f32 %v13729_v59 }
 0xa3c   : > { %v10245_v7 = vpop.eup %10244  ;;  %v5597_v26 = vor.u32 4788187, %v5596_v27  ;;  %v15573_v23 = vsub.s32 32, %v13957_v3  ;;  %v5604_v51 = vsub.s32 4, %v13971_v42  ;;  %v5661_v5 = vsel %vm5655_vm6, %v5658_v33, %v5660_v54 }
 0xa3d   : > { %v10247_v29 = vpop.eup %10246  ;;  %v5514_v39 = vxor.u32 2147483648, %v10245_v7  ;;  %v14065_v0 = vadd.f32 %v5839_v44, %v13711_v6  ;;  %vm5679_vm15 = vc.u32 %v14042_v30, %v14053_v50  ;;  %v5799_v59 = vshll.u32 %v13882_v34, %v13957_v3 }
 0xa3e   : > { %v5511_v60 = vxor.u32 2147483648, %v10247_v29  ;;  %v5800_v46 = vshrl.u32 %v13989_v8, %v15573_v23  ;;  %v5680_v61 = vadd.s32 1, %v14054_v49  ;;  %v5677_v18 = vmul.u32 %v5670_v47, %v5661_v5 }
 0xa3f   : > { %v5515_v41 = vsel %vm5513_vm8, %v5514_v39, %v10247_v29  ;;  %v5598_v29 = vand.u32 2147483647, %v5597_v26  ;;  %v5600_v39 = vcvt.s32.f32 %v5593_v32  ;;  %v15574_v32 = vshll.u32 %v13979_v4, 23 }
 0xa40   : > { %v5512_v36 = vsel %vm5510_vm14, %v10245_v7, %v5511_v60  ;;  %vm5520_vm8 = vcmp.lt.s32.totalorder %v13838_v19, 0  ;;  %v5801_v6 = vor.u32 %v5800_v46, %v5799_v59  ;;  %v15575_v27 = vand.u32 2147483647, %v13838_v19 }
 0xa41   : > { %v5516_v28 = vsel %vm5509_vm11, %v5512_v36, %v5515_v41  ;;  %v5601_v7 = vmul.f32 %v5600_v39, %v5598_v29  ;;  %v5805_v8 = vor.u32 4788187, %v15574_v32  ;;  %v5605_v34 = vsel %vm5520_vm8, %v5604_v51, %v13971_v42 }
 0xa42   : > { %v5517_v22 = vsel %vm5506_vm12, nan, %v5516_v28  ;;  %vm14078_vm14 = vcmp.le.f32.partialorder %v15575_v27, 0.7853982  ;;  %v5681_v3 = vsel %vm5679_vm15, %v5680_v61, %v14054_v49  ;;  %v5854_v60 = vrot.slane %v14065_v0, 7 }
 0xa43   : > { %v5831_v35 = vmul.f32 %v5517_v22, %v5517_v22  ;;  %v5602_v40 = vxor.u32 2147483648, %v5601_v7  ;;  %v5682_v52 = vadd.s32 %v5681_v3, %v5677_v18  ;;  %v5806_v41 = vand.u32 2147483647, %v5805_v8 }
 0xa44   : > { %v5808_v42 = vcvt.s32.f32 %v5801_v6  ;;  %vm15578_vm10 = vcmask 1040384   ;;  %vm5728_vm7 = vcmp.lt.s32.totalorder %v13721_v1, 0  ;;  %v5812_v6 = vsub.s32 4, %v13860_v17 }
 0xa45   : > { %v5840_v2 = vmul.f32 %v13976_v16, %v5831_v35  ;;  %v5603_v44 = vsel %vm5520_vm8, %v5602_v40, %v5601_v7  ;;  %v5683_v54 = vadd.s32 536870912, %v5682_v52  ;;  %vm5610_vm12 = vweird.f32 %v13838_v19 }
 0xa46   : > { %v5606_v47 = vsel %vm14078_vm14, %v13838_v19, %v5603_v44  ;;  %v5809_v49 = vmul.f32 %v5808_v42, %v5806_v41  ;;  %v5813_v41 = vsel %vm5728_vm7, %v5812_v6, %v13860_v17  ;;  %v5678_v42 = vadd.s32 %v14053_v50, %v14042_v30 }
 0xa47   : > { %v14085_v4 = vadd.f32 %v5840_v2, %v13713_v45  ;;  %10248 = vcosq.f32 %v5606_v47  ;;  %v5607_v45 = vsel %vm14078_vm14, 0, %v5605_v34  ;;  %v14099_v29 = vshrl.u32 %v5683_v54, 30 }
 0xa48   : > { %10250 = vsinq.f32 %v5606_v47  ;;  %v5611_v39 = vadd.s32 3, %v5607_v45  ;;  %v5810_v22 = vxor.u32 2147483648, %v5809_v49  ;;  %v15580_v2 = vand.u32 2147483647, %v13721_v1 }
 0xa49   : > { %v5855_v26 = vrot.slane %v14085_v4, 7  ;;  %v5872_v33 = vpack.c.bf16 %v14085_v4, %v14065_v0  ;;  %v5685_v46 = vshll.u32 %v14099_v29, 30  ;;  %v5876_v54 = vrot.slane %v14085_v4, 1 }
 0xa4a   : > { %v5612_v5 = vand.u32 3, %v5611_v39  ;;  %v5811_v32 = vsel %vm5728_vm7, %v5810_v22, %v5809_v49  ;;  %vm14109_vm6 = vcmp.le.f32.partialorder %v15580_v2, 0.7853982  ;;  %vm15583_vm8 = vcmask 1046528  }
 0xa4b   : > { %v5856_v36 = vsel %vm15578_vm10, %v5854_v60, %v5855_v26  ;;  %6073 = vmatprep.mubr.bf16.mxu0 %v5872_v33  ;;  %v5686_v51 = vsub.s32 %v5682_v52, %v5685_v46  ;;  %v5814_v34 = vsel %vm14109_vm6, %v13721_v1, %v5811_v32  ;;  %v5875_v33 = vrot.slane %v14065_v0, 1  ;;  %vm15584_vm14 = vmmov %vm15583_vm8 }
 0xa4c   : > { %v8876_v28 = vpack.c.bf16 %v5856_v36, %v5854_v60  ;;  %vm5617_vm2 = vcmp.eq.s32.totalorder %v5612_v5, 2  ;;  %vm5614_vm9 = vcmp.eq.s32.totalorder %v5612_v5, 0  ;;  %vm5613_vm11 = vcmp.lt.s32.totalorder %v5612_v5, 2 }
 0xa4d   : > { %v5688_v35 = vsub.s32 0, %v5686_v51  ;;  %10252 = vcosq.f32 %v5814_v34  ;;  %v5815_v22 = vsel %vm14109_vm6, 0, %v5813_v41  ;;  %v5877_v0 = vsel %vm15583_vm8, %v5875_v33, %v5876_v54 }
 0xa4e   : > { %8877 = vmatmul.mubr.msk.bf16.vlgmr.msra.gmra.mrb[60].mxu0 %vm11963_vm4, %v8876_v28  ;;  %10254 = vsinq.f32 %v5814_v34  ;;  %v5708_v40 = vsub.s32 4, %v14099_v29  ;;  %vm5624_vm10 = vcmp.lt.s32.totalorder %v13936_v55, 0  ;;  %v15585_v34 = vand.u32 2147483647, %v13936_v55 }
 0xa4f   : > { %v8843_v61 = vmin.u32 %v5688_v35, %v5686_v51 }
 0xa50   : > { %vm5623_vm7 = vcmp.le.f32.partialorder %v15585_v34, 0.7853982 }
 0xa51   : > { %v10249_v7 = vpop.eup %10248  ;;  %v5690_v11 = vclz %v8843_v61 }
 0xa52   : > { %v10251_v59 = vpop.eup %10250  ;;  %v5618_v8 = vxor.u32 2147483648, %v10249_v7 }
 0xa53   : > { %v5615_v18 = vxor.u32 2147483648, %v10251_v59  ;;  %v8844_v44 = vadd.s32 4294967294, %v5690_v11 }
 0xa54   : > { %v5619_v27 = vsel %vm5617_vm2, %v5618_v8, %v10251_v59  ;;  %v5819_v59 = vadd.s32 3, %v5815_v22 }
 0xa55   : > { %v5616_v3 = vsel %vm5614_vm9, %v10249_v7, %v5615_v18  ;;  %vm8845_vm15 = vcmp.lt.s32.totalorder %v8844_v44, 0 }
 0xa56   : > { %v5620_v60 = vsel %vm5613_vm11, %v5616_v3, %v5619_v27  ;;  %v5693_v45 = vsel %vm8845_vm15, 0, %v8844_v44  ;;  %v5820_v18 = vand.u32 3, %v5819_v59  ;;  %vm5818_vm11 = vweird.f32 %v13721_v1 }
 0xa57   : > { %v5621_v52 = vsel %vm5610_vm12, nan, %v5620_v60  ;;  %v5694_v36 = vsub.s32 32, %v5693_v45  ;;  %v5698_v49 = vsub.s32 4294967266, %v5693_v45  ;;  %v5695_v17 = vshll.u32 %v5686_v51, %v5693_v45  ;;  %v10253_v32 = vpop.eup %10252 }
 0xa58   : > { %v5832_v47 = vmul.f32 %v5621_v52, %v5621_v52  ;;  %v10255_v61 = vpop.eup %10254  ;;  %v5826_v27 = vxor.u32 2147483648, %v10253_v32  ;;  %v5709_v60 = vsel %vm5624_vm10, %v5708_v40, %v14099_v29  ;;  %vm5822_vm6 = vcmp.eq.s32.totalorder %v5820_v18, 0 }
 0xa59   : > { %v5696_v39 = vshrl.u32 %v5678_v42, %v5694_v36  ;;  %v5699_v46 = vadd.s32 127, %v5698_v49  ;;  %v5823_v6 = vxor.u32 2147483648, %v10255_v61  ;;  %vm5825_vm2 = vcmp.eq.s32.totalorder %v5820_v18, 2 }
 0xa5a   : > { %v5841_v19 = vmul.f32 %v13976_v16, %v5832_v47  ;;  %v5827_v41 = vsel %vm5825_vm2, %v5826_v27, %v10255_v61  ;;  %v5711_v47 = vsel %vm5623_vm7, 0, %v5709_v60  ;;  %vm5821_vm9 = vcmp.lt.s32.totalorder %v5820_v18, 2 }
 0xa5b   : > { %v5697_v50 = vor.u32 %v5696_v39, %v5695_v17  ;;  %v5700_v5 = vshll.u32 %v5699_v46, 23  ;;  %v5824_v52 = vsel %vm5822_vm6, %v10253_v32, %v5823_v6  ;;  %v5715_v42 = vadd.s32 3, %v5711_v47  ;;  %v14167_v47 = vld [vmem:[#allocation7 + $0x10] sm:$0xff] }
 0xa5c   : > { %v14127_v28 = vadd.f32 %v5841_v19, %v13715_v37  ;;  %v5828_v33 = vsel %vm5821_vm9, %v5824_v52, %v5827_v41  ;;  %vm15588_vm6 = vcmask 1046528   ;;  %v10067_v52 = vld [vmem:[#allocation8 + $0x240] sm:$0xff]  }
 0xa5d   : > { %v5701_v7 = vor.u32 4788187, %v5700_v5  ;;  %v5704_v8 = vcvt.s32.f32 %v5697_v50  ;;  %v5829_v45 = vsel %vm5818_vm11, nan, %v5828_v33  ;;  %vm15589_vm2 = vmmov %vm15588_vm6  ;;  %v10068_v41 = vld [vmem:[#allocation8 + $0x2c0] sm:$0xff]  }
 0xa5e   : > { %v5878_v30 = vrot.slane %v14127_v28, 1  ;;  %v5834_v19 = vmul.f32 %v5829_v45, %v5829_v45  ;;  %v15592_v33 = vld [vmem:[#allocation26_spill] sm:$0xff] }
 0xa5f   : > { %v5702_v51 = vand.u32 2147483647, %v5701_v7  ;;  %v5857_v7 = vrot.slane %v14127_v28, 7  ;;  %v10069_v45 = vld [vmem:[#allocation8 + $0x288] sm:$0xff]  }
 0xa60   : > { %v5879_v35 = vsel %vm15584_vm14, %v5876_v54, %v5878_v30  ;;  %v5716_v54 = vand.u32 3, %v5715_v42  ;;  %v5843_v39 = vmul.f32 %v13976_v16, %v5834_v19  ;;  %vm5714_vm14 = vweird.f32 %v13936_v55  ;;  %v10070_v19 = vld [vmem:[#allocation8 + $0x248] sm:$0xff]  }
 0xa61   : > { %v5890_v37 = vpack.c.bf16 %v5879_v35, %v5877_v0  ;;  %v5705_v2 = vmul.f32 %v5704_v8, %v5702_v51  ;;  %v14171_v42 = vrot.slane %v14167_v47, %v15592_v33 }
 0xa62   : > { %vm5721_vm12 = vcmp.eq.s32.totalorder %v5716_v54, 2  ;;  %vm5718_vm15 = vcmp.eq.s32.totalorder %v5716_v54, 0  ;;  %vm5717_vm8 = vcmp.lt.s32.totalorder %v5716_v54, 2  ;;  %v5848_v1 = vadd.f32 %v5843_v39, %v13709_v48  ;;  %v10071_v54 = vld [vmem:[#allocation8 + $0x2c8] sm:$0xff]   ;;  %v10073_v39 = vld [vmem:[#allocation8 + $0x250] sm:$0xff]  }
 0xa63   : > { %9525 = vmatmul.mubr.bf16.vlgmr.msra.gmra.mrb[60].mxu1 %v5890_v37  ;;  %v5706_v11 = vxor.u32 2147483648, %v5705_v2 }
 0xa64   : > { %9528 = vmatprep.mubr.msk.bf16.mxu1 %vm15507_vm0, %v15484_v62  ;;  %v5882_v37 = vrot.slane %v5848_v1, 1  ;;  %v5874_v40 = vpack.c.bf16 %v5848_v1, %v5848_v1  ;;  %v5861_v18 = vrot.slane %v5848_v1, 7  ;;  %9537 = vmatpush3.bf16.msra.mxu1 %v10068_v41 }
 0xa65   : > { %v5707_v3 = vsel %vm5624_vm10, %v5706_v11, %v5705_v2  ;;  %vm15586_vm10 = vcmask 1040384   ;;  %9538 = vmatprep.subr.bf16.mxu1 %v15484_v62 }
 0xa66   : > { %v5710_v44 = vsel %vm5623_vm7, %v13936_v55, %v5707_v3  ;;  %v5858_v51 = vsel %vm15586_vm10, %v5855_v26, %v5857_v7  ;;  %vm15587_vm7 = vmmov %vm15586_vm10  ;;  %v8879_v6 = vpack.c.bf16 %v5882_v37, %v5882_v37 }
 0xa67   : > { %10256 = vcosq.f32 %v5710_v44  ;;  %vm15590_vm9 = vmmov %vm15587_vm7 }
 0xa68   : > { %10258 = vsinq.f32 %v5710_v44  ;;  %v10066_v44 = vld [vmem:[#allocation8 + $0x280] sm:$0xff]   ;;  %9539 = vmatpush3.bf16.msra.mxu1 %v10071_v54 }
 0xa69   : > { %9267 = vmatprep.subr.bf16.mxu0 %v10066_v44  ;;  %9540 = vmatprep.subr.bf16.mxu1 %v15484_v62 }
 0xa6a   : > { %9268 = vmatpush3.bf16.msra.mxu0 %v10067_v52 }
 0xa6b   : > { %9269 = vmatprep.subr.bf16.mxu0 %v10069_v45 }
 0xa6e   : > { %9270 = vmatpush3.bf16.msra.mxu0 %v10070_v19 }
 0xa71   : > { %v10257_v36 = vpop.eup %10256 }
 0xa72   : > { %v10259_v49 = vpop.eup %10258  ;;  %v5722_v29 = vxor.u32 2147483648, %v10257_v36 }
 0xa73   : > { %v5719_v17 = vxor.u32 2147483648, %v10259_v49 }
 0xa74   : > { %v5723_v46 = vsel %vm5721_vm12, %v5722_v29, %v10259_v49  ;;  %v10074_v29 = vld [vmem:[#allocation8 + $0x2d0] sm:$0xff]  }
 0xa75   : > { %v5720_v22 = vsel %vm5718_vm15, %v10257_v36, %v5719_v17  ;;  %v10072_v36 = vld [vmem:[#allocation8 + $0x290] sm:$0xff]   ;;  %9541 = vmatpush3.bf16.msra.mxu1 %v10074_v29 }
 0xa76   : > { %v5724_v0 = vsel %vm5717_vm8, %v5720_v22, %v5723_v46  ;;  %9271 = vmatprep.subr.bf16.mxu0 %v10072_v36  ;;  %v10075_v22 = vld [vmem:[#allocation8 + $0x298] sm:$0xff]   ;;  %9542 = vmatprep.subr.bf16.mxu1 %v15484_v62 }
 0xa77   : > { %v5725_v50 = vsel %vm5714_vm14, nan, %v5724_v0  ;;  %9272 = vmatpush3.bf16.msra.mxu0 %v10073_v39 }
 0xa78   : > { %v5833_v5 = vmul.f32 %v5725_v50, %v5725_v50  ;;  %9273 = vmatprep.subr.bf16.mxu0 %v10075_v22 }
 0xa7a   : > { %v5842_v35 = vmul.f32 %v13976_v16, %v5833_v5  ;;  %v10077_v5 = vld [vmem:[#allocation8 + $0x2d8] sm:$0xff]  }
 0xa7b   : > { %9543 = vmatpush3.bf16.msra.mxu1 %v10077_v5 }
 0xa7c   : > { %v5847_v59 = vadd.f32 %v5842_v35, %v13717_v63  ;;  %9544 = vmatprep.subr.bf16.mxu1 %v15484_v62 }
 0xa7e   : > { %v5873_v32 = vpack.c.bf16 %v5847_v59, %v14127_v28  ;;  %v5859_v8 = vrot.slane %v5847_v59, 7  ;;  %v5880_v55 = vrot.slane %v5847_v59, 1  ;;  %v10076_v59 = vld [vmem:[#allocation8 + $0x258] sm:$0xff]  }
 0xa7f   : > { %9274 = vmatpush3.bf16.msra.mxu0 %v10076_v59 }
 0xa80   : > { %6081 = vmatprep.mubr.bf16.mxu0 %v5873_v32  ;;  %v5860_v61 = vsel %vm15587_vm7, %v5857_v7, %v5859_v8  ;;  %v5881_v48 = vsel %vm15588_vm6, %v5878_v30, %v5880_v55  ;;  %v5883_v16 = vsel %vm15589_vm2, %v5880_v55, %v5882_v37  ;;  %v5862_v4 = vsel %vm15590_vm9, %v5859_v8, %v5861_v18  ;;  %v10078_v37 = vld [vmem:[#allocation8 + $0x2a0] sm:$0xff]   ;;  %v10086_v18 = vld [vmem:[#allocation8 + $0x2f0] sm:$0xff]  }
 0xa81   : > { %v5870_v2 = vpack.c.bf16 %v5860_v61, %v5858_v51  ;;  %v5891_v63 = vpack.c.bf16 %v5883_v16, %v5881_v48  ;;  %v5871_v26 = vpack.c.bf16 %v5862_v4, %v5862_v4  ;;  %v10080_v55 = vld [vmem:[#allocation8 + $0x2e0] sm:$0xff]   ;;  %9275 = vmatprep.subr.bf16.mxu0 %v10078_v37  ;;  %v10081_v16 = vld [vmem:[#allocation8 + $0x2a8] sm:$0xff]   ;;  %v10085_v4 = vld [vmem:[#allocation8 + $0x270] sm:$0xff]  }
 0xa82   : > { %v10079_v48 = vld [vmem:[#allocation8 + $0x260] sm:$0xff]   ;;  %9545 = vmatpush3.bf16.msra.mxu1 %v10080_v55 }
 0xa83   : > { %6082 = vmatmul.mubr.bf16.gmra.mrb[64].mxu0 %v5870_v2  ;;  %9529 = vmatmul.mubr.bf16.gmra.mrb[64].mxu1 %v5891_v63  ;;  %v10083_v2 = vld [vmem:[#allocation8 + $0x2e8] sm:$0xff]  }
 0xa84   : > { %6089 = vmatprep.mubr.bf16.mxu0 %v5874_v40  ;;  %9532 = vmatprep.mubr.msk.bf16.mxu1 %vm15507_vm0, %v15484_v62  ;;  %v10082_v63 = vld [vmem:[#allocation8 + $0x268] sm:$0xff]   ;;  %v10084_v40 = vld [vmem:[#allocation8 + $0x2b0] sm:$0xff]  }
 0xa85   : > { %9276 = vmatpush3.bf16.msra.mxu0 %v10079_v48  ;;  %9546 = vmatprep.subr.bf16.mxu1 %v15484_v62 }
 0xa86   : > { %9277 = vmatprep.subr.bf16.mxu0 %v10081_v16  ;;  %9547 = vmatpush3.bf16.msra.mxu1 %v10083_v2 }
 0xa87   : > { %9548 = vmatprep.subr.bf16.mxu1 %v15484_v62 }
 0xa89   : > { %9278 = vmatpush3.bf16.msra.mxu0 %v10082_v63 }
 0xa8a   : > { %9279 = vmatprep.subr.bf16.mxu0 %v10084_v40  ;;  %9549 = vmatpush3.bf16.msra.mxu1 %v10086_v18 }
 0xa8b   : > { %6090 = vmatmul.mubr.bf16.gmra.mrb[68].mxu0 %v5871_v26  ;;  %9533 = vmatmul.mubr.msk.bf16.gmra.mrb[68].mxu1 %vm12036_vm5, %v8879_v6  ;;  %v10087_v26 = vld [vmem:[#allocation8 + $0x2b8] sm:$0xff]  }
 0xa8c   : > { %9552 = vmatprep.mubr.msk.bf16.mxu1 %vm15507_vm0, %v15484_v62  ;;  %9550 = vmatprep.subr.bf16.mxu1 %v15484_v62  ;;  %v10088_v6 = vld [vmem:[#allocation8 + $0x278] sm:$0xff]  }
 0xa8d   : > { %9280 = vmatpush3.bf16.msra.mxu0 %v10085_v4 }
 0xa8e   : > { %9281 = vmatprep.subr.bf16.mxu0 %v10087_v26 }
 0xa91   : > { %9282 = vmatpush3.bf16.msra.mxu0 %v10088_v6 }
 0xb21   : > { %v9238_v30 = vpop.f32.mrb[60].mxu0 }
 0xb22   : > { %v9239_v27 = vpop.f32.mrb[61].mxu0 }
 0xb23   : > { %v9240_v11 = vadd.f32 %v9239_v27, %v9238_v30  ;;  %v9241_v34 = vpop.f32.mrb[62].mxu0 }
 0xb24   : > { %v9242_v3 = vpop.f32.mrb[63].mxu0 }
 0xb25   : > { %v9243_v60 = vadd.f32 %v9242_v3, %v9241_v34  ;;  %v6076_v49 = vadd.f32 %v9240_v11, %v14171_v42 }
 0xb27   : > { %v6079_v17 = vadd.f32 %v9243_v60, %v14171_v42 }
 0xb36   : > { %v6131_v46 = vpop.f32.mrb[60].mxu1 }
 0xb37   : > { %v14177_v0 = vadd.f32 %v6131_v46, %v6076_v49  ;;  %v9526_v50 = vpop.f32.mrb[61].mxu1 }
 0xb38   : > { %v6134_v1 = vpop.f32.mrb[62].mxu1 }
 0xb39   : > { %v14179_v35 = vadd.f32 %v6134_v1, %v6079_v17  ;;  %v9527_v7 = vpop.f32.mrb[63].mxu1  ;;  %v6163_v32 = vmul.f32 %v14177_v0, %v14177_v0 }
 0xb3b   : > { %v6153_v51 = vadd.f32 %v14179_v35, %v14177_v0  ;;  %v6164_v8 = vmul.f32 %v14179_v35, %v14179_v35 }
 0xb3d   : > { %v6168_v61 = vadd.f32 %v6164_v8, %v6163_v32 }
 0xb56   : > { %v9244_v30 = vpop.f32.mrb[64].mxu0  ;;  %v6139_v27 = vpop.f32.mrb[64].mxu1 }
 0xb57   : > { %v9245_v11 = vpop.f32.mrb[65].mxu0  ;;  %v9530_v34 = vpop.f32.mrb[65].mxu1 }
 0xb58   : > { %v9246_v3 = vadd.f32 %v9245_v11, %v9244_v30  ;;  %v9247_v60 = vpop.f32.mrb[66].mxu0  ;;  %v6142_v44 = vpop.f32.mrb[66].mxu1 }
 0xb59   : > { %v9248_v52 = vpop.f32.mrb[67].mxu0  ;;  %v9531_v41 = vpop.f32.mrb[67].mxu1 }
 0xb5a   : > { %v6084_v45 = vadd.f32 %v9246_v3, %v14171_v42  ;;  %v9249_v54 = vadd.f32 %v9248_v52, %v9247_v60 }
 0xb5c   : > { %v6140_v19 = vadd.f32 %v6139_v27, %v6084_v45  ;;  %v6087_v36 = vadd.f32 %v9249_v54, %v14171_v42 }
 0xb5e   : > { %v6154_v49 = vadd.f32 %v6153_v51, %v6140_v19  ;;  %v6165_v29 = vmul.f32 %v6140_v19, %v6140_v19  ;;  %v6143_v17 = vadd.f32 %v6142_v44, %v6087_v36  ;;  %v9250_v39 = vpop.f32.mrb[68].mxu0  ;;  %v6147_v46 = vpop.f32.mrb[68].mxu1 }
 0xb5f   : > { %v9251_v22 = vpop.f32.mrb[69].mxu0  ;;  %v9534_v50 = vpop.f32.mrb[69].mxu1 }
 0xb60   : > { %v6169_v1 = vadd.f32 %v6168_v61, %v6165_v29  ;;  %v6155_v5 = vadd.f32 %v6154_v49, %v6143_v17  ;;  %v6166_v7 = vmul.f32 %v6143_v17, %v6143_v17  ;;  %v9252_v59 = vadd.f32 %v9251_v22, %v9250_v39  ;;  %v9253_v37 = vpop.f32.mrb[70].mxu0  ;;  %v6150_v32 = vpop.f32.mrb[70].mxu1  ;;  %v10089_v49 = vld [vmem:[#allocation8 + $0x2f8] sm:$0xff]  }
 0xb61   : > { %v9254_v8 = vpop.f32.mrb[71].mxu0  ;;  %v9535_v55 = vpop.f32.mrb[71].mxu1  ;;  %9551 = vmatpush3.bf16.msra.mxu1 %v10089_v49 }
 0xb62   : > { %v6170_v48 = vadd.f32 %v6169_v1, %v6166_v7  ;;  %v6092_v16 = vadd.f32 %v9252_v59, %v14171_v42  ;;  %9564 = vmatprep.subr.bf16.mxu1 %v15484_v62  ;;  %v6215_v55 = vld [vmem:[#allocation7 + $0x18] sm:$0xff] }
 0xb64   : > { %v6148_v2 = vadd.f32 %v6147_v46, %v6092_v16  ;;  %v15593_v46 = vld [vmem:[#allocation27_spill] sm:$0xff] }
 0xb66   : > { %v6156_v63 = vadd.f32 %v6155_v5, %v6148_v2  ;;  %v6167_v51 = vmul.f32 %v6148_v2, %v6148_v2 }
 0xb68   : > { %v6157_v40 = vrot.slane %v6156_v63, 4  ;;  %v6171_v18 = vadd.f32 %v6170_v48, %v6167_v51  ;;  %v15594_v48 = vld [vmem:[#allocation28_spill] sm:$0xff] }
 0xb6a   : > { %v6158_v4 = vadd.f32 %v6157_v40, %v6156_v63  ;;  %v6172_v26 = vrot.slane %v6171_v18, 4  ;;  %v15595_v63 = vld [vmem:[#allocation20_spill] sm:$0xff] }
 0xb6b   : > { %v14203_v51 = vrot.slane %v6215_v55, %v15595_v63 }
 0xb6c   : > { %v6159_v6 = vrot.slane %v6158_v4, 2  ;;  %v6173_v30 = vadd.f32 %v6172_v26, %v6171_v18 }
 0xb6e   : > { %v6160_v61 = vadd.f32 %v6159_v6, %v6158_v4  ;;  %v6174_v27 = vrot.slane %v6173_v30, 2 }
 0xb70   : > { %v6161_v11 = vrot.slane %v6160_v61, 1  ;;  %v6175_v34 = vadd.f32 %v6174_v27, %v6173_v30 }
 0xb72   : > { %v6162_v3 = vadd.f32 %v6161_v11, %v6160_v61  ;;  %v6176_v60 = vrot.slane %v6175_v34, 1 }
 0xb74   : > { %v6177_v44 = vadd.f32 %v6176_v60, %v6175_v34  ;;  %v6178_v52 = vmul.f32 0.025, %v6162_v3 }
 0xb76   : > { %v6179_v41 = vmul.f32 0.025, %v6177_v44  ;;  %v6180_v45 = vmul.f32 %v6178_v52, %v6178_v52 }
 0xb78   : > { %v6181_v42 = vsub.f32 %v6179_v41, %v6180_v45 }
 0xb7a   : > { %v6182_v54 = vmax.f32 %v6181_v42, 0.0 }
 0xb7c   : > { %v6183_v36 = vadd.f32 1e-05, %v6182_v54 }
 0xb7e   : > { %10260 = vrsqrt.f32 %v6183_v36 }
 0xb88   : > { %v10261_v29 = vpop.eup %10260 }
 0xb89   : > { %v6185_v39 = vmul.f32 %v14167_v47, %v10261_v29 }
 0xb8b   : > { %v6189_v22 = vrot.slane %v6185_v39, %v15593_v46  ;;  %v6195_v50 = vmul.f32 %v6185_v39, %v6178_v52 }
 0xb8d   : > { %v6194_v1 = vmul.f32 %v6189_v22, %v6148_v2  ;;  %v6197_v5 = vrot.slane %v6195_v50, 7  ;;  %v6190_v7 = vmul.f32 %v6189_v22, %v14177_v0  ;;  %v6191_v59 = vmul.f32 %v6189_v22, %v14179_v35 }
 0xb8e   : > { %v6192_v37 = vmul.f32 %v6189_v22, %v6140_v19  ;;  %v6193_v32 = vmul.f32 %v6189_v22, %v6143_v17 }
 0xb8f   : > { %v6199_v8 = vsub.f32 %v14167_v47, %v6197_v5  ;;  %v14243_v5 = vadd.f32 1e-09, %v6215_v55 }
 0xb91   : > { %v6203_v16 = vrot.slane %v6199_v8, %v15594_v48  ;;  %10262 = vrcp.f32 %v14243_v5 }
 0xb93   : > { %v6208_v40 = vadd.f32 %v6203_v16, %v6194_v1  ;;  %v6204_v18 = vadd.f32 %v6203_v16, %v6190_v7  ;;  %v6205_v4 = vadd.f32 %v6203_v16, %v6191_v59  ;;  %v6206_v26 = vadd.f32 %v6203_v16, %v6192_v37 }
 0xb94   : > { %v6207_v2 = vadd.f32 %v6203_v16, %v6193_v32 }
 0xb95   : > { %v14206_v6 = vadd.f32 %v6208_v40, %v13149_v14  ;;  %v14209_v0 = vadd.f32 %v6204_v18, %v13152_v15  ;;  %v14212_v35 = vadd.f32 %v6205_v4, %v13155_v56  ;;  %v14227_v14 = vadd.f32 %v6206_v26, %v13170_v38 }
 0xb96   : > { %v14249_v37 = vadd.f32 %v6207_v2, %v13192_v31 }
 0xb97   : > { %v14216_v47 = vmul.f32 %v14203_v51, %v14206_v6  ;;  %v14220_v19 = vmul.f32 %v14203_v51, %v14209_v0  ;;  %v14224_v17 = vmul.f32 %v14203_v51, %v14212_v35  ;;  %v14236_v3 = vmul.f32 %v14203_v51, %v14227_v14 }
 0xb99   : > { %v6745_v15 = vand.u32 2139095040, %v14216_v47  ;;  %v15418_v56 = vand.u32 2147483647, %v14220_v19  ;;  %v6329_v30 = vand.u32 2139095040, %v14220_v19  ;;  %v15417_v61 = vand.u32 2147483647, %v14224_v17 }
 0xb9a   : > { %v6433_v27 = vand.u32 2139095040, %v14224_v17  ;;  %v6537_v36 = vand.u32 2139095040, %v14236_v3 }
 0xb9b   : > { %v6746_v11 = vshrl.u32 %v6745_v15, 23  ;;  %v6330_v34 = vshrl.u32 %v6329_v30, 23  ;;  %v6333_v52 = vand.u32 8388607, %v15418_v56  ;;  %v6437_v45 = vand.u32 8388607, %v15417_v61 }
 0xb9c   : > { %v6434_v60 = vshrl.u32 %v6433_v27, 23  ;;  %v6538_v1 = vshrl.u32 %v6537_v36, 23 }
 0xb9d   : > { %v8897_v44 = vadd.s32 4294967169, %v6746_v11  ;;  %v8881_v38 = vadd.s32 4294967169, %v6330_v34  ;;  %v6334_v49 = vor.u32 8388608, %v6333_v52  ;;  %v6438_v39 = vor.u32 8388608, %v6437_v45 }
 0xb9e   : > { %v8885_v41 = vadd.s32 4294967169, %v6434_v60  ;;  %v8889_v55 = vadd.s32 4294967169, %v6538_v1 }
 0xb9f   : > { %v6752_v42 = vadd.s32 1, %v8897_v44  ;;  %v6336_v54 = vadd.s32 1, %v8881_v38  ;;  %v14245_v7 = vshll.u32 %v6334_v49, 8  ;;  %v14253_v16 = vshll.u32 %v6438_v39, 8 }
 0xba0   : > { %v6440_v22 = vadd.s32 1, %v8885_v41 }
 0xba1   : > { %vm6337_vm11 = vcmp.gt.s32.totalorder %v6336_v54, 0  ;;  %vm6753_vm12 = vcmp.gt.s32.totalorder %v6752_v42, 0 }
 0xba2   : > { %v6338_v29 = vsel %vm6337_vm11, %v6336_v54, 0  ;;  %v14251_v32 = vsel %vm6753_vm12, %v6752_v42, 0  ;;  %vm6441_vm15 = vcmp.gt.s32.totalorder %v6440_v22, 0 }
 0xba3   : > { %v6340_v50 = vand.u32 31, %v6338_v29  ;;  %v6339_v40 = vshrl.u32 %v6338_v29, 5  ;;  %v14267_v41 = vand.u32 31, %v14251_v32  ;;  %v6442_v36 = vsel %vm6441_vm15, %v6440_v22, 0 }
 0xba5   : > { %v6341_v8 = vsub.s32 32, %v6340_v50  ;;  %v6343_v18 = vshll.u32 %v15497_v25, %v6340_v50  ;;  %v6346_v4 = vshll.u32 %v15470_v24, %v6340_v50  ;;  %v6349_v30 = vshll.u32 %v15471_v10, %v6340_v50 }
 0xba6   : > { %v6352_v2 = vshll.u32 %v15472_v57, %v6340_v50  ;;  %v6355_v11 = vshll.u32 %v15565_v43, %v6340_v50  ;;  %vm6358_vm8 = vcmp.lt.s32.totalorder %v6339_v40, 1  ;;  %vm6360_vm14 = vcmp.lt.s32.totalorder %v6339_v40, 3 }
 0xba7   : > { %v6344_v26 = vshrl.u32 %v15470_v24, %v6341_v8  ;;  %v6347_v15 = vshrl.u32 %v15471_v10, %v6341_v8  ;;  %v6350_v31 = vshrl.u32 %v15472_v57, %v6341_v8  ;;  %v6353_v27 = vshrl.u32 %v15565_v43, %v6341_v8 }
 0xba8   : > { %v6356_v34 = vshrl.u32 %v15566_v58, %v6341_v8  ;;  %v6342_v60 = vshrl.u32 %v15497_v25, %v6341_v8  ;;  %vm6361_vm10 = vcmp.lt.s32.totalorder %v6339_v40, 4  ;;  %vm6359_vm7 = vcmp.lt.s32.totalorder %v6339_v40, 2 }
 0xba9   : > { %v6345_v44 = vor.u32 %v6344_v26, %v6343_v18  ;;  %v6348_v38 = vor.u32 %v6347_v15, %v6346_v4  ;;  %v6351_v52 = vor.u32 %v6350_v31, %v6349_v30  ;;  %v6354_v45 = vor.u32 %v6353_v27, %v6352_v2 }
 0xbaa   : > { %v6357_v42 = vor.u32 %v6356_v34, %v6355_v11  ;;  %v6444_v30 = vand.u32 31, %v6442_v36  ;;  %v6544_v11 = vadd.s32 1, %v8889_v55 }
 0xbab   : > { %v6362_v54 = vsel %vm6358_vm8, %v6342_v60, %v6345_v44  ;;  %v6363_v49 = vsel %vm6361_vm10, %v6351_v52, 2102212464  ;;  %v6366_v29 = vsel %vm6358_vm8, %v6345_v44, %v6348_v38  ;;  %v6367_v39 = vsel %vm6361_vm10, %v6354_v45, 920167782 }
 0xbac   : > { %v6370_v50 = vsel %vm6358_vm8, %v6348_v38, %v6351_v52  ;;  %v6364_v1 = vsel %vm6360_vm14, %v6348_v38, %v6363_v49  ;;  %v6368_v8 = vsel %vm6360_vm14, %v6351_v52, %v6367_v39  ;;  %v6371_v18 = vsel %vm6361_vm10, %v6357_v42, 1326507024 }
 0xbad   : > { %v6365_v4 = vsel %vm6359_vm7, %v6362_v54, %v6364_v1  ;;  %v6369_v26 = vsel %vm6359_vm7, %v6366_v29, %v6368_v8  ;;  %v6372_v15 = vsel %vm6360_vm14, %v6354_v45, %v6371_v18  ;;  %v6443_v60 = vshrl.u32 %v6442_v36, 5 }
 0xbae   : > { %v6373_v31 = vsel %vm6359_vm7, %v6370_v50, %v6372_v15  ;;  %v14271_v2 = vmul.u32.u64.low %v14245_v7, %v6369_v26  ;;  %v14272_v27 = vmul.u32.u64.high %v14245_v7, %v6369_v26, %v14271_v2  ;;  %v6445_v40 = vsub.s32 32, %v6444_v30 }
 0xbaf   : > { %v14276_v22 = vmul.u32.u64.low %v14245_v7, %v6373_v31  ;;  %v14277_v34 = vmul.u32.u64.high %v14245_v7, %v6373_v31, %v14276_v22  ;;  %v6381_v44 = vmul.u32 %v14245_v7, %v6365_v4  ;;  %v6447_v38 = vshll.u32 %v15497_v25, %v6444_v30 }
 0xbb0   : > { %v6450_v52 = vshll.u32 %v15470_v24, %v6444_v30  ;;  %v6453_v45 = vshll.u32 %v15471_v10, %v6444_v30  ;;  %v6448_v42 = vshrl.u32 %v15470_v24, %v6445_v40  ;;  %v6451_v54 = vshrl.u32 %v15471_v10, %v6445_v40 }
 0xbb1   : > { %v6454_v55 = vshrl.u32 %v15472_v57, %v6445_v40  ;;  %v6456_v49 = vshll.u32 %v15472_v57, %v6444_v30  ;;  %v6384_v29 = vadd.s32 1, %v14272_v27  ;;  %v6457_v36 = vshrl.u32 %v15565_v43, %v6445_v40 }
 0xbb2   : > { %v6459_v7 = vshll.u32 %v15565_v43, %v6444_v30  ;;  %v6460_v39 = vshrl.u32 %v15566_v58, %v6445_v40  ;;  %vm6383_vm6 = vc.u32 %v14277_v34, %v14271_v2  ;;  %v6446_v50 = vshrl.u32 %v15497_v25, %v6445_v40 }
 0xbb3   : > { %v6449_v1 = vor.u32 %v6448_v42, %v6447_v38  ;;  %v6452_v8 = vor.u32 %v6451_v54, %v6450_v52  ;;  %v6385_v18 = vsel %vm6383_vm6, %v6384_v29, %v14272_v27  ;;  %v6455_v4 = vor.u32 %v6454_v55, %v6453_v45 }
 0xbb4   : > { %v6458_v26 = vor.u32 %v6457_v36, %v6456_v49  ;;  %v6461_v15 = vor.u32 %v6460_v39, %v6459_v7  ;;  %v6386_v31 = vadd.s32 %v6385_v18, %v6381_v44  ;;  %vm6462_vm2 = vcmp.lt.s32.totalorder %v6443_v60, 1 }
 0xbb5   : > { %vm6463_vm9 = vcmp.lt.s32.totalorder %v6443_v60, 2  ;;  %vm6465_vm11 = vcmp.lt.s32.totalorder %v6443_v60, 4  ;;  %vm6464_vm12 = vcmp.lt.s32.totalorder %v6443_v60, 3  ;;  %v6470_v22 = vsel %vm6462_vm2, %v6449_v1, %v6452_v8 }
 0xbb6   : > { %v6467_v30 = vsel %vm6465_vm11, %v6455_v4, 2102212464  ;;  %v6471_v61 = vsel %vm6465_vm11, %v6458_v26, 920167782  ;;  %v6387_v56 = vadd.s32 536870912, %v6386_v31  ;;  %v6466_v59 = vsel %vm6462_vm2, %v6446_v50, %v6449_v1 }
 0xbb7   : > { %v6472_v48 = vsel %vm6464_vm12, %v6455_v4, %v6471_v61  ;;  %v6474_v46 = vsel %vm6462_vm2, %v6452_v8, %v6455_v4  ;;  %v6468_v40 = vsel %vm6464_vm12, %v6452_v8, %v6467_v30  ;;  %v6475_v52 = vsel %vm6465_vm11, %v6461_v15, 1326507024 }
 0xbb8   : > { %v6473_v38 = vsel %vm6463_vm9, %v6470_v22, %v6472_v48  ;;  %vm6545_vm15 = vcmp.gt.s32.totalorder %v6544_v11, 0  ;;  %v6388_v27 = vshrl.u32 %v6387_v56, 30  ;;  %v6476_v45 = vsel %vm6464_vm12, %v6458_v26, %v6475_v52 }
 0xbb9   : > { %v14297_v44 = vmul.u32.u64.low %v14253_v16, %v6473_v38  ;;  %v14298_v42 = vmul.u32.u64.high %v14253_v16, %v6473_v38, %v14297_v44  ;;  %v6477_v54 = vsel %vm6463_vm9, %v6474_v46, %v6476_v45  ;;  %v15596_v55 = vand.u32 2147483647, %v14236_v3 }
 0xbba   : > { %v6546_v29 = vsel %vm6545_vm15, %v6544_v11, 0  ;;  %v6389_v61 = vshll.u32 %v6388_v27, 30  ;;  %v6469_v36 = vsel %vm6463_vm9, %v6466_v59, %v6468_v40  ;;  %v14311_v39 = vmul.f32 %v14203_v51, %v14249_v37 }
 0xbbb   : > { %v6541_v49 = vand.u32 8388607, %v15596_v55  ;;  %v14306_v48 = vmul.u32.u64.low %v14253_v16, %v6477_v54  ;;  %v14307_v7 = vmul.u32.u64.high %v14253_v16, %v6477_v54, %v14306_v48  ;;  %v6548_v56 = vand.u32 31, %v6546_v29 }
 0xbbc   : > { %v14314_v50 = vsub.s32 32, %v14267_v41  ;;  %v14317_v46 = vsub.s32 %v6386_v31, %v6389_v61  ;;  %v6488_v11 = vadd.s32 1, %v14298_v42  ;;  %v15597_v59 = vand.u32 2147483647, %v14220_v19 }
 0xbbd   : > { %vm6328_vm14 = vcmp.lt.s32.totalorder %v14220_v19, 0  ;;  %v6485_v51 = vmul.u32 %v14253_v16, %v6469_v36  ;;  %v6542_v1 = vor.u32 8388608, %v6541_v49  ;;  %v6412_v18 = vsub.s32 4, %v6388_v27 }
 0xbbe   : > { %vm14322_vm8 = vcmp.le.f32.partialorder %v15597_v59, 0.7853982  ;;  %v6392_v8 = vsub.s32 0, %v14317_v46  ;;  %vm6487_vm10 = vc.u32 %v14307_v7, %v14297_v44  ;;  %v6549_v5 = vsub.s32 32, %v6548_v56 }
 0xbbf   : > { %v14332_v4 = vshrl.u32 %v14251_v32, 5  ;;  %v14336_v26 = vshll.u32 %v15472_v57, %v14267_v41  ;;  %v6489_v15 = vsel %vm6487_vm10, %v6488_v11, %v14298_v42  ;;  %v14342_v16 = vshrl.u32 %v15565_v43, %v14314_v50 }
 0xbc0   : > { %v14346_v30 = vshll.u32 %v15565_v43, %v14267_v41  ;;  %v8882_v22 = vmin.u32 %v6392_v8, %v14317_v46  ;;  %v6490_v32 = vadd.s32 %v6489_v15, %v6485_v51  ;;  %v14351_v40 = vshrl.u32 %v15566_v58, %v14314_v50 }
 0xbc1   : > { %v6382_v38 = vadd.s32 %v14271_v2, %v14277_v34  ;;  %v14355_v52 = vshrl.u32 %v6546_v29, 5  ;;  %v14357_v45 = vshll.u32 %v6542_v1, 8  ;;  %v14361_v54 = vsel %vm6328_vm14, %v6412_v18, %v6388_v27  ;;  %v14373_v18 = vpop.eup %10262 }
 0xbc2   : > { %v6394_v42 = vclz %v8882_v22  ;;  %v6552_v55 = vshrl.u32 %v15470_v24, %v6549_v5  ;;  %v6555_v49 = vshrl.u32 %v15471_v10, %v6549_v5  ;;  %v6491_v61 = vadd.s32 536870912, %v6490_v32  ;;  %15600 = vst [vmem:[#allocation29_spill] sm:$0xff] %v14373_v18 }
 0xbc3   : > { %v6558_v36 = vshrl.u32 %v15472_v57, %v6549_v5  ;;  %v6560_v48 = vshll.u32 %v15472_v57, %v6548_v56  ;;  %v6561_v2 = vshrl.u32 %v15565_v43, %v6549_v5  ;;  %v6551_v29 = vshll.u32 %v15497_v25, %v6548_v56 }
 0xbc4   : > { %v8883_v34 = vadd.s32 4294967294, %v6394_v42  ;;  %v6564_v11 = vshrl.u32 %v15566_v58, %v6549_v5  ;;  %v6641_v59 = vand.u32 2139095040, %v14311_v39  ;;  %v6492_v27 = vshrl.u32 %v6491_v61, 30 }
 0xbc5   : > { %v6554_v51 = vshll.u32 %v15470_v24, %v6548_v56  ;;  %v6557_v1 = vshll.u32 %v15471_v10, %v6548_v56  ;;  %v6562_v8 = vor.u32 %v6561_v2, %v6560_v48  ;;  %v6415_v15 = vsel %vm14322_vm8, 0, %v14361_v54 }
 0xbc6   : > { %vm8884_vm7 = vcmp.lt.s32.totalorder %v8883_v34, 0  ;;  %v6553_v22 = vor.u32 %v6552_v55, %v6551_v29  ;;  %v6563_v42 = vshll.u32 %v15565_v43, %v6548_v56  ;;  %v6493_v33 = vshll.u32 %v6492_v27, 30 }
 0xbc7   : > { %v6397_v31 = vsel %vm8884_vm7, 0, %v8883_v34  ;;  %v6556_v28 = vor.u32 %v6555_v49, %v6554_v51  ;;  %v6559_v23 = vor.u32 %v6558_v36, %v6557_v1  ;;  %vm6569_vm6 = vcmp.lt.s32.totalorder %v14355_v52, 4 }
 0xbc8   : > { %v6398_v61 = vsub.s32 32, %v6397_v31  ;;  %v6402_v53 = vsub.s32 4294967266, %v6397_v31  ;;  %v6565_v21 = vor.u32 %v6564_v11, %v6563_v42  ;;  %vm6432_vm2 = vcmp.lt.s32.totalorder %v14224_v17, 0 }
 0xbc9   : > { %v14381_v48 = vsub.s32 %v6490_v32, %v6493_v33  ;;  %v6550_v2 = vshrl.u32 %v15497_v25, %v6549_v5  ;;  %vm6566_vm9 = vcmp.lt.s32.totalorder %v14355_v52, 1  ;;  %v6575_v56 = vsel %vm6569_vm6, %v6562_v8, 920167782 }
 0xbca   : > { %v6399_v54 = vshll.u32 %v14317_v46, %v6397_v31  ;;  %v6400_v55 = vshrl.u32 %v6382_v38, %v6398_v61  ;;  %v6403_v49 = vadd.s32 127, %v6402_v53  ;;  %vm6568_vm11 = vcmp.lt.s32.totalorder %v14355_v52, 3 }
 0xbcb   : > { %v6496_v36 = vsub.s32 0, %v14381_v48  ;;  %v6574_v34 = vsel %vm6566_vm9, %v6553_v22, %v6556_v28  ;;  %v6576_v33 = vsel %vm6568_vm11, %v6559_v23, %v6575_v56  ;;  %v6578_v5 = vsel %vm6566_vm9, %v6556_v28, %v6559_v23 }
 0xbcc   : > { %v6401_v32 = vor.u32 %v6400_v55, %v6399_v54  ;;  %v6404_v29 = vshll.u32 %v6403_v49, 23  ;;  %v15601_v11 = vand.u32 2147483647, %v14224_v17  ;;  %v6571_v53 = vsel %vm6569_vm6, %v6559_v23, 2102212464 }
 0xbcd   : > { %v6579_v31 = vsel %vm6569_vm6, %v6565_v21, 1326507024  ;;  %v8886_v38 = vmin.u32 %v6496_v36, %v14381_v48  ;;  %vm6567_vm15 = vcmp.lt.s32.totalorder %v14355_v52, 2  ;;  %v6642_v1 = vshrl.u32 %v6641_v59, 23 }
 0xbce   : > { %vm14398_vm12 = vcmp.le.f32.partialorder %v15601_v11, 0.7853982  ;;  %v6580_v51 = vsel %vm6568_vm11, %v6562_v8, %v6579_v31  ;;  %v6405_v42 = vor.u32 4788187, %v6404_v29  ;;  %v6516_v61 = vsub.s32 4, %v6492_v27 }
 0xbcf   : > { %v6577_v56 = vsel %vm6567_vm15, %v6574_v34, %v6576_v33  ;;  %v6581_v54 = vsel %vm6567_vm15, %v6578_v5, %v6580_v51  ;;  %v6408_v23 = vcvt.s32.f32 %v6401_v32  ;;  %v6498_v55 = vclz %v8886_v38 }
 0xbd0   : > { %v6570_v21 = vsel %vm6566_vm9, %v6550_v2, %v6553_v22  ;;  %v6572_v49 = vsel %vm6568_vm11, %v6556_v28, %v6571_v53  ;;  %v6406_v36 = vand.u32 2147483647, %v6405_v42  ;;  %v8893_v29 = vadd.s32 4294967169, %v6642_v1 }
 0xbd1   : > { %v14419_v8 = vmul.u32.u64.low %v14357_v45, %v6581_v54  ;;  %v14420_v59 = vmul.u32.u64.high %v14357_v45, %v6581_v54, %v14419_v8  ;;  %v14424_v34 = vor.u32 %v14342_v16, %v14336_v26  ;;  %v8887_v33 = vadd.s32 4294967294, %v6498_v55 }
 0xbd2   : > { %v14427_v5 = vmul.u32.u64.low %v14357_v45, %v6577_v56  ;;  %v14428_v32 = vmul.u32.u64.high %v14357_v45, %v6577_v56, %v14427_v5  ;;  %v6773_v22 = vor.u32 %v14351_v40, %v14346_v30  ;;  %v6409_v28 = vmul.f32 %v6408_v23, %v6406_v36 }
 0xbd3   : > { %v6517_v2 = vsel %vm6432_vm2, %v6516_v61, %v6492_v27  ;;  %v6648_v11 = vadd.s32 1, %v8893_v29  ;;  %v6419_v53 = vadd.s32 3, %v6415_v15  ;;  %vm8888_vm10 = vcmp.lt.s32.totalorder %v8887_v33, 0 }
 0xbd4   : > { %v6573_v26 = vsel %vm6567_vm15, %v6570_v21, %v6572_v49  ;;  %v15604_v16 = vand.u32 2147483647, %v14311_v39  ;;  %v6410_v38 = vxor.u32 2147483648, %v6409_v28  ;;  %v6486_v51 = vadd.s32 %v14297_v44, %v14307_v7 }
 0xbd5   : > { %v6501_v1 = vsel %vm8888_vm10, 0, %v8887_v33  ;;  %vm6591_vm7 = vc.u32 %v14420_v59, %v14427_v5  ;;  %v6519_v27 = vsel %vm14398_vm12, 0, %v6517_v2  ;;  %v6592_v15 = vadd.s32 1, %v14428_v32 }
 0xbd6   : > { %v6645_v31 = vand.u32 8388607, %v15604_v16  ;;  %v6502_v30 = vsub.s32 32, %v6501_v1  ;;  %v6506_v40 = vsub.s32 4294967266, %v6501_v1  ;;  %v6411_v52 = vsel %vm6328_vm14, %v6410_v38, %v6409_v28 }
 0xbd7   : > { %v6503_v42 = vshll.u32 %v14381_v48, %v6501_v1  ;;  %v6589_v61 = vmul.u32 %v14357_v45, %v6573_v26  ;;  %vm6649_vm6 = vcmp.gt.s32.totalorder %v6648_v11, 0  ;;  %v6414_v44 = vsel %vm14322_vm8, %v14220_v19, %v6411_v52 }
 0xbd8   : > { %v6504_v7 = vshrl.u32 %v6486_v51, %v6502_v30  ;;  %v6507_v56 = vadd.s32 127, %v6506_v40  ;;  %v6593_v54 = vsel %vm6591_vm7, %v6592_v15, %v14428_v32  ;;  %10264 = vcosq.f32 %v6414_v44 }
 0xbd9   : > { %v14454_v23 = vand.u32 3, %v6419_v53  ;;  %v6594_v55 = vadd.s32 %v6593_v54, %v6589_v61  ;;  %v6650_v21 = vsel %vm6649_vm6, %v6648_v11, 0  ;;  %10266 = vsinq.f32 %v6414_v44 }
 0xbda   : > { %v6505_v49 = vor.u32 %v6504_v7, %v6503_v42  ;;  %v6508_v36 = vshll.u32 %v6507_v56, 23  ;;  %v6523_v48 = vadd.s32 3, %v6519_v27  ;;  %v6646_v45 = vor.u32 8388608, %v6645_v31 }
 0xbdb   : > { %v6595_v8 = vadd.s32 536870912, %v6594_v55  ;;  %v6652_v29 = vand.u32 31, %v6650_v21  ;;  %vm6777_vm14 = vcmp.lt.s32.totalorder %v14332_v4, 4  ;;  %v14459_v33 = vrot.slane %v14373_v18, %v15595_v63 }
 0xbdc   : > { %v6509_v60 = vor.u32 4788187, %v6508_v36  ;;  %v14464_v32 = vsel %vm6777_vm14, %v14424_v34, 920167782  ;;  %v14468_v28 = vsel %vm6777_vm14, %v6773_v22, 1326507024  ;;  %v6512_v26 = vcvt.s32.f32 %v6505_v49 }
 0xbdd   : > { %v14470_v2 = vshrl.u32 %v6595_v8, 30  ;;  %v6653_v11 = vsub.s32 32, %v6652_v29  ;;  %vm6422_vm8 = vcmp.eq.s32.totalorder %v14454_v23, 0  ;;  %vm6425_vm9 = vcmp.eq.s32.totalorder %v14454_v23, 2 }
 0xbde   : > { %v6510_v53 = vand.u32 2147483647, %v6509_v60  ;;  %v14474_v16 = vand.u32 3, %v6523_v48  ;;  %vm6421_vm11 = vcmp.lt.s32.totalorder %v14454_v23, 2  ;;  %v14478_v38 = vshll.u32 %v6646_v45, 8 }
 0xbdf   : > { %v6597_v31 = vshll.u32 %v14470_v2, 30  ;;  %v14483_v51 = vshrl.u32 %v15497_v25, %v14314_v50  ;;  %v6656_v30 = vshrl.u32 %v15470_v24, %v6653_v11  ;;  %v6659_v40 = vshrl.u32 %v15471_v10, %v6653_v11 }
 0xbe0   : > { %v6513_v1 = vmul.f32 %v6512_v26, %v6510_v53  ;;  %v14489_v27 = vshll.u32 %v15497_v25, %v14267_v41  ;;  %v14493_v52 = vshrl.u32 %v6650_v21, 5  ;;  %v6655_v42 = vshll.u32 %v15497_v25, %v6652_v29 }
 0xbe1   : > { %v14491_v15 = vsub.s32 %v6594_v55, %v6597_v31  ;;  %v6662_v61 = vshrl.u32 %v15472_v57, %v6653_v11  ;;  %vm6418_vm15 = vweird.f32 %v14220_v19  ;;  %v6658_v7 = vshll.u32 %v15470_v24, %v6652_v29 }
 0xbe2   : > { %v6514_v44 = vxor.u32 2147483648, %v6513_v1  ;;  %v6665_v56 = vshrl.u32 %v15565_v43, %v6653_v11  ;;  %v6668_v54 = vshrl.u32 %v15566_v58, %v6653_v11  ;;  %v10265_v49 = vpop.eup %10264  ;;  %v6661_v55 = vshll.u32 %v15471_v10, %v6652_v29 }
 0xbe3   : > { %v6600_v36 = vsub.s32 0, %v14491_v15  ;;  %v6664_v21 = vshll.u32 %v15472_v57, %v6652_v29  ;;  %v6667_v48 = vshll.u32 %v15565_v43, %v6652_v29  ;;  %v10267_v8 = vpop.eup %10266  ;;  %v6426_v45 = vxor.u32 2147483648, %v10265_v49 }
 0xbe4   : > { %v6515_v60 = vsel %vm6432_vm2, %v6514_v44, %v6513_v1  ;;  %v6657_v53 = vor.u32 %v6656_v30, %v6655_v42  ;;  %v6660_v26 = vor.u32 %v6659_v40, %v6658_v7  ;;  %v6423_v31 = vxor.u32 2147483648, %v10267_v8 }
 0xbe5   : > { %v6518_v22 = vsel %vm14398_vm12, %v14224_v17, %v6515_v60  ;;  %v8890_v63 = vmin.u32 %v6600_v36, %v14491_v15  ;;  %v6663_v18 = vor.u32 %v6662_v61, %v6661_v55  ;;  %v6427_v58 = vsel %vm6425_vm9, %v6426_v45, %v10267_v8 }
 0xbe6   : > { %10268 = vcosq.f32 %v6518_v22  ;;  %v6666_v29 = vor.u32 %v6665_v56, %v6664_v21  ;;  %v6669_v43 = vor.u32 %v6668_v54, %v6667_v48  ;;  %v6424_v13 = vsel %vm6422_vm8, %v10265_v49, %v6423_v31 }
 0xbe7   : > { %10270 = vsinq.f32 %v6518_v22  ;;  %v6590_v1 = vadd.s32 %v14427_v5, %v14420_v59  ;;  %v6602_v30 = vclz %v8890_v63  ;;  %v6428_v46 = vsel %vm6421_vm11, %v6424_v13, %v6427_v58 }
 0xbe8   : > { %v6654_v40 = vshrl.u32 %v15497_v25, %v6653_v11  ;;  %vm6670_vm2 = vcmp.lt.s32.totalorder %v14493_v52, 1  ;;  %vm6671_vm12 = vcmp.lt.s32.totalorder %v14493_v52, 2  ;;  %vm6672_vm10 = vcmp.lt.s32.totalorder %v14493_v52, 3 }
 0xbe9   : > { %v8891_v42 = vadd.s32 4294967294, %v6602_v30  ;;  %vm6673_vm7 = vcmp.lt.s32.totalorder %v14493_v52, 4  ;;  %v6678_v22 = vsel %vm6670_vm2, %v6657_v53, %v6660_v26  ;;  %vm6529_vm6 = vcmp.eq.s32.totalorder %v14474_v16, 2 }
 0xbea   : > { %v6675_v63 = vsel %vm6673_vm7, %v6663_v18, 2102212464  ;;  %v6679_v59 = vsel %vm6673_vm7, %v6666_v29, 920167782  ;;  %v6682_v13 = vsel %vm6670_vm2, %v6660_v26, %v6663_v18  ;;  %v6683_v58 = vsel %vm6673_vm7, %v6669_v43, 1326507024 }
 0xbeb   : > { %v6429_v5 = vsel %vm6418_vm15, nan, %v6428_v46  ;;  %vm6526_vm8 = vcmp.eq.s32.totalorder %v14474_v16, 0  ;;  %vm8892_vm9 = vcmp.lt.s32.totalorder %v8891_v42, 0  ;;  %v6680_v23 = vsel %vm6672_vm10, %v6663_v18, %v6679_v59 }
 0xbec   : > { %v6684_v11 = vsel %vm6672_vm10, %v6666_v29, %v6683_v58  ;;  %vm6525_vm11 = vcmp.lt.s32.totalorder %v14474_v16, 2  ;;  %v6605_v61 = vsel %vm8892_vm9, 0, %v8891_v42  ;;  %v6681_v44 = vsel %vm6671_vm12, %v6678_v22, %v6680_v23 }
 0xbed   : > { %v6685_v43 = vsel %vm6671_vm12, %v6682_v13, %v6684_v11  ;;  %v15605_v19 = vand.u32 2147483647, %v14216_v47  ;;  %vm6522_vm15 = vweird.f32 %v14224_v17  ;;  %v6606_v56 = vsub.s32 32, %v6605_v61 }
 0xbee   : > { %v6610_v54 = vsub.s32 4294967266, %v6605_v61  ;;  %v6674_v18 = vsel %vm6670_vm2, %v6654_v40, %v6657_v53  ;;  %v6676_v49 = vsel %vm6672_vm10, %v6660_v26, %v6675_v63  ;;  %v6846_v36 = vmul.f32 %v6429_v5, %v6429_v5 }
 0xbef   : > { %v6749_v7 = vand.u32 8388607, %v15605_v19  ;;  %v6607_v55 = vshll.u32 %v14491_v15, %v6605_v61  ;;  %v14550_v21 = vmul.u32.u64.low %v14478_v38, %v6685_v43  ;;  %v14551_v48 = vmul.u32.u64.high %v14478_v38, %v6685_v43, %v14550_v21 }
 0xbf0   : > { %vm6536_vm7 = vcmp.lt.s32.totalorder %v14236_v3, 0  ;;  %v6608_v8 = vshrl.u32 %v6590_v1, %v6606_v56  ;;  %v6611_v45 = vadd.s32 127, %v6610_v54  ;;  %v10269_v53 = vpop.eup %10268  ;;  %v6677_v26 = vsel %vm6671_vm12, %v6674_v18, %v6676_v49 }
 0xbf1   : > { %v14555_v60 = vmul.u32.u64.low %v14478_v38, %v6681_v44  ;;  %v14556_v31 = vmul.u32.u64.high %v14478_v38, %v6681_v44, %v14555_v60  ;;  %v6760_v15 = vshrl.u32 %v15470_v24, %v14314_v50  ;;  %v6762_v29 = vshll.u32 %v15470_v24, %v14267_v41  ;;  %v10271_v1 = vpop.eup %10270 }
 0xbf2   : > { %v6763_v30 = vshrl.u32 %v15471_v10, %v14314_v50  ;;  %v6530_v46 = vxor.u32 2147483648, %v10269_v53  ;;  %v6609_v40 = vor.u32 %v6608_v8, %v6607_v55  ;;  %v6612_v42 = vshll.u32 %v6611_v45, 23 }
 0xbf3   : > { %v6766_v22 = vshrl.u32 %v15472_v57, %v14314_v50  ;;  %v6527_v63 = vxor.u32 2147483648, %v10271_v1  ;;  %v6855_v52 = vmul.f32 %v14459_v33, %v6846_v36  ;;  %vm6695_vm2 = vc.u32 %v14551_v48, %v14555_v60 }
 0xbf4   : > { %v6765_v59 = vshll.u32 %v15471_v10, %v14267_v41  ;;  %v6531_v13 = vsel %vm6529_vm6, %v6530_v46, %v10271_v1  ;;  %v15606_v58 = vand.u32 2147483647, %v14236_v3  ;;  %v6613_v23 = vor.u32 4788187, %v6612_v42 }
 0xbf5   : > { %v6620_v50 = vsub.s32 4, %v14470_v2  ;;  %v6696_v11 = vadd.s32 1, %v14556_v31  ;;  %v6528_v61 = vsel %vm6526_vm8, %v10269_v53, %v6527_v63  ;;  %v6693_v44 = vmul.u32 %v14478_v38, %v6677_v26 }
 0xbf6   : > { %vm14578_vm12 = vcmp.le.f32.partialorder %v15606_v58, 0.7853982  ;;  %v6764_v41 = vor.u32 %v6763_v30, %v6762_v29  ;;  %v6767_v43 = vor.u32 %v6766_v22, %v6765_v59  ;;  %v6532_v19 = vsel %vm6525_vm11, %v6528_v61, %v6531_v13 }
 0xbf7   : > { %v6614_v56 = vand.u32 2147483647, %v6613_v23  ;;  %v6616_v54 = vcvt.s32.f32 %v6609_v40  ;;  %v6697_v18 = vsel %vm6695_vm2, %v6696_v11, %v14556_v31  ;;  %v6533_v49 = vsel %vm6522_vm15, nan, %v6532_v19 }
 0xbf8   : > { %v14593_v36 = vadd.f32 %v6855_v52, %v14209_v0  ;;  %v6698_v55 = vadd.s32 %v6697_v18, %v6693_v44  ;;  %v6750_v21 = vor.u32 8388608, %v6749_v7  ;;  %v6847_v8 = vmul.f32 %v6533_v49, %v6533_v49 }
 0xbf9   : > { %v6617_v45 = vmul.f32 %v6616_v54, %v6614_v56  ;;  %v6761_v38 = vor.u32 %v6760_v15, %v14489_v27  ;;  %vm6774_vm10 = vcmp.lt.s32.totalorder %v14332_v4, 1  ;;  %v6621_v16 = vsel %vm6536_vm7, %v6620_v50, %v14470_v2 }
 0xbfa   : > { %v6699_v53 = vadd.s32 536870912, %v6698_v55  ;;  %vm6776_vm6 = vcmp.lt.s32.totalorder %v14332_v4, 3  ;;  %v6786_v17 = vsel %vm6774_vm10, %v6764_v41, %v6767_v43  ;;  %v6856_v31 = vmul.f32 %v14459_v33, %v6847_v8 }
 0xbfb   : > { %v6618_v26 = vxor.u32 2147483648, %v6617_v45  ;;  %vm6775_vm8 = vcmp.lt.s32.totalorder %v14332_v4, 2  ;;  %v6788_v27 = vsel %vm6776_vm6, %v14424_v34, %v14468_v28  ;;  %v6870_v7 = vrot.slane %v14593_v36, 6 }
 0xbfc   : > { %v14610_v15 = vshrl.u32 %v6699_v53, 30  ;;  %v6789_v2 = vsel %vm6775_vm8, %v6786_v17, %v6788_v27  ;;  %v6790_v29 = vshll.u32 %v6750_v21, 8  ;;  %v14615_v30 = vadd.f32 %v6856_v31, %v14212_v35 }
 0xbfd   : > { %v6619_v1 = vsel %vm6536_vm7, %v6618_v26, %v6617_v45  ;;  %v6782_v46 = vsel %vm6774_vm10, %v6761_v38, %v6764_v41  ;;  %v6784_v34 = vsel %vm6776_vm6, %v6767_v43, %v14464_v32  ;;  %v6779_v59 = vsel %vm6777_vm14, %v6767_v43, 2102212464 }
 0xbfe   : > { %v6622_v28 = vsel %vm14578_vm12, %v14236_v3, %v6619_v1  ;;  %v6701_v40 = vshll.u32 %v14610_v15, 30  ;;  %v14628_v42 = vmul.u32.u64.low %v6790_v29, %v6789_v2  ;;  %v14629_v22 = vmul.u32.u64.high %v6790_v29, %v6789_v2, %v14628_v42 }
 0xbff   : > { %v6871_v63 = vrot.slane %v14615_v30, 6  ;;  %v6888_v52 = vpack.c.bf16 %v14615_v30, %v14593_v36  ;;  %10272 = vcosq.f32 %v6622_v28  ;;  %v6623_v32 = vsel %vm14578_vm12, 0, %v6621_v16 }
 0xc00   : > { %10274 = vsinq.f32 %v6622_v28  ;;  %v6702_v13 = vsub.s32 %v6698_v55, %v6701_v40  ;;  %v6785_v58 = vsel %vm6775_vm8, %v6782_v46, %v6784_v34  ;;  %v6778_v61 = vsel %vm6774_vm10, %v14483_v51, %v6761_v38 }
 0xc01   : > { %v6872_v23 = vsel %vm1094_vm13, %v6870_v7, %v6871_v63  ;;  %7089 = vmatprep.mubr.bf16.mxu0 %v6888_v52  ;;  %v6780_v5 = vsel %vm6776_vm6, %v6764_v41, %v6779_v59  ;;  %v6627_v44 = vadd.s32 3, %v6623_v32  ;;  %v6694_v17 = vadd.s32 %v14555_v60, %v14551_v48 }
 0xc02   : > { %v8927_v50 = vpack.c.bf16 %v6872_v23, %v6870_v7  ;;  %v6704_v11 = vsub.s32 0, %v6702_v13  ;;  %v14648_v43 = vmul.u32.u64.low %v6790_v29, %v6785_v58  ;;  %v14649_v19 = vmul.u32.u64.high %v6790_v29, %v6785_v58, %v14648_v43 }
 0xc03   : > { %v6781_v54 = vsel %vm6775_vm8, %v6778_v61, %v6780_v5  ;;  %v6628_v51 = vand.u32 3, %v6627_v44  ;;  %vm6626_vm15 = vweird.f32 %v14236_v3  ;;  %v6891_v48 = vrot.slane %v14593_v36, 2 }
 0xc04   : > { %8928 = vmatmul.mubr.msk.bf16.vlgmr.msra.gmra.mrb[72].mxu0 %vm11414_vm3, %v8927_v50  ;;  %v8894_v56 = vmin.u32 %v6704_v11, %v6702_v13  ;;  %vm6799_vm14 = vc.u32 %v14629_v22, %v14648_v43  ;;  %v6800_v49 = vadd.s32 1, %v14649_v19  ;;  %v6797_v55 = vmul.u32 %v6790_v29, %v6781_v54 }
 0xc05   : > { %vm6630_vm3 = vcmp.eq.s32.totalorder %v6628_v51, 0  ;;  %vm6633_vm11 = vcmp.eq.s32.totalorder %v6628_v51, 2  ;;  %vm6629_vm7 = vcmp.lt.s32.totalorder %v6628_v51, 2  ;;  %v6892_v60 = vrot.slane %v14615_v30, 2 }
 0xc06   : > { %v6706_v18 = vclz %v8894_v56  ;;  %v6801_v8 = vsel %vm6799_vm14, %v6800_v49, %v14649_v19  ;;  %vm15609_vm2 = vcmask 1045504   ;;  %v6724_v19 = vsub.s32 4, %v14610_v15 }
 0xc07   : > { %v6802_v9 = vadd.s32 %v6801_v8, %v6797_v55  ;;  %v6893_v61 = vsel %vm15609_vm2, %v6891_v48, %v6892_v60  ;;  %vm15610_vm12 = vmmov %vm15609_vm2  ;;  %vm6640_vm10 = vcmp.lt.s32.totalorder %v14311_v39, 0  ;;  %v15611_v49 = vand.u32 2147483647, %v14311_v39 }
 0xc08   : > { %v8895_v41 = vadd.s32 4294967294, %v6706_v18  ;;  %v6725_v55 = vsel %vm6640_vm10, %v6724_v19, %v14610_v15 }
 0xc09   : > { %v10273_v21 = vpop.eup %10272  ;;  %v6803_v7 = vadd.s32 536870912, %v6802_v9  ;;  %vm6639_vm6 = vcmp.le.f32.partialorder %v15611_v49, 0.7853982 }
 0xc0a   : > { %v10275_v45 = vpop.eup %10274  ;;  %v6634_v38 = vxor.u32 2147483648, %v10273_v21  ;;  %vm8896_vm9 = vcmp.lt.s32.totalorder %v8895_v41, 0 }
 0xc0b   : > { %v6631_v16 = vxor.u32 2147483648, %v10275_v45  ;;  %v6709_v4 = vsel %vm8896_vm9, 0, %v8895_v41  ;;  %v14663_v28 = vshrl.u32 %v6803_v7, 30 }
 0xc0c   : > { %v6635_v53 = vsel %vm6633_vm11, %v6634_v38, %v10275_v45  ;;  %v6710_v31 = vsub.s32 32, %v6709_v4  ;;  %v6714_v26 = vsub.s32 4294967266, %v6709_v4  ;;  %v6711_v29 = vshll.u32 %v6702_v13, %v6709_v4 }
 0xc0d   : > { %v6632_v27 = vsel %vm6630_vm3, %v10273_v21, %v6631_v16  ;;  %v6805_v59 = vshll.u32 %v14663_v28, 30  ;;  %v6727_v45 = vsel %vm6639_vm6, 0, %v6725_v55  ;;  %vm6730_vm11 = vweird.f32 %v14311_v39 }
 0xc0e   : > { %v6636_v2 = vsel %vm6629_vm7, %v6632_v27, %v6635_v53  ;;  %v6712_v1 = vshrl.u32 %v6694_v17, %v6710_v31  ;;  %v6715_v46 = vadd.s32 127, %v6714_v26  ;;  %v6731_v53 = vadd.s32 3, %v6727_v45 }
 0xc0f   : > { %v6637_v34 = vsel %vm6626_vm15, nan, %v6636_v2  ;;  %v6806_v58 = vsub.s32 %v6802_v9, %v6805_v59  ;;  %v6798_v9 = vadd.s32 %v14648_v43, %v14629_v22  ;;  %v6828_v43 = vsub.s32 4, %v14663_v28 }
 0xc10   : > { %v6848_v40 = vmul.f32 %v6637_v34, %v6637_v34  ;;  %v6713_v42 = vor.u32 %v6712_v1, %v6711_v29  ;;  %v6716_v52 = vshll.u32 %v6715_v46, 23  ;;  %v6732_v7 = vand.u32 3, %v6731_v53 }
 0xc11   : > { %v6808_v11 = vsub.s32 0, %v6806_v58  ;;  %vm6744_vm15 = vcmp.lt.s32.totalorder %v14216_v47, 0 }
 0xc12   : > { %v6857_v3 = vmul.f32 %v14459_v33, %v6848_v40  ;;  %v6717_v32 = vor.u32 4788187, %v6716_v52  ;;  %v6720_v50 = vcvt.s32.f32 %v6713_v42  ;;  %vm6737_vm14 = vcmp.eq.s32.totalorder %v6732_v7, 2 }
 0xc13   : > { %v8898_v36 = vmin.u32 %v6808_v11, %v6806_v58  ;;  %vm6734_vm9 = vcmp.eq.s32.totalorder %v6732_v7, 0  ;;  %vm6733_vm3 = vcmp.lt.s32.totalorder %v6732_v7, 2 }
 0xc14   : > { %v14670_v13 = vadd.f32 %v6857_v3, %v14227_v14  ;;  %v6718_v23 = vand.u32 2147483647, %v6717_v32 }
 0xc15   : > { %v6810_v51 = vclz %v8898_v36 }
 0xc16   : > { %v6894_v5 = vrot.slane %v14670_v13, 2  ;;  %v6721_v44 = vmul.f32 %v6720_v50, %v6718_v23  ;;  %v6829_v50 = vsel %vm6744_vm15, %v6828_v43, %v14663_v28 }
 0xc17   : > { %v8899_v8 = vadd.s32 4294967294, %v6810_v51 }
 0xc18   : > { %v6895_v56 = vsel %vm15610_vm12, %v6892_v60, %v6894_v5  ;;  %v6722_v54 = vxor.u32 2147483648, %v6721_v44 }
 0xc19   : > { %v6906_v18 = vpack.c.bf16 %v6895_v56, %v6893_v61  ;;  %vm8900_vm8 = vcmp.lt.s32.totalorder %v8899_v8, 0 }
 0xc1a   : > { %v6723_v41 = vsel %vm6640_vm10, %v6722_v54, %v6721_v44  ;;  %v6813_v38 = vsel %vm8900_vm8, 0, %v8899_v8  ;;  %v6873_v44 = vrot.slane %v14670_v13, 6  ;;  %vm15613_vm8 = vcmask 1045504  }
 0xc1b   : > { %9553 = vmatmul.mubr.bf16.vlgmr.msra.gmra.mrb[72].mxu1 %v6906_v18  ;;  %v6726_v21 = vsel %vm6639_vm6, %v14311_v39, %v6723_v41  ;;  %v6814_v16 = vsub.s32 32, %v6813_v38  ;;  %v6818_v4 = vsub.s32 4294967266, %v6813_v38  ;;  %v6815_v17 = vshll.u32 %v6806_v58, %v6813_v38 }
 0xc1c   : > { %10276 = vcosq.f32 %v6726_v21  ;;  %9556 = vmatprep.mubr.msk.bf16.mxu1 %vm15507_vm0, %v15484_v62  ;;  %v15612_v58 = vand.u32 2147483647, %v14216_v47  ;;  %v6874_v56 = vsel %vm1094_vm13, %v6871_v63, %v6873_v44  ;;  %vm6834_vm6 = vweird.f32 %v14216_v47 }
 0xc1d   : > { %10278 = vsinq.f32 %v6726_v21  ;;  %v6816_v15 = vshrl.u32 %v6798_v9, %v6814_v16  ;;  %v6819_v31 = vadd.s32 127, %v6818_v4 }
 0xc1e   : > { %vm6743_vm7 = vcmp.le.f32.partialorder %v15612_v58, 0.7853982 }
 0xc1f   : > { %v6817_v26 = vor.u32 %v6816_v15, %v6815_v17  ;;  %v6820_v27 = vshll.u32 %v6819_v31, 23  ;;  %v6831_v39 = vsel %vm6743_vm7, 0, %v6829_v50 }
 0xc20   : > { %v6835_v18 = vadd.s32 3, %v6831_v39 }
 0xc21   : > { %v6821_v2 = vor.u32 4788187, %v6820_v27  ;;  %v6824_v40 = vcvt.s32.f32 %v6817_v26 }
 0xc22   : > { %v6836_v49 = vand.u32 3, %v6835_v18 }
 0xc23   : > { %v6822_v34 = vand.u32 2147483647, %v6821_v2 }
 0xc24   : > { %vm6841_vm2 = vcmp.eq.s32.totalorder %v6836_v49, 2  ;;  %vm6838_vm12 = vcmp.eq.s32.totalorder %v6836_v49, 0  ;;  %vm6837_vm10 = vcmp.lt.s32.totalorder %v6836_v49, 2 }
 0xc25   : > { %v6825_v22 = vmul.f32 %v6824_v40, %v6822_v34  ;;  %v14716_v40 = vld [vmem:[#allocation7 + $0x18] sm:$0xff] }
 0xc26   : > { %v10277_v29 = vpop.eup %10276 }
 0xc27   : > { %v10279_v1 = vpop.eup %10278  ;;  %v6738_v46 = vxor.u32 2147483648, %v10277_v29  ;;  %v6826_v60 = vxor.u32 2147483648, %v6825_v22 }
 0xc28   : > { %v6735_v42 = vxor.u32 2147483648, %v10279_v1 }
 0xc29   : > { %v6739_v52 = vsel %vm6737_vm14, %v6738_v46, %v10279_v1  ;;  %v6827_v23 = vsel %vm6744_vm15, %v6826_v60, %v6825_v22  ;;  %vm15614_vm14 = vmmov %vm15613_vm8 }
 0xc2a   : > { %v6736_v59 = vsel %vm6734_vm9, %v10277_v29, %v6735_v42  ;;  %v6830_v11 = vsel %vm6743_vm7, %v14216_v47, %v6827_v23  ;;  %v6912_v42 = vrot.slane %v14716_v40, %v11540_v12 }
 0xc2b   : > { %v6740_v48 = vsel %vm6733_vm3, %v6736_v59, %v6739_v52  ;;  %10280 = vcosq.f32 %v6830_v11 }
 0xc2c   : > { %v6741_v3 = vsel %vm6730_vm11, nan, %v6740_v48  ;;  %10282 = vsinq.f32 %v6830_v11 }
 0xc2d   : > { %v6849_v32 = vmul.f32 %v6741_v3, %v6741_v3 }
 0xc2f   : > { %v6858_v61 = vmul.f32 %v14459_v33, %v6849_v32 }
 0xc31   : > { %v6863_v19 = vadd.f32 %v6858_v61, %v14249_v37 }
 0xc33   : > { %v6889_v36 = vpack.c.bf16 %v6863_v19, %v14670_v13  ;;  %v6875_v54 = vrot.slane %v6863_v19, 6  ;;  %v6896_v4 = vrot.slane %v6863_v19, 2 }
 0xc35   : > { %7097 = vmatprep.mubr.bf16.mxu0 %v6889_v36  ;;  %v6876_v28 = vsel %vm1094_vm13, %v6873_v44, %v6875_v54  ;;  %v10281_v41 = vpop.eup %10280  ;;  %v6897_v17 = vsel %vm15613_vm8, %v6894_v5, %v6896_v4 }
 0xc36   : > { %v6886_v51 = vpack.c.bf16 %v6876_v28, %v6874_v56  ;;  %v10283_v55 = vpop.eup %10282  ;;  %v6842_v21 = vxor.u32 2147483648, %v10281_v41 }
 0xc37   : > { %v6839_v8 = vxor.u32 2147483648, %v10283_v55 }
 0xc38   : > { %7098 = vmatmul.mubr.bf16.gmra.mrb[76].mxu0 %v6886_v51  ;;  %v6843_v45 = vsel %vm6841_vm2, %v6842_v21, %v10283_v55 }
 0xc39   : > { %v6840_v38 = vsel %vm6838_vm12, %v10281_v41, %v6839_v8 }
 0xc3a   : > { %v6844_v30 = vsel %vm6837_vm10, %v6840_v38, %v6843_v45 }
 0xc3b   : > { %v6845_v63 = vsel %vm6834_vm6, nan, %v6844_v30 }
 0xc3c   : > { %v6850_v9 = vmul.f32 %v6845_v63, %v6845_v63 }
 0xc3e   : > { %v6859_v16 = vmul.f32 %v14459_v33, %v6850_v9 }
 0xc40   : > { %v6864_v53 = vadd.f32 %v6859_v16, %v14206_v6 }
 0xc42   : > { %v6898_v15 = vrot.slane %v6864_v53, 2  ;;  %v6890_v31 = vpack.c.bf16 %v6864_v53, %v6864_v53  ;;  %v6877_v26 = vrot.slane %v6864_v53, 6 }
 0xc44   : > { %v6899_v27 = vsel %vm15614_vm14, %v6896_v4, %v6898_v15  ;;  %7105 = vmatprep.mubr.bf16.mxu0 %v6890_v31  ;;  %v6878_v47 = vsel %vm1094_vm13, %v6875_v54, %v6877_v26  ;;  %v8930_v33 = vpack.c.bf16 %v6898_v15, %v6898_v15 }
 0xc45   : > { %v6907_v7 = vpack.c.bf16 %v6899_v27, %v6897_v17  ;;  %v6887_v2 = vpack.c.bf16 %v6878_v47, %v6878_v47 }
 0xc47   : > { %9557 = vmatmul.mubr.bf16.gmra.mrb[76].mxu1 %v6907_v7  ;;  %7106 = vmatmul.mubr.bf16.gmra.mrb[80].mxu0 %v6887_v2 }
 0xc48   : > { %9560 = vmatprep.mubr.msk.bf16.mxu1 %vm15507_vm0, %v15484_v62 }
 0xc4f   : > { %9561 = vmatmul.mubr.msk.bf16.gmra.mrb[80].mxu1 %vm11531_vm1, %v8930_v33 }
 0xc50   : > { %9580 = vmatprep.mubr.msk.bf16.mxu1 %vm15507_vm0, %v15484_v62 }
 0xcd7   : > { %v9283_v13 = vpop.f32.mrb[72].mxu0 }
 0xcd8   : > { %v9284_v5 = vpop.f32.mrb[73].mxu0 }
 0xcd9   : > { %v9285_v29 = vadd.f32 %v9284_v5, %v9283_v13  ;;  %v9286_v1 = vpop.f32.mrb[74].mxu0  ;;  %v10090_v5 = vld [vmem:[#allocation10 + $0x280] sm:$0xff]  }
 0xcda   : > { %v9287_v46 = vpop.f32.mrb[75].mxu0  ;;  %9312 = vmatprep.subr.bf16.mxu0 %v10090_v5 }
 0xcdb   : > { %v9288_v34 = vadd.f32 %v9287_v46, %v9286_v1  ;;  %v7092_v52 = vadd.f32 %v9285_v29, %v6912_v42  ;;  %v10091_v46 = vld [vmem:[#allocation10 + $0x240] sm:$0xff]  }
 0xcdc   : > { %9313 = vmatpush3.bf16.msra.mxu0 %v10091_v46 }
 0xcdd   : > { %v7095_v22 = vadd.f32 %v9288_v34, %v6912_v42  ;;  %v10092_v34 = vld [vmem:[#allocation10 + $0x2c0] sm:$0xff]  }
 0xcde   : > { %9565 = vmatpush3.bf16.msra.mxu1 %v10092_v34  ;;  %v10113_v34 = vld [vmem:[#allocation10 + $0x2f8] sm:$0xff]  }
 0xcdf   : > { %9566 = vmatprep.subr.bf16.mxu1 %v15484_v62 }
 0xcee   : > { %v7147_v43 = vpop.f32.mrb[72].mxu1 }
 0xcef   : > { %v14720_v59 = vadd.f32 %v7147_v43, %v7092_v52  ;;  %v9554_v20 = vpop.f32.mrb[73].mxu1  ;;  %v10094_v43 = vld [vmem:[#allocation10 + $0x248] sm:$0xff]  }
 0xcf0   : > { %v7150_v48 = vpop.f32.mrb[74].mxu1  ;;  %v10095_v20 = vld [vmem:[#allocation10 + $0x2c8] sm:$0xff]  }
 0xcf1   : > { %v14722_v60 = vadd.f32 %v7150_v48, %v7095_v22  ;;  %v9555_v3 = vpop.f32.mrb[75].mxu1  ;;  %v7179_v32 = vmul.f32 %v14720_v59, %v14720_v59  ;;  %v10093_v22 = vld [vmem:[#allocation10 + $0x288] sm:$0xff]   ;;  %9567 = vmatpush3.bf16.msra.mxu1 %v10095_v20 }
 0xcf2   : > { %9314 = vmatprep.subr.bf16.mxu0 %v10093_v22  ;;  %9568 = vmatprep.subr.bf16.mxu1 %v15484_v62  ;;  %v15617_v22 = vld [vmem:[#allocation23_spill] sm:$0xff] }
 0xcf3   : > { %v7169_v58 = vadd.f32 %v14722_v60, %v14720_v59  ;;  %v7180_v23 = vmul.f32 %v14722_v60, %v14722_v60  ;;  %9315 = vmatpush3.bf16.msra.mxu0 %v10094_v43  ;;  %v14764_v43 = vrot.slane %v14716_v40, %v15617_v22 }
 0xcf5   : > { %v7184_v12 = vadd.f32 %v7180_v23, %v7179_v32  ;;  %v10096_v32 = vld [vmem:[#allocation10 + $0x290] sm:$0xff]  }
 0xcf6   : > { %9316 = vmatprep.subr.bf16.mxu0 %v10096_v32 }
 0xd0b   : > { %v9289_v50 = vpop.f32.mrb[76].mxu0 }
 0xd0c   : > { %v9290_v11 = vpop.f32.mrb[77].mxu0 }
 0xd0d   : > { %v9291_v61 = vadd.f32 %v9290_v11, %v9289_v50  ;;  %v9292_v44 = vpop.f32.mrb[78].mxu0  ;;  %v10098_v50 = vld [vmem:[#allocation10 + $0x2d0] sm:$0xff]   ;;  %v10099_v11 = vld [vmem:[#allocation10 + $0x298] sm:$0xff]  }
 0xd0e   : > { %v9293_v39 = vpop.f32.mrb[79].mxu0  ;;  %9569 = vmatpush3.bf16.msra.mxu1 %v10098_v50 }
 0xd0f   : > { %v9294_v19 = vadd.f32 %v9293_v39, %v9292_v44  ;;  %v7100_v36 = vadd.f32 %v9291_v61, %v6912_v42  ;;  %9570 = vmatprep.subr.bf16.mxu1 %v15484_v62 }
 0xd11   : > { %v7103_v56 = vadd.f32 %v9294_v19, %v6912_v42 }
 0xd1a   : > { %v7155_v54 = vpop.f32.mrb[76].mxu1  ;;  %v9295_v18 = vpop.f32.mrb[80].mxu0 }
 0xd1b   : > { %v14730_v28 = vadd.f32 %v7155_v54, %v7100_v36  ;;  %v9558_v51 = vpop.f32.mrb[77].mxu1  ;;  %v9296_v49 = vpop.f32.mrb[81].mxu0  ;;  %v10100_v36 = vld [vmem:[#allocation10 + $0x258] sm:$0xff]   ;;  %v10102_v54 = vld [vmem:[#allocation10 + $0x2a0] sm:$0xff]  }
 0xd1c   : > { %v7158_v41 = vpop.f32.mrb[78].mxu1  ;;  %v9297_v55 = vadd.f32 %v9296_v49, %v9295_v18  ;;  %v9298_v21 = vpop.f32.mrb[82].mxu0 }
 0xd1d   : > { %v7170_v8 = vadd.f32 %v7169_v58, %v14730_v28  ;;  %v7181_v45 = vmul.f32 %v14730_v28, %v14730_v28  ;;  %v14735_v38 = vadd.f32 %v7158_v41, %v7103_v56  ;;  %v9559_v30 = vpop.f32.mrb[79].mxu1  ;;  %v9299_v63 = vpop.f32.mrb[83].mxu0  ;;  %v10101_v56 = vld [vmem:[#allocation10 + $0x2d8] sm:$0xff]   ;;  %v10103_v41 = vld [vmem:[#allocation10 + $0x260] sm:$0xff]   ;;  %v10105_v21 = vld [vmem:[#allocation10 + $0x2a8] sm:$0xff]  }
 0xd1e   : > { %v7108_v53 = vadd.f32 %v9297_v55, %v6912_v42  ;;  %9571 = vmatpush3.bf16.msra.mxu1 %v10101_v56  ;;  %v10104_v55 = vld [vmem:[#allocation10 + $0x2e0] sm:$0xff]   ;;  %v10106_v30 = vld [vmem:[#allocation10 + $0x268] sm:$0xff]  }
 0xd1f   : > { %v7185_v9 = vadd.f32 %v7184_v12, %v7181_v45  ;;  %v7171_v16 = vadd.f32 %v7170_v8, %v14735_v38  ;;  %v7182_v4 = vmul.f32 %v14735_v38, %v14735_v38  ;;  %v10097_v12 = vld [vmem:[#allocation10 + $0x250] sm:$0xff]   ;;  %9572 = vmatprep.subr.bf16.mxu1 %v15484_v62  ;;  %v10107_v63 = vld [vmem:[#allocation10 + $0x2e8] sm:$0xff]  }
 0xd20   : > { %9317 = vmatpush3.bf16.msra.mxu0 %v10097_v12 }
 0xd21   : > { %v7186_v17 = vadd.f32 %v7185_v9, %v7182_v4  ;;  %9318 = vmatprep.subr.bf16.mxu0 %v10099_v11  ;;  %v10108_v9 = vld [vmem:[#allocation10 + $0x2b0] sm:$0xff]  }
 0xd22   : > { %v7163_v15 = vpop.f32.mrb[80].mxu1  ;;  %9573 = vmatpush3.bf16.msra.mxu1 %v10104_v55  ;;  %v10110_v4 = vld [vmem:[#allocation10 + $0x2f0] sm:$0xff]  }
 0xd23   : > { %v14740_v31 = vadd.f32 %v7163_v15, %v7108_v53  ;;  %v9562_v26 = vpop.f32.mrb[81].mxu1  ;;  %9574 = vmatprep.subr.bf16.mxu1 %v15484_v62  ;;  %v10111_v53 = vld [vmem:[#allocation10 + $0x2b8] sm:$0xff]  }
 0xd24   : > { %v7166_v27 = vpop.f32.mrb[82].mxu1  ;;  %9319 = vmatpush3.bf16.msra.mxu0 %v10100_v36 }
 0xd25   : > { %v7172_v47 = vadd.f32 %v7171_v16, %v14740_v31  ;;  %v7183_v7 = vmul.f32 %v14740_v31, %v14740_v31  ;;  %v9563_v2 = vpop.f32.mrb[83].mxu1  ;;  %9320 = vmatprep.subr.bf16.mxu0 %v10102_v54  ;;  %v10109_v16 = vld [vmem:[#allocation10 + $0x270] sm:$0xff]   ;;  %v15615_v27 = vld [vmem:[#allocation21_spill] sm:$0xff] }
 0xd26   : > { %9575 = vmatpush3.bf16.msra.mxu1 %v10107_v63 }
 0xd27   : > { %v7173_v33 = vrot.slane %v7172_v47, 4  ;;  %v7187_v13 = vadd.f32 %v7186_v17, %v7183_v7  ;;  %9576 = vmatprep.subr.bf16.mxu1 %v15484_v62  ;;  %v10112_v17 = vld [vmem:[#allocation10 + $0x278] sm:$0xff]  }
 0xd28   : > { %9321 = vmatpush3.bf16.msra.mxu0 %v10103_v41 }
 0xd29   : > { %v7174_v29 = vadd.f32 %v7173_v33, %v7172_v47  ;;  %v7188_v1 = vrot.slane %v7187_v13, 4  ;;  %9322 = vmatprep.subr.bf16.mxu0 %v10105_v21 }
 0xd2a   : > { %9577 = vmatpush3.bf16.msra.mxu1 %v10110_v4 }
 0xd2b   : > { %v7175_v42 = vrot.slane %v7174_v29, 2  ;;  %v7189_v52 = vadd.f32 %v7188_v1, %v7187_v13  ;;  %9578 = vmatprep.subr.bf16.mxu1 %v15484_v62 }
 0xd2c   : > { %9323 = vmatpush3.bf16.msra.mxu0 %v10106_v30 }
 0xd2d   : > { %v7176_v48 = vadd.f32 %v7175_v42, %v7174_v29  ;;  %v7190_v3 = vrot.slane %v7189_v52, 2  ;;  %9324 = vmatprep.subr.bf16.mxu0 %v10108_v9  ;;  %v15616_v42 = vld [vmem:[#allocation22_spill] sm:$0xff] }
 0xd2e   : > { %9579 = vmatpush3.bf16.msra.mxu1 %v10113_v34 }
 0xd2f   : > { %v7177_v58 = vrot.slane %v7176_v48, 1  ;;  %v7191_v23 = vadd.f32 %v7190_v3, %v7189_v52  ;;  %9620 = vmatprep.subr.bf16.mxu1 %v15484_v62 }
 0xd30   : > { %9325 = vmatpush3.bf16.msra.mxu0 %v10109_v16 }
 0xd31   : > { %v7178_v61 = vadd.f32 %v7177_v58, %v7176_v48  ;;  %v7192_v44 = vrot.slane %v7191_v23, 1  ;;  %9326 = vmatprep.subr.bf16.mxu0 %v10111_v53 }
 0xd33   : > { %v7193_v39 = vadd.f32 %v7192_v44, %v7191_v23  ;;  %v7194_v19 = vmul.f32 0.025, %v7178_v61 }
 0xd34   : > { %9327 = vmatpush3.bf16.msra.mxu0 %v10112_v17 }
 0xd35   : > { %v7195_v18 = vmul.f32 0.025, %v7193_v39  ;;  %v7196_v51 = vmul.f32 %v7194_v19, %v7194_v19  ;;  %9592 = vmatprep.subr.bf16.mxu0 %v15484_v62 }
 0xd37   : > { %v7197_v49 = vsub.f32 %v7195_v18, %v7196_v51 }
 0xd39   : > { %v7198_v8 = vmax.f32 %v7197_v49, 0.0 }
 0xd3b   : > { %v7199_v45 = vadd.f32 1e-05, %v7198_v8 }
 0xd3d   : > { %10284 = vrsqrt.f32 %v7199_v45 }
 0xd47   : > { %v10285_v15 = vpop.eup %10284 }
 0xd48   : > { %v7201_v26 = vmul.f32 %v14716_v40, %v10285_v15 }
 0xd4a   : > { %v7205_v47 = vrot.slane %v7201_v26, %v15615_v27  ;;  %v7211_v7 = vmul.f32 %v7201_v26, %v7194_v19 }
 0xd4c   : > { %v7210_v2 = vmul.f32 %v7205_v47, %v14740_v31  ;;  %v7213_v33 = vrot.slane %v7211_v7, 7  ;;  %v7206_v13 = vmul.f32 %v7205_v47, %v14720_v59  ;;  %v7207_v5 = vmul.f32 %v7205_v47, %v14722_v60 }
 0xd4d   : > { %v7208_v29 = vmul.f32 %v7205_v47, %v14730_v28  ;;  %v7209_v1 = vmul.f32 %v7205_v47, %v14735_v38 }
 0xd4e   : > { %v7215_v46 = vsub.f32 %v14716_v40, %v7213_v33 }
 0xd50   : > { %v7219_v52 = vrot.slane %v7215_v46, %v15616_v42 }
 0xd52   : > { %v14767_v31 = vadd.f32 %v7219_v52, %v7210_v2  ;;  %v14769_v59 = vadd.f32 %v7219_v52, %v7206_v13  ;;  %v14771_v60 = vadd.f32 %v7219_v52, %v7207_v5  ;;  %v14773_v28 = vadd.f32 %v7219_v52, %v7208_v29 }
 0xd53   : > { %v14775_v38 = vadd.f32 %v7219_v52, %v7209_v1  ;;  %v15618_v2 = vmov 920167782   ;;  %v15619_v5 = vmov 1326507024  }
 0xd54   : > { %v14779_v20 = vmul.f32 %v14764_v43, %v14767_v31  ;;  %v14783_v40 = vmul.f32 %v14764_v43, %v14769_v59  ;;  %v14787_v48 = vmul.f32 %v14764_v43, %v14771_v60 }
 0xd56   : > { %v7650_v3 = vand.u32 2147483647, %v14779_v20  ;;  %v7653_v32 = vand.u32 2139095040, %v14779_v20  ;;  %v7234_v58 = vand.u32 2147483647, %v14783_v40  ;;  %v7237_v23 = vand.u32 2139095040, %v14783_v40 }
 0xd57   : > { %v7341_v61 = vand.u32 2139095040, %v14787_v48 }
 0xd58   : > { %v7654_v12 = vshrl.u32 %v7653_v32, 23  ;;  %v7657_v50 = vand.u32 8388607, %v7650_v3  ;;  %v7238_v11 = vshrl.u32 %v7237_v23, 23  ;;  %v7241_v39 = vand.u32 8388607, %v7234_v58 }
 0xd59   : > { %v7342_v36 = vshrl.u32 %v7341_v61, 23 }
 0xd5a   : > { %v8948_v44 = vadd.s32 4294967169, %v7654_v12  ;;  %v8932_v19 = vadd.s32 4294967169, %v7238_v11  ;;  %v7658_v54 = vor.u32 8388608, %v7657_v50  ;;  %v7242_v51 = vor.u32 8388608, %v7241_v39 }
 0xd5b   : > { %v8936_v49 = vadd.s32 4294967169, %v7342_v36 }
 0xd5c   : > { %v7660_v56 = vadd.s32 1, %v8948_v44  ;;  %v7244_v18 = vadd.s32 1, %v8932_v19  ;;  %v14798_v8 = vshll.u32 %v7658_v54, 8  ;;  %v14800_v63 = vshll.u32 %v7242_v51, 8 }
 0xd5d   : > { %v14802_v9 = vadd.s32 1, %v8936_v49 }
 0xd5e   : > { %vm7661_vm13 = vcmp.gt.s32.totalorder %v7660_v56, 0  ;;  %vm7245_vm1 = vcmp.gt.s32.totalorder %v7244_v18, 0 }
 0xd5f   : > { %v7662_v41 = vsel %vm7661_vm13, %v7660_v56, 0  ;;  %v7246_v21 = vsel %vm7245_vm1, %v7244_v18, 0  ;;  %vm7349_vm7 = vcmp.gt.s32.totalorder %v14802_v9, 0 }
 0xd60   : > { %v7664_v55 = vand.u32 31, %v7662_v41  ;;  %v7248_v30 = vand.u32 31, %v7246_v21  ;;  %v14804_v16 = vshrl.u32 %v7662_v41, 5  ;;  %v14808_v17 = vshrl.u32 %v7246_v21, 5 }
 0xd62   : > { %v7665_v45 = vsub.s32 32, %v7664_v55  ;;  %v7667_v4 = vshll.u32 %v15497_v25, %v7664_v55  ;;  %v7670_v53 = vshll.u32 %v15470_v24, %v7664_v55  ;;  %v7673_v27 = vshll.u32 %v15471_v10, %v7664_v55 }
 0xd63   : > { %v7676_v7 = vshll.u32 %v15472_v57, %v7664_v55  ;;  %v7679_v13 = vshll.u32 %v15618_v2, %v7664_v55  ;;  %v7249_v42 = vsub.s32 32, %v7248_v30  ;;  %vm7682_vm9 = vcmp.lt.s32.totalorder %v14804_v16, 1 }
 0xd64   : > { %v7668_v15 = vshrl.u32 %v15470_v24, %v7665_v45  ;;  %v7671_v26 = vshrl.u32 %v15471_v10, %v7665_v45  ;;  %v7674_v47 = vshrl.u32 %v15472_v57, %v7665_v45  ;;  %v7677_v33 = vshrl.u32 %v15618_v2, %v7665_v45 }
 0xd65   : > { %v7680_v29 = vshrl.u32 %v15619_v5, %v7665_v45  ;;  %vm7683_vm3 = vcmp.lt.s32.totalorder %v14804_v16, 2  ;;  %v7666_v23 = vshrl.u32 %v15497_v25, %v7665_v45  ;;  %vm7685_vm11 = vcmp.lt.s32.totalorder %v14804_v16, 4 }
 0xd66   : > { %v7669_v1 = vor.u32 %v7668_v15, %v7667_v4  ;;  %v7672_v46 = vor.u32 %v7671_v26, %v7670_v53  ;;  %v7675_v34 = vor.u32 %v7674_v47, %v7673_v27  ;;  %v7678_v52 = vor.u32 %v7677_v33, %v7676_v7 }
 0xd67   : > { %v7681_v32 = vor.u32 %v7680_v29, %v7679_v13  ;;  %vm7684_vm15 = vcmp.lt.s32.totalorder %v14804_v16, 3  ;;  %v7251_v44 = vshll.u32 %v15497_v25, %v7248_v30  ;;  %v7252_v36 = vshrl.u32 %v15470_v24, %v7249_v42 }
 0xd68   : > { %v7690_v12 = vsel %vm7682_vm9, %v7669_v1, %v7672_v46  ;;  %v7694_v50 = vsel %vm7682_vm9, %v7672_v46, %v7675_v34  ;;  %v7691_v11 = vsel %vm7685_vm11, %v7678_v52, 920167782  ;;  %v7254_v56 = vshll.u32 %v15470_v24, %v7248_v30 }
 0xd69   : > { %v7695_v61 = vsel %vm7685_vm11, %v7681_v32, 1326507024  ;;  %v7692_v39 = vsel %vm7684_vm15, %v7675_v34, %v7691_v11  ;;  %v7687_v54 = vsel %vm7685_vm11, %v7675_v34, 2102212464  ;;  %v7255_v49 = vshrl.u32 %v15471_v10, %v7249_v42 }
 0xd6a   : > { %v7696_v19 = vsel %vm7684_vm15, %v7678_v52, %v7695_v61  ;;  %v7693_v18 = vsel %vm7683_vm3, %v7690_v12, %v7692_v39  ;;  %v7253_v4 = vor.u32 %v7252_v36, %v7251_v44  ;;  %v7257_v15 = vshll.u32 %v15471_v10, %v7248_v30 }
 0xd6b   : > { %v7697_v51 = vsel %vm7683_vm3, %v7694_v50, %v7696_v19  ;;  %v14844_v21 = vmul.u32.u64.low %v14798_v8, %v7693_v18  ;;  %v14845_v45 = vmul.u32.u64.high %v14798_v8, %v7693_v18, %v14844_v21  ;;  %v7256_v53 = vor.u32 %v7255_v49, %v7254_v56 }
 0xd6c   : > { %v14840_v41 = vmul.u32.u64.low %v14798_v8, %v7697_v51  ;;  %v14841_v55 = vmul.u32.u64.high %v14798_v8, %v7697_v51, %v14840_v41  ;;  %v7258_v26 = vshrl.u32 %v15472_v57, %v7249_v42  ;;  %v7260_v27 = vshll.u32 %v15472_v57, %v7248_v30 }
 0xd6d   : > { %v7261_v47 = vshrl.u32 %v15618_v2, %v7249_v42  ;;  %v7264_v7 = vshrl.u32 %v15619_v5, %v7249_v42  ;;  %v7686_v33 = vsel %vm7682_vm9, %v7666_v23, %v7669_v1  ;;  %v7688_v13 = vsel %vm7684_vm15, %v7672_v46, %v7687_v54 }
 0xd6e   : > { %v7259_v29 = vor.u32 %v7258_v26, %v7257_v15  ;;  %v7263_v34 = vshll.u32 %v15618_v2, %v7248_v30  ;;  %v7250_v52 = vshrl.u32 %v15497_v25, %v7249_v42  ;;  %vm7266_vm2 = vcmp.lt.s32.totalorder %v14808_v17, 1 }
 0xd6f   : > { %v7262_v32 = vor.u32 %v7261_v47, %v7260_v27  ;;  %vm7267_vm12 = vcmp.lt.s32.totalorder %v14808_v17, 2  ;;  %vm7268_vm10 = vcmp.lt.s32.totalorder %v14808_v17, 3  ;;  %vm7269_vm6 = vcmp.lt.s32.totalorder %v14808_v17, 4 }
 0xd70   : > { %v7265_v12 = vor.u32 %v7264_v7, %v7263_v34  ;;  %v7274_v50 = vsel %vm7266_vm2, %v7253_v4, %v7256_v53  ;;  %vm7707_vm8 = vc.u32 %v14841_v55, %v14844_v21  ;;  %v7271_v1 = vsel %vm7269_vm6, %v7259_v29, 2102212464 }
 0xd71   : > { %v7275_v46 = vsel %vm7269_vm6, %v7262_v32, 920167782  ;;  %v7278_v23 = vsel %vm7266_vm2, %v7256_v53, %v7259_v29  ;;  %v7708_v30 = vadd.s32 1, %v14845_v45  ;;  %v7270_v42 = vsel %vm7266_vm2, %v7250_v52, %v7253_v4 }
 0xd72   : > { %v7276_v11 = vsel %vm7268_vm10, %v7259_v29, %v7275_v46  ;;  %v7279_v61 = vsel %vm7269_vm6, %v7265_v12, 1326507024  ;;  %v7272_v44 = vsel %vm7268_vm10, %v7256_v53, %v7271_v1  ;;  %v7350_v36 = vsel %vm7349_vm7, %v14802_v9, 0 }
 0xd73   : > { %v7277_v39 = vsel %vm7267_vm12, %v7274_v50, %v7276_v11  ;;  %v7280_v19 = vsel %vm7268_vm10, %v7262_v32, %v7279_v61  ;;  %v7689_v56 = vsel %vm7683_vm3, %v7686_v33, %v7688_v13  ;;  %v7709_v9 = vsel %vm7707_vm8, %v7708_v30, %v14845_v45 }
 0xd74   : > { %v7281_v54 = vsel %vm7267_vm12, %v7278_v23, %v7280_v19  ;;  %v14877_v18 = vmul.u32.u64.low %v14800_v63, %v7277_v39  ;;  %v14878_v51 = vmul.u32.u64.high %v14800_v63, %v7277_v39, %v14877_v18  ;;  %v7273_v16 = vsel %vm7267_vm12, %v7270_v42, %v7272_v44 }
 0xd75   : > { %v14882_v49 = vmul.u32.u64.low %v14800_v63, %v7281_v54  ;;  %v14883_v41 = vmul.u32.u64.high %v14800_v63, %v7281_v54, %v14882_v49  ;;  %v7352_v4 = vand.u32 31, %v7350_v36  ;;  %v7705_v53 = vmul.u32 %v14798_v8, %v7689_v56 }
 0xd76   : > { %v7292_v15 = vadd.s32 1, %v14878_v51  ;;  %v7338_v26 = vand.u32 2147483647, %v14787_v48  ;;  %v14896_v47 = vmul.f32 %v14764_v43, %v14773_v28  ;;  %v7289_v33 = vmul.u32 %v14800_v63, %v7273_v16 }
 0xd77   : > { %v7353_v27 = vsub.s32 32, %v7352_v4  ;;  %v7710_v7 = vadd.s32 %v7709_v9, %v7705_v53  ;;  %vm7291_vm14 = vc.u32 %v14883_v41, %v14877_v18  ;;  %v7351_v63 = vshrl.u32 %v7350_v36, 5 }
 0xd78   : > { %v7293_v17 = vsel %vm7291_vm14, %v7292_v15, %v14878_v51  ;;  %v7345_v8 = vand.u32 8388607, %v7338_v26  ;;  %v7445_v29 = vand.u32 2139095040, %v14896_v47  ;;  %v7355_v50 = vshll.u32 %v15497_v25, %v7352_v4 }
 0xd79   : > { %v7294_v45 = vadd.s32 %v7293_v17, %v7289_v33  ;;  %v7356_v13 = vshrl.u32 %v15470_v24, %v7353_v27  ;;  %v7711_v34 = vadd.s32 536870912, %v7710_v7  ;;  %v7359_v32 = vshrl.u32 %v15471_v10, %v7353_v27 }
 0xd7a   : > { %v7362_v12 = vshrl.u32 %v15472_v57, %v7353_v27  ;;  %v7358_v1 = vshll.u32 %v15470_v24, %v7352_v4  ;;  %v7365_v46 = vshrl.u32 %v15618_v2, %v7353_v27  ;;  %v7361_v30 = vshll.u32 %v15471_v10, %v7352_v4 }
 0xd7b   : > { %v7295_v52 = vadd.s32 536870912, %v7294_v45  ;;  %v7364_v42 = vshll.u32 %v15472_v57, %v7352_v4  ;;  %v7368_v11 = vshrl.u32 %v15619_v5, %v7353_v27  ;;  %v7357_v61 = vor.u32 %v7356_v13, %v7355_v50 }
 0xd7c   : > { %v7367_v44 = vshll.u32 %v15618_v2, %v7352_v4  ;;  %v7446_v39 = vshrl.u32 %v7445_v29, 23  ;;  %v7360_v36 = vor.u32 %v7359_v32, %v7358_v1  ;;  %v7363_v56 = vor.u32 %v7362_v12, %v7361_v30 }
 0xd7d   : > { %v14911_v23 = vshrl.u32 %v7295_v52, 30  ;;  %v7366_v54 = vor.u32 %v7365_v46, %v7364_v42  ;;  %v7346_v51 = vor.u32 8388608, %v7345_v8  ;;  %vm7373_vm13 = vcmp.lt.s32.totalorder %v7351_v63, 4 }
 0xd7e   : > { %v7369_v49 = vor.u32 %v7368_v11, %v7367_v44  ;;  %v14918_v9 = vshrl.u32 %v7711_v34, 30  ;;  %vm7370_vm1 = vcmp.lt.s32.totalorder %v7351_v63, 1  ;;  %vm7372_vm9 = vcmp.lt.s32.totalorder %v7351_v63, 3 }
 0xd7f   : > { %v7297_v19 = vshll.u32 %v14911_v23, 30  ;;  %v7379_v53 = vsel %vm7373_vm13, %v7366_v54, 920167782  ;;  %v8940_v15 = vadd.s32 4294967169, %v7446_v39  ;;  %v7378_v4 = vsel %vm7370_vm1, %v7357_v61, %v7360_v36 }
 0xd80   : > { %v7380_v17 = vsel %vm7372_vm9, %v7363_v56, %v7379_v53  ;;  %v7382_v13 = vsel %vm7370_vm1, %v7360_v36, %v7363_v56  ;;  %vm7371_vm3 = vcmp.lt.s32.totalorder %v7351_v63, 2  ;;  %v7383_v8 = vsel %vm7373_vm13, %v7369_v49, 1326507024 }
 0xd81   : > { %v7298_v16 = vsub.s32 %v7294_v45, %v7297_v19  ;;  %v7386_v29 = vshll.u32 %v7346_v51, 8  ;;  %v7713_v34 = vshll.u32 %v14918_v9, 30  ;;  %v7375_v45 = vsel %vm7373_vm13, %v7363_v56, 2102212464 }
 0xd82   : > { %v7384_v32 = vsel %vm7372_vm9, %v7366_v54, %v7383_v8  ;;  %v7354_v12 = vshrl.u32 %v15497_v25, %v7353_v27  ;;  %v7381_v50 = vsel %vm7371_vm3, %v7378_v4, %v7380_v17  ;;  %v7452_v46 = vadd.s32 1, %v8940_v15 }
 0xd83   : > { %v7300_v33 = vsub.s32 0, %v7298_v16  ;;  %v7385_v1 = vsel %vm7371_vm3, %v7382_v13, %v7384_v32  ;;  %v7376_v11 = vsel %vm7372_vm9, %v7360_v36, %v7375_v45  ;;  %v14940_v27 = vsub.s32 %v7710_v7, %v7713_v34 }
 0xd84   : > { %v7374_v42 = vsel %vm7370_vm1, %v7354_v12, %v7357_v61  ;;  %v14933_v44 = vmul.u32.u64.low %v7386_v29, %v7385_v1  ;;  %v14934_v39 = vmul.u32.u64.high %v7386_v29, %v7385_v1, %v14933_v44  ;;  %vm7453_vm11 = vcmp.gt.s32.totalorder %v7452_v46, 0 }
 0xd85   : > { %v8933_v52 = vmin.u32 %v7300_v33, %v7298_v16  ;;  %v14936_v51 = vmul.u32.u64.low %v7386_v29, %v7381_v50  ;;  %v14937_v56 = vmul.u32.u64.high %v7386_v29, %v7381_v50, %v14936_v51  ;;  %v7454_v54 = vsel %vm7453_vm11, %v7452_v46, 0 }
 0xd86   : > { %v7377_v49 = vsel %vm7371_vm3, %v7374_v42, %v7376_v11  ;;  %v7456_v53 = vand.u32 31, %v7454_v54  ;;  %v7442_v61 = vand.u32 2147483647, %v14896_v47  ;;  %v7290_v36 = vadd.s32 %v14877_v18, %v14883_v41 }
 0xd87   : > { %v7302_v30 = vclz %v8933_v52  ;;  %vm7395_vm7 = vc.u32 %v14934_v39, %v14936_v51  ;;  %v7396_v17 = vadd.s32 1, %v14937_v56  ;;  %v7716_v7 = vsub.s32 0, %v14940_v27 }
 0xd88   : > { %v7393_v13 = vmul.u32 %v7386_v29, %v7377_v49  ;;  %v7457_v8 = vsub.s32 32, %v7456_v53  ;;  %v7449_v18 = vand.u32 8388607, %v7442_v61  ;;  %v7455_v29 = vshrl.u32 %v7454_v54, 5 }
 0xd89   : > { %v8934_v19 = vadd.s32 4294967294, %v7302_v30  ;;  %v7397_v45 = vsel %vm7395_vm7, %v7396_v17, %v14937_v56  ;;  %v8949_v46 = vmin.u32 %v7716_v7, %v14940_v27  ;;  %v7462_v11 = vshll.u32 %v15470_v24, %v7456_v53 }
 0xd8a   : > { %v7398_v32 = vadd.s32 %v7397_v45, %v7393_v13  ;;  %v7460_v12 = vshrl.u32 %v15470_v24, %v7457_v8  ;;  %v7463_v41 = vshrl.u32 %v15471_v10, %v7457_v8  ;;  %v7465_v44 = vshll.u32 %v15471_v10, %v7456_v53 }
 0xd8b   : > { %vm8935_vm15 = vcmp.lt.s32.totalorder %v8934_v19, 0  ;;  %v7472_v54 = vshrl.u32 %v15619_v5, %v7457_v8  ;;  %vm7236_vm2 = vcmp.lt.s32.totalorder %v14783_v40, 0  ;;  %v7450_v13 = vor.u32 8388608, %v7449_v18 }
 0xd8c   : > { %v7305_v15 = vsel %vm8935_vm15, 0, %v8934_v19  ;;  %v7399_v30 = vadd.s32 536870912, %v7398_v32  ;;  %v7466_v19 = vshrl.u32 %v15472_v57, %v7457_v8  ;;  %v7464_v17 = vor.u32 %v7463_v41, %v7462_v11 }
 0xd8d   : > { %v7306_v33 = vsub.s32 32, %v7305_v15  ;;  %v7310_v4 = vsub.s32 4294967266, %v7305_v15  ;;  %v7307_v63 = vshll.u32 %v7298_v16, %v7305_v15  ;;  %v7459_v16 = vshll.u32 %v15497_v25, %v7456_v53 }
 0xd8e   : > { %v14960_v56 = vshrl.u32 %v7399_v30, 30  ;;  %v7468_v15 = vshll.u32 %v15472_v57, %v7456_v53  ;;  %vm14969_vm12 = vcmp.le.f32.partialorder %v7234_v58, 0.7853982  ;;  %v7467_v45 = vor.u32 %v7466_v19, %v7465_v44 }
 0xd8f   : > { %v7308_v34 = vshrl.u32 %v7290_v36, %v7306_v33  ;;  %v7311_v52 = vadd.s32 127, %v7310_v4  ;;  %v7461_v49 = vor.u32 %v7460_v12, %v7459_v16  ;;  %v7469_v36 = vshrl.u32 %v15618_v2, %v7457_v8 }
 0xd90   : > { %v7401_v7 = vshll.u32 %v14960_v56, 30  ;;  %v7471_v12 = vshll.u32 %v15618_v2, %v7456_v53  ;;  %vm7474_vm10 = vcmp.lt.s32.totalorder %v7455_v29, 1  ;;  %vm7477_vm6 = vcmp.lt.s32.totalorder %v7455_v29, 4 }
 0xd91   : > { %v7309_v50 = vor.u32 %v7308_v34, %v7307_v63  ;;  %v7312_v1 = vshll.u32 %v7311_v52, 23  ;;  %v7470_v63 = vor.u32 %v7469_v36, %v7468_v15  ;;  %v7482_v18 = vsel %vm7474_vm10, %v7461_v49, %v7464_v17 }
 0xd92   : > { %v7402_v41 = vsub.s32 %v7398_v32, %v7401_v7  ;;  %v7473_v16 = vor.u32 %v7472_v54, %v7471_v12  ;;  %vm7476_vm8 = vcmp.lt.s32.totalorder %v7455_v29, 3  ;;  %v7490_v11 = vshll.u32 %v7450_v13, 8 }
 0xd93   : > { %v7313_v42 = vor.u32 4788187, %v7312_v1  ;;  %v7316_v4 = vcvt.s32.f32 %v7309_v50  ;;  %v7718_v50 = vclz %v8949_v46  ;;  %v7320_v1 = vsub.s32 4, %v14911_v23 }
 0xd94   : > { %v7483_v58 = vsel %vm7477_vm6, %v7470_v63, 920167782  ;;  %v7458_v44 = vshrl.u32 %v15497_v25, %v7457_v8  ;;  %vm7475_vm14 = vcmp.lt.s32.totalorder %v7455_v29, 2  ;;  %v7479_v19 = vsel %vm7477_vm6, %v7467_v45, 2102212464 }
 0xd95   : > { %v7314_v33 = vand.u32 2147483647, %v7313_v42  ;;  %v7404_v42 = vsub.s32 0, %v7402_v41  ;;  %v7484_v53 = vsel %vm7476_vm8, %v7467_v45, %v7483_v58  ;;  %v7321_v8 = vsel %vm7236_vm2, %v7320_v1, %v14911_v23 }
 0xd96   : > { %v7485_v36 = vsel %vm7475_vm14, %v7482_v18, %v7484_v53  ;;  %v7478_v12 = vsel %vm7474_vm10, %v7458_v44, %v7461_v49  ;;  %v7323_v23 = vsel %vm14969_vm12, 0, %v7321_v8  ;;  %vm7340_vm1 = vcmp.lt.s32.totalorder %v14787_v48, 0 }
 0xd97   : > { %v7317_v52 = vmul.f32 %v7316_v4, %v7314_v33  ;;  %v8937_v46 = vmin.u32 %v7404_v42, %v7402_v41  ;;  %v7486_v33 = vsel %vm7474_vm10, %v7464_v17, %v7467_v45  ;;  %v7487_v4 = vsel %vm7477_vm6, %v7473_v16, 1326507024 }
 0xd98   : > { %v14985_v54 = vmul.u32.u64.low %v7490_v11, %v7485_v36  ;;  %v14986_v7 = vmul.u32.u64.high %v7490_v11, %v7485_v36, %v14985_v54  ;;  %v7480_v45 = vsel %vm7476_vm8, %v7464_v17, %v7479_v19  ;;  %v8950_v16 = vadd.s32 4294967294, %v7718_v50 }
 0xd99   : > { %v7318_v30 = vxor.u32 2147483648, %v7317_v52  ;;  %v7406_v13 = vclz %v8937_v46  ;;  %v7424_v17 = vsub.s32 4, %v14960_v56  ;;  %v7394_v50 = vadd.s32 %v14936_v51, %v14934_v39 }
 0xd9a   : > { %v7500_v1 = vadd.s32 1, %v14986_v7  ;;  %vm8951_vm9 = vcmp.lt.s32.totalorder %v8950_v16, 0  ;;  %v7327_v34 = vadd.s32 3, %v7323_v23  ;;  %vm15022_vm11 = vcmp.le.f32.partialorder %v7338_v26, 0.7853982 }
 0xd9b   : > { %v7319_v15 = vsel %vm7236_vm2, %v7318_v30, %v7317_v52  ;;  %v14994_v52 = vmul.f32 %v14764_v43, %v14775_v38  ;;  %v7488_v30 = vsel %vm7476_vm8, %v7470_v63, %v7487_v4  ;;  %v8938_v18 = vadd.s32 4294967294, %v7406_v13 }
 0xd9c   : > { %v7322_v32 = vsel %vm14969_vm12, %v14783_v40, %v7319_v15  ;;  %v7489_v42 = vsel %vm7475_vm14, %v7486_v33, %v7488_v30  ;;  %v7481_v43 = vsel %vm7475_vm14, %v7478_v12, %v7480_v45  ;;  %v15015_v4 = vsel %vm8951_vm9, 0, %v8950_v16 }
 0xd9d   : > { %10286 = vcosq.f32 %v7322_v32  ;;  %v15000_v58 = vmul.u32.u64.low %v7490_v11, %v7489_v42  ;;  %v15001_v15 = vmul.u32.u64.high %v7490_v11, %v7489_v42, %v15000_v58  ;;  %vm8939_vm13 = vcmp.lt.s32.totalorder %v8938_v18, 0 }
 0xd9e   : > { %10288 = vsinq.f32 %v7322_v32  ;;  %v7409_v49 = vsel %vm8939_vm13, 0, %v8938_v18  ;;  %v7549_v63 = vand.u32 2139095040, %v14994_v52  ;;  %v7497_v32 = vmul.u32 %v7490_v11, %v7481_v43 }
 0xd9f   : > { %v7410_v44 = vsub.s32 32, %v7409_v49  ;;  %v7414_v53 = vsub.s32 4294967266, %v7409_v49  ;;  %vm7499_vm3 = vc.u32 %v15001_v15, %v14985_v54  ;;  %v7411_v46 = vshll.u32 %v7402_v41, %v7409_v49 }
 0xda0   : > { %v7550_v29 = vshrl.u32 %v7549_v63, 23  ;;  %v7501_v33 = vsel %vm7499_vm3, %v7500_v1, %v14986_v7  ;;  %v7425_v8 = vsel %vm7340_vm1, %v7424_v17, %v14960_v56  ;;  %v7726_v16 = vsub.s32 4294967266, %v15015_v4  ;;  %v15624_v63 = vld [vmem:[#allocation29_spill] sm:$0xff] }
 0xda1   : > { %v7412_v19 = vshrl.u32 %v7394_v50, %v7410_v44  ;;  %v7415_v36 = vadd.s32 127, %v7414_v53  ;;  %v7502_v39 = vadd.s32 %v7501_v33, %v7497_v32  ;;  %v7328_v18 = vand.u32 3, %v7327_v34 }
 0xda2   : > { %v8944_v51 = vadd.s32 4294967169, %v7550_v29  ;;  %v7427_v56 = vsel %vm15022_vm11, 0, %v7425_v8  ;;  %v7546_v43 = vand.u32 2147483647, %v14994_v52  ;;  %v15034_v50 = vrot.slane %v15624_v63, %v15617_v22 }
 0xda3   : > { %v7413_v12 = vor.u32 %v7412_v19, %v7411_v46  ;;  %v7416_v11 = vshll.u32 %v7415_v36, 23  ;;  %v7503_v30 = vadd.s32 536870912, %v7502_v39  ;;  %v15037_v53 = vadd.s32 127, %v7726_v16 }
 0xda4   : > { %v7556_v7 = vadd.s32 1, %v8944_v51  ;;  %v7431_v32 = vadd.s32 3, %v7427_v56  ;;  %vm7330_vm7 = vcmp.eq.s32.totalorder %v7328_v18, 0  ;;  %vm7333_vm2 = vcmp.eq.s32.totalorder %v7328_v18, 2 }
 0xda5   : > { %v7417_v42 = vor.u32 4788187, %v7416_v11  ;;  %v15029_v23 = vshrl.u32 %v7503_v30, 30  ;;  %v7420_v49 = vcvt.s32.f32 %v7413_v12  ;;  %v15043_v19 = vand.u32 8388607, %v7546_v43 }
 0xda6   : > { %vm7557_vm15 = vcmp.gt.s32.totalorder %v7556_v7, 0  ;;  %v15047_v51 = vadd.s32 %v14844_v21, %v14841_v55  ;;  %v7722_v12 = vsub.s32 32, %v15015_v4  ;;  %vm7326_vm12 = vweird.f32 %v14783_v40 }
 0xda7   : > { %v10287_v13 = vpop.eup %10286  ;;  %v7418_v26 = vand.u32 2147483647, %v7417_v42  ;;  %v7558_v17 = vsel %vm7557_vm15, %v7556_v7, 0  ;;  %v7505_v44 = vshll.u32 %v15029_v23, 30  ;;  %vm7329_vm10 = vcmp.lt.s32.totalorder %v7328_v18, 2 }
 0xda8   : > { %v10289_v45 = vpop.eup %10288  ;;  %v7334_v58 = vxor.u32 2147483648, %v10287_v13  ;;  %v7560_v29 = vand.u32 31, %v7558_v17  ;;  %v7498_v16 = vadd.s32 %v14985_v54, %v15001_v15  ;;  %v7554_v18 = vor.u32 8388608, %v15043_v19 }
 0xda9   : > { %v7331_v1 = vxor.u32 2147483648, %v10289_v45  ;;  %v7421_v34 = vmul.f32 %v7420_v49, %v7418_v26  ;;  %v15039_v46 = vsub.s32 %v7502_v39, %v7505_v44  ;;  %v7728_v39 = vshll.u32 %v15037_v53, 23 }
 0xdaa   : > { %v7335_v33 = vsel %vm7333_vm2, %v7334_v58, %v10289_v45  ;;  %v7561_v22 = vsub.s32 32, %v7560_v29  ;;  %v15066_v58 = vshrl.u32 %v7558_v17, 5  ;;  %v7563_v26 = vshll.u32 %v15497_v25, %v7560_v29 }
 0xdab   : > { %v7332_v36 = vsel %vm7330_vm7, %v10287_v13, %v7331_v1  ;;  %v7422_v8 = vxor.u32 2147483648, %v7421_v34  ;;  %v7508_v11 = vsub.s32 0, %v15039_v46  ;;  %v15055_v13 = vand.u32 3, %v7431_v32 }
 0xdac   : > { %v7336_v45 = vsel %vm7329_vm10, %v7332_v36, %v7335_v33  ;;  %v7567_v7 = vshrl.u32 %v15471_v10, %v7561_v22  ;;  %v7564_v42 = vshrl.u32 %v15470_v24, %v7561_v22  ;;  %v7566_v1 = vshll.u32 %v15470_v24, %v7560_v29 }
 0xdad   : > { %v7423_v30 = vsel %vm7340_vm1, %v7422_v8, %v7421_v34  ;;  %v8941_v21 = vmin.u32 %v7508_v11, %v15039_v46  ;;  %v7337_v41 = vsel %vm7326_vm12, nan, %v7336_v45  ;;  %v7569_v49 = vshll.u32 %v15471_v10, %v7560_v29 }
 0xdae   : > { %v7426_v55 = vsel %vm15022_vm11, %v14787_v48, %v7423_v30  ;;  %v7570_v63 = vshrl.u32 %v15472_v57, %v7561_v22  ;;  %v7568_v15 = vor.u32 %v7567_v7, %v7566_v1  ;;  %v7572_v44 = vshll.u32 %v15472_v57, %v7560_v29 }
 0xdaf   : > { %10290 = vcosq.f32 %v7426_v55  ;;  %v7510_v56 = vclz %v8941_v21  ;;  %v7573_v34 = vshrl.u32 %v15618_v2, %v7561_v22  ;;  %vm7437_vm6 = vcmp.eq.s32.totalorder %v15055_v13, 2 }
 0xdb0   : > { %10292 = vsinq.f32 %v7426_v55  ;;  %v7565_v17 = vor.u32 %v7564_v42, %v7563_v26  ;;  %v7571_v32 = vor.u32 %v7570_v63, %v7569_v49  ;;  %v7575_v24 = vshll.u32 %v15618_v2, %v7560_v29 }
 0xdb1   : > { %v8942_v54 = vadd.s32 4294967294, %v7510_v56  ;;  %v7576_v40 = vshrl.u32 %v15619_v5, %v7561_v22  ;;  %vm7434_vm8 = vcmp.eq.s32.totalorder %v15055_v13, 0  ;;  %v7754_v19 = vmul.f32 %v7337_v41, %v7337_v41 }
 0xdb2   : > { %v7574_v10 = vor.u32 %v7573_v34, %v7572_v44  ;;  %vm7578_vm13 = vcmp.lt.s32.totalorder %v15066_v58, 1  ;;  %vm7579_vm1 = vcmp.lt.s32.totalorder %v15066_v58, 2  ;;  %vm7580_vm9 = vcmp.lt.s32.totalorder %v15066_v58, 3 }
 0xdb3   : > { %vm8943_vm14 = vcmp.lt.s32.totalorder %v8942_v54, 0  ;;  %v7577_v33 = vor.u32 %v7576_v40, %v7575_v24  ;;  %vm7581_vm3 = vcmp.lt.s32.totalorder %v15066_v58, 4  ;;  %v7590_v2 = vsel %vm7578_vm13, %v7568_v15, %v7571_v32 }
 0xdb4   : > { %v7513_v36 = vsel %vm8943_vm14, 0, %v8942_v54  ;;  %v7586_v29 = vsel %vm7578_vm13, %v7565_v17, %v7568_v15  ;;  %v7587_v11 = vsel %vm7581_vm3, %v7574_v10, 920167782  ;;  %v7562_v56 = vshrl.u32 %v15497_v25, %v7561_v22 }
 0xdb5   : > { %v7514_v57 = vsub.s32 32, %v7513_v36  ;;  %v7518_v8 = vsub.s32 4294967266, %v7513_v36  ;;  %v7515_v5 = vshll.u32 %v15039_v46, %v7513_v36  ;;  %v7591_v30 = vsel %vm7581_vm3, %v7577_v33, 1326507024 }
 0xdb6   : > { %v7588_v21 = vsel %vm7580_vm9, %v7571_v32, %v7587_v11  ;;  %v7592_v7 = vsel %vm7580_vm9, %v7574_v10, %v7591_v30  ;;  %v7583_v1 = vsel %vm7581_vm3, %v7571_v32, 2102212464  ;;  %v7594_v41 = vshll.u32 %v7554_v18, 8 }
 0xdb7   : > { %v7516_v45 = vshrl.u32 %v7498_v16, %v7514_v57  ;;  %v7519_v55 = vadd.s32 127, %v7518_v8  ;;  %v7593_v46 = vsel %vm7579_vm1, %v7590_v2, %v7592_v7  ;;  %v7589_v16 = vsel %vm7579_vm1, %v7586_v29, %v7588_v21 }
 0xdb8   : > { %v7763_v34 = vmul.f32 %v15034_v50, %v7754_v19  ;;  %v15099_v24 = vmul.u32.u64.low %v7594_v41, %v7593_v46  ;;  %v15100_v40 = vmul.u32.u64.high %v7594_v41, %v7593_v46, %v15099_v24  ;;  %v7582_v18 = vsel %vm7578_vm13, %v7562_v56, %v7565_v17 }
 0xdb9   : > { %v10291_v42 = vpop.eup %10290  ;;  %v7517_v63 = vor.u32 %v7516_v45, %v7515_v5  ;;  %v7520_v54 = vshll.u32 %v7519_v55, 23  ;;  %v7584_v32 = vsel %vm7580_vm9, %v7568_v15, %v7583_v1  ;;  %vm7433_vm11 = vcmp.lt.s32.totalorder %v15055_v13, 2 }
 0xdba   : > { %v10293_v26 = vpop.eup %10292  ;;  %v7438_v49 = vxor.u32 2147483648, %v10291_v42  ;;  %v15111_v36 = vmul.u32.u64.low %v7594_v41, %v7589_v16  ;;  %v15112_v19 = vmul.u32.u64.high %v7594_v41, %v7589_v16, %v15111_v36  ;;  %vm7430_vm15 = vweird.f32 %v14787_v48 }
 0xdbb   : > { %v7435_v44 = vxor.u32 2147483648, %v10293_v26  ;;  %v7521_v22 = vor.u32 4788187, %v7520_v54  ;;  %v7524_v8 = vcvt.s32.f32 %v7517_v63  ;;  %v7724_v17 = vshrl.u32 %v15047_v51, %v7722_v12 }
 0xdbc   : > { %v7439_v25 = vsel %vm7437_vm6, %v7438_v49, %v10293_v26  ;;  %v7528_v15 = vsub.s32 4, %v15029_v23  ;;  %v7585_v13 = vsel %vm7579_vm1, %v7582_v18, %v7584_v32  ;;  %v15123_v29 = vadd.f32 %v7763_v34, %v14769_v59 }
 0xdbd   : > { %v7436_v10 = vsel %vm7434_vm8, %v10291_v42, %v7435_v44  ;;  %v7522_v57 = vand.u32 2147483647, %v7521_v22  ;;  %vm7603_vm7 = vc.u32 %v15100_v40, %v15111_v36  ;;  %v7723_v48 = vshll.u32 %v14940_v27, %v15015_v4 }
 0xdbe   : > { %v7440_v33 = vsel %vm7433_vm11, %v7436_v10, %v7439_v25  ;;  %v7729_v51 = vor.u32 4788187, %v7728_v39  ;;  %v7604_v12 = vadd.s32 1, %v15112_v19  ;;  %vm7444_vm2 = vcmp.lt.s32.totalorder %v14896_v47, 0 }
 0xdbf   : > { %v7441_v2 = vsel %vm7430_vm15, nan, %v7440_v33  ;;  %v7525_v11 = vmul.f32 %v7524_v8, %v7522_v57  ;;  %v7601_v45 = vmul.u32 %v7594_v41, %v7585_v13  ;;  %v7725_v59 = vor.u32 %v7724_v17, %v7723_v48 }
 0xdc0   : > { %v7755_v5 = vmul.f32 %v7441_v2, %v7441_v2  ;;  %vm15136_vm12 = vcmp.le.f32.partialorder %v7442_v61, 0.7853982  ;;  %v7529_v27 = vsel %vm7444_vm2, %v7528_v15, %v15029_v23  ;;  %v7605_v4 = vsel %vm7603_vm7, %v7604_v12, %v15112_v19 }
 0xdc1   : > { %v7526_v58 = vxor.u32 2147483648, %v7525_v11  ;;  %v7778_v39 = vrot.slane %v15123_v29, 7  ;;  %v7606_v7 = vadd.s32 %v7605_v4, %v7601_v45  ;;  %v7730_v42 = vand.u32 2147483647, %v7729_v51 }
 0xdc2   : > { %v7764_v30 = vmul.f32 %v15034_v50, %v7755_v5  ;;  %v7732_v23 = vcvt.s32.f32 %v7725_v59  ;;  %vm15627_vm10 = vcmask 1040384   ;;  %vm7652_vm6 = vcmp.lt.s32.totalorder %v14779_v20, 0 }
 0xdc3   : > { %v7527_v21 = vsel %vm7444_vm2, %v7526_v58, %v7525_v11  ;;  %v7607_v46 = vadd.s32 536870912, %v7606_v7  ;;  %vm15167_vm8 = vcmp.le.f32.partialorder %v7650_v3, 0.7853982  ;;  %v7736_v17 = vsub.s32 4, %v14918_v9 }
 0xdc4   : > { %v15143_v53 = vadd.f32 %v7764_v30, %v14771_v60  ;;  %v7530_v56 = vsel %vm15136_vm12, %v14896_v47, %v7527_v21  ;;  %v7531_v60 = vsel %vm15136_vm12, 0, %v7529_v27  ;;  %v7733_v26 = vmul.f32 %v7732_v23, %v7730_v42 }
 0xdc5   : > { %10294 = vcosq.f32 %v7530_v56  ;;  %v15157_v63 = vshrl.u32 %v7607_v46, 30  ;;  %v7535_v54 = vadd.s32 3, %v7531_v60  ;;  %vm7534_vm1 = vweird.f32 %v14896_v47 }
 0xdc6   : > { %v7779_v61 = vrot.slane %v15143_v53, 7  ;;  %v7796_v1 = vpack.c.bf16 %v15143_v53, %v15123_v29  ;;  %10296 = vsinq.f32 %v7530_v56  ;;  %v7734_v34 = vxor.u32 2147483648, %v7733_v26 }
 0xdc7   : > { %v7609_v44 = vshll.u32 %v15157_v63, 30  ;;  %v7536_v25 = vand.u32 3, %v7535_v54  ;;  %v7737_v51 = vsel %vm7652_vm6, %v7736_v17, %v14918_v9  ;;  %v7799_v30 = vrot.slane %v15123_v29, 1 }
 0xdc8   : > { %v7780_v41 = vsel %vm15627_vm10, %v7778_v39, %v7779_v61  ;;  %7997 = vmatprep.mubr.bf16.mxu0 %v7796_v1  ;;  %v7735_v10 = vsel %vm7652_vm6, %v7734_v34, %v7733_v26  ;;  %v7602_v58 = vadd.s32 %v15111_v36, %v15100_v40  ;;  %v7800_v59 = vrot.slane %v15143_v53, 1 }
 0xdc9   : > { %v8978_v49 = vpack.c.bf16 %v7780_v41, %v7778_v39  ;;  %v7610_v24 = vsub.s32 %v7606_v7, %v7609_v44  ;;  %vm7538_vm14 = vcmp.eq.s32.totalorder %v7536_v25, 0  ;;  %v7738_v13 = vsel %vm15167_vm8, %v14779_v20, %v7735_v10 }
 0xdca   : > { %vm7537_vm13 = vcmp.lt.s32.totalorder %v7536_v25, 2  ;;  %10298 = vcosq.f32 %v7738_v13  ;;  %v7739_v7 = vsel %vm15167_vm8, 0, %v7737_v51  ;;  %vm15631_vm3 = vcmask 1046528  }
 0xdcb   : > { %8979 = vmatmul.mubr.msk.bf16.vlgmr.msra.gmra.mrb[84].mxu0 %vm11963_vm4, %v8978_v49  ;;  %v7612_v22 = vsub.s32 0, %v7610_v24  ;;  %vm7541_vm4 = vcmp.eq.s32.totalorder %v7536_v25, 2  ;;  %10300 = vsinq.f32 %v7738_v13  ;;  %v7801_v29 = vsel %vm15631_vm3, %v7799_v30, %v7800_v59  ;;  %vm15632_vm11 = vmmov %vm15631_vm3 }
 0xdcc   : > { %v7743_v23 = vadd.s32 3, %v7739_v7  ;;  %v7632_v54 = vsub.s32 4, %v15157_v63  ;;  %vm7548_vm15 = vcmp.lt.s32.totalorder %v14994_v52, 0  ;;  %vm7547_vm7 = vcmp.le.f32.partialorder %v7546_v43, 0.7853982 }
 0xdcd   : > { %v8945_v33 = vmin.u32 %v7612_v22, %v7610_v24  ;;  %vm7742_vm6 = vweird.f32 %v14779_v20 }
 0xdce   : > { %v7744_v16 = vand.u32 3, %v7743_v23  ;;  %v7633_v22 = vsel %vm7548_vm15, %v7632_v54, %v15157_v63  ;;  %v10114_v54 = vld [vmem:[#allocation11] sm:$0xff]  }
 0xdcf   : > { %v10295_v18 = vpop.eup %10294  ;;  %v7614_v15 = vclz %v8945_v33  ;;  %9593 = vmatpush3.bf16.msra.mxu0 %v10114_v54 }
 0xdd0   : > { %v10297_v32 = vpop.eup %10296  ;;  %v7542_v19 = vxor.u32 2147483648, %v10295_v18  ;;  %vm7746_vm2 = vcmp.eq.s32.totalorder %v7744_v16, 0  ;;  %vm7749_vm12 = vcmp.eq.s32.totalorder %v7744_v16, 2  ;;  %vm7745_vm10 = vcmp.lt.s32.totalorder %v7744_v16, 2  ;;  %9594 = vmatprep.subr.bf16.mxu0 %v15484_v62 }
 0xdd1   : > { %v7539_v8 = vxor.u32 2147483648, %v10297_v32  ;;  %v8946_v3 = vadd.s32 4294967294, %v7614_v15 }
 0xdd2   : > { %v7543_v2 = vsel %vm7541_vm4, %v7542_v19, %v10297_v32  ;;  %v7635_v19 = vsel %vm7547_vm7, 0, %v7633_v22  ;;  %v10115_v22 = vld [vmem:[#allocation11 + $0x8] sm:$0xff]  }
 0xdd3   : > { %v7540_v5 = vsel %vm7538_vm14, %v10295_v18, %v7539_v8  ;;  %vm8947_vm9 = vcmp.lt.s32.totalorder %v8946_v3, 0  ;;  %v7639_v57 = vadd.s32 3, %v7635_v19  ;;  %9595 = vmatpush3.bf16.msra.mxu0 %v10115_v22 }
 0xdd4   : > { %v7544_v11 = vsel %vm7537_vm13, %v7540_v5, %v7543_v2  ;;  %v7617_v45 = vsel %vm8947_vm9, 0, %v8946_v3  ;;  %v10299_v60 = vpop.eup %10298  ;;  %vm7638_vm13 = vweird.f32 %v14994_v52  ;;  %9596 = vmatprep.subr.bf16.mxu0 %v15484_v62 }
 0xdd5   : > { %v7545_v48 = vsel %vm7534_vm1, nan, %v7544_v11  ;;  %v7618_v55 = vsub.s32 32, %v7617_v45  ;;  %v7622_v27 = vsub.s32 4294967266, %v7617_v45  ;;  %v7619_v9 = vshll.u32 %v7610_v24, %v7617_v45  ;;  %v10301_v26 = vpop.eup %10300 }
 0xdd6   : > { %v7756_v12 = vmul.f32 %v7545_v48, %v7545_v48  ;;  %v7747_v44 = vxor.u32 2147483648, %v10301_v26  ;;  %v7750_v34 = vxor.u32 2147483648, %v10299_v60  ;;  %v7640_v17 = vand.u32 3, %v7639_v57  ;;  %v10117_v57 = vld [vmem:[#allocation11 + $0x18] sm:$0xff]  }
 0xdd7   : > { %v7620_v39 = vshrl.u32 %v7602_v58, %v7618_v55  ;;  %v7623_v21 = vadd.s32 127, %v7622_v27  ;;  %vm15633_vm1 = vcmask 1040384  }
 0xdd8   : > { %v7765_v47 = vmul.f32 %v15034_v50, %v7756_v12  ;;  %v7748_v32 = vsel %vm7746_vm2, %v10299_v60, %v7747_v44  ;;  %v7751_v10 = vsel %vm7749_vm12, %v7750_v34, %v10301_v26  ;;  %vm7645_vm8 = vcmp.eq.s32.totalorder %v7640_v17, 2  ;;  %vm15634_vm9 = vmmov %vm15633_vm1  ;;  %v15638_v60 = vld [vmem:[#allocation26_spill] sm:$0xff] }
 0xdd9   : > { %v7621_v36 = vor.u32 %v7620_v39, %v7619_v9  ;;  %v7624_v42 = vshll.u32 %v7623_v21, 23  ;;  %v7752_v33 = vsel %vm7745_vm10, %v7748_v32, %v7751_v10  ;;  %vm7642_vm4 = vcmp.eq.s32.totalorder %v7640_v17, 0 }
 0xdda   : > { %v15185_v4 = vadd.f32 %v7765_v47, %v14773_v28  ;;  %v7753_v8 = vsel %vm7742_vm6, nan, %v7752_v33  ;;  %vm7641_vm14 = vcmp.lt.s32.totalorder %v7640_v17, 2  ;;  %v10116_v33 = vld [vmem:[#allocation11 + $0x10] sm:$0xff]   ;;  %v10119_v17 = vld [vmem:[#allocation11 + $0x28] sm:$0xff]  }
 0xddb   : > { %v7625_v1 = vor.u32 4788187, %v7624_v42  ;;  %v7628_v41 = vcvt.s32.f32 %v7621_v36  ;;  %v7758_v43 = vmul.f32 %v7753_v8, %v7753_v8  ;;  %9597 = vmatpush3.bf16.msra.mxu0 %v10116_v33  ;;  %v10118_v8 = vld [vmem:[#allocation11 + $0x20] sm:$0xff]  }
 0xddc   : > { %v7802_v40 = vrot.slane %v15185_v4, 1  ;;  %v7781_v58 = vrot.slane %v15185_v4, 7  ;;  %9598 = vmatprep.subr.bf16.mxu0 %v15484_v62 }
 0xddd   : > { %v7626_v46 = vand.u32 2147483647, %v7625_v1  ;;  %v7767_v5 = vmul.f32 %v15034_v50, %v7758_v43  ;;  %v10120_v43 = vld [vmem:[#allocation11 + $0x30] sm:$0xff]  }
 0xdde   : > { %v7803_v56 = vsel %vm15632_vm11, %v7800_v59, %v7802_v40  ;;  %v7782_v55 = vsel %vm15633_vm1, %v7779_v61, %v7781_v58  ;;  %vm15635_vm11 = vmmov %vm15631_vm3 }
 0xddf   : > { %v7814_v28 = vpack.c.bf16 %v7803_v56, %v7801_v29  ;;  %v7629_v49 = vmul.f32 %v7628_v41, %v7626_v46  ;;  %v7772_v20 = vadd.f32 %v7767_v5, %v14767_v31  ;;  %9599 = vmatpush3.bf16.msra.mxu0 %v10117_v57 }
 0xde0   : > { %9600 = vmatprep.subr.bf16.mxu0 %v15484_v62 }
 0xde1   : > { %9581 = vmatmul.mubr.bf16.vlgmr.msra.gmra.mrb[84].mxu1 %v7814_v28  ;;  %v7630_v24 = vxor.u32 2147483648, %v7629_v49  ;;  %v7806_v59 = vrot.slane %v7772_v20, 1  ;;  %v7798_v21 = vpack.c.bf16 %v7772_v20, %v7772_v20  ;;  %v7785_v7 = vrot.slane %v7772_v20, 7  ;;  %v15227_v28 = vld [vmem:[#allocation7 + $0x18] sm:$0xff] }
 0xde2   : > { %9584 = vmatprep.mubr.msk.bf16.mxu1 %vm15507_vm0, %v15484_v62  ;;  %v15231_v46 = vrot.slane %v15227_v28, %v15638_v60  ;;  %9628 = vmatpush3.bf16.msra.mxu1 %v10114_v54 }
 0xde3   : > { %v7631_v25 = vsel %vm7548_vm15, %v7630_v24, %v7629_v49  ;;  %vm15636_vm15 = vmmov %vm15633_vm1  ;;  %v8981_v29 = vpack.c.bf16 %v7806_v59, %v7806_v59  ;;  %9621 = vmatprep.subr.bf16.mxu1 %v15484_v62  ;;  %9601 = vmatpush3.bf16.msra.mxu0 %v10118_v8 }
 0xde4   : > { %v7634_v18 = vsel %vm7547_vm7, %v14994_v52, %v7631_v25  ;;  %9602 = vmatprep.subr.bf16.mxu0 %v15484_v62 }
 0xde5   : > { %10302 = vcosq.f32 %v7634_v18 }
 0xde6   : > { %10304 = vsinq.f32 %v7634_v18  ;;  %9629 = vmatpush3.bf16.msra.mxu1 %v10115_v22 }
 0xde7   : > { %9622 = vmatprep.subr.bf16.mxu1 %v15484_v62  ;;  %9603 = vmatpush3.bf16.msra.mxu0 %v10119_v17 }
 0xde8   : > { %9604 = vmatprep.subr.bf16.mxu0 %v15484_v62 }
 0xdea   : > { %9630 = vmatpush3.bf16.msra.mxu1 %v10116_v33 }
 0xdeb   : > { %9623 = vmatprep.subr.bf16.mxu1 %v15484_v62  ;;  %9605 = vmatpush3.bf16.msra.mxu0 %v10120_v43 }
 0xdec   : > { %9606 = vmatprep.subr.bf16.mxu0 %v15484_v62 }
 0xdee   : > { %9631 = vmatpush3.bf16.msra.mxu1 %v10117_v57 }
 0xdef   : > { %v10303_v2 = vpop.eup %10302  ;;  %9624 = vmatprep.subr.bf16.mxu1 %v15484_v62 }
 0xdf0   : > { %v10305_v15 = vpop.eup %10304  ;;  %v7646_v63 = vxor.u32 2147483648, %v10303_v2 }
 0xdf1   : > { %v7643_v13 = vxor.u32 2147483648, %v10305_v15 }
 0xdf2   : > { %v7647_v11 = vsel %vm7645_vm8, %v7646_v63, %v10305_v15  ;;  %9632 = vmatpush3.bf16.msra.mxu1 %v10118_v8 }
 0xdf3   : > { %v7644_v3 = vsel %vm7642_vm4, %v10303_v2, %v7643_v13  ;;  %9625 = vmatprep.subr.bf16.mxu1 %v15484_v62  ;;  %v10121_v2 = vld [vmem:[#allocation11 + $0x38] sm:$0xff]  }
 0xdf4   : > { %v7648_v48 = vsel %vm7641_vm14, %v7644_v3, %v7647_v11  ;;  %9607 = vmatpush3.bf16.msra.mxu0 %v10121_v2 }
 0xdf5   : > { %v7649_v51 = vsel %vm7638_vm13, nan, %v7648_v48 }
 0xdf6   : > { %v7757_v12 = vmul.f32 %v7649_v51, %v7649_v51  ;;  %9633 = vmatpush3.bf16.msra.mxu1 %v10119_v17 }
 0xdf7   : > { %9626 = vmatprep.subr.bf16.mxu1 %v15484_v62 }
 0xdf8   : > { %v7766_v30 = vmul.f32 %v15034_v50, %v7757_v12 }
 0xdfa   : > { %v7771_v45 = vadd.f32 %v7766_v30, %v14775_v38  ;;  %9634 = vmatpush3.bf16.msra.mxu1 %v10120_v43 }
 0xdfb   : > { %9627 = vmatprep.subr.bf16.mxu1 %v15484_v62 }
 0xdfc   : > { %v7797_v47 = vpack.c.bf16 %v7771_v45, %v15185_v4  ;;  %v7783_v27 = vrot.slane %v7771_v45, 7  ;;  %v7804_v52 = vrot.slane %v7771_v45, 1 }
 0xdfe   : > { %8005 = vmatprep.mubr.bf16.mxu0 %v7797_v47  ;;  %v7784_v9 = vsel %vm15634_vm9, %v7781_v58, %v7783_v27  ;;  %v7805_v31 = vsel %vm15631_vm3, %v7802_v40, %v7804_v52  ;;  %v7807_v50 = vsel %vm15635_vm11, %v7804_v52, %v7806_v59  ;;  %v7786_v53 = vsel %vm15636_vm15, %v7783_v27, %v7785_v7 }
 0xdff   : > { %v7794_v39 = vpack.c.bf16 %v7784_v9, %v7782_v55  ;;  %v7815_v38 = vpack.c.bf16 %v7807_v50, %v7805_v31  ;;  %v7795_v61 = vpack.c.bf16 %v7786_v53, %v7786_v53  ;;  %9635 = vmatpush3.bf16.msra.mxu1 %v10121_v2  ;;  %v15639_v2 = vld [vmem:[#allocation27_spill] sm:$0xff] }
 0xe01   : > { %8006 = vmatmul.mubr.bf16.gmra.mrb[88].mxu0 %v7794_v39  ;;  %9585 = vmatmul.mubr.bf16.gmra.mrb[88].mxu1 %v7815_v38 }
 0xe02   : > { %8013 = vmatprep.mubr.bf16.mxu0 %v7798_v21  ;;  %9588 = vmatprep.mubr.msk.bf16.mxu1 %vm15507_vm0, %v15484_v62 }
 0xe09   : > { %8014 = vmatmul.mubr.bf16.gmra.mrb[92].mxu0 %v7795_v61  ;;  %9589 = vmatmul.mubr.msk.bf16.gmra.mrb[92].mxu1 %vm12036_vm5, %v8981_v29 }
 0xe0a   : > { %9608 = vmatprep.mubr.msk.bf16.mxu0 %vm15507_vm0, %v15484_v62  ;;  %9612 = vmatprep.mubr.msk.bf16.mxu1 %vm15507_vm0, %v15484_v62 }
 0xe9e   : > { %v9328_v40 = vpop.f32.mrb[84].mxu0 }
 0xe9f   : > { %v9329_v36 = vpop.f32.mrb[85].mxu0 }
 0xea0   : > { %v9330_v42 = vadd.f32 %v9329_v36, %v9328_v40  ;;  %v9331_v56 = vpop.f32.mrb[86].mxu0 }
 0xea1   : > { %v9332_v1 = vpop.f32.mrb[87].mxu0 }
 0xea2   : > { %v9333_v23 = vadd.f32 %v9332_v1, %v9331_v56  ;;  %v8000_v41 = vadd.f32 %v9330_v42, %v15231_v46 }
 0xea4   : > { %v8003_v26 = vadd.f32 %v9333_v23, %v15231_v46 }
 0xeb4   : > { %v8055_v49 = vpop.f32.mrb[84].mxu1 }
 0xeb5   : > { %v15235_v16 = vadd.f32 %v8055_v49, %v8000_v41  ;;  %v9582_v44 = vpop.f32.mrb[85].mxu1 }
 0xeb6   : > { %v8058_v34 = vpop.f32.mrb[86].mxu1 }
 0xeb7   : > { %v15237_v24 = vadd.f32 %v8058_v34, %v8003_v26  ;;  %v9583_v25 = vpop.f32.mrb[87].mxu1  ;;  %v8087_v18 = vmul.f32 %v15235_v16, %v15235_v16 }
 0xeb9   : > { %v8077_v32 = vadd.f32 %v15237_v24, %v15235_v16  ;;  %v8088_v10 = vmul.f32 %v15237_v24, %v15237_v24 }
 0xebb   : > { %v8092_v19 = vadd.f32 %v8088_v10, %v8087_v18 }
 0xed4   : > { %v9334_v15 = vpop.f32.mrb[88].mxu0  ;;  %v8063_v63 = vpop.f32.mrb[88].mxu1 }
 0xed5   : > { %v9335_v13 = vpop.f32.mrb[89].mxu0  ;;  %v9586_v5 = vpop.f32.mrb[89].mxu1 }
 0xed6   : > { %v9336_v11 = vadd.f32 %v9335_v13, %v9334_v15  ;;  %v9337_v3 = vpop.f32.mrb[90].mxu0  ;;  %v8066_v48 = vpop.f32.mrb[90].mxu1 }
 0xed7   : > { %v9338_v51 = vpop.f32.mrb[91].mxu0  ;;  %v9587_v20 = vpop.f32.mrb[91].mxu1 }
 0xed8   : > { %v8008_v12 = vadd.f32 %v9336_v11, %v15231_v46  ;;  %v9339_v30 = vadd.f32 %v9338_v51, %v9337_v3 }
 0xeda   : > { %v8064_v58 = vadd.f32 %v8063_v63, %v8008_v12  ;;  %v8011_v45 = vadd.f32 %v9339_v30, %v15231_v46  ;;  %v15640_v12 = vld [vmem:[#allocation28_spill] sm:$0xff] }
 0xedc   : > { %v8078_v59 = vadd.f32 %v8077_v32, %v8064_v58  ;;  %v8089_v47 = vmul.f32 %v8064_v58, %v8064_v58  ;;  %v8067_v55 = vadd.f32 %v8066_v48, %v8011_v45  ;;  %v9340_v27 = vpop.f32.mrb[92].mxu0  ;;  %v8071_v52 = vpop.f32.mrb[92].mxu1 }
 0xedd   : > { %v9341_v9 = vpop.f32.mrb[93].mxu0  ;;  %v9590_v31 = vpop.f32.mrb[93].mxu1 }
 0xede   : > { %v8093_v50 = vadd.f32 %v8092_v19, %v8089_v47  ;;  %v8079_v39 = vadd.f32 %v8078_v59, %v8067_v55  ;;  %v8090_v38 = vmul.f32 %v8067_v55, %v8067_v55  ;;  %v9342_v21 = vadd.f32 %v9341_v9, %v9340_v27  ;;  %v9343_v7 = vpop.f32.mrb[94].mxu0  ;;  %v8074_v53 = vpop.f32.mrb[94].mxu1 }
 0xedf   : > { %v9344_v61 = vpop.f32.mrb[95].mxu0  ;;  %v9591_v29 = vpop.f32.mrb[95].mxu1 }
 0xee0   : > { %v8094_v4 = vadd.f32 %v8093_v50, %v8090_v38  ;;  %v8016_v40 = vadd.f32 %v9342_v21, %v15231_v46 }
 0xee2   : > { %v8072_v36 = vadd.f32 %v8071_v52, %v8016_v40 }
 0xee4   : > { %v8080_v42 = vadd.f32 %v8079_v39, %v8072_v36  ;;  %v8091_v56 = vmul.f32 %v8072_v36, %v8072_v36 }
 0xee6   : > { %v8081_v1 = vrot.slane %v8080_v42, 4  ;;  %v8095_v23 = vadd.f32 %v8094_v4, %v8091_v56 }
 0xee8   : > { %v8082_v60 = vadd.f32 %v8081_v1, %v8080_v42  ;;  %v8096_v41 = vrot.slane %v8095_v23, 4 }
 0xeea   : > { %v8083_v26 = vrot.slane %v8082_v60, 2  ;;  %v8097_v49 = vadd.f32 %v8096_v41, %v8095_v23 }
 0xeec   : > { %v8084_v54 = vadd.f32 %v8083_v26, %v8082_v60  ;;  %v8098_v44 = vrot.slane %v8097_v49, 2 }
 0xeee   : > { %v8085_v34 = vrot.slane %v8084_v54, 1  ;;  %v8099_v25 = vadd.f32 %v8098_v44, %v8097_v49 }
 0xef0   : > { %v8086_v22 = vadd.f32 %v8085_v34, %v8084_v54  ;;  %v8100_v18 = vrot.slane %v8099_v25, 1 }
 0xef2   : > { %v8101_v32 = vadd.f32 %v8100_v18, %v8099_v25  ;;  %v8102_v10 = vmul.f32 0.025, %v8086_v22  ;;  %v8138_v18 = vld [vmem:[#allocation5 + $0x2] sm:$0x1] }
 0xef4   : > { %v8103_v19 = vmul.f32 0.025, %v8101_v32  ;;  %v8104_v33 = vmul.f32 %v8102_v10, %v8102_v10 }
 0xef6   : > { %v8105_v46 = vsub.f32 %v8103_v19, %v8104_v33  ;;  %v8139_v19 = vld [vmem:[#allocation5 + $0x3] sm:$0x1] }
 0xef8   : > { %v8106_v57 = vmax.f32 %v8105_v46, 0.0  ;;  %v15641_v46 = vld [vmem:[#allocation20_spill] sm:$0xff] }
 0xefa   : > { %v8107_v8 = vadd.f32 1e-05, %v8106_v57 }
 0xefc   : > { %10306 = vrsqrt.f32 %v8107_v8 }
 0xf06   : > { %v10307_v17 = vpop.eup %10306 }
 0xf07   : > { %v8109_v43 = vmul.f32 %v15227_v28, %v10307_v17 }
 0xf09   : > { %v8113_v15 = vrot.slane %v8109_v43, %v15639_v2  ;;  %v8119_v63 = vmul.f32 %v8109_v43, %v8102_v10 }
 0xf0b   : > { %v8114_v13 = vmul.f32 %v8113_v15, %v15235_v16  ;;  %v8115_v5 = vmul.f32 %v8113_v15, %v15237_v24  ;;  %v8116_v11 = vmul.f32 %v8113_v15, %v8064_v58  ;;  %v8117_v3 = vmul.f32 %v8113_v15, %v8067_v55 }
 0xf0c   : > { %v8118_v48 = vmul.f32 %v8113_v15, %v8072_v36  ;;  %v8121_v51 = vrot.slane %v8119_v63, 7 }
 0xf0e   : > { %v8123_v20 = vsub.f32 %v15227_v28, %v8121_v51 }
 0xf10   : > { %v8127_v30 = vrot.slane %v8123_v20, %v15640_v12 }
 0xf12   : > { %v8128_v45 = vadd.f32 %v8127_v30, %v8114_v13  ;;  %v8129_v59 = vadd.f32 %v8127_v30, %v8115_v5  ;;  %v8130_v47 = vadd.f32 %v8127_v30, %v8116_v11  ;;  %v8131_v27 = vadd.f32 %v8127_v30, %v8117_v3 }
 0xf13   : > { %v8132_v52 = vadd.f32 %v8127_v30, %v8118_v48 }
 0xf14   : > { %v8133_v9 = vadd.f32 %v8128_v45, %v14209_v0  ;;  %v8134_v31 = vadd.f32 %v8129_v59, %v14212_v35  ;;  %v8135_v16 = vadd.f32 %v8130_v47, %v14227_v14  ;;  %v8136_v24 = vadd.f32 %v8131_v27, %v14249_v37  ;;  %v8983_v47 = vld [vmem:[#allocation13] ss:$0 sm:$0xff] }
 0xf15   : > { %v8137_v28 = vadd.f32 %v8132_v52, %v14206_v6  ;;  %v15642_v45 = vlaneseq }
 0xf16   : > { %v8140_v58 = vadd.f32 %v8134_v31, %v8133_v9  ;;  %v8150_v55 = vmul.f32 %v8133_v9, %v8133_v9  ;;  %v8151_v50 = vmul.f32 %v8134_v31, %v8134_v31  ;;  %v8152_v38 = vmul.f32 %v8135_v16, %v8135_v16 }
 0xf17   : > { %v8153_v53 = vmul.f32 %v8136_v24, %v8136_v24  ;;  %v8154_v4 = vmul.f32 %v8137_v28, %v8137_v28  ;;  %v8322_v59 = vand.u32 127, %v15642_v45 }
 0xf18   : > { %v8141_v39 = vadd.f32 %v8140_v58, %v8135_v16  ;;  %v8155_v21 = vadd.f32 %v8151_v50, %v8150_v55 }
 0xf19   : > { %vm8323_vm5 = vcmp.lt.s32.totalorder %v8322_v59, 8 }
 0xf1a   : > { %v8142_v7 = vadd.f32 %v8141_v39, %v8136_v24  ;;  %v8156_v61 = vadd.f32 %v8155_v21, %v8152_v38 }
 0xf1c   : > { %v8143_v29 = vadd.f32 %v8142_v7, %v8137_v28  ;;  %v8157_v0 = vadd.f32 %v8156_v61, %v8153_v53 }
 0xf1e   : > { %v8144_v40 = vrot.slane %v8143_v29, 4  ;;  %v8158_v35 = vadd.f32 %v8157_v0, %v8154_v4 }
 0xf20   : > { %v8145_v36 = vadd.f32 %v8144_v40, %v8143_v29  ;;  %v8159_v14 = vrot.slane %v8158_v35, 4 }
 0xf22   : > { %v8146_v42 = vrot.slane %v8145_v36, 2  ;;  %v8160_v37 = vadd.f32 %v8159_v14, %v8158_v35 }
 0xf24   : > { %v8147_v56 = vadd.f32 %v8146_v42, %v8145_v36  ;;  %v8161_v1 = vrot.slane %v8160_v37, 2 }
 0xf26   : > { %v8148_v23 = vrot.slane %v8147_v56, 1  ;;  %v8162_v60 = vadd.f32 %v8161_v1, %v8160_v37 }
 0xf28   : > { %v8149_v6 = vadd.f32 %v8148_v23, %v8147_v56  ;;  %v8163_v41 = vrot.slane %v8162_v60, 1 }
 0xf2a   : > { %v8164_v26 = vadd.f32 %v8163_v41, %v8162_v60  ;;  %v8165_v49 = vmul.f32 0.025, %v8149_v6 }
 0xf2c   : > { %v8166_v54 = vmul.f32 0.025, %v8164_v26  ;;  %v8167_v44 = vmul.f32 %v8165_v49, %v8165_v49 }
 0xf2e   : > { %v8168_v34 = vsub.f32 %v8166_v54, %v8167_v44 }
 0xf30   : > { %v8169_v25 = vmax.f32 %v8168_v34, 0.0 }
 0xf32   : > { %v8170_v22 = vadd.f32 1e-05, %v8169_v25 }
 0xf34   : > { %10308 = vrsqrt.f32 %v8170_v22 }
 0xf3e   : > { %v10309_v32 = vpop.eup %10308 }
 0xf3f   : > { %v8172_v10 = vmul.f32 %v10309_v32, %v8138_v18 }
 0xf41   : > { %v8182_v33 = vmul.f32 %v8172_v10, %v8165_v49  ;;  %v8176_v57 = vrot.slane %v8172_v10, %v15641_v46 }
 0xf43   : > { %v8183_v8 = vsub.f32 %v8139_v19, %v8182_v33  ;;  %v8177_v17 = vmul.f32 %v8176_v57, %v8133_v9  ;;  %v8178_v43 = vmul.f32 %v8176_v57, %v8134_v31  ;;  %v8179_v2 = vmul.f32 %v8176_v57, %v8135_v16 }
 0xf44   : > { %v8180_v15 = vmul.f32 %v8176_v57, %v8136_v24  ;;  %v8181_v63 = vmul.f32 %v8176_v57, %v8137_v28 }
 0xf45   : > { %v8187_v13 = vrot.slane %v8183_v8, %v15641_v46 }
 0xf47   : > { %v8188_v5 = vadd.f32 %v8187_v13, %v8177_v17  ;;  %v8189_v11 = vadd.f32 %v8187_v13, %v8178_v43  ;;  %v8190_v3 = vadd.f32 %v8187_v13, %v8179_v2  ;;  %v8191_v48 = vadd.f32 %v8187_v13, %v8180_v15 }
 0xf48   : > { %v8192_v51 = vadd.f32 %v8187_v13, %v8181_v63 }
 0xf49   : > { %v8193_v20 = vpack.c.bf16 %v8189_v11, %v8188_v5  ;;  %v8194_v12 = vpack.c.bf16 %v8191_v48, %v8190_v3 }
 0xf4a   : > { %v8195_v30 = vpack.c.bf16 %v8192_v51, %v8192_v51 }
 0xf4b   : > { %9609 = vmatmul.mubr.bf16.vlgmr.msra.gmra.mrb[96].mxu0 %v8193_v20  ;;  %9613 = vmatmul.mubr.bf16.vlgmr.msra.gmra.mrb[96].mxu1 %v8194_v12 }
 0xf4c   : > { %9616 = vmatprep.mubr.msk.bf16.mxu1 %vm15507_vm0, %v15484_v62 }
 0xf53   : > { %9617 = vmatmul.mubr.bf16.gmra.mrb[100].mxu1 %v8195_v30 }
0x101e   : > { %v8299_v27 = vpop.f32.mrb[96].mxu0  ;;  %v8307_v52 = vpop.f32.mrb[96].mxu1 }
0x101f   : > { %v8300_v9 = vadd.f32 %v8983_v47, %v8299_v27  ;;  %v8308_v31 = vadd.f32 %v8983_v47, %v8307_v52  ;;  %v9610_v16 = vpop.f32.mrb[97].mxu0  ;;  %v9614_v24 = vpop.f32.mrb[97].mxu1  ;;  %v8993_v52 = vld [vmem:[#allocation13 + $0x2] ss:$0 sm:$0xff] }
0x1020   : > { %v8302_v58 = vpop.f32.mrb[98].mxu0  ;;  %v8310_v55 = vpop.f32.mrb[98].mxu1 }
0x1021   : > { %v8303_v50 = vadd.f32 %v8983_v47, %v8302_v58  ;;  %v8311_v28 = vadd.f32 %v8983_v47, %v8310_v55  ;;  %v9611_v39 = vpop.f32.mrb[99].mxu0  ;;  %v9615_v38 = vpop.f32.mrb[99].mxu1  ;;  %v8326_v62 = vsel %vm8323_vm5, %v8308_v31, 0.0  ;;  %v8324_v21 = vsel %vm8323_vm5, %v8300_v9, 0.0 }
0x1022   : > { %8333 = vadd.xlane.f32.xlu1 %v8326_v62  ;;  %8329 = vadd.xlane.f32.xlu0 %v8324_v21 }
0x1023   : > { %v8327_v7 = vsel %vm8323_vm5, %v8311_v28, 0.0  ;;  %v8325_v53 = vsel %vm8323_vm5, %v8303_v50, 0.0 }
0x1026   : > { %8335 = vadd.xlane.f32.xlu1 %v8327_v7  ;;  %v8315_v61 = vpop.f32.mrb[100].mxu1  ;;  %8331 = vadd.xlane.f32.xlu0 %v8325_v53 }
0x1027   : > { %v8316_v29 = vadd.f32 %v8983_v47, %v8315_v61  ;;  %v9618_v4 = vpop.f32.mrb[101].mxu1  ;;  %v8992_v47 = vld [vmem:[#allocation13 + $0x1] ss:$0 sm:$0xff] }
0x1028   : > { %v8318_v0 = vpop.f32.mrb[102].mxu1 }
0x1029   : > { %v9619_v40 = vpop.f32.mrb[103].mxu1  ;;  %v8328_v35 = vsel %vm8323_vm5, %v8316_v29, 0.0 }
0x102a   : > { %8337 = vadd.xlane.f32.xlu0 %v8328_v35 }
0x10af   : > { %v8334_v36 = vpop.xlane.xlu1 %8333  ;;  %v8330_v14 = vpop.xlane.xlu0 %8329 }
0x10b0   : > { %v8341_v42 = vmul.f32 0.125, %v8334_v36  ;;  %v8339_v37 = vmul.f32 0.125, %v8330_v14 }
0x10b2   : > { %v8346_v56 = vsub.f32 %v8326_v62, %v8341_v42  ;;  %v8344_v1 = vsub.f32 %v8324_v21, %v8339_v37 }
0x10b3   : > { %v8336_v23 = vpop.xlane.xlu1 %8335  ;;  %v8332_v60 = vpop.xlane.xlu0 %8331 }
0x10b4   : > { %v8342_v6 = vmul.f32 0.125, %v8336_v23  ;;  %v8340_v41 = vmul.f32 0.125, %v8332_v60  ;;  %v8349_v26 = vsel %vm8323_vm5, %v8344_v1, 0.0  ;;  %v8351_v34 = vsel %vm8323_vm5, %v8346_v56, 0.0 }
0x10b5   : > { %v8354_v49 = vmul.f32 %v8349_v26, %v8349_v26  ;;  %v8356_v32 = vmul.f32 %v8351_v34, %v8351_v34 }
0x10b6   : > { %v8347_v54 = vsub.f32 %v8327_v7, %v8342_v6  ;;  %v8345_v44 = vsub.f32 %v8325_v53, %v8340_v41 }
0x10b7   : > { %8359 = vadd.xlane.f32.xlu1 %v8354_v49  ;;  %v8338_v25 = vpop.xlane.xlu0 %8337 }
0x10b8   : > { %v8343_v22 = vmul.f32 0.125, %v8338_v25  ;;  %v8350_v18 = vsel %vm8323_vm5, %v8345_v44, 0.0  ;;  %v8352_v33 = vsel %vm8323_vm5, %v8347_v54, 0.0 }
0x10b9   : > { %v8355_v10 = vmul.f32 %v8350_v18, %v8350_v18  ;;  %v8357_v57 = vmul.f32 %v8352_v33, %v8352_v33 }
0x10ba   : > { %v8348_v19 = vsub.f32 %v8328_v35, %v8343_v22 }
0x10bb   : > { %8363 = vadd.xlane.f32.xlu1 %v8356_v32  ;;  %8361 = vadd.xlane.f32.xlu0 %v8355_v10 }
0x10bc   : > { %v8353_v46 = vsel %vm8323_vm5, %v8348_v19, 0.0 }
0x10bd   : > { %v8358_v8 = vmul.f32 %v8353_v46, %v8353_v46 }
0x10bf   : > { %8365 = vadd.xlane.f32.xlu0 %v8357_v57  ;;  %8367 = vadd.xlane.f32.xlu1 %v8358_v8 }
0x1144   : > { %v8360_v17 = vpop.xlane.xlu1 %8359 }
0x1145   : > { %v8369_v43 = vmul.f32 0.125, %v8360_v17 }
0x1147   : > { %v8374_v2 = vadd.f32 1e-05, %v8369_v43 }
0x1148   : > { %v8364_v15 = vpop.xlane.xlu1 %8363  ;;  %v8362_v63 = vpop.xlane.xlu0 %8361 }
0x1149   : > { %10310 = vrsqrt.f32 %v8374_v2  ;;  %v8371_v13 = vmul.f32 0.125, %v8364_v15  ;;  %v8370_v5 = vmul.f32 0.125, %v8362_v63 }
0x114b   : > { %v8376_v11 = vadd.f32 1e-05, %v8371_v13  ;;  %v8375_v3 = vadd.f32 1e-05, %v8370_v5 }
0x114c   : > { %v8368_v48 = vpop.xlane.xlu1 %8367  ;;  %v8366_v51 = vpop.xlane.xlu0 %8365 }
0x114d   : > { %10312 = vrsqrt.f32 %v8376_v11  ;;  %v8373_v20 = vmul.f32 0.125, %v8368_v48  ;;  %v8372_v12 = vmul.f32 0.125, %v8366_v51 }
0x114e   : > { %10314 = vrsqrt.f32 %v8375_v3 }
0x114f   : > { %v8378_v30 = vadd.f32 1e-05, %v8373_v20  ;;  %v8377_v45 = vadd.f32 1e-05, %v8372_v12 }
0x1151   : > { %10316 = vrsqrt.f32 %v8378_v30 }
0x1152   : > { %10318 = vrsqrt.f32 %v8377_v45 }
0x1153   : > { %v10311_v59 = vpop.eup %10310 }
0x1154   : > { %v8384_v27 = vmul.f32 %v10311_v59, %v8349_v26 }
0x1156   : > { %v8394_v9 = vmul.f32 %v8992_v47, %v8384_v27 }
0x1157   : > { %v10313_v31 = vpop.eup %10312 }
0x1158   : > { %v10315_v16 = vpop.eup %10314  ;;  %v8404_v24 = vadd.f32 %v8993_v52, %v8394_v9  ;;  %v8386_v58 = vmul.f32 %v10313_v31, %v8351_v34 }
0x1159   : > { %v8385_v55 = vmul.f32 %v10315_v16, %v8350_v18 }
0x115a   : > { %8409 = vst [vmem:[%s379_s8] sm:$0xff] %v8404_v24  ;;  %v8396_v50 = vmul.f32 %v8992_v47, %v8386_v58 }
0x115b   : > { %v10317_v28 = vpop.eup %10316  ;;  %v8395_v39 = vmul.f32 %v8992_v47, %v8385_v55 }
0x115c   : > { %v10319_v38 = vpop.eup %10318  ;;  %v8406_v62 = vadd.f32 %v8993_v52, %v8396_v50  ;;  %v8388_v21 = vmul.f32 %v10317_v28, %v8353_v46 }
0x115d   : > { %v8405_v7 = vadd.f32 %v8993_v52, %v8395_v39  ;;  %v8387_v53 = vmul.f32 %v10319_v38, %v8352_v33 }
0x115e   : > { %8411 = vst [vmem:[%s379_s8 + $0x10] sm:$0xff] %v8406_v62  ;;  %v8398_v61 = vmul.f32 %v8992_v47, %v8388_v21 }
0x115f   : > { %8410 = vst [vmem:[%s379_s8 + $0x8] sm:$0xff] %v8405_v7  ;;  %v8397_v29 = vmul.f32 %v8992_v47, %v8387_v53 }
0x1160   : > { %v8408_v4 = vadd.f32 %v8993_v52, %v8398_v61 }
0x1161   : > { %v8407_v0 = vadd.f32 %v8993_v52, %v8397_v29 }
0x1162   : > { %8413 = vst [vmem:[%s379_s8 + $0x20] sm:$0xff] %v8408_v4 }
0x1163   : > { %8412 = vst [vmem:[%s379_s8 + $0x18] sm:$0xff] %v8407_v0 }
0x1164   : > { %10539 = shalt.err (!%p10536_p8)
}
0x1165   : > { %s10540_s18 = scalar_lea.hbm %s15294_s14, 640  ;;  %s10544_s22 = scalar_lea.hbm %s15347_s7, 1280 }
0x1166   : > { %p10541_p13 = scmp.ne.s32.totalorder %s15294_s14, %s10540_s18  ;;  %p10545_p9 = scmp.lt.u32.totalorder %s15294_s14, %s15347_s7 }
0x1167   : > { %p10546_p6 = scmp.lt.u32.totalorder %s10544_s22, %s10540_s18  ;;  %p10548_p10 = scmp.lt.u32.totalorder %s10540_s18, %s15294_s14 }
0x1168   : > { %p10542_p0 = pnand %p10541_p13, %p15643_p12 }
0x1169   : > { %p10547_p11 = por %p10546_p6, %p10545_p9 }
0x116a   : > { %p10543_p2 = pneg %p10542_p0 }
0x116b   : > { %p10549_p5 = por %p10548_p10, %p10547_p11 }
0x116d   : > { %p10550_p7 = pnand %p10549_p5, %p10543_p2 }
0x116f   : > { %10553 = shalt.err (!%p10550_p7)
}
0x1170   : > { %s10627_s28 = smov 128   ;;  %s10628_s12 = smov 8  }
0x1171   : > { %9826 = dma.vmem_to_hbm [thread:$0]  (%p15643_p12), %s15296_s20, 640, %s15294_s14, %s8415_s30, %s10627_s28, %s10627_s28, %s10628_s12  }
0x1172 PF: > { %s8443_s29 = sand.u32 1, %s10592_s24   ;;  %p15644_p4 = scmp.ne.s32.totalorder %s15433_s13, 0 }
0x1173   : > { %p15645_p1 = scmp.ge.s32.totalorder %s10604_s27, 2  ;;  %s8444_s11 = scalar_lea.sflag [#allocation4], %s8443_s29 }
0x1175   : > { %p9852_p3 = pnand %p15645_p1, %p15644_p4 }
0x1177   : > { %10587 = dma.done.wait (!%p9852_p3), %s8444_s11, 640  }
0x1178   : > { %10589 = vsyncadd (!%p9852_p3), %s8444_s11, 4294966656  ;;  %p23_p8 = scmp.ge.s32.totalorder %s10857_s19, 4   ;;  %s15646_s24 = smov %s10596_s25 }
0x1179   : > { %s15647_s25 = smov %s10600_s26  ;;  %s15648_s26 = smov %s10868_s15 }
0x117a   : > { %s15649_s27 = smov %s10857_s19  ;;  %25 = sbr.rel (!%p23_p8) target bundleno = 10 (0xa), region = 126 }
0x1181   :  { %8449 = vsyncpa [#allocation3], 1 }
0x1182   :  { %8451 = vsyncpa [#allocation3 + $0x1], 1 }
0x1183   :  { %8452 = vsyncpa [#allocation6], 1 }
0x1184   :  { %8453 = vsyncpa [#allocation9], 1 }
0x1185   :  { %8454 = vsyncpa [#allocation12], 1 }
0x1186   :  { %8455 = vsyncpa [#allocation4], 1 }
0x1187   :  { %8457 = vsyncpa [#allocation4 + $0x1], 1 }

</bundles_post_ra>
